<compile_context>
chip_gen: v6e
topology: v6e:2x2x1
jax: 0.10.0
libtpu: 0.0.40
codegen_flags: <defaults>
</compile_context>

<pallas_src>
import functools

import jax
import jax.numpy as jnp
from jax import lax
from jax.experimental import pallas as pl
from jax.experimental.pallas import tpu as pltpu

# Script uses embedding_dim = hidden_dim = 512; kept small-ish here per test guidance.
EMBEDDING_DIM = 256
HIDDEN_DIM = 256
VOCAB_SIZE = 1000


def _round_up(x, m):
    return (x + m - 1) // m * m


def _pick_tile(dim, candidates):
    for t in candidates:
        if dim % t == 0:
            return t
    return dim


# --------------------------------------------------------------------------- matmul kernel

def _matmul_bias_kernel(a_ref, b_ref, bias_ref, o_ref):
    # Full-K in a single MXU pass (no K grid axis, no accumulator scratch, no pl.when
    # init/finalize), bias fused into the same epilogue, lane-dense (tm, tn) store.
    acc = jnp.dot(a_ref[...], b_ref[...], preferred_element_type=jnp.float32)
    o_ref[...] = (acc + bias_ref[...]).astype(o_ref.dtype)


def matmul_bias(a, b, bias, out_dtype=jnp.float32):
    """a @ b + bias with bf16 MXU operands and f32 accumulation.

    K is kept whole per block (every GEMM in this model has K <= 512), M is padded to a
    multiple of 16 (native bf16 sublane tile), and the N axis is split into >= 2 blocks
    when only one M tile exists so both v7x TensorCores can be used.
    """
    M, K = a.shape
    K2, N = b.shape
    assert K == K2
    Mp = _round_up(max(M, 16), 16)
    Kp = _round_up(K, 128)
    Np = _round_up(N, 128)

    tm = _pick_tile(Mp, (256, 128, 64, 32, 16))
    tn = _pick_tile(Np, (512, 256, 128))
    if Mp // tm == 1:  # guarantee >= 2 parallel tiles for megacore when possible
        while tn > 128 and Np // tn < 2 and Np % (tn // 2) == 0:
            tn //= 2

    a_p = a.astype(jnp.bfloat16)
    if (Mp, Kp) != (M, K):
        a_p = jnp.pad(a_p, ((0, Mp - M), (0, Kp - K)))
    b_p = b.astype(jnp.bfloat16)
    if (Kp, Np) != (K, N):
        b_p = jnp.pad(b_p, ((0, Kp - K), (0, Np - N)))
    bias_p = bias.reshape(1, N).astype(jnp.float32)
    if Np != N:
        bias_p = jnp.pad(bias_p, ((0, 0), (0, Np - N)))

    cost = pl.CostEstimate(flops=2 * M * N * K, transcendentals=0,
                           bytes_accessed=(M * K + K * N) * 2 + M * N * 4 + N * 4)

    out = pl.pallas_call(
        _matmul_bias_kernel,
        out_shape=jax.ShapeDtypeStruct((Mp, Np), out_dtype),
        grid_spec=pltpu.PrefetchScalarGridSpec(
            num_scalar_prefetch=0,
            grid=(Mp // tm, Np // tn),
            in_specs=[
                pl.BlockSpec((tm, Kp), lambda i, j: (i, 0)),
                pl.BlockSpec((Kp, tn), lambda i, j: (0, j)),
                pl.BlockSpec((1, tn), lambda i, j: (0, j)),
            ],
            out_specs=pl.BlockSpec((tm, tn), lambda i, j: (i, j)),
        ),
        compiler_params=pltpu.CompilerParams(
            dimension_semantics=("parallel", "parallel"),
            vmem_limit_bytes=32 * 1024 * 1024,
        ),
        cost_estimate=cost,
    )(a_p, b_p, bias_p)

    if (Mp, Np) != (M, N):
        out = out[:M, :N]
    return out


# --------------------------------------------------------------------------- LSTM kernel

def _lstm_kernel(x_ref, h0_ref, c0_ref, wih_ref, whh_ref, b_ref,
                 out_ref, hT_ref, cT_ref, *, seq_len):
    """Whole LSTM layer (input projection + time recurrence) in ONE pallas_call.

    x_ref:  (Tp, E)  bf16 inputs (feature row + caption embeddings, zero padded)
    h0/c0:  (8, H)   f32, 8 replicated rows (native (8,128) tiles for all ops)
    wih:    (E, 4H)  bf16   whh: (H, 4H) bf16   b: (1, 4H) f32 (= b_ih + b_hh)
    out:    (Tp, H)  bf16 hidden states per timestep;  hT/cT: (8, H) f32 final state
    """
    H = whh_ref.shape[0]
    out_ref[...] = jnp.zeros(out_ref.shape, out_ref.dtype)  # keep padded rows defined

    # Input projection for EVERY timestep in a single full-K MXU pass; bias folded in.
    x_gates = jnp.dot(x_ref[...], wih_ref[...],
                      preferred_element_type=jnp.float32) + b_ref[...]

    whh = whh_ref[...]                           # resident bf16 recurrent weight
    h = h0_ref[...].astype(jnp.float32)          # (8, H), rows identical
    c = c0_ref[...].astype(jnp.float32)

    for t in range(seq_len):                     # static unroll: recurrence is sequential
        gates = x_gates[t:t + 1, :] + jnp.dot(h.astype(jnp.bfloat16), whh,
                                              preferred_element_type=jnp.float32)
        i_g = jax.nn.sigmoid(gates[:, 0 * H:1 * H])   # PyTorch gate order: i, f, g, o
        f_g = jax.nn.sigmoid(gates[:, 1 * H:2 * H])
        g_g = jnp.tanh(gates[:, 2 * H:3 * H])
        o_g = jax.nn.sigmoid(gates[:, 3 * H:4 * H])
        c = f_g * c + i_g * g_g
        h = o_g * jnp.tanh(c)
        out_ref[t:t + 1, :] = h[0:1].astype(out_ref.dtype)

    hT_ref[...] = h
    cT_ref[...] = c


def lstm_apply(x_padded, h0, c0, w_ih_bf16, w_hh_bf16, b, *, seq_len):
    Tp, E = x_padded.shape
    H = w_hh_bf16.shape[0]
    G = 4 * H
    return pl.pallas_call(
        functools.partial(_lstm_kernel, seq_len=seq_len),
        out_shape=(jax.ShapeDtypeStruct((Tp, H), jnp.bfloat16),
                   jax.ShapeDtypeStruct((8, H), jnp.float32),
                   jax.ShapeDtypeStruct((8, H), jnp.float32)),
        grid_spec=pltpu.PrefetchScalarGridSpec(
            num_scalar_prefetch=0,
            grid=(1,),  # everything fits in VMEM; single invocation, recurrence inside
            in_specs=[
                pl.BlockSpec((Tp, E), lambda i: (0, 0)),
                pl.BlockSpec((8, H), lambda i: (0, 0)),
                pl.BlockSpec((8, H), lambda i: (0, 0)),
                pl.BlockSpec((E, G), lambda i: (0, 0)),
                pl.BlockSpec((H, G), lambda i: (0, 0)),
                pl.BlockSpec((1, G), lambda i: (0, 0)),
            ],
            out_specs=(
                pl.BlockSpec((Tp, H), lambda i: (0, 0)),
                pl.BlockSpec((8, H), lambda i: (0, 0)),
                pl.BlockSpec((8, H), lambda i: (0, 0)),
            ),
        ),
        compiler_params=pltpu.CompilerParams(
            dimension_semantics=("arbitrary",),
            vmem_limit_bytes=32 * 1024 * 1024,
        ),
    )(x_padded, h0, c0, w_ih_bf16, w_hh_bf16, b)


# --------------------------------------------------------------------------- parameters

def init_params(key, vocab_size=VOCAB_SIZE, embedding_dim=EMBEDDING_DIM,
                hidden_dim=HIDDEN_DIM):
    ks = jax.random.split(key, 6)
    H = hidden_dim
    k = 1.0 / (H ** 0.5)  # nn.LSTM default init: U(-1/sqrt(H), 1/sqrt(H))
    return {
        # RNN.init_weights(): embedding ~ U(-0.1, 0.1)
        "embed": jax.random.uniform(ks[0], (vocab_size, embedding_dim),
                                    jnp.float32, -0.1, 0.1),
        # LSTM weights stored transposed (input-major) for the kernel; gate order i,f,g,o
        "w_ih": jax.random.uniform(ks[1], (embedding_dim, 4 * H), jnp.float32, -k, k),
        "w_hh": jax.random.uniform(ks[2], (H, 4 * H), jnp.float32, -k, k),
        "b_lstm": (jax.random.uniform(ks[3], (1, 4 * H), jnp.float32, -k, k)
                   + jax.random.uniform(ks[4], (1, 4 * H), jnp.float32, -k, k)),
        # RNN.init_weights(): linear weight ~ U(-0.1, 0.1), bias = 0
        "lin_w": jax.random.uniform(ks[5], (hidden_dim, vocab_size),
                                    jnp.float32, -0.1, 0.1),
        "lin_b": jnp.zeros((vocab_size,), jnp.float32),
    }


# --------------------------------------------------------------------------- forward / greedy

@jax.jit
def rnn_forward(params, features, caption):
    """RNN.forward(features, caption) -> (len(caption)+1, vocab_size) logits, f32."""
    H = params["w_hh"].shape[0]
    embeds = jnp.take(params["embed"], caption, axis=0)              # (L, E)
    x = jnp.concatenate([features.astype(jnp.float32), embeds], 0)   # (T, E), T = L+1
    T = x.shape[0]
    Tp = _round_up(T, 8)
    x_p = jnp.pad(x.astype(jnp.bfloat16), ((0, Tp - T), (0, 0)))     # bf16 activations
    zeros = jnp.zeros((8, H), jnp.float32)                           # h0 = c0 = 0
    w_ih = params["w_ih"].astype(jnp.bfloat16)
    w_hh = params["w_hh"].astype(jnp.bfloat16)
    lstm_out, _, _ = lstm_apply(x_p, zeros, zeros, w_ih, w_hh,
                                params["b_lstm"], seq_len=T)
    # out = self.linear(lstm_out.view(seq_length, -1))
    return matmul_bias(lstm_out[:T], params["lin_w"], params["lin_b"],
                       out_dtype=jnp.float32)


@functools.partial(jax.jit, static_argnames=("seq_len",))
def rnn_greedy(params, features, seq_len=20):
    """RNN.greedy(cnn_out, seq_len) -> (seq_len,) argmax word ids."""
    H = params["w_hh"].shape[0]
    w_ih = params["w_ih"].astype(jnp.bfloat16)
    w_hh = params["w_hh"].astype(jnp.bfloat16)
    emb_bf = params["embed"].astype(jnp.bfloat16)

    def step(carry, _):
        x, h, c = carry                                    # x: (1, E) bf16
        x_p = jnp.pad(x, ((0, 7), (0, 0)))                 # Tp = 8
        _, h, c = lstm_apply(x_p, h, c, w_ih, w_hh, params["b_lstm"], seq_len=1)
        # Review: M == 1 logits GEMM is degenerate for pallas_call; let XLA fuse it.
        logits = h[0:1] @ params["lin_w"] + params["lin_b"]           # (1, V) f32
        word = jnp.argmax(logits, axis=-1)                            # (1,)
        x_next = jnp.take(emb_bf, word, axis=0)                       # (1, E)
        return (x_next, h, c), word[0]

    zeros = jnp.zeros((8, H), jnp.float32)
    init = (features.astype(jnp.bfloat16), zeros, zeros)
    _, ids = lax.scan(step, init, xs=None, length=seq_len)
    return ids


if __name__ == "__main__":
    key = jax.random.PRNGKey(0)
    k_par, k_feat, k_cap = jax.random.split(key, 3)

    params = init_params(k_par)

    # `features` stands in for cnn_out = Resnet(embedding_dim)(image): a (1, E) vector.
    features = jax.random.normal(k_feat, (1, EMBEDDING_DIM), jnp.float32)
    caption = jax.random.randint(k_cap, (8,), 0, VOCAB_SIZE, dtype=jnp.int32)

    logits = jax.block_until_ready(rnn_forward(params, features, caption))
    assert logits.shape == (caption.shape[0] + 1, VOCAB_SIZE), logits.shape
    assert logits.dtype == jnp.float32
    assert bool(jnp.all(jnp.isfinite(logits)))

    ids = jax.block_until_ready(rnn_greedy(params, features, seq_len=5))
    assert ids.shape == (5,), ids.shape

    print("KERNEL_OK")
</pallas_src>

<mosaic_0001>
module attributes {stable_mosaic.version = 11 : i64} {
  func.func @_lstm_kernel(%arg0: i32, %arg1: memref<16x256xbf16, #tpu.memory_space<vmem>>, %arg2: memref<8x256xf32, #tpu.memory_space<vmem>>, %arg3: memref<8x256xf32, #tpu.memory_space<vmem>>, %arg4: memref<256x1024xbf16, #tpu.memory_space<vmem>>, %arg5: memref<256x1024xbf16, #tpu.memory_space<vmem>>, %arg6: memref<1x1024xf32, #tpu.memory_space<vmem>>, %arg7: memref<16x256xbf16, #tpu.memory_space<vmem>>, %arg8: memref<8x256xf32, #tpu.memory_space<vmem>>, %arg9: memref<8x256xf32, #tpu.memory_space<vmem>>) attributes {dimension_semantics = [#tpu.dimension_semantics<arbitrary>], iteration_bounds = array<i64: 1>, scalar_prefetch = 0 : i64, scratch_operands = 0 : i64, tpu.core_type = #tpu.core_type<tc>, window_params = [{pipeline_mode = #tpu.pipeline_mode<synchronous>, transform_indices = @transform_0, window_bounds = array<i64: 16, 256>}, {pipeline_mode = #tpu.pipeline_mode<synchronous>, transform_indices = @transform_1, window_bounds = array<i64: 8, 256>}, {pipeline_mode = #tpu.pipeline_mode<synchronous>, transform_indices = @transform_2, window_bounds = array<i64: 8, 256>}, {pipeline_mode = #tpu.pipeline_mode<synchronous>, transform_indices = @transform_3, window_bounds = array<i64: 256, 1024>}, {pipeline_mode = #tpu.pipeline_mode<synchronous>, transform_indices = @transform_4, window_bounds = array<i64: 256, 1024>}, {pipeline_mode = #tpu.pipeline_mode<synchronous>, transform_indices = @transform_5, window_bounds = array<i64: 1, 1024>}, {pipeline_mode = #tpu.pipeline_mode<synchronous>, transform_indices = @transform_6, window_bounds = array<i64: 16, 256>}, {pipeline_mode = #tpu.pipeline_mode<synchronous>, transform_indices = @transform_7, window_bounds = array<i64: 8, 256>}, {pipeline_mode = #tpu.pipeline_mode<synchronous>, transform_indices = @transform_8, window_bounds = array<i64: 8, 256>}]} {
    %cst = arith.constant 0.000000e+00 : bf16
    %0 = vector.broadcast %cst : bf16 to vector<16x256xbf16>
    %c0 = arith.constant 0 : index
    %c0_0 = arith.constant 0 : index
    %1 = vector.load %arg7[%c0, %c0_0] : memref<16x256xbf16, #tpu.memory_space<vmem>>, vector<16x256xbf16>
    tpu.vector_store %arg7[%c0, %c0_0], %0 {strides = array<i32>} : memref<16x256xbf16, #tpu.memory_space<vmem>>, vector<16x256xbf16>,
    %c0_1 = arith.constant 0 : index
    %c0_2 = arith.constant 0 : index
    %2 = vector.load %arg1[%c0_1, %c0_2] : memref<16x256xbf16, #tpu.memory_space<vmem>>, vector<16x256xbf16>
    %c0_3 = arith.constant 0 : index
    %c0_4 = arith.constant 0 : index
    %3 = vector.load %arg4[%c0_3, %c0_4] : memref<256x1024xbf16, #tpu.memory_space<vmem>>, vector<256x1024xbf16>
    %cst_5 = arith.constant dense<0.000000e+00> : vector<16x1024xf32>
    %4 = tpu.matmul %2, %3, %cst_5 {dimension_numbers = #tpu.dot_dimension_numbers<[1], [0], [0], [1], [0, 0, 1, 1], [], []>} : vector<16x256xbf16>, vector<256x1024xbf16>, vector<16x1024xf32> -> vector<16x1024xf32>
    %c0_6 = arith.constant 0 : index
    %c0_7 = arith.constant 0 : index
    %5 = vector.load %arg6[%c0_6, %c0_7] : memref<1x1024xf32, #tpu.memory_space<vmem>>, vector<1x1024xf32>
    %6 = vector.broadcast %5 : vector<1x1024xf32> to vector<16x1024xf32>
    %7 = arith.addf %4, %6 : vector<16x1024xf32>
    %c0_8 = arith.constant 0 : index
    %c0_9 = arith.constant 0 : index
    %8 = vector.load %arg5[%c0_8, %c0_9] : memref<256x1024xbf16, #tpu.memory_space<vmem>>, vector<256x1024xbf16>
    %c0_10 = arith.constant 0 : index
    %c0_11 = arith.constant 0 : index
    %9 = vector.load %arg2[%c0_10, %c0_11] : memref<8x256xf32, #tpu.memory_space<vmem>>, vector<8x256xf32>
    %c0_12 = arith.constant 0 : index
    %c0_13 = arith.constant 0 : index
    %10 = vector.load %arg3[%c0_12, %c0_13] : memref<8x256xf32, #tpu.memory_space<vmem>>, vector<8x256xf32>
    %11 = vector.extract_strided_slice %7 {offsets = [0, 0], sizes = [1, 1024], strides = [1, 1]} : vector<16x1024xf32> to vector<1x1024xf32>
    %12 = arith.truncf %9 : vector<8x256xf32> to vector<8x256xbf16>
    %cst_14 = arith.constant dense<0.000000e+00> : vector<8x1024xf32>
    %13 = tpu.matmul %12, %8, %cst_14 {dimension_numbers = #tpu.dot_dimension_numbers<[1], [0], [0], [1], [0, 0, 1, 1], [], []>} : vector<8x256xbf16>, vector<256x1024xbf16>, vector<8x1024xf32> -> vector<8x1024xf32>
    %14 = vector.broadcast %11 : vector<1x1024xf32> to vector<8x1024xf32>
    %15 = arith.addf %14, %13 : vector<8x1024xf32>
    %16 = vector.extract_strided_slice %15 {offsets = [0, 0], sizes = [8, 256], strides = [1, 1]} : vector<8x1024xf32> to vector<8x256xf32>
    %17 = arith.negf %16 : vector<8x256xf32>
    %18 = math.exp %17 : vector<8x256xf32>
    %cst_15 = arith.constant 1.000000e+00 : f32
    %19 = vector.broadcast %cst_15 : f32 to vector<8x256xf32>
    %20 = arith.addf %19, %18 : vector<8x256xf32>
    %21 = arith.divf %19, %20 : vector<8x256xf32>
    %22 = vector.extract_strided_slice %15 {offsets = [0, 256], sizes = [8, 256], strides = [1, 1]} : vector<8x1024xf32> to vector<8x256xf32>
    %23 = arith.negf %22 : vector<8x256xf32>
    %24 = math.exp %23 : vector<8x256xf32>
    %cst_16 = arith.constant 1.000000e+00 : f32
    %25 = vector.broadcast %cst_16 : f32 to vector<8x256xf32>
    %26 = arith.addf %25, %24 : vector<8x256xf32>
    %27 = arith.divf %25, %26 : vector<8x256xf32>
    %28 = vector.extract_strided_slice %15 {offsets = [0, 512], sizes = [8, 256], strides = [1, 1]} : vector<8x1024xf32> to vector<8x256xf32>
    %29 = math.tanh %28 : vector<8x256xf32>
    %30 = vector.extract_strided_slice %15 {offsets = [0, 768], sizes = [8, 256], strides = [1, 1]} : vector<8x1024xf32> to vector<8x256xf32>
    %31 = arith.negf %30 : vector<8x256xf32>
    %32 = math.exp %31 : vector<8x256xf32>
    %cst_17 = arith.constant 1.000000e+00 : f32
    %33 = vector.broadcast %cst_17 : f32 to vector<8x256xf32>
    %34 = arith.addf %33, %32 : vector<8x256xf32>
    %35 = arith.divf %33, %34 : vector<8x256xf32>
    %36 = arith.mulf %27, %10 : vector<8x256xf32>
    %37 = arith.mulf %21, %29 : vector<8x256xf32>
    %38 = arith.addf %36, %37 : vector<8x256xf32>
    %39 = math.tanh %38 : vector<8x256xf32>
    %40 = arith.mulf %35, %39 : vector<8x256xf32>
    %41 = vector.extract_strided_slice %40 {offsets = [0, 0], sizes = [1, 256], strides = [1, 1]} : vector<8x256xf32> to vector<1x256xf32>
    %42 = arith.truncf %41 : vector<1x256xf32> to vector<1x256xbf16>
    %c0_18 = arith.constant 0 : index
    %c0_19 = arith.constant 0 : index
    %43 = vector.load %arg7[%c0_18, %c0_19] : memref<16x256xbf16, #tpu.memory_space<vmem>>, vector<1x256xbf16>
    tpu.vector_store %arg7[%c0_18, %c0_19], %42 {strides = array<i32>} : memref<16x256xbf16, #tpu.memory_space<vmem>>, vector<1x256xbf16>,
    %44 = vector.extract_strided_slice %7 {offsets = [1, 0], sizes = [1, 1024], strides = [1, 1]} : vector<16x1024xf32> to vector<1x1024xf32>
    %45 = arith.truncf %40 : vector<8x256xf32> to vector<8x256xbf16>
    %cst_20 = arith.constant dense<0.000000e+00> : vector<8x1024xf32>
    %46 = tpu.matmul %45, %8, %cst_20 {dimension_numbers = #tpu.dot_dimension_numbers<[1], [0], [0], [1], [0, 0, 1, 1], [], []>} : vector<8x256xbf16>, vector<256x1024xbf16>, vector<8x1024xf32> -> vector<8x1024xf32>
    %47 = vector.broadcast %44 : vector<1x1024xf32> to vector<8x1024xf32>
    %48 = arith.addf %47, %46 : vector<8x1024xf32>
    %49 = vector.extract_strided_slice %48 {offsets = [0, 0], sizes = [8, 256], strides = [1, 1]} : vector<8x1024xf32> to vector<8x256xf32>
    %50 = arith.negf %49 : vector<8x256xf32>
    %51 = math.exp %50 : vector<8x256xf32>
    %cst_21 = arith.constant 1.000000e+00 : f32
    %52 = vector.broadcast %cst_21 : f32 to vector<8x256xf32>
    %53 = arith.addf %52, %51 : vector<8x256xf32>
    %54 = arith.divf %52, %53 : vector<8x256xf32>
    %55 = vector.extract_strided_slice %48 {offsets = [0, 256], sizes = [8, 256], strides = [1, 1]} : vector<8x1024xf32> to vector<8x256xf32>
    %56 = arith.negf %55 : vector<8x256xf32>
    %57 = math.exp %56 : vector<8x256xf32>
    %cst_22 = arith.constant 1.000000e+00 : f32
    %58 = vector.broadcast %cst_22 : f32 to vector<8x256xf32>
    %59 = arith.addf %58, %57 : vector<8x256xf32>
    %60 = arith.divf %58, %59 : vector<8x256xf32>
    %61 = vector.extract_strided_slice %48 {offsets = [0, 512], sizes = [8, 256], strides = [1, 1]} : vector<8x1024xf32> to vector<8x256xf32>
    %62 = math.tanh %61 : vector<8x256xf32>
    %63 = vector.extract_strided_slice %48 {offsets = [0, 768], sizes = [8, 256], strides = [1, 1]} : vector<8x1024xf32> to vector<8x256xf32>
    %64 = arith.negf %63 : vector<8x256xf32>
    %65 = math.exp %64 : vector<8x256xf32>
    %cst_23 = arith.constant 1.000000e+00 : f32
    %66 = vector.broadcast %cst_23 : f32 to vector<8x256xf32>
    %67 = arith.addf %66, %65 : vector<8x256xf32>
    %68 = arith.divf %66, %67 : vector<8x256xf32>
    %69 = arith.mulf %60, %38 : vector<8x256xf32>
    %70 = arith.mulf %54, %62 : vector<8x256xf32>
    %71 = arith.addf %69, %70 : vector<8x256xf32>
    %72 = math.tanh %71 : vector<8x256xf32>
    %73 = arith.mulf %68, %72 : vector<8x256xf32>
    %74 = vector.extract_strided_slice %73 {offsets = [0, 0], sizes = [1, 256], strides = [1, 1]} : vector<8x256xf32> to vector<1x256xf32>
    %75 = arith.truncf %74 : vector<1x256xf32> to vector<1x256xbf16>
    %c1 = arith.constant 1 : index
    %c0_24 = arith.constant 0 : index
    %76 = vector.load %arg7[%c1, %c0_24] : memref<16x256xbf16, #tpu.memory_space<vmem>>, vector<1x256xbf16>
    tpu.vector_store %arg7[%c1, %c0_24], %75 {strides = array<i32>} : memref<16x256xbf16, #tpu.memory_space<vmem>>, vector<1x256xbf16>,
    %77 = vector.extract_strided_slice %7 {offsets = [2, 0], sizes = [1, 1024], strides = [1, 1]} : vector<16x1024xf32> to vector<1x1024xf32>
    %78 = arith.truncf %73 : vector<8x256xf32> to vector<8x256xbf16>
    %cst_25 = arith.constant dense<0.000000e+00> : vector<8x1024xf32>
    %79 = tpu.matmul %78, %8, %cst_25 {dimension_numbers = #tpu.dot_dimension_numbers<[1], [0], [0], [1], [0, 0, 1, 1], [], []>} : vector<8x256xbf16>, vector<256x1024xbf16>, vector<8x1024xf32> -> vector<8x1024xf32>
    %80 = vector.broadcast %77 : vector<1x1024xf32> to vector<8x1024xf32>
    %81 = arith.addf %80, %79 : vector<8x1024xf32>
    %82 = vector.extract_strided_slice %81 {offsets = [0, 0], sizes = [8, 256], strides = [1, 1]} : vector<8x1024xf32> to vector<8x256xf32>
    %83 = arith.negf %82 : vector<8x256xf32>
    %84 = math.exp %83 : vector<8x256xf32>
    %cst_26 = arith.constant 1.000000e+00 : f32
    %85 = vector.broadcast %cst_26 : f32 to vector<8x256xf32>
    %86 = arith.addf %85, %84 : vector<8x256xf32>
    %87 = arith.divf %85, %86 : vector<8x256xf32>
    %88 = vector.extract_strided_slice %81 {offsets = [0, 256], sizes = [8, 256], strides = [1, 1]} : vector<8x1024xf32> to vector<8x256xf32>
    %89 = arith.negf %88 : vector<8x256xf32>
    %90 = math.exp %89 : vector<8x256xf32>
    %cst_27 = arith.constant 1.000000e+00 : f32
    %91 = vector.broadcast %cst_27 : f32 to vector<8x256xf32>
    %92 = arith.addf %91, %90 : vector<8x256xf32>
    %93 = arith.divf %91, %92 : vector<8x256xf32>
    %94 = vector.extract_strided_slice %81 {offsets = [0, 512], sizes = [8, 256], strides = [1, 1]} : vector<8x1024xf32> to vector<8x256xf32>
    %95 = math.tanh %94 : vector<8x256xf32>
    %96 = vector.extract_strided_slice %81 {offsets = [0, 768], sizes = [8, 256], strides = [1, 1]} : vector<8x1024xf32> to vector<8x256xf32>
    %97 = arith.negf %96 : vector<8x256xf32>
    %98 = math.exp %97 : vector<8x256xf32>
    %cst_28 = arith.constant 1.000000e+00 : f32
    %99 = vector.broadcast %cst_28 : f32 to vector<8x256xf32>
    %100 = arith.addf %99, %98 : vector<8x256xf32>
    %101 = arith.divf %99, %100 : vector<8x256xf32>
    %102 = arith.mulf %93, %71 : vector<8x256xf32>
    %103 = arith.mulf %87, %95 : vector<8x256xf32>
    %104 = arith.addf %102, %103 : vector<8x256xf32>
    %105 = math.tanh %104 : vector<8x256xf32>
    %106 = arith.mulf %101, %105 : vector<8x256xf32>
    %107 = vector.extract_strided_slice %106 {offsets = [0, 0], sizes = [1, 256], strides = [1, 1]} : vector<8x256xf32> to vector<1x256xf32>
    %108 = arith.truncf %107 : vector<1x256xf32> to vector<1x256xbf16>
    %c2 = arith.constant 2 : index
    %c0_29 = arith.constant 0 : index
    %109 = vector.load %arg7[%c2, %c0_29] : memref<16x256xbf16, #tpu.memory_space<vmem>>, vector<1x256xbf16>
    tpu.vector_store %arg7[%c2, %c0_29], %108 {strides = array<i32>} : memref<16x256xbf16, #tpu.memory_space<vmem>>, vector<1x256xbf16>,
    %110 = vector.extract_strided_slice %7 {offsets = [3, 0], sizes = [1, 1024], strides = [1, 1]} : vector<16x1024xf32> to vector<1x1024xf32>
    %111 = arith.truncf %106 : vector<8x256xf32> to vector<8x256xbf16>
    %cst_30 = arith.constant dense<0.000000e+00> : vector<8x1024xf32>
    %112 = tpu.matmul %111, %8, %cst_30 {dimension_numbers = #tpu.dot_dimension_numbers<[1], [0], [0], [1], [0, 0, 1, 1], [], []>} : vector<8x256xbf16>, vector<256x1024xbf16>, vector<8x1024xf32> -> vector<8x1024xf32>
    %113 = vector.broadcast %110 : vector<1x1024xf32> to vector<8x1024xf32>
    %114 = arith.addf %113, %112 : vector<8x1024xf32>
    %115 = vector.extract_strided_slice %114 {offsets = [0, 0], sizes = [8, 256], strides = [1, 1]} : vector<8x1024xf32> to vector<8x256xf32>
    %116 = arith.negf %115 : vector<8x256xf32>
    %117 = math.exp %116 : vector<8x256xf32>
    %cst_31 = arith.constant 1.000000e+00 : f32
    %118 = vector.broadcast %cst_31 : f32 to vector<8x256xf32>
    %119 = arith.addf %118, %117 : vector<8x256xf32>
    %120 = arith.divf %118, %119 : vector<8x256xf32>
    %121 = vector.extract_strided_slice %114 {offsets = [0, 256], sizes = [8, 256], strides = [1, 1]} : vector<8x1024xf32> to vector<8x256xf32>
    %122 = arith.negf %121 : vector<8x256xf32>
    %123 = math.exp %122 : vector<8x256xf32>
    %cst_32 = arith.constant 1.000000e+00 : f32
    %124 = vector.broadcast %cst_32 : f32 to vector<8x256xf32>
    %125 = arith.addf %124, %123 : vector<8x256xf32>
    %126 = arith.divf %124, %125 : vector<8x256xf32>
    %127 = vector.extract_strided_slice %114 {offsets = [0, 512], sizes = [8, 256], strides = [1, 1]} : vector<8x1024xf32> to vector<8x256xf32>
    %128 = math.tanh %127 : vector<8x256xf32>
    %129 = vector.extract_strided_slice %114 {offsets = [0, 768], sizes = [8, 256], strides = [1, 1]} : vector<8x1024xf32> to vector<8x256xf32>
    %130 = arith.negf %129 : vector<8x256xf32>
    %131 = math.exp %130 : vector<8x256xf32>
    %cst_33 = arith.constant 1.000000e+00 : f32
    %132 = vector.broadcast %cst_33 : f32 to vector<8x256xf32>
    %133 = arith.addf %132, %131 : vector<8x256xf32>
    %134 = arith.divf %132, %133 : vector<8x256xf32>
    %135 = arith.mulf %126, %104 : vector<8x256xf32>
    %136 = arith.mulf %120, %128 : vector<8x256xf32>
    %137 = arith.addf %135, %136 : vector<8x256xf32>
    %138 = math.tanh %137 : vector<8x256xf32>
    %139 = arith.mulf %134, %138 : vector<8x256xf32>
    %140 = vector.extract_strided_slice %139 {offsets = [0, 0], sizes = [1, 256], strides = [1, 1]} : vector<8x256xf32> to vector<1x256xf32>
    %141 = arith.truncf %140 : vector<1x256xf32> to vector<1x256xbf16>
    %c3 = arith.constant 3 : index
    %c0_34 = arith.constant 0 : index
    %142 = vector.load %arg7[%c3, %c0_34] : memref<16x256xbf16, #tpu.memory_space<vmem>>, vector<1x256xbf16>
    tpu.vector_store %arg7[%c3, %c0_34], %141 {strides = array<i32>} : memref<16x256xbf16, #tpu.memory_space<vmem>>, vector<1x256xbf16>,
    %143 = vector.extract_strided_slice %7 {offsets = [4, 0], sizes = [1, 1024], strides = [1, 1]} : vector<16x1024xf32> to vector<1x1024xf32>
    %144 = arith.truncf %139 : vector<8x256xf32> to vector<8x256xbf16>
    %cst_35 = arith.constant dense<0.000000e+00> : vector<8x1024xf32>
    %145 = tpu.matmul %144, %8, %cst_35 {dimension_numbers = #tpu.dot_dimension_numbers<[1], [0], [0], [1], [0, 0, 1, 1], [], []>} : vector<8x256xbf16>, vector<256x1024xbf16>, vector<8x1024xf32> -> vector<8x1024xf32>
    %146 = vector.broadcast %143 : vector<1x1024xf32> to vector<8x1024xf32>
    %147 = arith.addf %146, %145 : vector<8x1024xf32>
    %148 = vector.extract_strided_slice %147 {offsets = [0, 0], sizes = [8, 256], strides = [1, 1]} : vector<8x1024xf32> to vector<8x256xf32>
    %149 = arith.negf %148 : vector<8x256xf32>
    %150 = math.exp %149 : vector<8x256xf32>
    %cst_36 = arith.constant 1.000000e+00 : f32
    %151 = vector.broadcast %cst_36 : f32 to vector<8x256xf32>
    %152 = arith.addf %151, %150 : vector<8x256xf32>
    %153 = arith.divf %151, %152 : vector<8x256xf32>
    %154 = vector.extract_strided_slice %147 {offsets = [0, 256], sizes = [8, 256], strides = [1, 1]} : vector<8x1024xf32> to vector<8x256xf32>
    %155 = arith.negf %154 : vector<8x256xf32>
    %156 = math.exp %155 : vector<8x256xf32>
    %cst_37 = arith.constant 1.000000e+00 : f32
    %157 = vector.broadcast %cst_37 : f32 to vector<8x256xf32>
    %158 = arith.addf %157, %156 : vector<8x256xf32>
    %159 = arith.divf %157, %158 : vector<8x256xf32>
    %160 = vector.extract_strided_slice %147 {offsets = [0, 512], sizes = [8, 256], strides = [1, 1]} : vector<8x1024xf32> to vector<8x256xf32>
    %161 = math.tanh %160 : vector<8x256xf32>
    %162 = vector.extract_strided_slice %147 {offsets = [0, 768], sizes = [8, 256], strides = [1, 1]} : vector<8x1024xf32> to vector<8x256xf32>
    %163 = arith.negf %162 : vector<8x256xf32>
    %164 = math.exp %163 : vector<8x256xf32>
    %cst_38 = arith.constant 1.000000e+00 : f32
    %165 = vector.broadcast %cst_38 : f32 to vector<8x256xf32>
    %166 = arith.addf %165, %164 : vector<8x256xf32>
    %167 = arith.divf %165, %166 : vector<8x256xf32>
    %168 = arith.mulf %159, %137 : vector<8x256xf32>
    %169 = arith.mulf %153, %161 : vector<8x256xf32>
    %170 = arith.addf %168, %169 : vector<8x256xf32>
    %171 = math.tanh %170 : vector<8x256xf32>
    %172 = arith.mulf %167, %171 : vector<8x256xf32>
    %173 = vector.extract_strided_slice %172 {offsets = [0, 0], sizes = [1, 256], strides = [1, 1]} : vector<8x256xf32> to vector<1x256xf32>
    %174 = arith.truncf %173 : vector<1x256xf32> to vector<1x256xbf16>
    %c4 = arith.constant 4 : index
    %c0_39 = arith.constant 0 : index
    %175 = vector.load %arg7[%c4, %c0_39] : memref<16x256xbf16, #tpu.memory_space<vmem>>, vector<1x256xbf16>
    tpu.vector_store %arg7[%c4, %c0_39], %174 {strides = array<i32>} : memref<16x256xbf16, #tpu.memory_space<vmem>>, vector<1x256xbf16>,
    %176 = vector.extract_strided_slice %7 {offsets = [5, 0], sizes = [1, 1024], strides = [1, 1]} : vector<16x1024xf32> to vector<1x1024xf32>
    %177 = arith.truncf %172 : vector<8x256xf32> to vector<8x256xbf16>
    %cst_40 = arith.constant dense<0.000000e+00> : vector<8x1024xf32>
    %178 = tpu.matmul %177, %8, %cst_40 {dimension_numbers = #tpu.dot_dimension_numbers<[1], [0], [0], [1], [0, 0, 1, 1], [], []>} : vector<8x256xbf16>, vector<256x1024xbf16>, vector<8x1024xf32> -> vector<8x1024xf32>
    %179 = vector.broadcast %176 : vector<1x1024xf32> to vector<8x1024xf32>
    %180 = arith.addf %179, %178 : vector<8x1024xf32>
    %181 = vector.extract_strided_slice %180 {offsets = [0, 0], sizes = [8, 256], strides = [1, 1]} : vector<8x1024xf32> to vector<8x256xf32>
    %182 = arith.negf %181 : vector<8x256xf32>
    %183 = math.exp %182 : vector<8x256xf32>
    %cst_41 = arith.constant 1.000000e+00 : f32
    %184 = vector.broadcast %cst_41 : f32 to vector<8x256xf32>
    %185 = arith.addf %184, %183 : vector<8x256xf32>
    %186 = arith.divf %184, %185 : vector<8x256xf32>
    %187 = vector.extract_strided_slice %180 {offsets = [0, 256], sizes = [8, 256], strides = [1, 1]} : vector<8x1024xf32> to vector<8x256xf32>
    %188 = arith.negf %187 : vector<8x256xf32>
    %189 = math.exp %188 : vector<8x256xf32>
    %cst_42 = arith.constant 1.000000e+00 : f32
    %190 = vector.broadcast %cst_42 : f32 to vector<8x256xf32>
    %191 = arith.addf %190, %189 : vector<8x256xf32>
    %192 = arith.divf %190, %191 : vector<8x256xf32>
    %193 = vector.extract_strided_slice %180 {offsets = [0, 512], sizes = [8, 256], strides = [1, 1]} : vector<8x1024xf32> to vector<8x256xf32>
    %194 = math.tanh %193 : vector<8x256xf32>
    %195 = vector.extract_strided_slice %180 {offsets = [0, 768], sizes = [8, 256], strides = [1, 1]} : vector<8x1024xf32> to vector<8x256xf32>
    %196 = arith.negf %195 : vector<8x256xf32>
    %197 = math.exp %196 : vector<8x256xf32>
    %cst_43 = arith.constant 1.000000e+00 : f32
    %198 = vector.broadcast %cst_43 : f32 to vector<8x256xf32>
    %199 = arith.addf %198, %197 : vector<8x256xf32>
    %200 = arith.divf %198, %199 : vector<8x256xf32>
    %201 = arith.mulf %192, %170 : vector<8x256xf32>
    %202 = arith.mulf %186, %194 : vector<8x256xf32>
    %203 = arith.addf %201, %202 : vector<8x256xf32>
    %204 = math.tanh %203 : vector<8x256xf32>
    %205 = arith.mulf %200, %204 : vector<8x256xf32>
    %206 = vector.extract_strided_slice %205 {offsets = [0, 0], sizes = [1, 256], strides = [1, 1]} : vector<8x256xf32> to vector<1x256xf32>
    %207 = arith.truncf %206 : vector<1x256xf32> to vector<1x256xbf16>
    %c5 = arith.constant 5 : index
    %c0_44 = arith.constant 0 : index
    %208 = vector.load %arg7[%c5, %c0_44] : memref<16x256xbf16, #tpu.memory_space<vmem>>, vector<1x256xbf16>
    tpu.vector_store %arg7[%c5, %c0_44], %207 {strides = array<i32>} : memref<16x256xbf16, #tpu.memory_space<vmem>>, vector<1x256xbf16>,
    %209 = vector.extract_strided_slice %7 {offsets = [6, 0], sizes = [1, 1024], strides = [1, 1]} : vector<16x1024xf32> to vector<1x1024xf32>
    %210 = arith.truncf %205 : vector<8x256xf32> to vector<8x256xbf16>
    %cst_45 = arith.constant dense<0.000000e+00> : vector<8x1024xf32>
    %211 = tpu.matmul %210, %8, %cst_45 {dimension_numbers = #tpu.dot_dimension_numbers<[1], [0], [0], [1], [0, 0, 1, 1], [], []>} : vector<8x256xbf16>, vector<256x1024xbf16>, vector<8x1024xf32> -> vector<8x1024xf32>
    %212 = vector.broadcast %209 : vector<1x1024xf32> to vector<8x1024xf32>
    %213 = arith.addf %212, %211 : vector<8x1024xf32>
    %214 = vector.extract_strided_slice %213 {offsets = [0, 0], sizes = [8, 256], strides = [1, 1]} : vector<8x1024xf32> to vector<8x256xf32>
    %215 = arith.negf %214 : vector<8x256xf32>
    %216 = math.exp %215 : vector<8x256xf32>
    %cst_46 = arith.constant 1.000000e+00 : f32
    %217 = vector.broadcast %cst_46 : f32 to vector<8x256xf32>
    %218 = arith.addf %217, %216 : vector<8x256xf32>
    %219 = arith.divf %217, %218 : vector<8x256xf32>
    %220 = vector.extract_strided_slice %213 {offsets = [0, 256], sizes = [8, 256], strides = [1, 1]} : vector<8x1024xf32> to vector<8x256xf32>
    %221 = arith.negf %220 : vector<8x256xf32>
    %222 = math.exp %221 : vector<8x256xf32>
    %cst_47 = arith.constant 1.000000e+00 : f32
    %223 = vector.broadcast %cst_47 : f32 to vector<8x256xf32>
    %224 = arith.addf %223, %222 : vector<8x256xf32>
    %225 = arith.divf %223, %224 : vector<8x256xf32>
    %226 = vector.extract_strided_slice %213 {offsets = [0, 512], sizes = [8, 256], strides = [1, 1]} : vector<8x1024xf32> to vector<8x256xf32>
    %227 = math.tanh %226 : vector<8x256xf32>
    %228 = vector.extract_strided_slice %213 {offsets = [0, 768], sizes = [8, 256], strides = [1, 1]} : vector<8x1024xf32> to vector<8x256xf32>
    %229 = arith.negf %228 : vector<8x256xf32>
    %230 = math.exp %229 : vector<8x256xf32>
    %cst_48 = arith.constant 1.000000e+00 : f32
    %231 = vector.broadcast %cst_48 : f32 to vector<8x256xf32>
    %232 = arith.addf %231, %230 : vector<8x256xf32>
    %233 = arith.divf %231, %232 : vector<8x256xf32>
    %234 = arith.mulf %225, %203 : vector<8x256xf32>
    %235 = arith.mulf %219, %227 : vector<8x256xf32>
    %236 = arith.addf %234, %235 : vector<8x256xf32>
    %237 = math.tanh %236 : vector<8x256xf32>
    %238 = arith.mulf %233, %237 : vector<8x256xf32>
    %239 = vector.extract_strided_slice %238 {offsets = [0, 0], sizes = [1, 256], strides = [1, 1]} : vector<8x256xf32> to vector<1x256xf32>
    %240 = arith.truncf %239 : vector<1x256xf32> to vector<1x256xbf16>
    %c6 = arith.constant 6 : index
    %c0_49 = arith.constant 0 : index
    %241 = vector.load %arg7[%c6, %c0_49] : memref<16x256xbf16, #tpu.memory_space<vmem>>, vector<1x256xbf16>
    tpu.vector_store %arg7[%c6, %c0_49], %240 {strides = array<i32>} : memref<16x256xbf16, #tpu.memory_space<vmem>>, vector<1x256xbf16>,
    %242 = vector.extract_strided_slice %7 {offsets = [7, 0], sizes = [1, 1024], strides = [1, 1]} : vector<16x1024xf32> to vector<1x1024xf32>
    %243 = arith.truncf %238 : vector<8x256xf32> to vector<8x256xbf16>
    %cst_50 = arith.constant dense<0.000000e+00> : vector<8x1024xf32>
    %244 = tpu.matmul %243, %8, %cst_50 {dimension_numbers = #tpu.dot_dimension_numbers<[1], [0], [0], [1], [0, 0, 1, 1], [], []>} : vector<8x256xbf16>, vector<256x1024xbf16>, vector<8x1024xf32> -> vector<8x1024xf32>
    %245 = vector.broadcast %242 : vector<1x1024xf32> to vector<8x1024xf32>
    %246 = arith.addf %245, %244 : vector<8x1024xf32>
    %247 = vector.extract_strided_slice %246 {offsets = [0, 0], sizes = [8, 256], strides = [1, 1]} : vector<8x1024xf32> to vector<8x256xf32>
    %248 = arith.negf %247 : vector<8x256xf32>
    %249 = math.exp %248 : vector<8x256xf32>
    %cst_51 = arith.constant 1.000000e+00 : f32
    %250 = vector.broadcast %cst_51 : f32 to vector<8x256xf32>
    %251 = arith.addf %250, %249 : vector<8x256xf32>
    %252 = arith.divf %250, %251 : vector<8x256xf32>
    %253 = vector.extract_strided_slice %246 {offsets = [0, 256], sizes = [8, 256], strides = [1, 1]} : vector<8x1024xf32> to vector<8x256xf32>
    %254 = arith.negf %253 : vector<8x256xf32>
    %255 = math.exp %254 : vector<8x256xf32>
    %cst_52 = arith.constant 1.000000e+00 : f32
    %256 = vector.broadcast %cst_52 : f32 to vector<8x256xf32>
    %257 = arith.addf %256, %255 : vector<8x256xf32>
    %258 = arith.divf %256, %257 : vector<8x256xf32>
    %259 = vector.extract_strided_slice %246 {offsets = [0, 512], sizes = [8, 256], strides = [1, 1]} : vector<8x1024xf32> to vector<8x256xf32>
    %260 = math.tanh %259 : vector<8x256xf32>
    %261 = vector.extract_strided_slice %246 {offsets = [0, 768], sizes = [8, 256], strides = [1, 1]} : vector<8x1024xf32> to vector<8x256xf32>
    %262 = arith.negf %261 : vector<8x256xf32>
    %263 = math.exp %262 : vector<8x256xf32>
    %cst_53 = arith.constant 1.000000e+00 : f32
    %264 = vector.broadcast %cst_53 : f32 to vector<8x256xf32>
    %265 = arith.addf %264, %263 : vector<8x256xf32>
    %266 = arith.divf %264, %265 : vector<8x256xf32>
    %267 = arith.mulf %258, %236 : vector<8x256xf32>
    %268 = arith.mulf %252, %260 : vector<8x256xf32>
    %269 = arith.addf %267, %268 : vector<8x256xf32>
    %270 = math.tanh %269 : vector<8x256xf32>
    %271 = arith.mulf %266, %270 : vector<8x256xf32>
    %272 = vector.extract_strided_slice %271 {offsets = [0, 0], sizes = [1, 256], strides = [1, 1]} : vector<8x256xf32> to vector<1x256xf32>
    %273 = arith.truncf %272 : vector<1x256xf32> to vector<1x256xbf16>
    %c7 = arith.constant 7 : index
    %c0_54 = arith.constant 0 : index
    %274 = vector.load %arg7[%c7, %c0_54] : memref<16x256xbf16, #tpu.memory_space<vmem>>, vector<1x256xbf16>
    tpu.vector_store %arg7[%c7, %c0_54], %273 {strides = array<i32>} : memref<16x256xbf16, #tpu.memory_space<vmem>>, vector<1x256xbf16>,
    %275 = vector.extract_strided_slice %7 {offsets = [8, 0], sizes = [1, 1024], strides = [1, 1]} : vector<16x1024xf32> to vector<1x1024xf32>
    %276 = arith.truncf %271 : vector<8x256xf32> to vector<8x256xbf16>
    %cst_55 = arith.constant dense<0.000000e+00> : vector<8x1024xf32>
    %277 = tpu.matmul %276, %8, %cst_55 {dimension_numbers = #tpu.dot_dimension_numbers<[1], [0], [0], [1], [0, 0, 1, 1], [], []>} : vector<8x256xbf16>, vector<256x1024xbf16>, vector<8x1024xf32> -> vector<8x1024xf32>
    %278 = vector.broadcast %275 : vector<1x1024xf32> to vector<8x1024xf32>
    %279 = arith.addf %278, %277 : vector<8x1024xf32>
    %280 = vector.extract_strided_slice %279 {offsets = [0, 0], sizes = [8, 256], strides = [1, 1]} : vector<8x1024xf32> to vector<8x256xf32>
    %281 = arith.negf %280 : vector<8x256xf32>
    %282 = math.exp %281 : vector<8x256xf32>
    %cst_56 = arith.constant 1.000000e+00 : f32
    %283 = vector.broadcast %cst_56 : f32 to vector<8x256xf32>
    %284 = arith.addf %283, %282 : vector<8x256xf32>
    %285 = arith.divf %283, %284 : vector<8x256xf32>
    %286 = vector.extract_strided_slice %279 {offsets = [0, 256], sizes = [8, 256], strides = [1, 1]} : vector<8x1024xf32> to vector<8x256xf32>
    %287 = arith.negf %286 : vector<8x256xf32>
    %288 = math.exp %287 : vector<8x256xf32>
    %cst_57 = arith.constant 1.000000e+00 : f32
    %289 = vector.broadcast %cst_57 : f32 to vector<8x256xf32>
    %290 = arith.addf %289, %288 : vector<8x256xf32>
    %291 = arith.divf %289, %290 : vector<8x256xf32>
    %292 = vector.extract_strided_slice %279 {offsets = [0, 512], sizes = [8, 256], strides = [1, 1]} : vector<8x1024xf32> to vector<8x256xf32>
    %293 = math.tanh %292 : vector<8x256xf32>
    %294 = vector.extract_strided_slice %279 {offsets = [0, 768], sizes = [8, 256], strides = [1, 1]} : vector<8x1024xf32> to vector<8x256xf32>
    %295 = arith.negf %294 : vector<8x256xf32>
    %296 = math.exp %295 : vector<8x256xf32>
    %cst_58 = arith.constant 1.000000e+00 : f32
    %297 = vector.broadcast %cst_58 : f32 to vector<8x256xf32>
    %298 = arith.addf %297, %296 : vector<8x256xf32>
    %299 = arith.divf %297, %298 : vector<8x256xf32>
    %300 = arith.mulf %291, %269 : vector<8x256xf32>
    %301 = arith.mulf %285, %293 : vector<8x256xf32>
    %302 = arith.addf %300, %301 : vector<8x256xf32>
    %303 = math.tanh %302 : vector<8x256xf32>
    %304 = arith.mulf %299, %303 : vector<8x256xf32>
    %305 = vector.extract_strided_slice %304 {offsets = [0, 0], sizes = [1, 256], strides = [1, 1]} : vector<8x256xf32> to vector<1x256xf32>
    %306 = arith.truncf %305 : vector<1x256xf32> to vector<1x256xbf16>
    %c8 = arith.constant 8 : index
    %c0_59 = arith.constant 0 : index
    %307 = vector.load %arg7[%c8, %c0_59] : memref<16x256xbf16, #tpu.memory_space<vmem>>, vector<1x256xbf16>
    tpu.vector_store %arg7[%c8, %c0_59], %306 {strides = array<i32>} : memref<16x256xbf16, #tpu.memory_space<vmem>>, vector<1x256xbf16>,
    %c0_60 = arith.constant 0 : index
    %c0_61 = arith.constant 0 : index
    %308 = vector.load %arg8[%c0_60, %c0_61] : memref<8x256xf32, #tpu.memory_space<vmem>>, vector<8x256xf32>
    tpu.vector_store %arg8[%c0_60, %c0_61], %304 {strides = array<i32>} : memref<8x256xf32, #tpu.memory_space<vmem>>, vector<8x256xf32>,
    %c0_62 = arith.constant 0 : index
    %c0_63 = arith.constant 0 : index
    %309 = vector.load %arg9[%c0_62, %c0_63] : memref<8x256xf32, #tpu.memory_space<vmem>>, vector<8x256xf32>
    tpu.vector_store %arg9[%c0_62, %c0_63], %302 {strides = array<i32>} : memref<8x256xf32, #tpu.memory_space<vmem>>, vector<8x256xf32>,
    return
  }
  func.func @transform_0(%arg0: i32) -> (i32, i32) {
    %c0_i32 = arith.constant 0 : i32
    %c0_i32_0 = arith.constant 0 : i32
    %c0_i32_1 = arith.constant 0 : i32
    return %c0_i32, %c0_i32_0 : i32, i32
  }
  func.func @transform_1(%arg0: i32) -> (i32, i32) {
    %c0_i32 = arith.constant 0 : i32
    %c0_i32_0 = arith.constant 0 : i32
    %c0_i32_1 = arith.constant 0 : i32
    return %c0_i32, %c0_i32_0 : i32, i32
  }
  func.func @transform_2(%arg0: i32) -> (i32, i32) {
    %c0_i32 = arith.constant 0 : i32
    %c0_i32_0 = arith.constant 0 : i32
    %c0_i32_1 = arith.constant 0 : i32
    return %c0_i32, %c0_i32_0 : i32, i32
  }
  func.func @transform_3(%arg0: i32) -> (i32, i32) {
    %c0_i32 = arith.constant 0 : i32
    %c0_i32_0 = arith.constant 0 : i32
    %c0_i32_1 = arith.constant 0 : i32
    return %c0_i32, %c0_i32_0 : i32, i32
  }
  func.func @transform_4(%arg0: i32) -> (i32, i32) {
    %c0_i32 = arith.constant 0 : i32
    %c0_i32_0 = arith.constant 0 : i32
    %c0_i32_1 = arith.constant 0 : i32
    return %c0_i32, %c0_i32_0 : i32, i32
  }
  func.func @transform_5(%arg0: i32) -> (i32, i32) {
    %c0_i32 = arith.constant 0 : i32
    %c0_i32_0 = arith.constant 0 : i32
    %c0_i32_1 = arith.constant 0 : i32
    return %c0_i32, %c0_i32_0 : i32, i32
  }
  func.func @transform_6(%arg0: i32) -> (i32, i32) {
    %c0_i32 = arith.constant 0 : i32
    %c0_i32_0 = arith.constant 0 : i32
    %c0_i32_1 = arith.constant 0 : i32
    return %c0_i32, %c0_i32_0 : i32, i32
  }
  func.func @transform_7(%arg0: i32) -> (i32, i32) {
    %c0_i32 = arith.constant 0 : i32
    %c0_i32_0 = arith.constant 0 : i32
    %c0_i32_1 = arith.constant 0 : i32
    return %c0_i32, %c0_i32_0 : i32, i32
  }
  func.func @transform_8(%arg0: i32) -> (i32, i32) {
    %c0_i32 = arith.constant 0 : i32
    %c0_i32_0 = arith.constant 0 : i32
    %c0_i32_1 = arith.constant 0 : i32
    return %c0_i32, %c0_i32_0 : i32, i32
  }
}

module attributes {stable_mosaic.version = 11 : i64} {
  func.func @_matmul_bias_kernel(%arg0: i32, %arg1: i32, %arg2: memref<16x256xbf16, #tpu.memory_space<vmem>>, %arg3: memref<256x512xbf16, #tpu.memory_space<vmem>>, %arg4: memref<1x512xf32, #tpu.memory_space<vmem>>, %arg5: memref<16x512xf32, #tpu.memory_space<vmem>>) attributes {dimension_semantics = [#tpu.dimension_semantics<parallel>, #tpu.dimension_semantics<parallel>], iteration_bounds = array<i64: 1, 2>, scalar_prefetch = 0 : i64, scratch_operands = 0 : i64, tpu.core_type = #tpu.core_type<tc>, window_params = [{transform_indices = @transform_0, window_bounds = array<i64: 16, 256>}, {transform_indices = @transform_1, window_bounds = array<i64: 256, 512>}, {transform_indices = @transform_2, window_bounds = array<i64: 1, 512>}, {transform_indices = @transform_3, window_bounds = array<i64: 16, 512>}]} {
    %c0 = arith.constant 0 : index
    %c0_0 = arith.constant 0 : index
    %0 = vector.load %arg2[%c0, %c0_0] : memref<16x256xbf16, #tpu.memory_space<vmem>>, vector<16x256xbf16>
    %c0_1 = arith.constant 0 : index
    %c0_2 = arith.constant 0 : index
    %1 = vector.load %arg3[%c0_1, %c0_2] : memref<256x512xbf16, #tpu.memory_space<vmem>>, vector<256x512xbf16>
    %cst = arith.constant dense<0.000000e+00> : vector<16x512xf32>
    %2 = tpu.matmul %0, %1, %cst {dimension_numbers = #tpu.dot_dimension_numbers<[1], [0], [0], [1], [0, 0, 1, 1], [], []>} : vector<16x256xbf16>, vector<256x512xbf16>, vector<16x512xf32> -> vector<16x512xf32>
    %c0_3 = arith.constant 0 : index
    %c0_4 = arith.constant 0 : index
    %3 = vector.load %arg4[%c0_3, %c0_4] : memref<1x512xf32, #tpu.memory_space<vmem>>, vector<1x512xf32>
    %4 = vector.broadcast %3 : vector<1x512xf32> to vector<16x512xf32>
    %5 = arith.addf %2, %4 : vector<16x512xf32>
    %c0_5 = arith.constant 0 : index
    %c0_6 = arith.constant 0 : index
    %6 = vector.load %arg5[%c0_5, %c0_6] : memref<16x512xf32, #tpu.memory_space<vmem>>, vector<16x512xf32>
    tpu.vector_store %arg5[%c0_5, %c0_6], %5 {strides = array<i32>} : memref<16x512xf32, #tpu.memory_space<vmem>>, vector<16x512xf32>,
    return
  }
  func.func @transform_0(%arg0: i32, %arg1: i32) -> (i32, i32) {
    %c0_i32 = arith.constant 0 : i32
    %c0_i32_0 = arith.constant 0 : i32
    return %arg0, %c0_i32 : i32, i32
  }
  func.func @transform_1(%arg0: i32, %arg1: i32) -> (i32, i32) {
    %c0_i32 = arith.constant 0 : i32
    %c0_i32_0 = arith.constant 0 : i32
    return %c0_i32, %arg1 : i32, i32
  }
  func.func @transform_2(%arg0: i32, %arg1: i32) -> (i32, i32) {
    %c0_i32 = arith.constant 0 : i32
    %c0_i32_0 = arith.constant 0 : i32
    return %c0_i32, %arg1 : i32, i32
  }
  func.func @transform_3(%arg0: i32, %arg1: i32) -> (i32, i32) {
    %c0_i32 = arith.constant 0 : i32
    return %arg0, %arg1 : i32, i32
  }
}

</mosaic_0001>

<bundles_post_ra>
// kernel: rnn_forward.3
= control target key start
LH: loop header
LB: loop body
LE: loop exit
PB: predicated region body
PF: predicated region fallthrough
CT: control target
= control target key end

     0   :  { %8 = vsyncpa [#allocation4], 0  ;;  %s1683_s0 = inlined_call_operand.vmem [shape: bf16[16,256], index: 0, kind: input, shape index: {}]   ;;  %s1684_s1 = inlined_call_operand.vmem [shape: bf16[256,1024], index: 1, kind: input, shape index: {}]   ;;  %s1685_s2 = inlined_call_operand.vmem [shape: f32[1,1024], index: 2, kind: input, shape index: {}]   ;;  %s1686_s3 = inlined_call_operand.hbm [shape: f32[16,1024], index: 3, kind: output, shape index: {}]  }
   0x1   :  { %10 = vsyncpa [#allocation4 + $0x1], 0  ;;  %s1352_s12 = smov 0   ;;  %s1354_s13 = smov 0  }
   0x2   :  { %s1356_s14 = smov 0   ;;  %s1358_s15 = smov 0  }
   0x3   :  { %s1360_s16 = smov 0   ;;  %s1362_s17 = smov 0  }
   0x4 LB: > { %s1008_s18 = sadd.s32 4294967295, %s1326_s17   ;;  %s1009_s19 = sadd.s32 4294967294, %s1326_s17   ;;  %s1326_s17 = sphi %s1362_s17, %s16_s17   ;;  %s1322_s16 = sphi %s1360_s16, %s1693_s16   ;;  %s1318_s15 = sphi %s1358_s15, %s1692_s15   ;;  %s1314_s14 = sphi %s1356_s14, %s1691_s14   ;;  %s1310_s13 = sphi %s1354_s13, %s1690_s13   ;;  %s1306_s12 = sphi %s1352_s12, %s1689_s12  }
   0x5   : > { %s25_s20 = sadd.s32 1, %s1322_s16  ;;  %s61_s21 = sadd.s32 1, %s1314_s14 }
   0x6   : > { %p26_p0 = scmp.ge.s32.totalorder %s25_s20, 2  ;;  %p68_p1 = scmp.ne.s32.totalorder %s1314_s14, %s1310_s13 }
   0x7   : > { %p69_p2 = scmp.eq.s32.totalorder %s1326_s17, 0  ;;  %p126_p3 = scmp.eq.s32.totalorder %s1008_s18, 1 }
   0x8   : > { %s1695_s20 = smov (%p26_p0, %s25_s20), 0  ;;  %p131_p6 = scmp.ne.s32.totalorder %s1310_s13, %s1306_s12 }
   0x9   : > { %p70_p4 = por %p69_p2, %p68_p1  ;;  %p1391_p5 = por %p126_p3, %p68_p1 }
   0xa   : > { %s58_s23 = ssub.s32 %s1322_s16, %s1695_s20  ;;  %p132_p8 = scmp.eq.s32.totalorder %s1009_s19, 1 }
   0xb   : > { %p59_p7 = scmp.eq.s32.totalorder %s58_s23, 0  ;;  %p1012_p10 = scmp.ge.s32.totalorder %s1326_s17, 2 }
   0xc   : > { %p1402_p9 = por %p132_p8, %p131_p6 }
   0xd   : > { %s1400_s24 = scalar_select %p59_p7, %s1314_s14, %s61_s21  }
   0xe   : > { %158 = sbr.rel (%p1012_p10) target bundleno = 55 (0x37), region = 20 }
  0x13   : > { %161 = sbr.rel (!%p70_p4) target bundleno = 55 (0x37), region = 24  ;;  %s163_s26 = sand.u32 (%p70_p4), 1, %s1314_s14  }
  0x14   : > { %s1091_s27 = sshll.u32 (%p70_p4), %s1322_s16, 4  ;;  %s1013_s28 = sshll.u32 (%p70_p4), %s163_s26, 9 }
  0x15   : > { %s1414_s4 = scalar_lea.vmem (%p70_p4), %s1684_s1, %s1091_s27  ;;  %s1419_s5 = scalar_lea.vmem (%p70_p4), [#allocation2], %s1013_s28 }
  0x16   : > { %v181_v0 = vld [vmem:[%s1414_s4] sm:$0xff] (%p70_p4)  ;;  %v183_v1 = vld [vmem:[%s1414_s4 + $0x8] sm:$0xff] (%p70_p4) }
  0x17   : > { %v185_v2 = vld [vmem:[%s1414_s4 + $0x20] sm:$0xff] (%p70_p4)  ;;  %182 = vst [vmem:[%s1419_s5] sm:$0xff] (%p70_p4), %v181_v0  ;;  %184 = vst [vmem:[%s1419_s5 + $0x8] sm:$0xff] (%p70_p4), %v183_v1  ;;  %v187_v3 = vld [vmem:[%s1414_s4 + $0x28] sm:$0xff] (%p70_p4) }
  0x18   : > { %186 = vst [vmem:[%s1419_s5 + $0x10] sm:$0xff] %v185_v2  ;;  %v189_v4 = vld [vmem:[%s1414_s4 + $0x40] sm:$0xff]  ;;  %v191_v5 = vld [vmem:[%s1414_s4 + $0x48] sm:$0xff]  ;;  %188 = vst [vmem:[%s1419_s5 + $0x18] sm:$0xff] %v187_v3 }
  0x19   : > { %190 = vst [vmem:[%s1419_s5 + $0x20] sm:$0xff] %v189_v4  ;;  %192 = vst [vmem:[%s1419_s5 + $0x28] sm:$0xff] %v191_v5  ;;  %v193_v6 = vld [vmem:[%s1414_s4 + $0x60] sm:$0xff]  ;;  %v195_v7 = vld [vmem:[%s1414_s4 + $0x68] sm:$0xff] }
  0x1a   : > { %v197_v8 = vld [vmem:[%s1414_s4 + $0x80] sm:$0xff]  ;;  %194 = vst [vmem:[%s1419_s5 + $0x30] sm:$0xff] %v193_v6  ;;  %196 = vst [vmem:[%s1419_s5 + $0x38] sm:$0xff] %v195_v7  ;;  %v199_v9 = vld [vmem:[%s1414_s4 + $0x88] sm:$0xff] }
  0x1b   : > { %198 = vst [vmem:[%s1419_s5 + $0x40] sm:$0xff] %v197_v8  ;;  %v201_v10 = vld [vmem:[%s1414_s4 + $0xa0] sm:$0xff]  ;;  %v203_v11 = vld [vmem:[%s1414_s4 + $0xa8] sm:$0xff]  ;;  %200 = vst [vmem:[%s1419_s5 + $0x48] sm:$0xff] %v199_v9 }
  0x1c   : > { %202 = vst [vmem:[%s1419_s5 + $0x50] sm:$0xff] %v201_v10  ;;  %204 = vst [vmem:[%s1419_s5 + $0x58] sm:$0xff] %v203_v11  ;;  %v205_v12 = vld [vmem:[%s1414_s4 + $0xc0] sm:$0xff]  ;;  %v207_v13 = vld [vmem:[%s1414_s4 + $0xc8] sm:$0xff] }
  0x1d   : > { %v209_v14 = vld [vmem:[%s1414_s4 + $0xe0] sm:$0xff]  ;;  %206 = vst [vmem:[%s1419_s5 + $0x60] sm:$0xff] %v205_v12  ;;  %208 = vst [vmem:[%s1419_s5 + $0x68] sm:$0xff] %v207_v13  ;;  %v211_v15 = vld [vmem:[%s1414_s4 + $0xe8] sm:$0xff] }
  0x1e   : > { %210 = vst [vmem:[%s1419_s5 + $0x70] sm:$0xff] %v209_v14  ;;  %v213_v16 = vld [vmem:[%s1414_s4 + $0x100] sm:$0xff]  ;;  %v215_v17 = vld [vmem:[%s1414_s4 + $0x108] sm:$0xff]  ;;  %212 = vst [vmem:[%s1419_s5 + $0x78] sm:$0xff] %v211_v15 }
  0x1f   : > { %214 = vst [vmem:[%s1419_s5 + $0x80] sm:$0xff] %v213_v16  ;;  %216 = vst [vmem:[%s1419_s5 + $0x88] sm:$0xff] %v215_v17  ;;  %v217_v18 = vld [vmem:[%s1414_s4 + $0x120] sm:$0xff]  ;;  %v219_v19 = vld [vmem:[%s1414_s4 + $0x128] sm:$0xff] }
  0x20   : > { %v221_v20 = vld [vmem:[%s1414_s4 + $0x140] sm:$0xff]  ;;  %218 = vst [vmem:[%s1419_s5 + $0x90] sm:$0xff] %v217_v18  ;;  %220 = vst [vmem:[%s1419_s5 + $0x98] sm:$0xff] %v219_v19  ;;  %v223_v21 = vld [vmem:[%s1414_s4 + $0x148] sm:$0xff] }
  0x21   : > { %222 = vst [vmem:[%s1419_s5 + $0xa0] sm:$0xff] %v221_v20  ;;  %v225_v22 = vld [vmem:[%s1414_s4 + $0x160] sm:$0xff]  ;;  %v227_v23 = vld [vmem:[%s1414_s4 + $0x168] sm:$0xff]  ;;  %224 = vst [vmem:[%s1419_s5 + $0xa8] sm:$0xff] %v223_v21 }
  0x22   : > { %226 = vst [vmem:[%s1419_s5 + $0xb0] sm:$0xff] %v225_v22  ;;  %228 = vst [vmem:[%s1419_s5 + $0xb8] sm:$0xff] %v227_v23  ;;  %v229_v24 = vld [vmem:[%s1414_s4 + $0x180] sm:$0xff]  ;;  %v231_v25 = vld [vmem:[%s1414_s4 + $0x188] sm:$0xff] }
  0x23   : > { %v233_v26 = vld [vmem:[%s1414_s4 + $0x1a0] sm:$0xff]  ;;  %230 = vst [vmem:[%s1419_s5 + $0xc0] sm:$0xff] %v229_v24  ;;  %232 = vst [vmem:[%s1419_s5 + $0xc8] sm:$0xff] %v231_v25  ;;  %v235_v27 = vld [vmem:[%s1414_s4 + $0x1a8] sm:$0xff] }
  0x24   : > { %234 = vst [vmem:[%s1419_s5 + $0xd0] sm:$0xff] %v233_v26  ;;  %v237_v28 = vld [vmem:[%s1414_s4 + $0x1c0] sm:$0xff]  ;;  %v239_v29 = vld [vmem:[%s1414_s4 + $0x1c8] sm:$0xff]  ;;  %236 = vst [vmem:[%s1419_s5 + $0xd8] sm:$0xff] %v235_v27 }
  0x25   : > { %238 = vst [vmem:[%s1419_s5 + $0xe0] sm:$0xff] %v237_v28  ;;  %240 = vst [vmem:[%s1419_s5 + $0xe8] sm:$0xff] %v239_v29  ;;  %v241_v30 = vld [vmem:[%s1414_s4 + $0x1e0] sm:$0xff]  ;;  %v243_v31 = vld [vmem:[%s1414_s4 + $0x1e8] sm:$0xff] }
  0x26   : > { %v245_v32 = vld [vmem:[%s1414_s4 + $0x200] sm:$0xff]  ;;  %242 = vst [vmem:[%s1419_s5 + $0xf0] sm:$0xff] %v241_v30  ;;  %244 = vst [vmem:[%s1419_s5 + $0xf8] sm:$0xff] %v243_v31  ;;  %v247_v33 = vld [vmem:[%s1414_s4 + $0x208] sm:$0xff] }
  0x27   : > { %246 = vst [vmem:[%s1419_s5 + $0x100] sm:$0xff] %v245_v32  ;;  %v249_v34 = vld [vmem:[%s1414_s4 + $0x220] sm:$0xff]  ;;  %v251_v35 = vld [vmem:[%s1414_s4 + $0x228] sm:$0xff]  ;;  %248 = vst [vmem:[%s1419_s5 + $0x108] sm:$0xff] %v247_v33 }
  0x28   : > { %250 = vst [vmem:[%s1419_s5 + $0x110] sm:$0xff] %v249_v34  ;;  %252 = vst [vmem:[%s1419_s5 + $0x118] sm:$0xff] %v251_v35  ;;  %v253_v36 = vld [vmem:[%s1414_s4 + $0x240] sm:$0xff]  ;;  %v255_v37 = vld [vmem:[%s1414_s4 + $0x248] sm:$0xff] }
  0x29   : > { %v257_v38 = vld [vmem:[%s1414_s4 + $0x260] sm:$0xff]  ;;  %254 = vst [vmem:[%s1419_s5 + $0x120] sm:$0xff] %v253_v36  ;;  %256 = vst [vmem:[%s1419_s5 + $0x128] sm:$0xff] %v255_v37  ;;  %v259_v39 = vld [vmem:[%s1414_s4 + $0x268] sm:$0xff] }
  0x2a   : > { %258 = vst [vmem:[%s1419_s5 + $0x130] sm:$0xff] %v257_v38  ;;  %v261_v40 = vld [vmem:[%s1414_s4 + $0x280] sm:$0xff]  ;;  %v263_v41 = vld [vmem:[%s1414_s4 + $0x288] sm:$0xff]  ;;  %260 = vst [vmem:[%s1419_s5 + $0x138] sm:$0xff] %v259_v39 }
  0x2b   : > { %262 = vst [vmem:[%s1419_s5 + $0x140] sm:$0xff] %v261_v40  ;;  %264 = vst [vmem:[%s1419_s5 + $0x148] sm:$0xff] %v263_v41  ;;  %v265_v42 = vld [vmem:[%s1414_s4 + $0x2a0] sm:$0xff]  ;;  %v267_v43 = vld [vmem:[%s1414_s4 + $0x2a8] sm:$0xff] }
  0x2c   : > { %v269_v44 = vld [vmem:[%s1414_s4 + $0x2c0] sm:$0xff]  ;;  %266 = vst [vmem:[%s1419_s5 + $0x150] sm:$0xff] %v265_v42  ;;  %268 = vst [vmem:[%s1419_s5 + $0x158] sm:$0xff] %v267_v43  ;;  %v271_v45 = vld [vmem:[%s1414_s4 + $0x2c8] sm:$0xff] }
  0x2d   : > { %270 = vst [vmem:[%s1419_s5 + $0x160] sm:$0xff] %v269_v44  ;;  %v273_v46 = vld [vmem:[%s1414_s4 + $0x2e0] sm:$0xff]  ;;  %v275_v47 = vld [vmem:[%s1414_s4 + $0x2e8] sm:$0xff]  ;;  %272 = vst [vmem:[%s1419_s5 + $0x168] sm:$0xff] %v271_v45 }
  0x2e   : > { %274 = vst [vmem:[%s1419_s5 + $0x170] sm:$0xff] %v273_v46  ;;  %276 = vst [vmem:[%s1419_s5 + $0x178] sm:$0xff] %v275_v47  ;;  %v277_v48 = vld [vmem:[%s1414_s4 + $0x300] sm:$0xff]  ;;  %v279_v49 = vld [vmem:[%s1414_s4 + $0x308] sm:$0xff] }
  0x2f   : > { %v281_v50 = vld [vmem:[%s1414_s4 + $0x320] sm:$0xff]  ;;  %278 = vst [vmem:[%s1419_s5 + $0x180] sm:$0xff] %v277_v48  ;;  %280 = vst [vmem:[%s1419_s5 + $0x188] sm:$0xff] %v279_v49  ;;  %v283_v51 = vld [vmem:[%s1414_s4 + $0x328] sm:$0xff] }
  0x30   : > { %282 = vst [vmem:[%s1419_s5 + $0x190] sm:$0xff] %v281_v50  ;;  %v285_v52 = vld [vmem:[%s1414_s4 + $0x340] sm:$0xff]  ;;  %v287_v53 = vld [vmem:[%s1414_s4 + $0x348] sm:$0xff]  ;;  %284 = vst [vmem:[%s1419_s5 + $0x198] sm:$0xff] %v283_v51 }
  0x31   : > { %286 = vst [vmem:[%s1419_s5 + $0x1a0] sm:$0xff] %v285_v52  ;;  %288 = vst [vmem:[%s1419_s5 + $0x1a8] sm:$0xff] %v287_v53  ;;  %v289_v54 = vld [vmem:[%s1414_s4 + $0x360] sm:$0xff]  ;;  %v291_v55 = vld [vmem:[%s1414_s4 + $0x368] sm:$0xff] }
  0x32   : > { %v293_v56 = vld [vmem:[%s1414_s4 + $0x380] sm:$0xff]  ;;  %290 = vst [vmem:[%s1419_s5 + $0x1b0] sm:$0xff] %v289_v54  ;;  %292 = vst [vmem:[%s1419_s5 + $0x1b8] sm:$0xff] %v291_v55  ;;  %v295_v57 = vld [vmem:[%s1414_s4 + $0x388] sm:$0xff] }
  0x33   : > { %294 = vst [vmem:[%s1419_s5 + $0x1c0] sm:$0xff] %v293_v56  ;;  %v297_v58 = vld [vmem:[%s1414_s4 + $0x3a0] sm:$0xff]  ;;  %v299_v59 = vld [vmem:[%s1414_s4 + $0x3a8] sm:$0xff]  ;;  %296 = vst [vmem:[%s1419_s5 + $0x1c8] sm:$0xff] %v295_v57 }
  0x34   : > { %298 = vst [vmem:[%s1419_s5 + $0x1d0] sm:$0xff] %v297_v58  ;;  %300 = vst [vmem:[%s1419_s5 + $0x1d8] sm:$0xff] %v299_v59  ;;  %v301_v60 = vld [vmem:[%s1414_s4 + $0x3c0] sm:$0xff]  ;;  %v303_v61 = vld [vmem:[%s1414_s4 + $0x3c8] sm:$0xff] }
  0x35   : > { %v305_v62 = vld [vmem:[%s1414_s4 + $0x3e0] sm:$0xff]  ;;  %302 = vst [vmem:[%s1419_s5 + $0x1e0] sm:$0xff] %v301_v60  ;;  %304 = vst [vmem:[%s1419_s5 + $0x1e8] sm:$0xff] %v303_v61  ;;  %v307_v63 = vld [vmem:[%s1414_s4 + $0x3e8] sm:$0xff] }
  0x36   : > { %306 = vst [vmem:[%s1419_s5 + $0x1f0] sm:$0xff] %v305_v62  ;;  %308 = vst [vmem:[%s1419_s5 + $0x1f8] sm:$0xff] %v307_v63 }
  0x37 PF: > { %p1016_p11 = scmp.ge.s32.totalorder %s1326_s17, 1  ;;  %p321_p12 = scmp.lt.s32.totalorder %s1326_s17, 3 }
  0x39   : > { %p322_p13 = pnand %p1016_p11, %p321_p12 }
  0x3a   : > { %s1549_s6 = sand.u32 (!%p322_p13), 1, %s1310_s13   ;;  %s1019_s19 = sshll.u32 (!%p322_p13), %s1318_s15, 2 }
  0x3b   : > { %325 = sbr.rel (%p322_p13) target bundleno = 346 (0x15a), region = 51  ;;  %s1017_s7 = sshll.u32 (!%p322_p13), %s1549_s6, 9 }
  0x3c   : > { %s1555_s10 = scalar_lea.vmem (!%p322_p13), [#allocation2], %s1017_s7  ;;  %p370_p0 = scmp.lt.s32.totalorder (!%p322_p13), %s1019_s19, 7 }
  0x3d   : > { %s1018_s27 = sshll.u32 (!%p322_p13), %s1549_s6, 6  ;;  %s1092_s30 = sshll.u32 (!%p322_p13), %s1318_s15, 9 }
  0x3e   : > { %s360_s28 = scalar_lea.vmem (!%p322_p13), [#allocation3], %s1018_s27  ;;  %s1635_s7 = scalar_lea.hbm (!%p322_p13), %s1686_s3, %s1092_s30 }
  0x3f   : > { %s905_s29 = sshll.u32 (!%p322_p13), %s360_s28, 4  ;;  %s889_s15 = scalar_lea.sflag (!%p322_p13), [#allocation4], %s1549_s6  ;;  %s1630_s29 = int_to_ptr.vmem [resolvable:$true] %s905_s29 }
  0x40   : > { %v1249_v0 = vld [vmem:[%s1683_s0 + $0x4] ss:$8 sps:$4 sm:$0xff]   ;;  %v1155_v3 = vld [vmem:[%s1555_s10 + $0xe0] ss:$16 sps:$4 sm:$0xff]   ;;  %v1156_v4 = vld [vmem:[%s1555_s10 + $0xe8] ss:$16 sps:$4 sm:$0xff]  }
  0x41   : > { %v1151_v1 = vld [vmem:[%s1555_s10 + $0xe4] ss:$16 sps:$4 sm:$0xff]   ;;  %826 = vmatprep.mubr.bf16.mxu0 %v1249_v0  ;;  %869 = vmatprep.mubr.bf16.mxu1 %v1249_v0  ;;  %v1153_v2 = vld [vmem:[%s1555_s10 + $0xec] ss:$16 sps:$4 sm:$0xff]   ;;  %v1161_v7 = vld [vmem:[%s1555_s10 + $0xc0] ss:$16 sps:$4 sm:$0xff]  }
  0x42   : > { %794 = vmatprep.subr.bf16.mxu0 %v1151_v1  ;;  %837 = vmatprep.subr.bf16.mxu1 %v1153_v2  ;;  %v1157_v5 = vld [vmem:[%s1555_s10 + $0xc4] ss:$16 sps:$4 sm:$0xff]   ;;  %v1159_v6 = vld [vmem:[%s1555_s10 + $0xcc] ss:$16 sps:$4 sm:$0xff]   ;;  %v1162_v8 = vld [vmem:[%s1555_s10 + $0xc8] ss:$16 sps:$4 sm:$0xff]   ;;  %v444_v2 = vlaneseq }
  0x43   : > { %795 = vmatpush1.bf16.msra.mxu0 %v1155_v3  ;;  %838 = vmatpush1.bf16.msra.mxu1 %v1156_v4  ;;  %v1163_v9 = vld [vmem:[%s1555_s10 + $0xa4] ss:$16 sps:$4 sm:$0xff]   ;;  %v1165_v10 = vld [vmem:[%s1555_s10 + $0xac] ss:$16 sps:$4 sm:$0xff]   ;;  %v1167_v11 = vld [vmem:[%s1555_s10 + $0xa0] ss:$16 sps:$4 sm:$0xff]  }
  0x44   : > { %796 = vmatprep.subr.bf16.mxu0 %v1157_v5  ;;  %839 = vmatprep.subr.bf16.mxu1 %v1159_v6  ;;  %v1168_v12 = vld [vmem:[%s1555_s10 + $0xa8] ss:$16 sps:$4 sm:$0xff]   ;;  %v1169_v13 = vld [vmem:[%s1555_s10 + $0x84] ss:$16 sps:$4 sm:$0xff]   ;;  %v1171_v14 = vld [vmem:[%s1555_s10 + $0x8c] ss:$16 sps:$4 sm:$0xff]  }
  0x45   : > { %v1173_v15 = vld [vmem:[%s1555_s10 + $0x80] ss:$16 sps:$4 sm:$0xff]   ;;  %v1174_v16 = vld [vmem:[%s1555_s10 + $0x88] ss:$16 sps:$4 sm:$0xff]   ;;  %v1175_v17 = vld [vmem:[%s1555_s10 + $0x64] ss:$16 sps:$4 sm:$0xff]  }
  0x46   : > { %v1177_v18 = vld [vmem:[%s1555_s10 + $0x6c] ss:$16 sps:$4 sm:$0xff]   ;;  %v1179_v19 = vld [vmem:[%s1555_s10 + $0x60] ss:$16 sps:$4 sm:$0xff]   ;;  %v1180_v20 = vld [vmem:[%s1555_s10 + $0x68] ss:$16 sps:$4 sm:$0xff]  }
  0x47   : > { %797 = vmatpush1.bf16.msra.mxu0 %v1161_v7  ;;  %840 = vmatpush1.bf16.msra.mxu1 %v1162_v8  ;;  %v1181_v21 = vld [vmem:[%s1555_s10 + $0x44] ss:$16 sps:$4 sm:$0xff]   ;;  %v1183_v22 = vld [vmem:[%s1555_s10 + $0x4c] ss:$16 sps:$4 sm:$0xff]   ;;  %v1185_v23 = vld [vmem:[%s1555_s10 + $0x40] ss:$16 sps:$4 sm:$0xff]  }
  0x48   : > { %798 = vmatprep.subr.bf16.mxu0 %v1163_v9  ;;  %841 = vmatprep.subr.bf16.mxu1 %v1165_v10  ;;  %v1186_v24 = vld [vmem:[%s1555_s10 + $0x48] ss:$16 sps:$4 sm:$0xff]   ;;  %v1187_v25 = vld [vmem:[%s1555_s10 + $0x24] ss:$16 sps:$4 sm:$0xff]   ;;  %v1189_v26 = vld [vmem:[%s1555_s10 + $0x2c] ss:$16 sps:$4 sm:$0xff]  }
  0x49   : > { %v1191_v27 = vld [vmem:[%s1555_s10 + $0x20] ss:$16 sps:$4 sm:$0xff]   ;;  %v1192_v28 = vld [vmem:[%s1555_s10 + $0x28] ss:$16 sps:$4 sm:$0xff]   ;;  %v1193_v29 = vld [vmem:[%s1555_s10 + $0x4] ss:$16 sps:$4 sm:$0xff]  }
  0x4a   : > { %v1195_v30 = vld [vmem:[%s1555_s10 + $0xc] ss:$16 sps:$4 sm:$0xff]   ;;  %v1197_v31 = vld [vmem:[%s1555_s10] ss:$16 sps:$4 sm:$0xff]   ;;  %v1198_v32 = vld [vmem:[%s1555_s10 + $0x8] ss:$16 sps:$4 sm:$0xff]  }
  0x4b   : > { %799 = vmatpush1.bf16.msra.mxu0 %v1167_v11  ;;  %842 = vmatpush1.bf16.msra.mxu1 %v1168_v12  ;;  %v1199_v33 = vld [vmem:[%s1555_s10 + $0x1e4] ss:$16 sps:$4 sm:$0xff]   ;;  %v1201_v34 = vld [vmem:[%s1555_s10 + $0x1ec] ss:$16 sps:$4 sm:$0xff]   ;;  %v1203_v35 = vld [vmem:[%s1555_s10 + $0x1e0] ss:$16 sps:$4 sm:$0xff]  }
  0x4c   : > { %800 = vmatprep.subr.bf16.mxu0 %v1169_v13  ;;  %843 = vmatprep.subr.bf16.mxu1 %v1171_v14  ;;  %v1204_v36 = vld [vmem:[%s1555_s10 + $0x1e8] ss:$16 sps:$4 sm:$0xff]   ;;  %v1205_v37 = vld [vmem:[%s1555_s10 + $0x1c4] ss:$16 sps:$4 sm:$0xff]   ;;  %v1207_v38 = vld [vmem:[%s1555_s10 + $0x1cc] ss:$16 sps:$4 sm:$0xff]  }
  0x4d   : > { %v1209_v39 = vld [vmem:[%s1555_s10 + $0x1c0] ss:$16 sps:$4 sm:$0xff]   ;;  %v1210_v40 = vld [vmem:[%s1555_s10 + $0x1c8] ss:$16 sps:$4 sm:$0xff]   ;;  %v1211_v41 = vld [vmem:[%s1555_s10 + $0x1a4] ss:$16 sps:$4 sm:$0xff]  }
  0x4e   : > { %v1213_v42 = vld [vmem:[%s1555_s10 + $0x1ac] ss:$16 sps:$4 sm:$0xff]   ;;  %v1215_v43 = vld [vmem:[%s1555_s10 + $0x1a0] ss:$16 sps:$4 sm:$0xff]   ;;  %v1216_v44 = vld [vmem:[%s1555_s10 + $0x1a8] ss:$16 sps:$4 sm:$0xff]  }
  0x4f   : > { %801 = vmatpush1.bf16.msra.mxu0 %v1173_v15  ;;  %844 = vmatpush1.bf16.msra.mxu1 %v1174_v16  ;;  %v1217_v45 = vld [vmem:[%s1555_s10 + $0x184] ss:$16 sps:$4 sm:$0xff]   ;;  %v1219_v46 = vld [vmem:[%s1555_s10 + $0x18c] ss:$16 sps:$4 sm:$0xff]   ;;  %v1221_v47 = vld [vmem:[%s1555_s10 + $0x180] ss:$16 sps:$4 sm:$0xff]  }
  0x50   : > { %802 = vmatprep.subr.bf16.mxu0 %v1175_v17  ;;  %845 = vmatprep.subr.bf16.mxu1 %v1177_v18  ;;  %v1222_v48 = vld [vmem:[%s1555_s10 + $0x188] ss:$16 sps:$4 sm:$0xff]   ;;  %v1223_v49 = vld [vmem:[%s1555_s10 + $0x164] ss:$16 sps:$4 sm:$0xff]   ;;  %v1225_v50 = vld [vmem:[%s1555_s10 + $0x16c] ss:$16 sps:$4 sm:$0xff]  }
  0x51   : > { %v1227_v51 = vld [vmem:[%s1555_s10 + $0x160] ss:$16 sps:$4 sm:$0xff]   ;;  %v1228_v52 = vld [vmem:[%s1555_s10 + $0x168] ss:$16 sps:$4 sm:$0xff]   ;;  %v1229_v53 = vld [vmem:[%s1555_s10 + $0x144] ss:$16 sps:$4 sm:$0xff]  }
  0x52   : > { %v1231_v54 = vld [vmem:[%s1555_s10 + $0x14c] ss:$16 sps:$4 sm:$0xff]   ;;  %v1233_v55 = vld [vmem:[%s1555_s10 + $0x140] ss:$16 sps:$4 sm:$0xff]   ;;  %v1234_v56 = vld [vmem:[%s1555_s10 + $0x148] ss:$16 sps:$4 sm:$0xff]  }
  0x53   : > { %803 = vmatpush1.bf16.msra.mxu0 %v1179_v19  ;;  %846 = vmatpush1.bf16.msra.mxu1 %v1180_v20  ;;  %v1235_v57 = vld [vmem:[%s1555_s10 + $0x124] ss:$16 sps:$4 sm:$0xff]   ;;  %v1237_v58 = vld [vmem:[%s1555_s10 + $0x12c] ss:$16 sps:$4 sm:$0xff]   ;;  %v1239_v59 = vld [vmem:[%s1555_s10 + $0x120] ss:$16 sps:$4 sm:$0xff]  }
  0x54   : > { %804 = vmatprep.subr.bf16.mxu0 %v1181_v21  ;;  %847 = vmatprep.subr.bf16.mxu1 %v1183_v22  ;;  %v1240_v60 = vld [vmem:[%s1555_s10 + $0x128] ss:$16 sps:$4 sm:$0xff]   ;;  %v1241_v61 = vld [vmem:[%s1555_s10 + $0x104] ss:$16 sps:$4 sm:$0xff]   ;;  %v1243_v62 = vld [vmem:[%s1555_s10 + $0x10c] ss:$16 sps:$4 sm:$0xff]  }
  0x55   : > { %v1245_v63 = vld [vmem:[%s1555_s10 + $0x100] ss:$16 sps:$4 sm:$0xff]   ;;  %v1246_v0 = vld [vmem:[%s1555_s10 + $0x108] ss:$16 sps:$4 sm:$0xff]   ;;  %s1697_s19 = smov (!%p370_p0, %s1019_s19), 7  ;;  %v445_v3 = vshrl.u32 %v444_v2, 7 }
  0x56   : > { %v1247_v1 = vld [vmem:[%s1683_s0] ss:$8 sps:$4 sm:$0xff]   ;;  %s372_s26 = scalar_lea.vmem %s1685_s2, %s1697_s19  ;;  %s1250_s8 = scalar_lea.vmem %s1630_s29, 1024 }
  0x57   : > { %805 = vmatpush1.bf16.msra.mxu0 %v1185_v23  ;;  %848 = vmatpush1.bf16.msra.mxu1 %v1186_v24  ;;  %v446_v4 = vsub.s32 0, %v445_v3  ;;  %v454_v5 = vsub.s32 2, %v445_v3  ;;  %v442_v6 = vld [vmem:[%s372_s26] sm:$0xf]  ;;  %v450_v7 = vsub.s32 1, %v445_v3  ;;  %v458_v8 = vsub.s32 3, %v445_v3  ;;  %p1251_p1 = scmp.ne.s32.totalorder %s1630_s29, %s1250_s8 }
  0x58   : > { %806 = vmatprep.subr.bf16.mxu0 %v1187_v25  ;;  %849 = vmatprep.subr.bf16.mxu1 %v1189_v26  ;;  %s1328_s9 = smov [#allocation3]  }
  0x59   : > { %v447_v9 = vrot.slane %v442_v6, %v446_v4  ;;  %v455_v10 = vrot.slane %v442_v6, %v454_v5  ;;  %v451_v11 = vrot.slane %v442_v6, %v450_v7  ;;  %v459_v12 = vrot.slane %v442_v6, %v458_v8  ;;  %p1252_p2 = pnand %p1251_p1, %p1391_p5  ;;  %s1254_s10 = sshll.u32 %s1328_s9, 4  ;;  %s1255_s10 = int_to_ptr.vmem [resolvable:$false] %s1254_s10 }
  0x5a   : > { %s1256_s11 = scalar_lea.vmem %s1255_s10, 2048  ;;  %p1257_p4 = scmp.lt.s32.totalorder %s1630_s29, %s1255_s10 }
  0x5b   : > { %807 = vmatpush1.bf16.msra.mxu0 %v1191_v27  ;;  %850 = vmatpush1.bf16.msra.mxu1 %v1192_v28  ;;  %p1253_p3 = pneg %p1252_p2  ;;  %p1258_p6 = scmp.lt.s32.totalorder %s1256_s11, %s1250_s8 }
  0x5c   : > { %808 = vmatprep.subr.bf16.mxu0 %v1193_v29  ;;  %851 = vmatprep.subr.bf16.mxu1 %v1195_v30 }
  0x5d   : > { %p1259_p7 = por %p1258_p6, %p1257_p4 }
  0x5f   : > { %809 = vmatpush1.bf16.msra.mxu0 %v1197_v31  ;;  %852 = vmatpush1.bf16.msra.mxu1 %v1198_v32  ;;  %p1260_p8 = pnand %p1259_p7, %p1253_p3 }
  0x60   : > { %810 = vmatprep.subr.bf16.mxu0 %v1199_v33  ;;  %853 = vmatprep.subr.bf16.mxu1 %v1201_v34 }
  0x63   : > { %811 = vmatpush2.bf16.msra.mxu0 %v1203_v35  ;;  %854 = vmatpush2.bf16.msra.mxu1 %v1204_v36 }
  0x64   : > { %812 = vmatprep.subr.bf16.mxu0 %v1205_v37  ;;  %855 = vmatprep.subr.bf16.mxu1 %v1207_v38 }
  0x67   : > { %813 = vmatpush2.bf16.msra.mxu0 %v1209_v39  ;;  %856 = vmatpush2.bf16.msra.mxu1 %v1210_v40 }
  0x68   : > { %814 = vmatprep.subr.bf16.mxu0 %v1211_v41  ;;  %857 = vmatprep.subr.bf16.mxu1 %v1213_v42 }
  0x6b   : > { %815 = vmatpush2.bf16.msra.mxu0 %v1215_v43  ;;  %858 = vmatpush2.bf16.msra.mxu1 %v1216_v44 }
  0x6c   : > { %816 = vmatprep.subr.bf16.mxu0 %v1217_v45  ;;  %859 = vmatprep.subr.bf16.mxu1 %v1219_v46 }
  0x6f   : > { %817 = vmatpush2.bf16.msra.mxu0 %v1221_v47  ;;  %860 = vmatpush2.bf16.msra.mxu1 %v1222_v48 }
  0x70   : > { %818 = vmatprep.subr.bf16.mxu0 %v1223_v49  ;;  %861 = vmatprep.subr.bf16.mxu1 %v1225_v50 }
  0x73   : > { %819 = vmatpush2.bf16.msra.mxu0 %v1227_v51  ;;  %862 = vmatpush2.bf16.msra.mxu1 %v1228_v52 }
  0x74   : > { %820 = vmatprep.subr.bf16.mxu0 %v1229_v53  ;;  %863 = vmatprep.subr.bf16.mxu1 %v1231_v54 }
  0x77   : > { %821 = vmatpush2.bf16.msra.mxu0 %v1233_v55  ;;  %864 = vmatpush2.bf16.msra.mxu1 %v1234_v56 }
  0x78   : > { %822 = vmatprep.subr.bf16.mxu0 %v1235_v57  ;;  %865 = vmatprep.subr.bf16.mxu1 %v1237_v58 }
  0x7b   : > { %823 = vmatpush2.bf16.msra.mxu0 %v1239_v59  ;;  %866 = vmatpush2.bf16.msra.mxu1 %v1240_v60 }
  0x7c   : > { %824 = vmatprep.subr.bf16.mxu0 %v1241_v61  ;;  %867 = vmatprep.subr.bf16.mxu1 %v1243_v62 }
  0x7f   : > { %825 = vmatpush2.bf16.msra.mxu0 %v1245_v63  ;;  %868 = vmatpush2.bf16.msra.mxu1 %v1246_v0 }
  0x82   : > { %827 = vmatmul.mubr.bf16.vlgmr.msra.gmra.mxu0 %v1247_v1  ;;  %870 = vmatmul.mubr.bf16.vlgmr.msra.gmra.mxu1 %v1247_v1 }
 0x142   : > { %v828_v13 = vpop.f32.mrf.mxu0  ;;  %v871_v14 = vpop.f32.mrf.mxu1 }
 0x143   : > { %v829_v15 = vadd.f32 %v828_v13, %v447_v9  ;;  %v872_v16 = vadd.f32 %v871_v14, %v455_v10 }
 0x144   : > { %v830_v17 = vpop.f32.mrf.mxu0  ;;  %v873_v18 = vpop.f32.mrf.mxu1 }
 0x145   : > { %880 = vst [vmem:[%s360_s28] sm:$0xff] %v829_v15  ;;  %882 = vst [vmem:[%s360_s28 + $0x10] sm:$0xff] %v872_v16  ;;  %v831_v19 = vadd.f32 %v830_v17, %v451_v11  ;;  %v874_v20 = vadd.f32 %v873_v18, %v459_v12 }
 0x146   : > { %v832_v21 = vpop.f32.mrf.mxu0  ;;  %v875_v22 = vpop.f32.mrf.mxu1 }
 0x147   : > { %881 = vst [vmem:[%s360_s28 + $0x8] sm:$0xff] %v831_v19  ;;  %883 = vst [vmem:[%s360_s28 + $0x18] sm:$0xff] %v874_v20  ;;  %v833_v23 = vadd.f32 %v832_v21, %v447_v9  ;;  %v876_v24 = vadd.f32 %v875_v22, %v455_v10 }
 0x148   : > { %v834_v25 = vpop.f32.mrf.mxu0  ;;  %v877_v26 = vpop.f32.mrf.mxu1 }
 0x149   : > { %884 = vst [vmem:[%s360_s28 + $0x20] sm:$0xff] %v833_v23  ;;  %886 = vst [vmem:[%s360_s28 + $0x30] sm:$0xff] %v876_v24  ;;  %v835_v27 = vadd.f32 %v834_v25, %v451_v11  ;;  %v878_v28 = vadd.f32 %v877_v26, %v459_v12 }
 0x14b   : > { %885 = vst [vmem:[%s360_s28 + $0x28] sm:$0xff] %v835_v27  ;;  %887 = vst [vmem:[%s360_s28 + $0x38] sm:$0xff] %v878_v28 }
 0x14c   : > { %1263 = shalt.err (!%p1260_p8)
}
 0x14d   : > { %s1264_s18 = scalar_lea.hbm %s1635_s7, 1024  ;;  %s1268_s23 = scalar_lea.hbm %s1686_s3, 2048 }
 0x14e   : > { %p1265_p11 = scmp.ne.s32.totalorder %s1635_s7, %s1264_s18  ;;  %p1269_p0 = scmp.lt.s32.totalorder %s1635_s7, %s1686_s3 }
 0x14f   : > { %p1270_p1 = scmp.lt.s32.totalorder %s1268_s23, %s1264_s18 }
 0x150   : > { %p1266_p12 = pnand %p1265_p11, %p1391_p5 }
 0x151   : > { %p1271_p2 = por %p1270_p1, %p1269_p0 }
 0x152   : > { %p1267_p13 = pneg %p1266_p12 }
 0x154   : > { %p1272_p3 = pnand %p1271_p2, %p1267_p13 }
 0x156   : > { %1275 = shalt.err (!%p1272_p3)
}
 0x157   : > { %s1329_s28 = smov 512   ;;  %s1330_s30 = smov 1024  }
 0x158   : > { %s1331_s4 = smov 32  }
 0x159   : > { %1093 = dma.vmem_to_hbm [thread:$0]  (%p1391_p5), %s1630_s29, 1024, %s1635_s7, %s889_s15, %s1329_s28, %s1330_s30, %s1331_s4  }
 0x15a PF: > { %s920_s5 = sand.u32 1, %s1306_s12   ;;  %p1096_p4 = pnand %p1012_p10, %p1402_p9 }
 0x15b   : > { %s921_s8 = scalar_lea.sflag [#allocation4], %s920_s5 }
 0x15c   : > { %p1097_p6 = pneg %p1096_p4 }
 0x15e   : > { %1301 = dma.done.wait (%p1097_p6), %s921_s8, 1024  }
 0x15f   : > { %1303 = vsyncadd (%p1097_p6), %s921_s8, 4294966272  ;;  %s16_s17 = sadd.s32 1, %s1326_s17   ;;  %s1689_s12 = smov %s1310_s13 }
 0x160   : > { %p13_p7 = scmp.ge.s32.totalorder %s16_s17, 4   ;;  %s1690_s13 = smov %s1314_s14 }
 0x161   : > { %s1691_s14 = smov %s1400_s24  ;;  %s1692_s15 = smov %s1322_s16 }
 0x162   : > { %s1693_s16 = smov %s1695_s20  ;;  %15 = sbr.rel (!%p13_p7) target bundleno = 4 (0x4), region = 101 }
 0x167   :  { %926 = vsyncpa [#allocation4], 1 }
 0x168   :  { %928 = vsyncpa [#allocation4 + $0x1], 1 }

// kernel: rnn_forward.2
= control target key start
LH: loop header
LB: loop body
LE: loop exit
PB: predicated region body
PF: predicated region fallthrough
CT: control target
= control target key end

     0   :  { %14 = vsyncpa [#allocation3], 0  ;;  %s7729_s0 = inlined_call_operand.vmem [shape: bf16[16,256], index: 0, kind: input, shape index: {}]   ;;  %s7730_s1 = inlined_call_operand.vmem [shape: f32[8,256], index: 1, kind: input, shape index: {}, may-alias: {1,2}]   ;;  %s7731_s2 = inlined_call_operand.vmem [shape: f32[8,256], index: 2, kind: input, shape index: {}, may-alias: {1,2}]   ;;  %s7732_s3 = inlined_call_operand.vmem [shape: bf16[256,1024], index: 3, kind: input, shape index: {}]   ;;  %s7733_s4 = inlined_call_operand.vmem [shape: bf16[256,1024], index: 4, kind: input, shape index: {}]   ;;  %s7734_s5 = inlined_call_operand.vmem [shape: f32[1,1024], index: 5, kind: input, shape index: {}]   ;;  %s7735_s6 = inlined_call_operand.vmem [shape: bf16[16,256], index: 6, kind: output, shape index: {0}]   ;;  %s7736_s7 = inlined_call_operand.hbm [shape: f32[8,256], index: 7, kind: output, shape index: {1}]   ;;  %s7737_s8 = inlined_call_operand.hbm [shape: f32[8,256], index: 8, kind: output, shape index: {2}]  }
   0x1   :  { %v89_v0 = vld [vmem:[%s7732_s3 + $0x1c0] sm:$0xff]  ;;  %v90_v2 = vld [vmem:[%s7732_s3 + $0x1c8] sm:$0xff] }
   0x2   :  { %v93_v1 = vld [vmem:[%s7732_s3 + $0x1e0] sm:$0xff]  ;;  %v94_v4 = vld [vmem:[%s7732_s3 + $0x1e8] sm:$0xff] }
   0x3   :  { %v4327_v3 = vcombine.high %v89_v0, %v93_v1  ;;  %v4326_v5 = vcombine.low %v89_v0, %v93_v1  ;;  %v81_v6 = vld [vmem:[%s7732_s3 + $0x180] sm:$0xff]  ;;  %v4329_v8 = vcombine.high %v90_v2, %v94_v4  ;;  %v4328_v9 = vcombine.low %v90_v2, %v94_v4  ;;  %v82_v11 = vld [vmem:[%s7732_s3 + $0x188] sm:$0xff] }
   0x4   :  { %v85_v7 = vld [vmem:[%s7732_s3 + $0x1a0] sm:$0xff]  ;;  %v86_v12 = vld [vmem:[%s7732_s3 + $0x1a8] sm:$0xff] }
   0x5   :  { %v4319_v10 = vcombine.high %v81_v6, %v85_v7  ;;  %v73_v13 = vld [vmem:[%s7732_s3 + $0x140] sm:$0xff]  ;;  %853 = vmatprep.subr.bf16.mxu0 %v4327_v3  ;;  %v4321_v14 = vcombine.high %v82_v11, %v86_v12  ;;  %v74_v16 = vld [vmem:[%s7732_s3 + $0x148] sm:$0xff]  ;;  %896 = vmatprep.subr.bf16.mxu1 %v4329_v8  ;;  %v4318_v18 = vcombine.low %v81_v6, %v85_v7 }
   0x6   :  { %v77_v15 = vld [vmem:[%s7732_s3 + $0x160] sm:$0xff]  ;;  %v78_v17 = vld [vmem:[%s7732_s3 + $0x168] sm:$0xff]  ;;  %854 = vmatpush1.bf16.msra.mxu0 %v4326_v5  ;;  %897 = vmatpush1.bf16.msra.mxu1 %v4328_v9  ;;  %v4320_v19 = vcombine.low %v82_v11, %v86_v12 }
   0x7   :  { %855 = vmatprep.subr.bf16.mxu0 %v4319_v10  ;;  %v4311_v20 = vcombine.high %v73_v13, %v77_v15  ;;  %898 = vmatprep.subr.bf16.mxu1 %v4321_v14  ;;  %v4313_v21 = vcombine.high %v74_v16, %v78_v17  ;;  %v65_v22 = vld [vmem:[%s7732_s3 + $0x100] sm:$0xff]  ;;  %v66_v24 = vld [vmem:[%s7732_s3 + $0x108] sm:$0xff]  ;;  %v4310_v26 = vcombine.low %v73_v13, %v77_v15 }
   0x8   :  { %v69_v23 = vld [vmem:[%s7732_s3 + $0x120] sm:$0xff]  ;;  %v70_v25 = vld [vmem:[%s7732_s3 + $0x128] sm:$0xff]  ;;  %v4312_v27 = vcombine.low %v74_v16, %v78_v17 }
   0x9   :  { %v4303_v28 = vcombine.high %v65_v22, %v69_v23  ;;  %v4305_v29 = vcombine.high %v66_v24, %v70_v25  ;;  %v57_v30 = vld [vmem:[%s7732_s3 + $0xc0] sm:$0xff]  ;;  %v58_v32 = vld [vmem:[%s7732_s3 + $0xc8] sm:$0xff]  ;;  %v4302_v34 = vcombine.low %v65_v22, %v69_v23  ;;  %v4304_v35 = vcombine.low %v66_v24, %v70_v25 }
   0xa   :  { %856 = vmatpush1.bf16.msra.mxu0 %v4318_v18  ;;  %899 = vmatpush1.bf16.msra.mxu1 %v4320_v19  ;;  %v61_v31 = vld [vmem:[%s7732_s3 + $0xe0] sm:$0xff]  ;;  %v62_v33 = vld [vmem:[%s7732_s3 + $0xe8] sm:$0xff] }
   0xb   :  { %857 = vmatprep.subr.bf16.mxu0 %v4311_v20  ;;  %900 = vmatprep.subr.bf16.mxu1 %v4313_v21  ;;  %v4295_v36 = vcombine.high %v57_v30, %v61_v31  ;;  %v4297_v37 = vcombine.high %v58_v32, %v62_v33  ;;  %v49_v38 = vld [vmem:[%s7732_s3 + $0x80] sm:$0xff]  ;;  %v50_v40 = vld [vmem:[%s7732_s3 + $0x88] sm:$0xff]  ;;  %v4294_v42 = vcombine.low %v57_v30, %v61_v31 }
   0xc   :  { %v53_v39 = vld [vmem:[%s7732_s3 + $0xa0] sm:$0xff]  ;;  %v54_v41 = vld [vmem:[%s7732_s3 + $0xa8] sm:$0xff]  ;;  %v4296_v43 = vcombine.low %v58_v32, %v62_v33 }
   0xd   :  { %v4287_v44 = vcombine.high %v49_v38, %v53_v39  ;;  %v4289_v45 = vcombine.high %v50_v40, %v54_v41  ;;  %v41_v46 = vld [vmem:[%s7732_s3 + $0x40] sm:$0xff]  ;;  %v42_v48 = vld [vmem:[%s7732_s3 + $0x48] sm:$0xff]  ;;  %v4286_v50 = vcombine.low %v49_v38, %v53_v39  ;;  %v4288_v51 = vcombine.low %v50_v40, %v54_v41 }
   0xe   :  { %858 = vmatpush1.bf16.msra.mxu0 %v4310_v26  ;;  %901 = vmatpush1.bf16.msra.mxu1 %v4312_v27  ;;  %v45_v47 = vld [vmem:[%s7732_s3 + $0x60] sm:$0xff]  ;;  %v46_v49 = vld [vmem:[%s7732_s3 + $0x68] sm:$0xff] }
   0xf   :  { %859 = vmatprep.subr.bf16.mxu0 %v4303_v28  ;;  %902 = vmatprep.subr.bf16.mxu1 %v4305_v29  ;;  %v4279_v52 = vcombine.high %v41_v46, %v45_v47  ;;  %v4281_v53 = vcombine.high %v42_v48, %v46_v49  ;;  %v33_v54 = vld [vmem:[%s7732_s3] sm:$0xff]  ;;  %v34_v57 = vld [vmem:[%s7732_s3 + $0x8] sm:$0xff]  ;;  %v4278_v59 = vcombine.low %v41_v46, %v45_v47 }
  0x10   :  { %v37_v55 = vld [vmem:[%s7732_s3 + $0x20] sm:$0xff]  ;;  %v38_v58 = vld [vmem:[%s7732_s3 + $0x28] sm:$0xff]  ;;  %v4280_v60 = vcombine.low %v42_v48, %v46_v49 }
  0x11   :  { %v5077_v56 = vld [vmem:[%s7729_s0 + $0x4] ss:$8 sps:$4 sm:$0xff]   ;;  %v4271_v61 = vcombine.high %v33_v54, %v37_v55  ;;  %v4273_v62 = vcombine.high %v34_v57, %v38_v58  ;;  %v4270_v3 = vcombine.low %v33_v54, %v37_v55  ;;  %v4272_v4 = vcombine.low %v34_v57, %v38_v58 }
  0x12   :  { %860 = vmatpush1.bf16.msra.mxu0 %v4302_v34  ;;  %903 = vmatpush1.bf16.msra.mxu1 %v4304_v35  ;;  %v153_v63 = vld [vmem:[%s7732_s3 + $0x3c0] sm:$0xff]  ;;  %v154_v1 = vld [vmem:[%s7732_s3 + $0x3c8] sm:$0xff] }
  0x13   :  { %861 = vmatprep.subr.bf16.mxu0 %v4295_v36  ;;  %904 = vmatprep.subr.bf16.mxu1 %v4297_v37  ;;  %v157_v0 = vld [vmem:[%s7732_s3 + $0x3e0] sm:$0xff]  ;;  %v158_v2 = vld [vmem:[%s7732_s3 + $0x3e8] sm:$0xff] }
  0x14   :  { %885 = vmatprep.mubr.bf16.mxu0 %v5077_v56  ;;  %928 = vmatprep.mubr.bf16.mxu1 %v5077_v56  ;;  %v4391_v5 = vcombine.high %v153_v63, %v157_v0  ;;  %v4393_v6 = vcombine.high %v154_v1, %v158_v2  ;;  %v145_v7 = vld [vmem:[%s7732_s3 + $0x380] sm:$0xff]  ;;  %v146_v9 = vld [vmem:[%s7732_s3 + $0x388] sm:$0xff]  ;;  %v4390_v11 = vcombine.low %v153_v63, %v157_v0  ;;  %v91_v0 = vld [vmem:[%s7732_s3 + $0x1d0] sm:$0xff] }
  0x15   :  { %v149_v8 = vld [vmem:[%s7732_s3 + $0x3a0] sm:$0xff]  ;;  %v150_v10 = vld [vmem:[%s7732_s3 + $0x3a8] sm:$0xff]  ;;  %v4392_v12 = vcombine.low %v154_v1, %v158_v2  ;;  %v95_v1 = vld [vmem:[%s7732_s3 + $0x1f0] sm:$0xff] }
  0x16   :  { %862 = vmatpush1.bf16.msra.mxu0 %v4294_v42  ;;  %905 = vmatpush1.bf16.msra.mxu1 %v4296_v43  ;;  %v4383_v13 = vcombine.high %v145_v7, %v149_v8  ;;  %v4385_v14 = vcombine.high %v146_v9, %v150_v10  ;;  %v137_v15 = vld [vmem:[%s7732_s3 + $0x340] sm:$0xff]  ;;  %v138_v17 = vld [vmem:[%s7732_s3 + $0x348] sm:$0xff]  ;;  %v4382_v19 = vcombine.low %v145_v7, %v149_v8  ;;  %v92_v2 = vld [vmem:[%s7732_s3 + $0x1d8] sm:$0xff] }
  0x17   :  { %863 = vmatprep.subr.bf16.mxu0 %v4287_v44  ;;  %906 = vmatprep.subr.bf16.mxu1 %v4289_v45  ;;  %v141_v16 = vld [vmem:[%s7732_s3 + $0x360] sm:$0xff]  ;;  %v142_v18 = vld [vmem:[%s7732_s3 + $0x368] sm:$0xff]  ;;  %v4384_v20 = vcombine.low %v146_v9, %v150_v10  ;;  %v83_v8 = vld [vmem:[%s7732_s3 + $0x190] sm:$0xff] }
  0x18   :  { %v4375_v21 = vcombine.high %v137_v15, %v141_v16  ;;  %v4377_v22 = vcombine.high %v138_v17, %v142_v18  ;;  %v129_v23 = vld [vmem:[%s7732_s3 + $0x300] sm:$0xff]  ;;  %v130_v25 = vld [vmem:[%s7732_s3 + $0x308] sm:$0xff]  ;;  %v4374_v27 = vcombine.low %v137_v15, %v141_v16  ;;  %v4376_v28 = vcombine.low %v138_v17, %v142_v18  ;;  %v87_v9 = vld [vmem:[%s7732_s3 + $0x1b0] sm:$0xff] }
  0x19   :  { %v133_v24 = vld [vmem:[%s7732_s3 + $0x320] sm:$0xff]  ;;  %v134_v26 = vld [vmem:[%s7732_s3 + $0x328] sm:$0xff]  ;;  %v4323_v15 = vcombine.high %v83_v8, %v87_v9  ;;  %v75_v17 = vld [vmem:[%s7732_s3 + $0x150] sm:$0xff] }
  0x1a   :  { %864 = vmatpush1.bf16.msra.mxu0 %v4286_v50  ;;  %907 = vmatpush1.bf16.msra.mxu1 %v4288_v51  ;;  %v4367_v29 = vcombine.high %v129_v23, %v133_v24  ;;  %v4369_v30 = vcombine.high %v130_v25, %v134_v26  ;;  %v121_v31 = vld [vmem:[%s7732_s3 + $0x2c0] sm:$0xff]  ;;  %v122_v33 = vld [vmem:[%s7732_s3 + $0x2c8] sm:$0xff]  ;;  %v4366_v35 = vcombine.low %v129_v23, %v133_v24  ;;  %v79_v18 = vld [vmem:[%s7732_s3 + $0x170] sm:$0xff] }
  0x1b   :  { %865 = vmatprep.subr.bf16.mxu0 %v4279_v52  ;;  %908 = vmatprep.subr.bf16.mxu1 %v4281_v53  ;;  %v125_v32 = vld [vmem:[%s7732_s3 + $0x2e0] sm:$0xff]  ;;  %v126_v34 = vld [vmem:[%s7732_s3 + $0x2e8] sm:$0xff]  ;;  %v4368_v36 = vcombine.low %v130_v25, %v134_v26 }
  0x1c   :  { %v4359_v37 = vcombine.high %v121_v31, %v125_v32  ;;  %v4361_v38 = vcombine.high %v122_v33, %v126_v34  ;;  %v113_v39 = vld [vmem:[%s7732_s3 + $0x280] sm:$0xff]  ;;  %v114_v41 = vld [vmem:[%s7732_s3 + $0x288] sm:$0xff]  ;;  %v4358_v43 = vcombine.low %v121_v31, %v125_v32  ;;  %v4360_v44 = vcombine.low %v122_v33, %v126_v34 }
  0x1d   :  { %v117_v40 = vld [vmem:[%s7732_s3 + $0x2a0] sm:$0xff]  ;;  %v118_v42 = vld [vmem:[%s7732_s3 + $0x2a8] sm:$0xff] }
  0x1e   :  { %866 = vmatpush1.bf16.msra.mxu0 %v4278_v59  ;;  %909 = vmatpush1.bf16.msra.mxu1 %v4280_v60  ;;  %v4351_v45 = vcombine.high %v113_v39, %v117_v40  ;;  %v4353_v46 = vcombine.high %v114_v41, %v118_v42  ;;  %v105_v47 = vld [vmem:[%s7732_s3 + $0x240] sm:$0xff]  ;;  %v106_v49 = vld [vmem:[%s7732_s3 + $0x248] sm:$0xff]  ;;  %v4350_v51 = vcombine.low %v113_v39, %v117_v40 }
  0x1f   :  { %867 = vmatprep.subr.bf16.mxu0 %v4271_v61  ;;  %910 = vmatprep.subr.bf16.mxu1 %v4273_v62  ;;  %v109_v48 = vld [vmem:[%s7732_s3 + $0x260] sm:$0xff]  ;;  %v110_v50 = vld [vmem:[%s7732_s3 + $0x268] sm:$0xff]  ;;  %v4352_v52 = vcombine.low %v114_v41, %v118_v42 }
  0x20   :  { %v4343_v53 = vcombine.high %v105_v47, %v109_v48  ;;  %v4345_v54 = vcombine.high %v106_v49, %v110_v50  ;;  %v97_v55 = vld [vmem:[%s7732_s3 + $0x200] sm:$0xff]  ;;  %v98_v58 = vld [vmem:[%s7732_s3 + $0x208] sm:$0xff]  ;;  %v4342_v60 = vcombine.low %v105_v47, %v109_v48  ;;  %v4344_v61 = vcombine.low %v106_v49, %v110_v50 }
  0x21   :  { %v101_v57 = vld [vmem:[%s7732_s3 + $0x220] sm:$0xff]  ;;  %v102_v59 = vld [vmem:[%s7732_s3 + $0x228] sm:$0xff] }
  0x22   :  { %868 = vmatpush1.bf16.msra.mxu0 %v4270_v3  ;;  %911 = vmatpush1.bf16.msra.mxu1 %v4272_v4  ;;  %v4335_v62 = vcombine.high %v97_v55, %v101_v57  ;;  %v4337_v63 = vcombine.high %v98_v58, %v102_v59  ;;  %v96_v3 = vld [vmem:[%s7732_s3 + $0x1f8] sm:$0xff]  ;;  %v4334_v4 = vcombine.low %v97_v55, %v101_v57  ;;  %v5204_v10 = vld [vmem:[%s7729_s0] ss:$8 sps:$4 sm:$0xff]  }
  0x23   :  { %869 = vmatprep.subr.bf16.mxu0 %v4391_v5  ;;  %912 = vmatprep.subr.bf16.mxu1 %v4393_v6  ;;  %v4336_v5 = vcombine.low %v98_v58, %v102_v59  ;;  %v4331_v6 = vcombine.high %v91_v0, %v95_v1  ;;  %v4333_v7 = vcombine.high %v92_v2, %v96_v3 }
  0x26   :  { %870 = vmatpush2.bf16.msra.mxu0 %v4390_v11  ;;  %913 = vmatpush2.bf16.msra.mxu1 %v4392_v12  ;;  %v84_v11 = vld [vmem:[%s7732_s3 + $0x198] sm:$0xff] }
  0x27   :  { %871 = vmatprep.subr.bf16.mxu0 %v4383_v13  ;;  %914 = vmatprep.subr.bf16.mxu1 %v4385_v14  ;;  %v88_v12 = vld [vmem:[%s7732_s3 + $0x1b8] sm:$0xff]  ;;  %v4330_v13 = vcombine.low %v91_v0, %v95_v1  ;;  %v4332_v14 = vcombine.low %v92_v2, %v96_v3 }
  0x28   :  { %v4325_v16 = vcombine.high %v84_v11, %v88_v12 }
  0x2a   :  { %872 = vmatpush2.bf16.msra.mxu0 %v4382_v19  ;;  %915 = vmatpush2.bf16.msra.mxu1 %v4384_v20  ;;  %v76_v19 = vld [vmem:[%s7732_s3 + $0x158] sm:$0xff] }
  0x2b   :  { %873 = vmatprep.subr.bf16.mxu0 %v4375_v21  ;;  %916 = vmatprep.subr.bf16.mxu1 %v4377_v22  ;;  %v80_v20 = vld [vmem:[%s7732_s3 + $0x178] sm:$0xff] }
  0x2e   :  { %874 = vmatpush2.bf16.msra.mxu0 %v4374_v27  ;;  %917 = vmatpush2.bf16.msra.mxu1 %v4376_v28 }
  0x2f   :  { %875 = vmatprep.subr.bf16.mxu0 %v4367_v29  ;;  %918 = vmatprep.subr.bf16.mxu1 %v4369_v30 }
  0x32   :  { %876 = vmatpush2.bf16.msra.mxu0 %v4366_v35  ;;  %919 = vmatpush2.bf16.msra.mxu1 %v4368_v36 }
  0x33   :  { %877 = vmatprep.subr.bf16.mxu0 %v4359_v37  ;;  %920 = vmatprep.subr.bf16.mxu1 %v4361_v38 }
  0x36   :  { %878 = vmatpush2.bf16.msra.mxu0 %v4358_v43  ;;  %921 = vmatpush2.bf16.msra.mxu1 %v4360_v44 }
  0x37   :  { %879 = vmatprep.subr.bf16.mxu0 %v4351_v45  ;;  %922 = vmatprep.subr.bf16.mxu1 %v4353_v46 }
  0x3a   :  { %880 = vmatpush2.bf16.msra.mxu0 %v4350_v51  ;;  %923 = vmatpush2.bf16.msra.mxu1 %v4352_v52 }
  0x3b   :  { %881 = vmatprep.subr.bf16.mxu0 %v4343_v53  ;;  %924 = vmatprep.subr.bf16.mxu1 %v4345_v54 }
  0x3e   :  { %882 = vmatpush2.bf16.msra.mxu0 %v4342_v60  ;;  %925 = vmatpush2.bf16.msra.mxu1 %v4344_v61 }
  0x3f   :  { %883 = vmatprep.subr.bf16.mxu0 %v4335_v62  ;;  %926 = vmatprep.subr.bf16.mxu1 %v4337_v63 }
  0x42   :  { %884 = vmatpush2.bf16.msra.mxu0 %v4334_v4  ;;  %927 = vmatpush2.bf16.msra.mxu1 %v4336_v5 }
  0x43   :  { %939 = vmatprep.subr.bf16.mxu0 %v4331_v6  ;;  %982 = vmatprep.subr.bf16.mxu1 %v4333_v7 }
  0x45   :  { %886 = vmatmul.mubr.bf16.vlgmr.msra.gmra.mxu0 %v5204_v10 }
  0x46   :  { %15 = vsyncpa [#allocation5], 0  ;;  %929 = vmatmul.mubr.bf16.vlgmr.msra.gmra.mxu1 %v5204_v10  ;;  %940 = vmatpush1.bf16.msra.mxu0 %v4330_v13  ;;  %v4322_v21 = vcombine.low %v83_v8, %v87_v9  ;;  %v4324_v22 = vcombine.low %v84_v11, %v88_v12  ;;  %v4315_v23 = vcombine.high %v75_v17, %v79_v18  ;;  %v67_v25 = vld [vmem:[%s7732_s3 + $0x110] sm:$0xff]  ;;  %v68_v27 = vld [vmem:[%s7732_s3 + $0x118] sm:$0xff]  ;;  %vm2059_vm0 = vcmask 1040384   ;;  %s4937_s19 = smov [#allocation4]  }
  0x47   :  { %983 = vmatpush1.bf16.msra.mxu1 %v4332_v14  ;;  %941 = vmatprep.subr.bf16.mxu0 %v4323_v15  ;;  %v4317_v24 = vcombine.high %v76_v19, %v80_v20  ;;  %v71_v26 = vld [vmem:[%s7732_s3 + $0x130] sm:$0xff]  ;;  %v72_v28 = vld [vmem:[%s7732_s3 + $0x138] sm:$0xff]  ;;  %v4314_v29 = vcombine.low %v75_v17, %v79_v18  ;;  %v4316_v30 = vcombine.low %v76_v19, %v80_v20  ;;  %vm2060_vm1 = vsmask.f32 256  ;;  %s4254_s20 = sshll.u32 %s4937_s19, 4  ;;  %s4255_s20 = int_to_ptr.vmem [resolvable:$true] %s4254_s20 }
  0x48   :  { %984 = vmatprep.subr.bf16.mxu1 %v4325_v16  ;;  %971 = vmatprep.mubr.bf16.mxu0 %v5077_v56  ;;  %v4307_v31 = vcombine.high %v67_v25, %v71_v26  ;;  %v4309_v32 = vcombine.high %v68_v27, %v72_v28  ;;  %v59_v33 = vld [vmem:[%s7732_s3 + $0xd0] sm:$0xff]  ;;  %v64_v35 = vld [vmem:[%s7732_s3 + $0xf8] sm:$0xff]  ;;  %v4306_v36 = vcombine.low %v67_v25, %v71_v26  ;;  %vm2062_vm2 = vcmask 1044484   ;;  %vm6380_vm4 = vmand %vm2059_vm0, %vm2060_vm1  ;;  %s4892_s21 = scalar_lea.vmem %s4255_s20, 256  ;;  %p4897_p1 = scmp.lt.s32.totalorder %s4255_s20, %s4255_s20 }
  0x49   :  { %1014 = vmatprep.mubr.bf16.mxu1 %v5077_v56  ;;  %v63_v34 = vld [vmem:[%s7732_s3 + $0xf0] sm:$0xff]  ;;  %v60_v56 = vld [vmem:[%s7732_s3 + $0xd8] sm:$0xff]  ;;  %v4308_v37 = vcombine.low %v68_v27, %v72_v28  ;;  %vm2063_vm3 = vsmask.f32 4352  ;;  %vm2332_vm7 = vsmask.f32 7938  ;;  %p4893_p0 = scmp.ne.s32.totalorder %s4255_s20, %s4892_s21  ;;  %p4898_p2 = scmp.lt.s32.totalorder %s4892_s21, %s4892_s21 }
  0x4a   :  { %942 = vmatpush1.bf16.msra.mxu0 %v4322_v21  ;;  %v4299_v38 = vcombine.high %v59_v33, %v63_v34  ;;  %v4301_v39 = vcombine.high %v60_v56, %v64_v35  ;;  %v51_v40 = vld [vmem:[%s7732_s3 + $0x90] sm:$0xff]  ;;  %v52_v42 = vld [vmem:[%s7732_s3 + $0x98] sm:$0xff]  ;;  %v4298_v44 = vcombine.low %v59_v33, %v63_v34  ;;  %v4300_v45 = vcombine.low %v60_v56, %v64_v35  ;;  %vm6385_vm5 = vmand %vm2062_vm2, %vm2063_vm3 }
  0x4b   :  { %985 = vmatpush1.bf16.msra.mxu1 %v4324_v22  ;;  %943 = vmatprep.subr.bf16.mxu0 %v4315_v23  ;;  %v55_v41 = vld [vmem:[%s7732_s3 + $0xb0] sm:$0xff]  ;;  %v56_v43 = vld [vmem:[%s7732_s3 + $0xb8] sm:$0xff]  ;;  %vm2065_vm6 = vmor %vm6385_vm5, %vm6380_vm4  ;;  %vm2334_vm8 = vsmask.f32 7954  ;;  %vm2601_vm12 = vcmask 1041409   ;;  %vm2604_vm14 = vcmask 1045509   ;;  %p4899_p3 = por %p4898_p2, %p4897_p1 }
  0x4c   :  { %986 = vmatprep.subr.bf16.mxu1 %v4317_v24  ;;  %v4291_v46 = vcombine.high %v51_v40, %v55_v41  ;;  %v4293_v47 = vcombine.high %v52_v42, %v56_v43  ;;  %v43_v48 = vld [vmem:[%s7732_s3 + $0x50] sm:$0xff]  ;;  %v44_v50 = vld [vmem:[%s7732_s3 + $0x58] sm:$0xff]  ;;  %v4290_v52 = vcombine.low %v51_v40, %v55_v41  ;;  %v4292_v53 = vcombine.low %v52_v42, %v56_v43  ;;  %vm6563_vm9 = vmand %vm2059_vm0, %vm2332_vm7 }
  0x4d   :  { %v47_v49 = vld [vmem:[%s7732_s3 + $0x70] sm:$0xff]  ;;  %v48_v51 = vld [vmem:[%s7732_s3 + $0x78] sm:$0xff]  ;;  %vm2335_vm10 = vmand %vm2062_vm2, %vm2334_vm8  ;;  %vm2602_vm13 = vsmask.f32 1280  ;;  %vm2605_vm15 = vsmask.f32 5376  ;;  %p4900_p4 = pnand %p4899_p3, %p4893_p0 }
  0x4e   :  { %944 = vmatpush1.bf16.msra.mxu0 %v4314_v29  ;;  %v4283_v54 = vcombine.high %v43_v48, %v47_v49  ;;  %v4285_v55 = vcombine.high %v44_v50, %v48_v51  ;;  %v35_v57 = vld [vmem:[%s7732_s3 + $0x10] sm:$0xff]  ;;  %v36_v59 = vld [vmem:[%s7732_s3 + $0x18] sm:$0xff]  ;;  %v4282_v61 = vcombine.low %v43_v48, %v47_v49  ;;  %v4284_v62 = vcombine.low %v44_v50, %v48_v51  ;;  %vm2336_vm11 = vmor %vm2335_vm10, %vm6563_vm9 }
  0x4f   :  { %987 = vmatpush1.bf16.msra.mxu1 %v4316_v30  ;;  %945 = vmatprep.subr.bf16.mxu0 %v4307_v31  ;;  %v39_v58 = vld [vmem:[%s7732_s3 + $0x30] sm:$0xff]  ;;  %v40_v60 = vld [vmem:[%s7732_s3 + $0x38] sm:$0xff]  ;;  %vm6735_vm0 = vmand %vm2601_vm12, %vm2602_vm13  ;;  %vm2875_vm3 = vsmask.f32 7942  ;;  %vm2877_vm7 = vsmask.f32 7958 }
  0x50   :  { %988 = vmatprep.subr.bf16.mxu1 %v4309_v32  ;;  %v4275_v63 = vcombine.high %v35_v57, %v39_v58  ;;  %v4277_v0 = vcombine.high %v36_v59, %v40_v60  ;;  %v155_v1 = vld [vmem:[%s7732_s3 + $0x3d0] sm:$0xff]  ;;  %v156_v3 = vld [vmem:[%s7732_s3 + $0x3d8] sm:$0xff]  ;;  %v4274_v5 = vcombine.low %v35_v57, %v39_v58  ;;  %v4276_v6 = vcombine.low %v36_v59, %v40_v60  ;;  %vm2606_vm1 = vmand %vm2604_vm14, %vm2605_vm15 }
  0x51   :  { %v159_v2 = vld [vmem:[%s7732_s3 + $0x3f0] sm:$0xff]  ;;  %v160_v4 = vld [vmem:[%s7732_s3 + $0x3f8] sm:$0xff]  ;;  %vm2607_vm2 = vmor %vm2606_vm1, %vm6735_vm0  ;;  %vm3147_vm13 = vcmask 1046534  }
  0x52   :  { %946 = vmatpush1.bf16.msra.mxu0 %v4306_v36  ;;  %v4395_v7 = vcombine.high %v155_v1, %v159_v2  ;;  %v4397_v8 = vcombine.high %v156_v3, %v160_v4  ;;  %v147_v9 = vld [vmem:[%s7732_s3 + $0x390] sm:$0xff]  ;;  %v148_v12 = vld [vmem:[%s7732_s3 + $0x398] sm:$0xff]  ;;  %v4394_v14 = vcombine.low %v155_v1, %v159_v2  ;;  %v4396_v15 = vcombine.low %v156_v3, %v160_v4  ;;  %v1081_v2 = vld [vmem:[%s7733_s4 + $0x1c0] sm:$0xff] }
  0x53   :  { %989 = vmatpush1.bf16.msra.mxu1 %v4308_v37  ;;  %947 = vmatprep.subr.bf16.mxu0 %v4299_v38  ;;  %v151_v11 = vld [vmem:[%s7732_s3 + $0x3b0] sm:$0xff]  ;;  %v152_v13 = vld [vmem:[%s7732_s3 + $0x3b8] sm:$0xff]  ;;  %v1085_v3 = vld [vmem:[%s7733_s4 + $0x1e0] sm:$0xff] }
  0x54   :  { %990 = vmatprep.subr.bf16.mxu1 %v4301_v39  ;;  %v4387_v16 = vcombine.high %v147_v9, %v151_v11  ;;  %v4389_v17 = vcombine.high %v148_v12, %v152_v13  ;;  %v139_v18 = vld [vmem:[%s7732_s3 + $0x350] sm:$0xff]  ;;  %v140_v20 = vld [vmem:[%s7732_s3 + $0x358] sm:$0xff]  ;;  %v4386_v22 = vcombine.low %v147_v9, %v151_v11  ;;  %v4388_v23 = vcombine.low %v148_v12, %v152_v13  ;;  %v1082_v4 = vld [vmem:[%s7733_s4 + $0x1c8] sm:$0xff] }
  0x55   :  { %v143_v19 = vld [vmem:[%s7732_s3 + $0x370] sm:$0xff]  ;;  %v144_v21 = vld [vmem:[%s7732_s3 + $0x378] sm:$0xff]  ;;  %v1073_v11 = vld [vmem:[%s7733_s4 + $0x180] sm:$0xff] }
  0x56   :  { %948 = vmatpush1.bf16.msra.mxu0 %v4298_v44  ;;  %v4379_v24 = vcombine.high %v139_v18, %v143_v19  ;;  %v4381_v25 = vcombine.high %v140_v20, %v144_v21  ;;  %v131_v26 = vld [vmem:[%s7732_s3 + $0x310] sm:$0xff]  ;;  %v132_v28 = vld [vmem:[%s7732_s3 + $0x318] sm:$0xff]  ;;  %v4378_v30 = vcombine.low %v139_v18, %v143_v19  ;;  %v4380_v31 = vcombine.low %v140_v20, %v144_v21  ;;  %v1077_v12 = vld [vmem:[%s7733_s4 + $0x1a0] sm:$0xff] }
  0x57   :  { %991 = vmatpush1.bf16.msra.mxu1 %v4300_v45  ;;  %949 = vmatprep.subr.bf16.mxu0 %v4291_v46  ;;  %v135_v27 = vld [vmem:[%s7732_s3 + $0x330] sm:$0xff]  ;;  %v136_v29 = vld [vmem:[%s7732_s3 + $0x338] sm:$0xff]  ;;  %v1074_v13 = vld [vmem:[%s7733_s4 + $0x188] sm:$0xff]  ;;  %v5420_v18 = vcombine.high %v1073_v11, %v1077_v12 }
  0x58   :  { %992 = vmatprep.subr.bf16.mxu1 %v4293_v47  ;;  %v4371_v32 = vcombine.high %v131_v26, %v135_v27  ;;  %v4373_v33 = vcombine.high %v132_v28, %v136_v29  ;;  %v123_v34 = vld [vmem:[%s7732_s3 + $0x2d0] sm:$0xff]  ;;  %v124_v35 = vld [vmem:[%s7732_s3 + $0x2d8] sm:$0xff]  ;;  %v4370_v37 = vcombine.low %v131_v26, %v135_v27  ;;  %v4372_v38 = vcombine.low %v132_v28, %v136_v29  ;;  %v1065_v20 = vld [vmem:[%s7733_s4 + $0x140] sm:$0xff] }
  0x59   :  { %v127_v56 = vld [vmem:[%s7732_s3 + $0x2f0] sm:$0xff]  ;;  %v128_v36 = vld [vmem:[%s7732_s3 + $0x2f8] sm:$0xff]  ;;  %8046 = vst [vmem:[#allocation12_spill] sm:$0xff] %v5420_v18  ;;  %v1069_v21 = vld [vmem:[%s7733_s4 + $0x160] sm:$0xff] }
  0x5a   :  { %950 = vmatpush1.bf16.msra.mxu0 %v4290_v52  ;;  %v4363_v39 = vcombine.high %v123_v34, %v127_v56  ;;  %v4365_v40 = vcombine.high %v124_v35, %v128_v36  ;;  %v115_v41 = vld [vmem:[%s7732_s3 + $0x290] sm:$0xff]  ;;  %v116_v43 = vld [vmem:[%s7732_s3 + $0x298] sm:$0xff]  ;;  %v4362_v45 = vcombine.low %v123_v34, %v127_v56  ;;  %v4364_v46 = vcombine.low %v124_v35, %v128_v36  ;;  %v1061_v29 = vld [vmem:[%s7733_s4 + $0x120] sm:$0xff] }
  0x5b   :  { %993 = vmatpush1.bf16.msra.mxu1 %v4292_v53  ;;  %951 = vmatprep.subr.bf16.mxu0 %v4283_v54  ;;  %v119_v42 = vld [vmem:[%s7732_s3 + $0x2b0] sm:$0xff]  ;;  %v120_v44 = vld [vmem:[%s7732_s3 + $0x2b8] sm:$0xff]  ;;  %v5448_v27 = vcombine.high %v1065_v20, %v1069_v21  ;;  %v1049_v35 = vld [vmem:[%s7733_s4 + $0xc0] sm:$0xff] }
  0x5c   :  { %994 = vmatprep.subr.bf16.mxu1 %v4285_v55  ;;  %v4355_v47 = vcombine.high %v115_v41, %v119_v42  ;;  %v4357_v48 = vcombine.high %v116_v43, %v120_v44  ;;  %v107_v49 = vld [vmem:[%s7732_s3 + $0x250] sm:$0xff]  ;;  %v108_v51 = vld [vmem:[%s7732_s3 + $0x258] sm:$0xff]  ;;  %v4354_v53 = vcombine.low %v115_v41, %v119_v42  ;;  %v4356_v54 = vcombine.low %v116_v43, %v120_v44  ;;  %v1053_v36 = vld [vmem:[%s7733_s4 + $0xe0] sm:$0xff] }
  0x5d   :  { %v111_v50 = vld [vmem:[%s7732_s3 + $0x270] sm:$0xff]  ;;  %v112_v52 = vld [vmem:[%s7732_s3 + $0x278] sm:$0xff]  ;;  %8050 = vst [vmem:[#allocation16_spill] sm:$0xff] %v5448_v27  ;;  %v5498_v41 = vcombine.high %v1049_v35, %v1053_v36  ;;  %v1041_v43 = vld [vmem:[%s7733_s4 + $0x80] sm:$0xff] }
  0x5e   :  { %952 = vmatpush1.bf16.msra.mxu0 %v4282_v61  ;;  %v4347_v55 = vcombine.high %v107_v49, %v111_v50  ;;  %v4349_v57 = vcombine.high %v108_v51, %v112_v52  ;;  %v99_v58 = vld [vmem:[%s7732_s3 + $0x210] sm:$0xff]  ;;  %v100_v60 = vld [vmem:[%s7732_s3 + $0x218] sm:$0xff]  ;;  %v1045_v44 = vld [vmem:[%s7733_s4 + $0xa0] sm:$0xff] }
  0x5f   :  { %995 = vmatpush1.bf16.msra.mxu1 %v4284_v62  ;;  %953 = vmatprep.subr.bf16.mxu0 %v4275_v63  ;;  %v103_v59 = vld [vmem:[%s7732_s3 + $0x230] sm:$0xff]  ;;  %v104_v61 = vld [vmem:[%s7732_s3 + $0x238] sm:$0xff]  ;;  %v4346_v62 = vcombine.low %v107_v49, %v111_v50  ;;  %v4348_v63 = vcombine.low %v108_v51, %v112_v52  ;;  %8058 = vst [vmem:[#allocation24_spill] sm:$0xff] %v5498_v41  ;;  %v1033_v51 = vld [vmem:[%s7733_s4 + $0x40] sm:$0xff] }
  0x60   :  { %996 = vmatprep.subr.bf16.mxu1 %v4277_v0  ;;  %v4339_v0 = vcombine.high %v99_v58, %v103_v59  ;;  %v4341_v1 = vcombine.high %v100_v60, %v104_v61  ;;  %v5522_v49 = vcombine.high %v1041_v43, %v1045_v44  ;;  %v1037_v52 = vld [vmem:[%s7733_s4 + $0x60] sm:$0xff]  ;;  %vm6907_vm8 = vmand %vm2601_vm12, %vm2875_vm3  ;;  %vm3145_vm12 = vsmask.f32 2304 }
  0x61   :  { %vm6912_vm9 = vmand %vm2604_vm14, %vm2877_vm7  ;;  %vm3148_vm14 = vsmask.f32 6400  ;;  %vm3420_vm3 = vsmask.f32 7962 }
  0x62   :  { %954 = vmatpush1.bf16.msra.mxu0 %v4274_v5  ;;  %v1086_v5 = vld [vmem:[%s7733_s4 + $0x1e8] sm:$0xff]  ;;  %8062 = vst [vmem:[#allocation28_spill] sm:$0xff] %v5522_v49  ;;  %vm2879_vm10 = vmor %vm6912_vm9, %vm6907_vm8 }
  0x63   :  { %997 = vmatpush1.bf16.msra.mxu1 %v4276_v6  ;;  %955 = vmatprep.subr.bf16.mxu0 %v4395_v7  ;;  %v4338_v6 = vcombine.low %v99_v58, %v103_v59  ;;  %v4340_v7 = vcombine.low %v100_v60, %v104_v61  ;;  %v5398_v9 = vcombine.high %v1082_v4, %v1086_v5  ;;  %v1025_v60 = vld [vmem:[%s7733_s4] sm:$0xff]  ;;  %vm3149_vm0 = vmand %vm3147_vm13, %vm3148_vm14 }
  0x64   :  { %998 = vmatprep.subr.bf16.mxu1 %v4397_v8  ;;  %v5396_v8 = vcombine.high %v1081_v2, %v1085_v3  ;;  %v5546_v58 = vcombine.high %v1033_v51, %v1037_v52  ;;  %v1029_v61 = vld [vmem:[%s7733_s4 + $0x20] sm:$0xff]  ;;  %vm7262_vm8 = vmand %vm3147_vm13, %vm3420_vm3  ;;  %vm3691_vm13 = vsmask.f32 7424 }
  0x65   :  { %8043 = vst [vmem:[#allocation9_spill] sm:$0xff] %v5398_v9 }
  0x66   :  { %956 = vmatpush2.bf16.msra.mxu0 %v4394_v14  ;;  %8042 = vst [vmem:[#allocation8_spill] sm:$0xff] %v5396_v8  ;;  %v1078_v14 = vld [vmem:[%s7733_s4 + $0x1a8] sm:$0xff]  ;;  %8066 = vst [vmem:[#allocation32_spill] sm:$0xff] %v5546_v58 }
  0x67   :  { %999 = vmatpush2.bf16.msra.mxu1 %v4396_v15  ;;  %957 = vmatprep.subr.bf16.mxu0 %v4387_v16  ;;  %v1154_v15 = vld [vmem:[%s7730_s1 + $0x8] sm:$0xff]  ;;  %v5415_v16 = vcombine.low %v1081_v2, %v1085_v3  ;;  %v5423_v19 = vcombine.high %v1074_v13, %v1078_v14  ;;  %v5446_v26 = vcombine.low %v1074_v13, %v1078_v14 }
  0x68   :  { %1000 = vmatprep.subr.bf16.mxu1 %v4389_v17  ;;  %v5418_v17 = vcombine.low %v1082_v4, %v1086_v5  ;;  %v5570_v2 = vcombine.high %v1025_v60, %v1029_v61  ;;  %v1145_v4 = vld [vmem:[%s7733_s4 + $0x3c0] sm:$0xff] }
  0x69   :  { %8044 = vst [vmem:[#allocation10_spill] sm:$0xff] %v5415_v16  ;;  %8047 = vst [vmem:[#allocation13_spill] sm:$0xff] %v5423_v19  ;;  %v1149_v5 = vld [vmem:[%s7733_s4 + $0x3e0] sm:$0xff] }
  0x6a   :  { %958 = vmatpush2.bf16.msra.mxu0 %v4386_v22  ;;  %8045 = vst [vmem:[#allocation11_spill] sm:$0xff] %v5418_v17  ;;  %v5431_v22 = vpack.c.bf16 %v1154_v15, %v1154_v15  ;;  %8049 = vst [vmem:[#allocation15_spill] sm:$0xff] %v5446_v26  ;;  %v5594_v13 = vcombine.high %v1145_v4, %v1149_v5  ;;  %v1137_v15 = vld [vmem:[%s7733_s4 + $0x380] sm:$0xff] }
  0x6b   :  { %1001 = vmatpush2.bf16.msra.mxu1 %v4388_v23  ;;  %959 = vmatprep.subr.bf16.mxu0 %v4379_v24  ;;  %v1066_v23 = vld [vmem:[%s7733_s4 + $0x148] sm:$0xff]  ;;  %8070 = vst [vmem:[#allocation36_spill] sm:$0xff] %v5570_v2 }
  0x6c   :  { %1002 = vmatprep.subr.bf16.mxu1 %v4381_v25  ;;  %v1070_v24 = vld [vmem:[%s7733_s4 + $0x168] sm:$0xff]  ;;  %v5442_v25 = vcombine.low %v1073_v11, %v1077_v12  ;;  %v5588_v11 = vcombine.low %v1025_v60, %v1029_v61  ;;  %8074 = vst [vmem:[#allocation40_spill] sm:$0xff] %v5594_v13 }
  0x6d   :  { %v5451_v28 = vcombine.high %v1066_v23, %v1070_v24 }
  0x6e   :  { %960 = vmatpush2.bf16.msra.mxu0 %v4378_v30  ;;  %8048 = vst [vmem:[#allocation14_spill] sm:$0xff] %v5442_v25  ;;  %v1058_v30 = vld [vmem:[%s7733_s4 + $0x108] sm:$0xff]  ;;  %8072 = vst [vmem:[#allocation38_spill] sm:$0xff] %v5588_v11 }
  0x6f   :  { %1003 = vmatpush2.bf16.msra.mxu1 %v4380_v31  ;;  %961 = vmatprep.subr.bf16.mxu0 %v4371_v32  ;;  %8051 = vst [vmem:[#allocation17_spill] sm:$0xff] %v5451_v28  ;;  %v1062_v31 = vld [vmem:[%s7733_s4 + $0x128] sm:$0xff]  ;;  %v5468_v32 = vcombine.low %v1065_v20, %v1069_v21  ;;  %v1141_v20 = vld [vmem:[%s7733_s4 + $0x3a0] sm:$0xff] }
  0x70   :  { %1004 = vmatprep.subr.bf16.mxu1 %v4373_v33  ;;  %v5472_v33 = vcombine.low %v1066_v23, %v1070_v24  ;;  %v5477_v56 = vcombine.high %v1058_v30, %v1062_v31  ;;  %v1138_v21 = vld [vmem:[%s7733_s4 + $0x388] sm:$0xff]  ;;  %v5612_v24 = vcombine.low %v1145_v4, %v1149_v5  ;;  %v1117_v4 = vld [vmem:[%s7733_s4 + $0x2e0] sm:$0xff] }
  0x71   :  { %8052 = vst [vmem:[#allocation18_spill] sm:$0xff] %v5468_v32  ;;  %v1142_v23 = vld [vmem:[%s7733_s4 + $0x3a8] sm:$0xff] }
  0x72   :  { %962 = vmatpush2.bf16.msra.mxu0 %v4370_v37  ;;  %8053 = vst [vmem:[#allocation19_spill] sm:$0xff] %v5472_v33  ;;  %8055 = vst [vmem:[#allocation21_spill] sm:$0xff] %v5477_v56  ;;  %v1050_v37 = vld [vmem:[%s7733_s4 + $0xc8] sm:$0xff] }
  0x73   :  { %1005 = vmatpush2.bf16.msra.mxu1 %v4372_v38  ;;  %963 = vmatprep.subr.bf16.mxu0 %v4363_v39  ;;  %v1054_v38 = vld [vmem:[%s7733_s4 + $0xe8] sm:$0xff]  ;;  %8076 = vst [vmem:[#allocation42_spill] sm:$0xff] %v5612_v24 }
  0x74   :  { %1006 = vmatprep.subr.bf16.mxu1 %v4365_v40  ;;  %v5496_v40 = vcombine.low %v1058_v30, %v1062_v31  ;;  %v5501_v42 = vcombine.high %v1050_v37, %v1054_v38  ;;  %v5621_v30 = vcombine.high %v1138_v21, %v1142_v23  ;;  %v1129_v31 = vld [vmem:[%s7733_s4 + $0x340] sm:$0xff]  ;;  %v1114_v5 = vld [vmem:[%s7733_s4 + $0x2c8] sm:$0xff] }
  0x76   :  { %964 = vmatpush2.bf16.msra.mxu0 %v4362_v45  ;;  %8057 = vst [vmem:[#allocation23_spill] sm:$0xff] %v5496_v40  ;;  %8059 = vst [vmem:[#allocation25_spill] sm:$0xff] %v5501_v42  ;;  %v1042_v45 = vld [vmem:[%s7733_s4 + $0x88] sm:$0xff] }
  0x77   :  { %1007 = vmatpush2.bf16.msra.mxu1 %v4364_v46  ;;  %965 = vmatprep.subr.bf16.mxu0 %v4355_v47  ;;  %v1046_v46 = vld [vmem:[%s7733_s4 + $0xa8] sm:$0xff]  ;;  %v5516_v47 = vcombine.low %v1049_v35, %v1053_v36  ;;  %8079 = vst [vmem:[#allocation45_spill] sm:$0xff] %v5621_v30  ;;  %v1133_v35 = vld [vmem:[%s7733_s4 + $0x360] sm:$0xff] }
  0x78   :  { %1008 = vmatprep.subr.bf16.mxu1 %v4357_v48  ;;  %v5520_v48 = vcombine.low %v1050_v37, %v1054_v38  ;;  %v5525_v50 = vcombine.high %v1042_v45, %v1046_v46  ;;  %v1130_v36 = vld [vmem:[%s7733_s4 + $0x348] sm:$0xff]  ;;  %v5636_v38 = vcombine.low %v1137_v15, %v1141_v20 }
  0x79   :  { %8060 = vst [vmem:[#allocation26_spill] sm:$0xff] %v5516_v47  ;;  %v1134_v37 = vld [vmem:[%s7733_s4 + $0x368] sm:$0xff] }
  0x7a   :  { %966 = vmatpush2.bf16.msra.mxu0 %v4354_v53  ;;  %8061 = vst [vmem:[#allocation27_spill] sm:$0xff] %v5520_v48  ;;  %8063 = vst [vmem:[#allocation29_spill] sm:$0xff] %v5525_v50  ;;  %v1034_v53 = vld [vmem:[%s7733_s4 + $0x48] sm:$0xff]  ;;  %v5664_v60 = vcombine.low %v1130_v36, %v1134_v37 }
  0x7b   :  { %1009 = vmatpush2.bf16.msra.mxu1 %v4356_v54  ;;  %967 = vmatprep.subr.bf16.mxu0 %v4347_v55  ;;  %v1038_v54 = vld [vmem:[%s7733_s4 + $0x68] sm:$0xff]  ;;  %v5540_v55 = vcombine.low %v1041_v43, %v1045_v44  ;;  %8080 = vst [vmem:[#allocation46_spill] sm:$0xff] %v5636_v38  ;;  %v5640_v43 = vcombine.low %v1138_v21, %v1142_v23  ;;  %v1105_v23 = vld [vmem:[%s7733_s4 + $0x280] sm:$0xff] }
  0x7c   :  { %1010 = vmatprep.subr.bf16.mxu1 %v4349_v57  ;;  %v5544_v57 = vcombine.low %v1042_v45, %v1046_v46  ;;  %v5549_v59 = vcombine.high %v1034_v53, %v1038_v54  ;;  %v5642_v44 = vcombine.high %v1129_v31, %v1133_v35  ;;  %v5645_v45 = vcombine.high %v1130_v36, %v1134_v37  ;;  %v1121_v46 = vld [vmem:[%s7733_s4 + $0x300] sm:$0xff]  ;;  %v1110_v36 = vld [vmem:[%s7733_s4 + $0x2a8] sm:$0xff] }
  0x7d   :  { %8064 = vst [vmem:[#allocation30_spill] sm:$0xff] %v5540_v55  ;;  %8081 = vst [vmem:[#allocation47_spill] sm:$0xff] %v5640_v43 }
  0x7e   :  { %968 = vmatpush2.bf16.msra.mxu0 %v4346_v62  ;;  %8065 = vst [vmem:[#allocation31_spill] sm:$0xff] %v5544_v57  ;;  %8067 = vst [vmem:[#allocation33_spill] sm:$0xff] %v5549_v59  ;;  %v1026_v62 = vld [vmem:[%s7733_s4 + $0x8] sm:$0xff] }
  0x7f   :  { %1011 = vmatpush2.bf16.msra.mxu1 %v4348_v63  ;;  %969 = vmatprep.subr.bf16.mxu0 %v4339_v0  ;;  %v1030_v63 = vld [vmem:[%s7733_s4 + $0x28] sm:$0xff]  ;;  %v5564_v0 = vcombine.low %v1033_v51, %v1037_v52  ;;  %8082 = vst [vmem:[#allocation48_spill] sm:$0xff] %v5642_v44  ;;  %8083 = vst [vmem:[#allocation49_spill] sm:$0xff] %v5645_v45  ;;  %v1125_v51 = vld [vmem:[%s7733_s4 + $0x320] sm:$0xff] }
  0x80   :  { %1012 = vmatprep.subr.bf16.mxu1 %v4341_v1  ;;  %v5568_v1 = vcombine.low %v1034_v53, %v1038_v54  ;;  %v5573_v3 = vcombine.high %v1026_v62, %v1030_v63  ;;  %v5592_v12 = vcombine.low %v1026_v62, %v1030_v63  ;;  %v1122_v52 = vld [vmem:[%s7733_s4 + $0x308] sm:$0xff]  ;;  %v5660_v54 = vcombine.low %v1129_v31, %v1133_v35  ;;  %v1113_v63 = vld [vmem:[%s7733_s4 + $0x2c0] sm:$0xff] }
  0x81   :  { %8068 = vst [vmem:[#allocation34_spill] sm:$0xff] %v5564_v0  ;;  %v1126_v53 = vld [vmem:[%s7733_s4 + $0x328] sm:$0xff]  ;;  %8085 = vst [vmem:[#allocation51_spill] sm:$0xff] %v5664_v60  ;;  %v5666_v61 = vcombine.high %v1121_v46, %v1125_v51  ;;  %v1109_v31 = vld [vmem:[%s7733_s4 + $0x2a0] sm:$0xff]  ;;  %v5708_v37 = vcombine.low %v1113_v63, %v1117_v4 }
  0x82   :  { %970 = vmatpush2.bf16.msra.mxu0 %v4338_v6  ;;  %8069 = vst [vmem:[#allocation35_spill] sm:$0xff] %v5568_v1  ;;  %8071 = vst [vmem:[#allocation37_spill] sm:$0xff] %v5573_v3  ;;  %v1146_v6 = vld [vmem:[%s7733_s4 + $0x3c8] sm:$0xff]  ;;  %v5669_v62 = vcombine.high %v1122_v52, %v1126_v53 }
  0x83   :  { %1013 = vmatpush2.bf16.msra.mxu1 %v4340_v7  ;;  %1799 = vmatprep.subr.bf16.mxu0 %v5396_v8  ;;  %v1150_v7 = vld [vmem:[%s7733_s4 + $0x3e8] sm:$0xff]  ;;  %8073 = vst [vmem:[#allocation39_spill] sm:$0xff] %v5592_v12  ;;  %8084 = vst [vmem:[#allocation50_spill] sm:$0xff] %v5660_v54 }
  0x84   :  { %1840 = vmatprep.subr.bf16.mxu1 %v5398_v9  ;;  %v5597_v14 = vcombine.high %v1146_v6, %v1150_v7  ;;  %8086 = vst [vmem:[#allocation52_spill] sm:$0xff] %v5666_v61  ;;  %8087 = vst [vmem:[#allocation53_spill] sm:$0xff] %v5669_v62  ;;  %v1106_v35 = vld [vmem:[%s7733_s4 + $0x288] sm:$0xff] }
  0x85   :  { %972 = vmatmul.mubr.bf16.vlgmr.msra.gmra.mxu0 %v5204_v10  ;;  %8092 = vst [vmem:[#allocation58_spill] sm:$0xff] %v5708_v37 }
  0x86   :  { %1015 = vmatmul.mubr.bf16.vlgmr.msra.gmra.mxu1 %v5204_v10  ;;  %1800 = vmatpush1.bf16.msra.mxu0 %v5415_v16  ;;  %v1057_v10 = vld [vmem:[%s7733_s4 + $0x100] sm:$0xff]  ;;  %8075 = vst [vmem:[#allocation41_spill] sm:$0xff] %v5597_v14 }
  0x87   :  { %1841 = vmatpush1.bf16.msra.mxu1 %v5418_v17  ;;  %1801 = vmatprep.subr.bf16.mxu0 %v5420_v18  ;;  %v5474_v34 = vcombine.high %v1057_v10, %v1061_v29  ;;  %v5492_v39 = vcombine.low %v1057_v10, %v1061_v29  ;;  %v5616_v10 = vcombine.low %v1146_v6, %v1150_v7  ;;  %v1118_v6 = vld [vmem:[%s7733_s4 + $0x2e8] sm:$0xff] }
  0x88   :  { %1842 = vmatprep.subr.bf16.mxu1 %v5423_v19  ;;  %1831 = vmatprep.mubr.bf16.mxu0 %v5431_v22  ;;  %v5618_v29 = vcombine.high %v1137_v15, %v1141_v20  ;;  %v5684_v7 = vcombine.low %v1121_v46, %v1125_v51  ;;  %v5688_v15 = vcombine.low %v1122_v52, %v1126_v53  ;;  %v1097_v53 = vld [vmem:[%s7733_s4 + $0x240] sm:$0xff] }
  0x89   :  { %1872 = vmatprep.mubr.bf16.mxu1 %v5431_v22  ;;  %8054 = vst [vmem:[#allocation20_spill] sm:$0xff] %v5474_v34  ;;  %8056 = vst [vmem:[#allocation22_spill] sm:$0xff] %v5492_v39  ;;  %v5690_v20 = vcombine.high %v1113_v63, %v1117_v4  ;;  %v5693_v21 = vcombine.high %v1114_v5, %v1118_v6  ;;  %v5712_v46 = vcombine.low %v1114_v5, %v1118_v6  ;;  %v1101_v63 = vld [vmem:[%s7733_s4 + $0x260] sm:$0xff]  ;;  %v1098_v4 = vld [vmem:[%s7733_s4 + $0x248] sm:$0xff] }
  0x8a   :  { %1802 = vmatpush1.bf16.msra.mxu0 %v5442_v25  ;;  %8077 = vst [vmem:[#allocation43_spill] sm:$0xff] %v5616_v10  ;;  %8078 = vst [vmem:[#allocation44_spill] sm:$0xff] %v5618_v29  ;;  %v5714_v51 = vcombine.high %v1105_v23, %v1109_v31  ;;  %v5717_v52 = vcombine.high %v1106_v35, %v1110_v36  ;;  %v1102_v5 = vld [vmem:[%s7733_s4 + $0x268] sm:$0xff]  ;;  %v5732_v6 = vcombine.low %v1105_v23, %v1109_v31  ;;  %v1093_v23 = vld [vmem:[%s7733_s4 + $0x220] sm:$0xff] }
  0x8b   :  { %1843 = vmatpush1.bf16.msra.mxu1 %v5446_v26  ;;  %1803 = vmatprep.subr.bf16.mxu0 %v5448_v27  ;;  %8088 = vst [vmem:[#allocation54_spill] sm:$0xff] %v5684_v7  ;;  %8089 = vst [vmem:[#allocation55_spill] sm:$0xff] %v5688_v15  ;;  %v1090_v31 = vld [vmem:[%s7733_s4 + $0x208] sm:$0xff] }
  0x8c   :  { %1844 = vmatprep.subr.bf16.mxu1 %v5451_v28  ;;  %8090 = vst [vmem:[#allocation56_spill] sm:$0xff] %v5690_v20  ;;  %8091 = vst [vmem:[#allocation57_spill] sm:$0xff] %v5693_v21 }
  0x8d   :  { %8093 = vst [vmem:[#allocation59_spill] sm:$0xff] %v5712_v46  ;;  %8094 = vst [vmem:[#allocation60_spill] sm:$0xff] %v5714_v51 }
  0x8e   :  { %1804 = vmatpush1.bf16.msra.mxu0 %v5468_v32  ;;  %8095 = vst [vmem:[#allocation61_spill] sm:$0xff] %v5717_v52  ;;  %8096 = vst [vmem:[#allocation62_spill] sm:$0xff] %v5732_v6 }
  0x8f   :  { %1845 = vmatpush1.bf16.msra.mxu1 %v5472_v33  ;;  %1805 = vmatprep.subr.bf16.mxu0 %v5474_v34 }
  0x90   :  { %1846 = vmatprep.subr.bf16.mxu1 %v5477_v56 }
  0x92   :  { %1806 = vmatpush1.bf16.msra.mxu0 %v5492_v39 }
  0x93   :  { %1847 = vmatpush1.bf16.msra.mxu1 %v5496_v40  ;;  %1807 = vmatprep.subr.bf16.mxu0 %v5498_v41 }
  0x94   :  { %1848 = vmatprep.subr.bf16.mxu1 %v5501_v42 }
  0x96   :  { %1808 = vmatpush1.bf16.msra.mxu0 %v5516_v47 }
  0x97   :  { %1849 = vmatpush1.bf16.msra.mxu1 %v5520_v48  ;;  %1809 = vmatprep.subr.bf16.mxu0 %v5522_v49 }
  0x98   :  { %1850 = vmatprep.subr.bf16.mxu1 %v5525_v50 }
  0x9a   :  { %1810 = vmatpush1.bf16.msra.mxu0 %v5540_v55 }
  0x9b   :  { %1851 = vmatpush1.bf16.msra.mxu1 %v5544_v57  ;;  %1811 = vmatprep.subr.bf16.mxu0 %v5546_v58 }
  0x9c   :  { %1852 = vmatprep.subr.bf16.mxu1 %v5549_v59 }
  0x9e   :  { %1812 = vmatpush1.bf16.msra.mxu0 %v5564_v0 }
  0x9f   :  { %1853 = vmatpush1.bf16.msra.mxu1 %v5568_v1  ;;  %1813 = vmatprep.subr.bf16.mxu0 %v5570_v2 }
  0xa0   :  { %1854 = vmatprep.subr.bf16.mxu1 %v5573_v3 }
  0xa2   :  { %1814 = vmatpush1.bf16.msra.mxu0 %v5588_v11 }
  0xa3   :  { %1855 = vmatpush1.bf16.msra.mxu1 %v5592_v12  ;;  %1815 = vmatprep.subr.bf16.mxu0 %v5594_v13 }
  0xa4   :  { %1856 = vmatprep.subr.bf16.mxu1 %v5597_v14 }
  0xa6   :  { %1816 = vmatpush2.bf16.msra.mxu0 %v5612_v24 }
  0xa7   :  { %1857 = vmatpush2.bf16.msra.mxu1 %v5616_v10  ;;  %1817 = vmatprep.subr.bf16.mxu0 %v5618_v29 }
  0xa8   :  { %1858 = vmatprep.subr.bf16.mxu1 %v5621_v30 }
  0xaa   :  { %1818 = vmatpush2.bf16.msra.mxu0 %v5636_v38 }
  0xab   :  { %1859 = vmatpush2.bf16.msra.mxu1 %v5640_v43  ;;  %1819 = vmatprep.subr.bf16.mxu0 %v5642_v44 }
  0xac   :  { %1860 = vmatprep.subr.bf16.mxu1 %v5645_v45 }
  0xae   :  { %1820 = vmatpush2.bf16.msra.mxu0 %v5660_v54 }
  0xaf   :  { %1861 = vmatpush2.bf16.msra.mxu1 %v5664_v60  ;;  %1821 = vmatprep.subr.bf16.mxu0 %v5666_v61 }
  0xb0   :  { %1862 = vmatprep.subr.bf16.mxu1 %v5669_v62  ;;  %v1067_v62 = vld [vmem:[%s7733_s4 + $0x150] sm:$0xff] }
  0xb2   :  { %1822 = vmatpush2.bf16.msra.mxu0 %v5684_v7  ;;  %v1089_v7 = vld [vmem:[%s7733_s4 + $0x200] sm:$0xff] }
  0xb3   :  { %1863 = vmatpush2.bf16.msra.mxu1 %v5688_v15  ;;  %1823 = vmatprep.subr.bf16.mxu0 %v5690_v20  ;;  %v5738_v20 = vcombine.high %v1097_v53, %v1101_v63  ;;  %v5741_v15 = vcombine.high %v1098_v4, %v1102_v5 }
  0xb4   :  { %1864 = vmatprep.subr.bf16.mxu1 %v5693_v21  ;;  %v5736_v21 = vcombine.low %v1106_v35, %v1110_v36  ;;  %v1094_v35 = vld [vmem:[%s7733_s4 + $0x228] sm:$0xff]  ;;  %v5756_v36 = vcombine.low %v1097_v53, %v1101_v63  ;;  %v1087_v53 = vld [vmem:[%s7733_s4 + $0x1f0] sm:$0xff]  ;;  %v1084_v63 = vld [vmem:[%s7733_s4 + $0x1d8] sm:$0xff] }
  0xb5   :  { %8098 = vst [vmem:[#allocation64_spill] sm:$0xff] %v5738_v20  ;;  %8099 = vst [vmem:[#allocation65_spill] sm:$0xff] %v5741_v15 }
  0xb6   :  { %1824 = vmatpush2.bf16.msra.mxu0 %v5708_v37  ;;  %8097 = vst [vmem:[#allocation63_spill] sm:$0xff] %v5736_v21  ;;  %8100 = vst [vmem:[#allocation66_spill] sm:$0xff] %v5756_v36  ;;  %v1083_v37 = vld [vmem:[%s7733_s4 + $0x1d0] sm:$0xff] }
  0xb7   :  { %1865 = vmatpush2.bf16.msra.mxu1 %v5712_v46  ;;  %1825 = vmatprep.subr.bf16.mxu0 %v5714_v51  ;;  %v5762_v51 = vcombine.high %v1089_v7, %v1093_v23  ;;  %v5765_v46 = vcombine.high %v1090_v31, %v1094_v35 }
  0xb8   :  { %1866 = vmatprep.subr.bf16.mxu1 %v5717_v52  ;;  %v5760_v52 = vcombine.low %v1098_v4, %v1102_v5  ;;  %v1088_v4 = vld [vmem:[%s7733_s4 + $0x1f8] sm:$0xff]  ;;  %v5780_v5 = vcombine.low %v1089_v7, %v1093_v23  ;;  %v1075_v7 = vld [vmem:[%s7733_s4 + $0x190] sm:$0xff] }
  0xb9   :  { %8102 = vst [vmem:[#allocation68_spill] sm:$0xff] %v5762_v51  ;;  %8103 = vst [vmem:[#allocation69_spill] sm:$0xff] %v5765_v46  ;;  %v1079_v23 = vld [vmem:[%s7733_s4 + $0x1b0] sm:$0xff] }
  0xba   :  { %1826 = vmatpush2.bf16.msra.mxu0 %v5732_v6  ;;  %8101 = vst [vmem:[#allocation67_spill] sm:$0xff] %v5760_v52  ;;  %8104 = vst [vmem:[#allocation70_spill] sm:$0xff] %v5780_v5  ;;  %v5792_v6 = vcombine.high %v1084_v63, %v1088_v4 }
  0xbb   :  { %1867 = vmatpush2.bf16.msra.mxu1 %v5736_v21  ;;  %1827 = vmatprep.subr.bf16.mxu0 %v5738_v20  ;;  %v5787_v20 = vcombine.low %v1090_v31, %v1094_v35  ;;  %v5789_v21 = vcombine.high %v1083_v37, %v1087_v53  ;;  %v1076_v31 = vld [vmem:[%s7733_s4 + $0x198] sm:$0xff] }
  0xbc   :  { %1868 = vmatprep.subr.bf16.mxu1 %v5741_v15  ;;  %v1153_v15 = vld [vmem:[%s7730_s1] sm:$0xff]  ;;  %8107 = vst [vmem:[#allocation73_spill] sm:$0xff] %v5792_v6  ;;  %v1080_v35 = vld [vmem:[%s7733_s4 + $0x1b8] sm:$0xff] }
  0xbd   :  { %8105 = vst [vmem:[#allocation71_spill] sm:$0xff] %v5787_v20  ;;  %8106 = vst [vmem:[#allocation72_spill] sm:$0xff] %v5789_v21 }
  0xbe   :  { %1828 = vmatpush2.bf16.msra.mxu0 %v5756_v36  ;;  %v5800_v36 = vpack.c.bf16 %v1153_v15, %v1153_v15  ;;  %v5815_v15 = vcombine.high %v1075_v7, %v1079_v23 }
  0xbf   :  { %1869 = vmatpush2.bf16.msra.mxu1 %v5760_v52  ;;  %1829 = vmatprep.subr.bf16.mxu0 %v5762_v51  ;;  %v5813_v51 = vcombine.low %v1084_v63, %v1088_v4  ;;  %v5818_v52 = vcombine.high %v1076_v31, %v1080_v35  ;;  %v1072_v63 = vld [vmem:[%s7733_s4 + $0x178] sm:$0xff]  ;;  %v5835_v4 = vcombine.low %v1075_v7, %v1079_v23  ;;  %v1063_v7 = vld [vmem:[%s7733_s4 + $0x130] sm:$0xff] }
  0xc0   :  { %1870 = vmatprep.subr.bf16.mxu1 %v5765_v46  ;;  %v5809_v46 = vcombine.low %v1083_v37, %v1087_v53  ;;  %8110 = vst [vmem:[#allocation76_spill] sm:$0xff] %v5815_v15  ;;  %v1071_v37 = vld [vmem:[%s7733_s4 + $0x170] sm:$0xff]  ;;  %v1068_v53 = vld [vmem:[%s7733_s4 + $0x158] sm:$0xff] }
  0xc1   :  { %8109 = vst [vmem:[#allocation75_spill] sm:$0xff] %v5813_v51  ;;  %8111 = vst [vmem:[#allocation77_spill] sm:$0xff] %v5818_v52  ;;  %v1060_v23 = vld [vmem:[%s7733_s4 + $0x118] sm:$0xff] }
  0xc2   :  { %1830 = vmatpush2.bf16.msra.mxu0 %v5780_v5  ;;  %8108 = vst [vmem:[#allocation74_spill] sm:$0xff] %v5809_v46  ;;  %8112 = vst [vmem:[#allocation78_spill] sm:$0xff] %v5835_v4  ;;  %v1059_v5 = vld [vmem:[%s7733_s4 + $0x110] sm:$0xff] }
  0xc3   :  { %1871 = vmatpush2.bf16.msra.mxu1 %v5787_v20  ;;  %1881 = vmatprep.subr.bf16.mxu0 %v5789_v21  ;;  %v5841_v21 = vcombine.high %v1067_v62, %v1071_v37  ;;  %v5844_v20 = vcombine.high %v1068_v53, %v1072_v63 }
  0xc4   :  { %1922 = vmatprep.subr.bf16.mxu1 %v5792_v6  ;;  %v5839_v6 = vcombine.low %v1076_v31, %v1080_v35  ;;  %v1064_v31 = vld [vmem:[%s7733_s4 + $0x138] sm:$0xff]  ;;  %v5861_v35 = vcombine.low %v1067_v62, %v1071_v37  ;;  %v1055_v62 = vld [vmem:[%s7733_s4 + $0xf0] sm:$0xff] }
  0xc5   :  { %1832 = vmatmul.mubr.bf16.vlgmr.msra.gmra.mxu0 %v5800_v36  ;;  %8114 = vst [vmem:[#allocation80_spill] sm:$0xff] %v5841_v21  ;;  %8115 = vst [vmem:[#allocation81_spill] sm:$0xff] %v5844_v20  ;;  %v1052_v37 = vld [vmem:[%s7733_s4 + $0xd8] sm:$0xff] }
  0xc6   :  { %1873 = vmatmul.mubr.bf16.vlgmr.msra.gmra.mxu1 %v5800_v36  ;;  %1882 = vmatpush1.bf16.msra.mxu0 %v5809_v46  ;;  %8113 = vst [vmem:[#allocation79_spill] sm:$0xff] %v5839_v6  ;;  %8116 = vst [vmem:[#allocation82_spill] sm:$0xff] %v5861_v35 }
  0xc7   :  { %1923 = vmatpush1.bf16.msra.mxu1 %v5813_v51  ;;  %1883 = vmatprep.subr.bf16.mxu0 %v5815_v15  ;;  %v5867_v15 = vcombine.high %v1059_v5, %v1063_v7  ;;  %v5870_v51 = vcombine.high %v1060_v23, %v1064_v31 }
  0xc8   :  { %1924 = vmatprep.subr.bf16.mxu1 %v5818_v52  ;;  %1913 = vmatprep.mubr.bf16.mxu0 %v5431_v22  ;;  %v5865_v52 = vcombine.low %v1068_v53, %v1072_v63  ;;  %v1056_v53 = vld [vmem:[%s7733_s4 + $0xf8] sm:$0xff]  ;;  %v5885_v63 = vcombine.low %v1059_v5, %v1063_v7  ;;  %v1047_v5 = vld [vmem:[%s7733_s4 + $0xb0] sm:$0xff] }
  0xc9   :  { %1954 = vmatprep.mubr.bf16.mxu1 %v5431_v22  ;;  %8118 = vst [vmem:[#allocation84_spill] sm:$0xff] %v5867_v15  ;;  %8119 = vst [vmem:[#allocation85_spill] sm:$0xff] %v5870_v51  ;;  %v1051_v22 = vld [vmem:[%s7733_s4 + $0xd0] sm:$0xff]  ;;  %v1044_v7 = vld [vmem:[%s7733_s4 + $0x98] sm:$0xff] }
  0xca   :  { %1884 = vmatpush1.bf16.msra.mxu0 %v5835_v4  ;;  %8117 = vst [vmem:[#allocation83_spill] sm:$0xff] %v5865_v52  ;;  %8120 = vst [vmem:[#allocation86_spill] sm:$0xff] %v5885_v63  ;;  %v1043_v4 = vld [vmem:[%s7733_s4 + $0x90] sm:$0xff] }
  0xcb   :  { %1925 = vmatpush1.bf16.msra.mxu1 %v5839_v6  ;;  %1885 = vmatprep.subr.bf16.mxu0 %v5841_v21  ;;  %v5891_v21 = vcombine.high %v1051_v22, %v1055_v62  ;;  %v5894_v6 = vcombine.high %v1052_v37, %v1056_v53 }
  0xcc   :  { %1926 = vmatprep.subr.bf16.mxu1 %v5844_v20  ;;  %v5889_v20 = vcombine.low %v1060_v23, %v1064_v31  ;;  %v1048_v23 = vld [vmem:[%s7733_s4 + $0xb8] sm:$0xff]  ;;  %v5909_v31 = vcombine.low %v1051_v22, %v1055_v62  ;;  %v1039_v22 = vld [vmem:[%s7733_s4 + $0x70] sm:$0xff] }
  0xcd   :  { %8122 = vst [vmem:[#allocation88_spill] sm:$0xff] %v5891_v21  ;;  %8123 = vst [vmem:[#allocation89_spill] sm:$0xff] %v5894_v6  ;;  %v1036_v62 = vld [vmem:[%s7733_s4 + $0x58] sm:$0xff] }
  0xce   :  { %1886 = vmatpush1.bf16.msra.mxu0 %v5861_v35  ;;  %8121 = vst [vmem:[#allocation87_spill] sm:$0xff] %v5889_v20  ;;  %8124 = vst [vmem:[#allocation90_spill] sm:$0xff] %v5909_v31  ;;  %v1035_v35 = vld [vmem:[%s7733_s4 + $0x50] sm:$0xff] }
  0xcf   :  { %1927 = vmatpush1.bf16.msra.mxu1 %v5865_v52  ;;  %1887 = vmatprep.subr.bf16.mxu0 %v5867_v15  ;;  %v5915_v15 = vcombine.high %v1043_v4, %v1047_v5  ;;  %v5918_v52 = vcombine.high %v1044_v7, %v1048_v23 }
  0xd0   :  { %1928 = vmatprep.subr.bf16.mxu1 %v5870_v51  ;;  %v5913_v51 = vcombine.low %v1052_v37, %v1056_v53  ;;  %v1040_v37 = vld [vmem:[%s7733_s4 + $0x78] sm:$0xff]  ;;  %v5933_v53 = vcombine.low %v1043_v4, %v1047_v5  ;;  %v1031_v4 = vld [vmem:[%s7733_s4 + $0x30] sm:$0xff] }
  0xd1   :  { %8126 = vst [vmem:[#allocation92_spill] sm:$0xff] %v5915_v15  ;;  %8127 = vst [vmem:[#allocation93_spill] sm:$0xff] %v5918_v52  ;;  %v1028_v5 = vld [vmem:[%s7733_s4 + $0x18] sm:$0xff] }
  0xd2   :  { %1888 = vmatpush1.bf16.msra.mxu0 %v5885_v63  ;;  %8125 = vst [vmem:[#allocation91_spill] sm:$0xff] %v5913_v51  ;;  %8128 = vst [vmem:[#allocation94_spill] sm:$0xff] %v5933_v53  ;;  %v1027_v63 = vld [vmem:[%s7733_s4 + $0x10] sm:$0xff] }
  0xd3   :  { %1929 = vmatpush1.bf16.msra.mxu1 %v5889_v20  ;;  %1889 = vmatprep.subr.bf16.mxu0 %v5891_v21  ;;  %v5939_v21 = vcombine.high %v1035_v35, %v1039_v22  ;;  %v5942_v20 = vcombine.high %v1036_v62, %v1040_v37 }
  0xd4   :  { %1930 = vmatprep.subr.bf16.mxu1 %v5894_v6  ;;  %v5937_v6 = vcombine.low %v1044_v7, %v1048_v23  ;;  %v1032_v7 = vld [vmem:[%s7733_s4 + $0x38] sm:$0xff]  ;;  %v5957_v23 = vcombine.low %v1035_v35, %v1039_v22  ;;  %v1151_v35 = vld [vmem:[%s7733_s4 + $0x3f0] sm:$0xff] }
  0xd5   :  { %8130 = vst [vmem:[#allocation96_spill] sm:$0xff] %v5939_v21  ;;  %8131 = vst [vmem:[#allocation97_spill] sm:$0xff] %v5942_v20  ;;  %v1148_v22 = vld [vmem:[%s7733_s4 + $0x3d8] sm:$0xff] }
  0xd6   :  { %1890 = vmatpush1.bf16.msra.mxu0 %v5909_v31  ;;  %8129 = vst [vmem:[#allocation95_spill] sm:$0xff] %v5937_v6  ;;  %8132 = vst [vmem:[#allocation98_spill] sm:$0xff] %v5957_v23  ;;  %v1147_v31 = vld [vmem:[%s7733_s4 + $0x3d0] sm:$0xff] }
  0xd7   :  { %1931 = vmatpush1.bf16.msra.mxu1 %v5913_v51  ;;  %1891 = vmatprep.subr.bf16.mxu0 %v5915_v15  ;;  %v5963_v15 = vcombine.high %v1027_v63, %v1031_v4  ;;  %v5966_v51 = vcombine.high %v1028_v5, %v1032_v7 }
  0xd8   :  { %1932 = vmatprep.subr.bf16.mxu1 %v5918_v52  ;;  %v5961_v52 = vcombine.low %v1036_v62, %v1040_v37  ;;  %v1152_v62 = vld [vmem:[%s7733_s4 + $0x3f8] sm:$0xff]  ;;  %v5981_v37 = vcombine.low %v1027_v63, %v1031_v4  ;;  %v1143_v63 = vld [vmem:[%s7733_s4 + $0x3b0] sm:$0xff] }
  0xd9   :  { %8134 = vst [vmem:[#allocation100_spill] sm:$0xff] %v5963_v15  ;;  %8135 = vst [vmem:[#allocation101_spill] sm:$0xff] %v5966_v51  ;;  %v1140_v4 = vld [vmem:[%s7733_s4 + $0x398] sm:$0xff] }
  0xda   :  { %1892 = vmatpush1.bf16.msra.mxu0 %v5933_v53  ;;  %8133 = vst [vmem:[#allocation99_spill] sm:$0xff] %v5961_v52  ;;  %8136 = vst [vmem:[#allocation102_spill] sm:$0xff] %v5981_v37  ;;  %v1139_v53 = vld [vmem:[%s7733_s4 + $0x390] sm:$0xff] }
  0xdb   :  { %1933 = vmatpush1.bf16.msra.mxu1 %v5937_v6  ;;  %1893 = vmatprep.subr.bf16.mxu0 %v5939_v21  ;;  %v5987_v21 = vcombine.high %v1147_v31, %v1151_v35  ;;  %v5990_v6 = vcombine.high %v1148_v22, %v1152_v62 }
  0xdc   :  { %1934 = vmatprep.subr.bf16.mxu1 %v5942_v20  ;;  %v5985_v20 = vcombine.low %v1028_v5, %v1032_v7  ;;  %v1144_v5 = vld [vmem:[%s7733_s4 + $0x3b8] sm:$0xff]  ;;  %v6005_v7 = vcombine.low %v1147_v31, %v1151_v35  ;;  %v1135_v31 = vld [vmem:[%s7733_s4 + $0x370] sm:$0xff] }
  0xdd   :  { %8138 = vst [vmem:[#allocation104_spill] sm:$0xff] %v5987_v21  ;;  %8139 = vst [vmem:[#allocation105_spill] sm:$0xff] %v5990_v6  ;;  %v1132_v35 = vld [vmem:[%s7733_s4 + $0x358] sm:$0xff] }
  0xde   :  { %1894 = vmatpush1.bf16.msra.mxu0 %v5957_v23  ;;  %8137 = vst [vmem:[#allocation103_spill] sm:$0xff] %v5985_v20  ;;  %8140 = vst [vmem:[#allocation106_spill] sm:$0xff] %v6005_v7  ;;  %v1131_v23 = vld [vmem:[%s7733_s4 + $0x350] sm:$0xff] }
  0xdf   :  { %1935 = vmatpush1.bf16.msra.mxu1 %v5961_v52  ;;  %1895 = vmatprep.subr.bf16.mxu0 %v5963_v15  ;;  %v6011_v15 = vcombine.high %v1139_v53, %v1143_v63  ;;  %v6014_v52 = vcombine.high %v1140_v4, %v1144_v5 }
  0xe0   :  { %1936 = vmatprep.subr.bf16.mxu1 %v5966_v51  ;;  %v6009_v51 = vcombine.low %v1148_v22, %v1152_v62  ;;  %v1136_v22 = vld [vmem:[%s7733_s4 + $0x378] sm:$0xff]  ;;  %v6029_v62 = vcombine.low %v1139_v53, %v1143_v63  ;;  %v1127_v53 = vld [vmem:[%s7733_s4 + $0x330] sm:$0xff] }
  0xe1   :  { %8142 = vst [vmem:[#allocation108_spill] sm:$0xff] %v6011_v15  ;;  %8143 = vst [vmem:[#allocation109_spill] sm:$0xff] %v6014_v52  ;;  %v1124_v63 = vld [vmem:[%s7733_s4 + $0x318] sm:$0xff] }
  0xe2   :  { %1896 = vmatpush1.bf16.msra.mxu0 %v5981_v37  ;;  %8141 = vst [vmem:[#allocation107_spill] sm:$0xff] %v6009_v51  ;;  %8144 = vst [vmem:[#allocation110_spill] sm:$0xff] %v6029_v62  ;;  %v1123_v37 = vld [vmem:[%s7733_s4 + $0x310] sm:$0xff] }
  0xe3   :  { %1937 = vmatpush1.bf16.msra.mxu1 %v5985_v20  ;;  %1897 = vmatprep.subr.bf16.mxu0 %v5987_v21  ;;  %v6035_v21 = vcombine.high %v1131_v23, %v1135_v31  ;;  %v6038_v20 = vcombine.high %v1132_v35, %v1136_v22 }
  0xe4   :  { %1938 = vmatprep.subr.bf16.mxu1 %v5990_v6  ;;  %v6033_v6 = vcombine.low %v1140_v4, %v1144_v5  ;;  %v1128_v4 = vld [vmem:[%s7733_s4 + $0x338] sm:$0xff]  ;;  %v6053_v5 = vcombine.low %v1131_v23, %v1135_v31  ;;  %v1119_v23 = vld [vmem:[%s7733_s4 + $0x2f0] sm:$0xff] }
  0xe5   :  { %8146 = vst [vmem:[#allocation112_spill] sm:$0xff] %v6035_v21  ;;  %8147 = vst [vmem:[#allocation113_spill] sm:$0xff] %v6038_v20  ;;  %v1116_v31 = vld [vmem:[%s7733_s4 + $0x2d8] sm:$0xff] }
  0xe6   :  { %1898 = vmatpush2.bf16.msra.mxu0 %v6005_v7  ;;  %8145 = vst [vmem:[#allocation111_spill] sm:$0xff] %v6033_v6  ;;  %8148 = vst [vmem:[#allocation114_spill] sm:$0xff] %v6053_v5  ;;  %v1115_v7 = vld [vmem:[%s7733_s4 + $0x2d0] sm:$0xff] }
  0xe7   :  { %1939 = vmatpush2.bf16.msra.mxu1 %v6009_v51  ;;  %1899 = vmatprep.subr.bf16.mxu0 %v6011_v15  ;;  %v6059_v15 = vcombine.high %v1123_v37, %v1127_v53  ;;  %v6062_v51 = vcombine.high %v1124_v63, %v1128_v4 }
  0xe8   :  { %1940 = vmatprep.subr.bf16.mxu1 %v6014_v52  ;;  %v6057_v52 = vcombine.low %v1132_v35, %v1136_v22  ;;  %v1120_v35 = vld [vmem:[%s7733_s4 + $0x2f8] sm:$0xff]  ;;  %v6077_v22 = vcombine.low %v1123_v37, %v1127_v53  ;;  %v1111_v37 = vld [vmem:[%s7733_s4 + $0x2b0] sm:$0xff] }
  0xe9   :  { %8150 = vst [vmem:[#allocation116_spill] sm:$0xff] %v6059_v15  ;;  %8151 = vst [vmem:[#allocation117_spill] sm:$0xff] %v6062_v51  ;;  %v1108_v53 = vld [vmem:[%s7733_s4 + $0x298] sm:$0xff] }
  0xea   :  { %1900 = vmatpush2.bf16.msra.mxu0 %v6029_v62  ;;  %8149 = vst [vmem:[#allocation115_spill] sm:$0xff] %v6057_v52  ;;  %8152 = vst [vmem:[#allocation118_spill] sm:$0xff] %v6077_v22  ;;  %v1107_v62 = vld [vmem:[%s7733_s4 + $0x290] sm:$0xff] }
  0xeb   :  { %1941 = vmatpush2.bf16.msra.mxu1 %v6033_v6  ;;  %1901 = vmatprep.subr.bf16.mxu0 %v6035_v21  ;;  %v6083_v21 = vcombine.high %v1115_v7, %v1119_v23  ;;  %v6086_v6 = vcombine.high %v1116_v31, %v1120_v35 }
  0xec   :  { %1942 = vmatprep.subr.bf16.mxu1 %v6038_v20  ;;  %v6081_v20 = vcombine.low %v1124_v63, %v1128_v4  ;;  %v1112_v63 = vld [vmem:[%s7733_s4 + $0x2b8] sm:$0xff]  ;;  %v6101_v4 = vcombine.low %v1115_v7, %v1119_v23  ;;  %v1103_v7 = vld [vmem:[%s7733_s4 + $0x270] sm:$0xff] }
  0xed   :  { %8154 = vst [vmem:[#allocation120_spill] sm:$0xff] %v6083_v21  ;;  %8155 = vst [vmem:[#allocation121_spill] sm:$0xff] %v6086_v6  ;;  %v1100_v23 = vld [vmem:[%s7733_s4 + $0x258] sm:$0xff] }
  0xee   :  { %1902 = vmatpush2.bf16.msra.mxu0 %v6053_v5  ;;  %8153 = vst [vmem:[#allocation119_spill] sm:$0xff] %v6081_v20  ;;  %8156 = vst [vmem:[#allocation122_spill] sm:$0xff] %v6101_v4  ;;  %v1099_v5 = vld [vmem:[%s7733_s4 + $0x250] sm:$0xff] }
  0xef   :  { %1943 = vmatpush2.bf16.msra.mxu1 %v6057_v52  ;;  %1903 = vmatprep.subr.bf16.mxu0 %v6059_v15  ;;  %v6107_v15 = vcombine.high %v1107_v62, %v1111_v37  ;;  %v6110_v52 = vcombine.high %v1108_v53, %v1112_v63 }
  0xf0   :  { %1944 = vmatprep.subr.bf16.mxu1 %v6062_v51  ;;  %v6105_v51 = vcombine.low %v1116_v31, %v1120_v35  ;;  %v1104_v31 = vld [vmem:[%s7733_s4 + $0x278] sm:$0xff]  ;;  %v6125_v35 = vcombine.low %v1107_v62, %v1111_v37  ;;  %v1095_v62 = vld [vmem:[%s7733_s4 + $0x230] sm:$0xff] }
  0xf1   :  { %8158 = vst [vmem:[#allocation124_spill] sm:$0xff] %v6107_v15  ;;  %8159 = vst [vmem:[#allocation125_spill] sm:$0xff] %v6110_v52  ;;  %v1092_v37 = vld [vmem:[%s7733_s4 + $0x218] sm:$0xff] }
  0xf2   :  { %1904 = vmatpush2.bf16.msra.mxu0 %v6077_v22  ;;  %8157 = vst [vmem:[#allocation123_spill] sm:$0xff] %v6105_v51  ;;  %8160 = vst [vmem:[#allocation126_spill] sm:$0xff] %v6125_v35  ;;  %v1091_v22 = vld [vmem:[%s7733_s4 + $0x210] sm:$0xff] }
  0xf3   :  { %1945 = vmatpush2.bf16.msra.mxu1 %v6081_v20  ;;  %1905 = vmatprep.subr.bf16.mxu0 %v6083_v21  ;;  %v6131_v21 = vcombine.high %v1099_v5, %v1103_v7  ;;  %v6134_v20 = vcombine.high %v1100_v23, %v1104_v31  ;;  %v6161_v46 = vcombine.low %v1091_v22, %v1095_v62 }
  0xf4   :  { %1946 = vmatprep.subr.bf16.mxu1 %v6086_v6  ;;  %v6129_v6 = vcombine.low %v1108_v53, %v1112_v63  ;;  %v1096_v53 = vld [vmem:[%s7733_s4 + $0x238] sm:$0xff]  ;;  %v6149_v63 = vcombine.low %v1099_v5, %v1103_v7 }
  0xf5   :  { %8162 = vst [vmem:[#allocation128_spill] sm:$0xff] %v6131_v21  ;;  %8163 = vst [vmem:[#allocation129_spill] sm:$0xff] %v6134_v20  ;;  %v6165_v5 = vcombine.low %v1092_v37, %v1096_v53 }
  0xf6   :  { %1906 = vmatpush2.bf16.msra.mxu0 %v6101_v4  ;;  %8161 = vst [vmem:[#allocation127_spill] sm:$0xff] %v6129_v6  ;;  %8164 = vst [vmem:[#allocation130_spill] sm:$0xff] %v6149_v63  ;;  %v163_v4 = vlaneseq }
  0xf7   :  { %1947 = vmatpush2.bf16.msra.mxu1 %v6105_v51  ;;  %1907 = vmatprep.subr.bf16.mxu0 %v6107_v15  ;;  %v6155_v15 = vcombine.high %v1091_v22, %v1095_v62  ;;  %v6158_v51 = vcombine.high %v1092_v37, %v1096_v53  ;;  %8168 = vst [vmem:[#allocation134_spill] sm:$0xff] %v6161_v46  ;;  %8169 = vst [vmem:[#allocation135_spill] sm:$0xff] %v6165_v5  ;;  %v6180_v22 = vld [vmem:[%s7734_s5] sm:$0xff] }
  0xf8   :  { %1948 = vmatprep.subr.bf16.mxu1 %v6110_v52  ;;  %v6153_v52 = vcombine.low %v1100_v23, %v1104_v31  ;;  %v6168_v7 = vshrl.u32 %v163_v4, 7 }
  0xf9   :  { %8166 = vst [vmem:[#allocation132_spill] sm:$0xff] %v6155_v15  ;;  %8167 = vst [vmem:[#allocation133_spill] sm:$0xff] %v6158_v51 }
  0xfa   :  { %1908 = vmatpush2.bf16.msra.mxu0 %v6125_v35  ;;  %8165 = vst [vmem:[#allocation131_spill] sm:$0xff] %v6153_v52  ;;  %v6174_v23 = vsub.s32 0, %v6168_v7  ;;  %v6185_v4 = vsub.s32 2, %v6168_v7  ;;  %v6192_v37 = vsub.s32 1, %v6168_v7 }
  0xfb   :  { %1949 = vmatpush2.bf16.msra.mxu1 %v6129_v6  ;;  %1909 = vmatprep.subr.bf16.mxu0 %v6131_v21 }
  0xfc   :  { %1950 = vmatprep.subr.bf16.mxu1 %v6134_v20  ;;  %8170 = vst [vmem:[#allocation136_spill] sm:$0xff] %v6174_v23  ;;  %8171 = vst [vmem:[#allocation137_spill] sm:$0xff] %v6185_v4 }
  0xfd   :  { %8172 = vst [vmem:[#allocation138_spill] sm:$0xff] %v6192_v37 }
  0xfe   :  { %1910 = vmatpush2.bf16.msra.mxu0 %v6149_v63 }
  0xff   :  { %1951 = vmatpush2.bf16.msra.mxu1 %v6153_v52  ;;  %1911 = vmatprep.subr.bf16.mxu0 %v6155_v15 }
 0x100   :  { %1952 = vmatprep.subr.bf16.mxu1 %v6158_v51 }
 0x102   :  { %1912 = vmatpush2.bf16.msra.mxu0 %v6161_v46  ;;  %v6215_v46 = vrot.slane %v6180_v22, %v6192_v37 }
 0x103   :  { %1953 = vmatpush2.bf16.msra.mxu1 %v6165_v5  ;;  %2069 = vmatprep.subr.bf16.mxu0 %v5396_v8  ;;  %v6204_v8 = vrot.slane %v6180_v22, %v6174_v23 }
 0x104   :  { %2110 = vmatprep.subr.bf16.mxu1 %v5398_v9  ;;  %v6198_v9 = vsub.s32 3, %v6168_v7 }
 0x105   :  { %v6182_v31 = vpop.f32.mrf.mxu0  ;;  %1914 = vmatmul.mubr.bf16.vlgmr.msra.gmra.mxu0 %v5800_v36 }
 0x106   :  { %v6188_v62 = vpop.f32.mrf.mxu1  ;;  %1955 = vmatmul.mubr.bf16.vlgmr.msra.gmra.mxu1 %v5800_v36  ;;  %2070 = vmatpush1.bf16.msra.mxu0 %v5415_v16  ;;  %8173 = vst [vmem:[#allocation139_spill] sm:$0xff] %v6198_v9  ;;  %v6211_v36 = vrot.slane %v6180_v22, %v6185_v4  ;;  %v6223_v51 = vrot.slane %v6180_v22, %v6198_v9  ;;  %v8184_v9 = vld [vmem:[#allocation59_spill] sm:$0xff] }
 0x107   :  { %v6195_v53 = vpop.f32.mrf.mxu0  ;;  %2111 = vmatpush1.bf16.msra.mxu1 %v5418_v17  ;;  %2071 = vmatprep.subr.bf16.mxu0 %v5420_v18 }
 0x108   :  { %v6206_v5 = vpop.f32.mrf.mxu1  ;;  %2112 = vmatprep.subr.bf16.mxu1 %v5423_v19 }
 0x109   :  { %v891_v16 = vpop.f32.mrf.mxu0 }
 0x10a   :  { %v6218_v17 = vadd.f32 %v891_v16, %v6204_v8  ;;  %v934_v18 = vpop.f32.mrf.mxu1  ;;  %2072 = vmatpush1.bf16.msra.mxu0 %v5442_v25 }
 0x10b   :  { %v6226_v19 = vadd.f32 %v934_v18, %v6211_v36  ;;  %v893_v4 = vpop.f32.mrf.mxu0  ;;  %2113 = vmatpush1.bf16.msra.mxu1 %v5446_v26  ;;  %2073 = vmatprep.subr.bf16.mxu0 %v5448_v27  ;;  %v8178_v18 = vld [vmem:[#allocation53_spill] sm:$0xff] }
 0x10c   :  { %8174 = vst [vmem:[#allocation140_spill] sm:$0xff] %v6218_v17  ;;  %v6231_v37 = vadd.f32 %v893_v4, %v6215_v46  ;;  %v936_v16 = vpop.f32.mrf.mxu1  ;;  %2114 = vmatprep.subr.bf16.mxu1 %v5451_v28  ;;  %v8179_v4 = vld [vmem:[#allocation54_spill] sm:$0xff] }
 0x10d   :  { %8175 = vst [vmem:[#allocation141_spill] sm:$0xff] %v6226_v19  ;;  %v6235_v17 = vadd.f32 %v936_v16, %v6223_v51  ;;  %v8180_v16 = vld [vmem:[#allocation55_spill] sm:$0xff]  ;;  %v8183_v19 = vld [vmem:[#allocation58_spill] sm:$0xff] }
 0x10e   :  { %8176 = vst [vmem:[#allocation142_spill] sm:$0xff] %v6231_v37  ;;  %2074 = vmatpush1.bf16.msra.mxu0 %v5468_v32  ;;  %v8182_v37 = vld [vmem:[#allocation57_spill] sm:$0xff] }
 0x10f   :  { %8177 = vst [vmem:[#allocation143_spill] sm:$0xff] %v6235_v17  ;;  %2115 = vmatpush1.bf16.msra.mxu1 %v5472_v33  ;;  %2075 = vmatprep.subr.bf16.mxu0 %v5474_v34  ;;  %v8181_v17 = vld [vmem:[#allocation56_spill] sm:$0xff] }
 0x110   :  { %2116 = vmatprep.subr.bf16.mxu1 %v5477_v56 }
 0x112   :  { %2076 = vmatpush1.bf16.msra.mxu0 %v5492_v39 }
 0x113   :  { %2117 = vmatpush1.bf16.msra.mxu1 %v5496_v40  ;;  %2077 = vmatprep.subr.bf16.mxu0 %v5498_v41 }
 0x114   :  { %2118 = vmatprep.subr.bf16.mxu1 %v5501_v42 }
 0x116   :  { %2078 = vmatpush1.bf16.msra.mxu0 %v5516_v47 }
 0x117   :  { %2119 = vmatpush1.bf16.msra.mxu1 %v5520_v48  ;;  %2079 = vmatprep.subr.bf16.mxu0 %v5522_v49 }
 0x118   :  { %2120 = vmatprep.subr.bf16.mxu1 %v5525_v50 }
 0x11a   :  { %2080 = vmatpush1.bf16.msra.mxu0 %v5540_v55 }
 0x11b   :  { %2121 = vmatpush1.bf16.msra.mxu1 %v5544_v57  ;;  %2081 = vmatprep.subr.bf16.mxu0 %v5546_v58 }
 0x11c   :  { %2122 = vmatprep.subr.bf16.mxu1 %v5549_v59 }
 0x11e   :  { %2082 = vmatpush1.bf16.msra.mxu0 %v5564_v0 }
 0x11f   :  { %2123 = vmatpush1.bf16.msra.mxu1 %v5568_v1  ;;  %2083 = vmatprep.subr.bf16.mxu0 %v5570_v2 }
 0x120   :  { %2124 = vmatprep.subr.bf16.mxu1 %v5573_v3 }
 0x122   :  { %2084 = vmatpush1.bf16.msra.mxu0 %v5588_v11 }
 0x123   :  { %2125 = vmatpush1.bf16.msra.mxu1 %v5592_v12  ;;  %2085 = vmatprep.subr.bf16.mxu0 %v5594_v13 }
 0x124   :  { %2126 = vmatprep.subr.bf16.mxu1 %v5597_v14 }
 0x126   :  { %2086 = vmatpush2.bf16.msra.mxu0 %v5612_v24 }
 0x127   :  { %2127 = vmatpush2.bf16.msra.mxu1 %v5616_v10  ;;  %2087 = vmatprep.subr.bf16.mxu0 %v5618_v29 }
 0x128   :  { %2128 = vmatprep.subr.bf16.mxu1 %v5621_v30 }
 0x12a   :  { %2088 = vmatpush2.bf16.msra.mxu0 %v5636_v38 }
 0x12b   :  { %2129 = vmatpush2.bf16.msra.mxu1 %v5640_v43  ;;  %2089 = vmatprep.subr.bf16.mxu0 %v5642_v44 }
 0x12c   :  { %2130 = vmatprep.subr.bf16.mxu1 %v5645_v45  ;;  %v8185_v45 = vld [vmem:[#allocation60_spill] sm:$0xff] }
 0x12e   :  { %2090 = vmatpush2.bf16.msra.mxu0 %v5660_v54  ;;  %v8186_v54 = vld [vmem:[#allocation61_spill] sm:$0xff] }
 0x12f   :  { %2131 = vmatpush2.bf16.msra.mxu1 %v5664_v60  ;;  %2091 = vmatprep.subr.bf16.mxu0 %v5666_v61  ;;  %v8187_v60 = vld [vmem:[#allocation62_spill] sm:$0xff]  ;;  %v8188_v61 = vld [vmem:[#allocation63_spill] sm:$0xff] }
 0x130   :  { %2132 = vmatprep.subr.bf16.mxu1 %v8178_v18  ;;  %v8189_v18 = vld [vmem:[#allocation64_spill] sm:$0xff] }
 0x132   :  { %2092 = vmatpush2.bf16.msra.mxu0 %v8179_v4  ;;  %v8190_v4 = vld [vmem:[#allocation65_spill] sm:$0xff] }
 0x133   :  { %2133 = vmatpush2.bf16.msra.mxu1 %v8180_v16  ;;  %2093 = vmatprep.subr.bf16.mxu0 %v8181_v17  ;;  %v8191_v16 = vld [vmem:[#allocation66_spill] sm:$0xff]  ;;  %v8192_v17 = vld [vmem:[#allocation67_spill] sm:$0xff] }
 0x134   :  { %2134 = vmatprep.subr.bf16.mxu1 %v8182_v37  ;;  %v8193_v37 = vld [vmem:[#allocation68_spill] sm:$0xff] }
 0x136   :  { %2094 = vmatpush2.bf16.msra.mxu0 %v8183_v19  ;;  %v8194_v19 = vld [vmem:[#allocation69_spill] sm:$0xff] }
 0x137   :  { %2135 = vmatpush2.bf16.msra.mxu1 %v8184_v9  ;;  %2095 = vmatprep.subr.bf16.mxu0 %v8185_v45  ;;  %v8195_v9 = vld [vmem:[#allocation70_spill] sm:$0xff]  ;;  %v8196_v45 = vld [vmem:[#allocation71_spill] sm:$0xff] }
 0x138   :  { %2136 = vmatprep.subr.bf16.mxu1 %v8186_v54  ;;  %v8197_v54 = vld [vmem:[#allocation72_spill] sm:$0xff] }
 0x13a   :  { %2096 = vmatpush2.bf16.msra.mxu0 %v8187_v60  ;;  %v8198_v60 = vld [vmem:[#allocation73_spill] sm:$0xff] }
 0x13b   :  { %2137 = vmatpush2.bf16.msra.mxu1 %v8188_v61  ;;  %2097 = vmatprep.subr.bf16.mxu0 %v8189_v18  ;;  %v6294_v18 = vsub.s32 4, %v6168_v7 }
 0x13c   :  { %2138 = vmatprep.subr.bf16.mxu1 %v8190_v4 }
 0x13d   :  { %8199 = vst [vmem:[#allocation144_spill] sm:$0xff] %v6294_v18 }
 0x13e   :  { %2098 = vmatpush2.bf16.msra.mxu0 %v8191_v16  ;;  %v6297_v16 = vsub.s32 6, %v6168_v7 }
 0x13f   :  { %2139 = vmatpush2.bf16.msra.mxu1 %v8192_v17  ;;  %2099 = vmatprep.subr.bf16.mxu0 %v8193_v37 }
 0x140   :  { %2140 = vmatprep.subr.bf16.mxu1 %v8194_v19  ;;  %8200 = vst [vmem:[#allocation145_spill] sm:$0xff] %v6297_v16  ;;  %v182_v19 = vrot.slane %v6180_v22, %v6294_v18 }
 0x142   :  { %2100 = vmatpush2.bf16.msra.mxu0 %v8195_v9  ;;  %v6302_v9 = vsub.s32 5, %v6168_v7 }
 0x143   :  { %2141 = vmatpush2.bf16.msra.mxu1 %v8196_v45  ;;  %2151 = vmatprep.subr.bf16.mxu0 %v8197_v54  ;;  %v190_v54 = vrot.slane %v6180_v22, %v6297_v16 }
 0x144   :  { %2192 = vmatprep.subr.bf16.mxu1 %v8198_v60  ;;  %8201 = vst [vmem:[#allocation146_spill] sm:$0xff] %v6302_v9  ;;  %v6307_v60 = vsub.s32 7, %v6168_v7  ;;  %v186_v44 = vrot.slane %v6180_v22, %v6302_v9  ;;  %v4936_v7 = vmov 0   ;;  %v6337_v9 = vadd.f32 %v6206_v5, %v6223_v51 }
 0x145   :  { %v973_v61 = vpop.f32.mrf.mxu0  ;;  %29 = vst [vmem:[%s7735_s6] sm:$0xff] %v4936_v7  ;;  %30 = vst [vmem:[%s7735_s6 + $0x8] sm:$0xff] %v4936_v7  ;;  %v6341_v7 = vadd.f32 %v6195_v53, %v6215_v46 }
 0x146   :  { %v1016_v4 = vpop.f32.mrf.mxu1  ;;  %8202 = vst [vmem:[#allocation147_spill] sm:$0xff] %v6307_v60  ;;  %v194_v18 = vrot.slane %v6180_v22, %v6307_v60  ;;  %8209 = vst [vmem:[#allocation154_spill] sm:$0xff] %v6337_v9 }
 0x147   :  { %v975_v17 = vpop.f32.mrf.mxu0  ;;  %8210 = vst [vmem:[#allocation155_spill] sm:$0xff] %v6341_v7 }
 0x148   :  { %v1018_v45 = vpop.f32.mrf.mxu1 }
 0x149   :  { %v977_v37 = vpop.f32.mrf.mxu0 }
 0x14a   :  { %v6311_v43 = vadd.f32 %v977_v37, %v182_v19  ;;  %v1020_v38 = vpop.f32.mrf.mxu1 }
 0x14b   :  { %v6315_v30 = vadd.f32 %v1020_v38, %v190_v54  ;;  %v979_v29 = vpop.f32.mrf.mxu0 }
 0x14c   :  { %8203 = vst [vmem:[#allocation148_spill] sm:$0xff] %v6311_v43  ;;  %v6317_v10 = vadd.f32 %v979_v29, %v186_v44  ;;  %v1022_v24 = vpop.f32.mrf.mxu1 }
 0x14d   :  { %8204 = vst [vmem:[#allocation149_spill] sm:$0xff] %v6315_v30  ;;  %v6319_v16 = vadd.f32 %v1022_v24, %v194_v18  ;;  %v6329_v24 = vadd.f32 %v6182_v31, %v6204_v8 }
 0x14e   :  { %8205 = vst [vmem:[#allocation150_spill] sm:$0xff] %v6317_v10 }
 0x14f   :  { %8206 = vst [vmem:[#allocation151_spill] sm:$0xff] %v6319_v16  ;;  %8207 = vst [vmem:[#allocation152_spill] sm:$0xff] %v6329_v24  ;;  %v6333_v16 = vadd.f32 %v6188_v62, %v6211_v36  ;;  %v1970_v62 = vrot.slane %v6341_v7, %v6174_v23  ;;  %v6355_v7 = vadd.f32 %v975_v17, %v186_v44 }
 0x151   :  { %8208 = vst [vmem:[#allocation153_spill] sm:$0xff] %v6333_v16  ;;  %v1986_v17 = vrot.slane %v6355_v7, %v6174_v23 }
 0x185   :  { %v1833_v37 = vpop.f32.mrf.mxu0 }
 0x186   :  { %v1874_v43 = vpop.f32.mrf.mxu1 }
 0x187   :  { %v1835_v22 = vpop.f32.mrf.mxu0 }
 0x188   :  { %v1876_v38 = vpop.f32.mrf.mxu1  ;;  %v1996_v36 = vadd.f32 %v1970_v62, %v1835_v22  ;;  %v6357_v22 = vadd.f32 %v1018_v45, %v194_v18 }
 0x189   :  { %v1837_v30 = vpop.f32.mrf.mxu0 }
 0x18a   :  { %v1878_v60 = vpop.f32.mrf.mxu1  ;;  %v1966_v30 = vrot.slane %v6329_v24, %v6174_v23  ;;  %v4527_v53 = vmul.f32 -1.442695, %v1996_v36  ;;  %v1994_v18 = vrot.slane %v6357_v22, %v6174_v23 }
 0x18b   :  { %v1838_v29 = vpop.f32.mrf.mxu0  ;;  %v1978_v60 = vrot.slane %v6337_v9, %v6174_v23  ;;  %v6353_v9 = vadd.f32 %v1016_v4, %v190_v54 }
 0x18c   :  { %v1879_v10 = vpop.f32.mrf.mxu1  ;;  %v1995_v8 = vadd.f32 %v1966_v30, %v1833_v37  ;;  %v6351_v30 = vadd.f32 %v973_v61, %v182_v19 }
 0x18d   :  { %v1974_v10 = vrot.slane %v6333_v16, %v6174_v23  ;;  %v1998_v51 = vadd.f32 %v1978_v60, %v1876_v38  ;;  %v1990_v19 = vrot.slane %v6353_v9, %v6174_v23 }
 0x18e   :  { %v4526_v5 = vmul.f32 -1.442695, %v1995_v8  ;;  %v1982_v60 = vrot.slane %v6351_v30, %v6174_v23  ;;  %v8238_v23 = vld [vmem:[#allocation95_spill] sm:$0xff] }
 0x18f   :  { %v1997_v31 = vadd.f32 %v1974_v10, %v1874_v43  ;;  %v4529_v46 = vmul.f32 -1.442695, %v1998_v51 }
 0x190   :  { %4604 = vpow2.f32 %v4526_v5 }
 0x191   :  { %v4528_v29 = vmul.f32 -1.442695, %v1997_v31 }
 0x193   :  { %4606 = vpow2.f32 %v4528_v29 }
 0x194   :  { %4608 = vpow2.f32 %v4529_v46 }
 0x195   :  { %4610 = vpow2.f32 %v4527_v53 }
 0x19d   :  { %v4605_v24 = vpop.eup %4604 }
 0x19e   :  { %v2009_v43 = vadd.f32 1.0, %v4605_v24 }
 0x1a0   :  { %v4607_v16 = vpop.eup %4606  ;;  %4612 = vrcp.f32 %v2009_v43 }
 0x1a1   :  { %v4609_v37 = vpop.eup %4608  ;;  %v2021_v38 = vadd.f32 1.0, %v4607_v16 }
 0x1a2   :  { %v4611_v10 = vpop.eup %4610  ;;  %v2022_v8 = vadd.f32 1.0, %v4609_v37 }
 0x1a3   :  { %v2010_v31 = vadd.f32 1.0, %v4611_v10  ;;  %4614 = vrcp.f32 %v2021_v38  ;;  %v1155_v10 = vld [vmem:[%s7731_s2] sm:$0xff] }
 0x1a4   :  { %4616 = vrcp.f32 %v2022_v8 }
 0x1ad   :  { %v4613_v37 = vpop.eup %4612 }
 0x1b0   :  { %v4615_v43 = vpop.eup %4614 }
 0x1b1   :  { %v4617_v38 = vpop.eup %4616 }
 0x1c5   :  { %v1915_v62 = vpop.f32.mrf.mxu0 }
 0x1c6   :  { %v1999_v54 = vadd.f32 %v1982_v60, %v1915_v62  ;;  %v1956_v61 = vpop.f32.mrf.mxu1  ;;  %v1156_v60 = vld [vmem:[%s7731_s2 + $0x8] sm:$0xff]  ;;  %v2041_v62 = vmul.f32 %v4615_v43, %v1155_v10  ;;  %v2066_v10 = vld [vmem:[%s7735_s6] sm:$0x11] }
 0x1c7   :  { %v2001_v44 = vadd.f32 %v1990_v19, %v1956_v61  ;;  %v1917_v45 = vpop.f32.mrf.mxu0 }
 0x1c8   :  { %4618 = vtanh.f32 %v1999_v54  ;;  %v2000_v4 = vadd.f32 %v1986_v17, %v1917_v45  ;;  %v1958_v16 = vpop.f32.mrf.mxu1 }
 0x1c9   :  { %4620 = vrcp.f32 %v2010_v31  ;;  %v4530_v24 = vmul.f32 -1.442695, %v2001_v44  ;;  %v2002_v51 = vadd.f32 %v1994_v18, %v1958_v16  ;;  %v1919_v5 = vpop.f32.mrf.mxu0  ;;  %v2042_v44 = vmul.f32 %v4617_v38, %v1156_v60 }
 0x1ca   :  { %4622 = vtanh.f32 %v2000_v4  ;;  %v1960_v36 = vpop.f32.mrf.mxu1 }
 0x1cb   :  { %4624 = vpow2.f32 %v4530_v24  ;;  %v4531_v29 = vmul.f32 -1.442695, %v2002_v51  ;;  %v1920_v46 = vpop.f32.mrf.mxu0  ;;  %v8211_v36 = vmov 0 }
 0x1cc   :  { %v1961_v53 = vpop.f32.mrf.mxu1  ;;  %v8212_v36 = vsel %vm6380_vm4, 4294967295, %v8211_v36  ;;  %v8214_v46 = vmov 0 }
 0x1cd   :  { %4626 = vpow2.f32 %v4531_v29  ;;  %8213 = vst [vmem:[#allocation156_spill] sm:$0xff] %v8212_v36  ;;  %v8215_v46 = vsel %vm6385_vm5, 4294967295, %v8214_v46  ;;  %v8236_v36 = vld [vmem:[#allocation93_spill] sm:$0xff] }
 0x1ce   :  { %8216 = vst [vmem:[#allocation157_spill] sm:$0xff] %v8215_v46  ;;  %v8237_v46 = vld [vmem:[#allocation94_spill] sm:$0xff] }
 0x1d5   :  { %v4619_v8 = vpop.eup %4618 }
 0x1d6   :  { %v4621_v31 = vpop.eup %4620  ;;  %v2043_v19 = vmul.f32 %v4619_v8, %v4613_v37 }
 0x1d7   :  { %v4623_v54 = vpop.eup %4622 }
 0x1d8   :  { %v4625_v61 = vpop.eup %4624  ;;  %v6373_v17 = vadd.f32 %v2043_v19, %v2041_v62  ;;  %v2044_v45 = vmul.f32 %v4623_v54, %v4621_v31  ;;  %v8217_v62 = vld [vmem:[#allocation74_spill] sm:$0xff]  ;;  %v8218_v19 = vld [vmem:[#allocation75_spill] sm:$0xff]  ;;  %v8219_v54 = vld [vmem:[#allocation76_spill] sm:$0xff] }
 0x1d9   :  { %v2035_v18 = vadd.f32 1.0, %v4625_v61  ;;  %v8220_v61 = vld [vmem:[#allocation77_spill] sm:$0xff] }
 0x1da   :  { %v4627_v4 = vpop.eup %4626  ;;  %4628 = vtanh.f32 %v6373_v17  ;;  %v6376_v16 = vadd.f32 %v2044_v45, %v2042_v44  ;;  %v8221_v44 = vld [vmem:[#allocation78_spill] sm:$0xff]  ;;  %v8222_v45 = vld [vmem:[#allocation79_spill] sm:$0xff] }
 0x1db   :  { %4630 = vrcp.f32 %v2035_v18  ;;  %v2036_v24 = vadd.f32 1.0, %v4627_v4  ;;  %v8223_v18 = vld [vmem:[#allocation80_spill] sm:$0xff]  ;;  %v8224_v4 = vld [vmem:[#allocation81_spill] sm:$0xff] }
 0x1dc   :  { %4632 = vtanh.f32 %v6376_v16 }
 0x1dd   :  { %4634 = vrcp.f32 %v2036_v24  ;;  %v8225_v24 = vld [vmem:[#allocation82_spill] sm:$0xff] }
 0x1e7   :  { %v4629_v51 = vpop.eup %4628 }
 0x1e8   :  { %v4631_v5 = vpop.eup %4630 }
 0x1e9   :  { %v4633_v29 = vpop.eup %4632  ;;  %v2049_v37 = vmul.f32 %v4631_v5, %v4629_v51  ;;  %v8226_v51 = vld [vmem:[#allocation83_spill] sm:$0xff]  ;;  %v8227_v5 = vld [vmem:[#allocation84_spill] sm:$0xff] }
 0x1ea   :  { %v4635_v53 = vpop.eup %4634 }
 0x1eb   :  { %v2050_v43 = vmul.f32 %v4635_v53, %v4633_v29  ;;  %v6396_v60 = vpack.c.bf16 %v2049_v37, %v2049_v37  ;;  %v8228_v29 = vld [vmem:[#allocation85_spill] sm:$0xff]  ;;  %v8229_v53 = vld [vmem:[#allocation86_spill] sm:$0xff] }
 0x1ed   :  { %v2052_v38 = vpack.c.bf16 %v2050_v43, %v2050_v43  ;;  %v4589_v8 = vpack.c.bf16 %v2050_v43, %v2049_v37  ;;  %v8230_v37 = vld [vmem:[#allocation87_spill] sm:$0xff]  ;;  %v8231_v43 = vld [vmem:[#allocation88_spill] sm:$0xff] }
 0x1ef   :  { %2101 = vmatprep.mubr.bf16.mxu0 %v2052_v38  ;;  %2142 = vmatprep.mubr.bf16.mxu1 %v2052_v38  ;;  %v2067_v31 = vsel %vm2065_vm6, %v4589_v8, %v2066_v10  ;;  %v8232_v10 = vld [vmem:[#allocation89_spill] sm:$0xff]  ;;  %v8234_v8 = vld [vmem:[#allocation91_spill] sm:$0xff] }
 0x1f0   :  { %2102 = vmatmul.mubr.bf16.vlgmr.msra.gmra.mxu0 %v6396_v60  ;;  %2143 = vmatmul.mubr.bf16.vlgmr.msra.gmra.mxu1 %v6396_v60  ;;  %2068 = vst [vmem:[%s7735_s6] sm:$0x11] %v2067_v31  ;;  %v8235_v31 = vld [vmem:[#allocation92_spill] sm:$0xff] }
 0x1f1   :  { %2152 = vmatpush1.bf16.msra.mxu0 %v8217_v62  ;;  %2193 = vmatpush1.bf16.msra.mxu1 %v8218_v19 }
 0x1f2   :  { %2183 = vmatprep.mubr.bf16.mxu0 %v2052_v38  ;;  %2224 = vmatprep.mubr.bf16.mxu1 %v2052_v38  ;;  %v8233_v38 = vld [vmem:[#allocation90_spill] sm:$0xff] }
 0x1f3   :  { %2153 = vmatprep.subr.bf16.mxu0 %v8219_v54  ;;  %2194 = vmatprep.subr.bf16.mxu1 %v8220_v61 }
 0x1f5   :  { %2154 = vmatpush1.bf16.msra.mxu0 %v8221_v44  ;;  %2195 = vmatpush1.bf16.msra.mxu1 %v8222_v45 }
 0x1f6   :  { %2155 = vmatprep.subr.bf16.mxu0 %v8223_v18  ;;  %2196 = vmatprep.subr.bf16.mxu1 %v8224_v4 }
 0x1f9   :  { %2156 = vmatpush1.bf16.msra.mxu0 %v8225_v24  ;;  %2197 = vmatpush1.bf16.msra.mxu1 %v8226_v51 }
 0x1fa   :  { %2157 = vmatprep.subr.bf16.mxu0 %v8227_v5  ;;  %2198 = vmatprep.subr.bf16.mxu1 %v8228_v29  ;;  %v8239_v29 = vld [vmem:[#allocation96_spill] sm:$0xff] }
 0x1fd   :  { %2158 = vmatpush1.bf16.msra.mxu0 %v8229_v53  ;;  %2199 = vmatpush1.bf16.msra.mxu1 %v8230_v37  ;;  %v8240_v53 = vld [vmem:[#allocation97_spill] sm:$0xff]  ;;  %v8241_v37 = vld [vmem:[#allocation98_spill] sm:$0xff] }
 0x1fe   :  { %2159 = vmatprep.subr.bf16.mxu0 %v8231_v43  ;;  %2200 = vmatprep.subr.bf16.mxu1 %v8232_v10  ;;  %v8242_v43 = vld [vmem:[#allocation99_spill] sm:$0xff]  ;;  %v8243_v10 = vld [vmem:[#allocation100_spill] sm:$0xff] }
 0x201   :  { %2160 = vmatpush1.bf16.msra.mxu0 %v8233_v38  ;;  %2201 = vmatpush1.bf16.msra.mxu1 %v8234_v8  ;;  %v8244_v38 = vld [vmem:[#allocation101_spill] sm:$0xff]  ;;  %v8245_v8 = vld [vmem:[#allocation102_spill] sm:$0xff] }
 0x202   :  { %2161 = vmatprep.subr.bf16.mxu0 %v8235_v31  ;;  %2202 = vmatprep.subr.bf16.mxu1 %v8236_v36  ;;  %v8246_v31 = vld [vmem:[#allocation103_spill] sm:$0xff]  ;;  %v8247_v36 = vld [vmem:[#allocation104_spill] sm:$0xff] }
 0x205   :  { %2162 = vmatpush1.bf16.msra.mxu0 %v8237_v46  ;;  %2203 = vmatpush1.bf16.msra.mxu1 %v8238_v23  ;;  %v8248_v46 = vld [vmem:[#allocation105_spill] sm:$0xff]  ;;  %v8249_v23 = vld [vmem:[#allocation106_spill] sm:$0xff] }
 0x206   :  { %2163 = vmatprep.subr.bf16.mxu0 %v8239_v29  ;;  %2204 = vmatprep.subr.bf16.mxu1 %v8240_v53  ;;  %v8250_v29 = vld [vmem:[#allocation107_spill] sm:$0xff]  ;;  %v8251_v53 = vld [vmem:[#allocation108_spill] sm:$0xff] }
 0x209   :  { %2164 = vmatpush1.bf16.msra.mxu0 %v8241_v37  ;;  %2205 = vmatpush1.bf16.msra.mxu1 %v8242_v43  ;;  %v8252_v37 = vld [vmem:[#allocation109_spill] sm:$0xff]  ;;  %v8253_v43 = vld [vmem:[#allocation110_spill] sm:$0xff] }
 0x20a   :  { %2165 = vmatprep.subr.bf16.mxu0 %v8243_v10  ;;  %2206 = vmatprep.subr.bf16.mxu1 %v8244_v38  ;;  %v8254_v10 = vld [vmem:[#allocation111_spill] sm:$0xff]  ;;  %v8255_v38 = vld [vmem:[#allocation112_spill] sm:$0xff] }
 0x20d   :  { %2166 = vmatpush1.bf16.msra.mxu0 %v8245_v8  ;;  %2207 = vmatpush1.bf16.msra.mxu1 %v8246_v31  ;;  %v8256_v8 = vld [vmem:[#allocation113_spill] sm:$0xff]  ;;  %v8257_v31 = vld [vmem:[#allocation114_spill] sm:$0xff] }
 0x20e   :  { %2167 = vmatprep.subr.bf16.mxu0 %v8247_v36  ;;  %2208 = vmatprep.subr.bf16.mxu1 %v8248_v46  ;;  %v8258_v36 = vld [vmem:[#allocation115_spill] sm:$0xff]  ;;  %v8259_v46 = vld [vmem:[#allocation116_spill] sm:$0xff] }
 0x211   :  { %2168 = vmatpush2.bf16.msra.mxu0 %v8249_v23  ;;  %2209 = vmatpush2.bf16.msra.mxu1 %v8250_v29  ;;  %v8260_v23 = vld [vmem:[#allocation117_spill] sm:$0xff]  ;;  %v8261_v29 = vld [vmem:[#allocation118_spill] sm:$0xff] }
 0x212   :  { %2169 = vmatprep.subr.bf16.mxu0 %v8251_v53  ;;  %2210 = vmatprep.subr.bf16.mxu1 %v8252_v37  ;;  %v8262_v53 = vld [vmem:[#allocation119_spill] sm:$0xff]  ;;  %v8263_v37 = vld [vmem:[#allocation120_spill] sm:$0xff] }
 0x215   :  { %2170 = vmatpush2.bf16.msra.mxu0 %v8253_v43  ;;  %2211 = vmatpush2.bf16.msra.mxu1 %v8254_v10  ;;  %v8264_v43 = vld [vmem:[#allocation121_spill] sm:$0xff]  ;;  %v8265_v10 = vld [vmem:[#allocation122_spill] sm:$0xff] }
 0x216   :  { %2171 = vmatprep.subr.bf16.mxu0 %v8255_v38  ;;  %2212 = vmatprep.subr.bf16.mxu1 %v8256_v8  ;;  %v8266_v38 = vld [vmem:[#allocation123_spill] sm:$0xff]  ;;  %v8267_v8 = vld [vmem:[#allocation124_spill] sm:$0xff] }
 0x219   :  { %2172 = vmatpush2.bf16.msra.mxu0 %v8257_v31  ;;  %2213 = vmatpush2.bf16.msra.mxu1 %v8258_v36  ;;  %v8268_v31 = vld [vmem:[#allocation125_spill] sm:$0xff] }
 0x21a   :  { %2173 = vmatprep.subr.bf16.mxu0 %v8259_v46  ;;  %2214 = vmatprep.subr.bf16.mxu1 %v8260_v23 }
 0x21d   :  { %2174 = vmatpush2.bf16.msra.mxu0 %v8261_v29  ;;  %2215 = vmatpush2.bf16.msra.mxu1 %v8262_v53 }
 0x21e   :  { %2175 = vmatprep.subr.bf16.mxu0 %v8263_v37  ;;  %2216 = vmatprep.subr.bf16.mxu1 %v8264_v43 }
 0x221   :  { %2176 = vmatpush2.bf16.msra.mxu0 %v8265_v10  ;;  %2217 = vmatpush2.bf16.msra.mxu1 %v8266_v38  ;;  %v8269_v10 = vld [vmem:[#allocation133_spill] sm:$0xff]  ;;  %v8270_v38 = vld [vmem:[#allocation134_spill] sm:$0xff] }
 0x222   :  { %2177 = vmatprep.subr.bf16.mxu0 %v8267_v8  ;;  %2218 = vmatprep.subr.bf16.mxu1 %v8268_v31  ;;  %v8271_v8 = vld [vmem:[#allocation135_spill] sm:$0xff]  ;;  %v8272_v31 = vld [vmem:[#allocation8_spill] sm:$0xff] }
 0x225   :  { %2178 = vmatpush2.bf16.msra.mxu0 %v6125_v35  ;;  %2219 = vmatpush2.bf16.msra.mxu1 %v6129_v6  ;;  %v8273_v35 = vld [vmem:[#allocation9_spill] sm:$0xff] }
 0x226   :  { %2179 = vmatprep.subr.bf16.mxu0 %v6131_v21  ;;  %2220 = vmatprep.subr.bf16.mxu1 %v6134_v20  ;;  %v8274_v20 = vld [vmem:[#allocation10_spill] sm:$0xff] }
 0x229   :  { %2180 = vmatpush2.bf16.msra.mxu0 %v6149_v63  ;;  %2221 = vmatpush2.bf16.msra.mxu1 %v6153_v52  ;;  %v8275_v63 = vld [vmem:[#allocation11_spill] sm:$0xff]  ;;  %v8276_v52 = vld [vmem:[#allocation12_spill] sm:$0xff] }
 0x22a   :  { %2181 = vmatprep.subr.bf16.mxu0 %v6155_v15  ;;  %2222 = vmatprep.subr.bf16.mxu1 %v8269_v10  ;;  %v8277_v15 = vld [vmem:[#allocation13_spill] sm:$0xff] }
 0x22d   :  { %2182 = vmatpush2.bf16.msra.mxu0 %v8270_v38  ;;  %2223 = vmatpush2.bf16.msra.mxu1 %v8271_v8 }
 0x22e   :  { %2340 = vmatprep.subr.bf16.mxu0 %v8272_v31  ;;  %2381 = vmatprep.subr.bf16.mxu1 %v8273_v35 }
 0x230   :  { %2184 = vmatmul.mubr.bf16.vlgmr.msra.gmra.mxu0 %v6396_v60  ;;  %2225 = vmatmul.mubr.bf16.vlgmr.msra.gmra.mxu1 %v6396_v60  ;;  %v8278_v60 = vld [vmem:[#allocation42_spill] sm:$0xff] }
 0x231   :  { %2341 = vmatpush1.bf16.msra.mxu0 %v8274_v20  ;;  %2382 = vmatpush1.bf16.msra.mxu1 %v8275_v63 }
 0x232   :  { %2342 = vmatprep.subr.bf16.mxu0 %v8276_v52  ;;  %2383 = vmatprep.subr.bf16.mxu1 %v8277_v15 }
 0x235   :  { %2343 = vmatpush1.bf16.msra.mxu0 %v5442_v25  ;;  %2384 = vmatpush1.bf16.msra.mxu1 %v5446_v26 }
 0x236   :  { %2344 = vmatprep.subr.bf16.mxu0 %v5448_v27  ;;  %2385 = vmatprep.subr.bf16.mxu1 %v5451_v28 }
 0x239   :  { %2345 = vmatpush1.bf16.msra.mxu0 %v5468_v32  ;;  %2386 = vmatpush1.bf16.msra.mxu1 %v5472_v33 }
 0x23a   :  { %2346 = vmatprep.subr.bf16.mxu0 %v5474_v34  ;;  %2387 = vmatprep.subr.bf16.mxu1 %v5477_v56 }
 0x23d   :  { %2347 = vmatpush1.bf16.msra.mxu0 %v5492_v39  ;;  %2388 = vmatpush1.bf16.msra.mxu1 %v5496_v40 }
 0x23e   :  { %2348 = vmatprep.subr.bf16.mxu0 %v5498_v41  ;;  %2389 = vmatprep.subr.bf16.mxu1 %v5501_v42  ;;  %v8314_v41 = vld [vmem:[#allocation154_spill] sm:$0xff] }
 0x241   :  { %2349 = vmatpush1.bf16.msra.mxu0 %v5516_v47  ;;  %2390 = vmatpush1.bf16.msra.mxu1 %v5520_v48 }
 0x242   :  { %2350 = vmatprep.subr.bf16.mxu0 %v5522_v49  ;;  %2391 = vmatprep.subr.bf16.mxu1 %v5525_v50  ;;  %v8310_v49 = vld [vmem:[#allocation138_spill] sm:$0xff] }
 0x243   :  { %v2248_v40 = vrot.slane %v8314_v41, %v8310_v49 }
 0x245   :  { %2351 = vmatpush1.bf16.msra.mxu0 %v5540_v55  ;;  %2392 = vmatpush1.bf16.msra.mxu1 %v5544_v57 }
 0x246   :  { %2352 = vmatprep.subr.bf16.mxu0 %v5546_v58  ;;  %2393 = vmatprep.subr.bf16.mxu1 %v5549_v59  ;;  %v8279_v58 = vld [vmem:[#allocation43_spill] sm:$0xff]  ;;  %v8280_v59 = vld [vmem:[#allocation44_spill] sm:$0xff] }
 0x249   :  { %2353 = vmatpush1.bf16.msra.mxu0 %v5564_v0  ;;  %2394 = vmatpush1.bf16.msra.mxu1 %v5568_v1  ;;  %v8281_v0 = vld [vmem:[#allocation45_spill] sm:$0xff]  ;;  %v8282_v1 = vld [vmem:[#allocation46_spill] sm:$0xff] }
 0x24a   :  { %2354 = vmatprep.subr.bf16.mxu0 %v5570_v2  ;;  %2395 = vmatprep.subr.bf16.mxu1 %v5573_v3  ;;  %v8283_v2 = vld [vmem:[#allocation47_spill] sm:$0xff]  ;;  %v8284_v3 = vld [vmem:[#allocation48_spill] sm:$0xff] }
 0x24d   :  { %2355 = vmatpush1.bf16.msra.mxu0 %v5588_v11  ;;  %2396 = vmatpush1.bf16.msra.mxu1 %v5592_v12  ;;  %v8285_v11 = vld [vmem:[#allocation49_spill] sm:$0xff]  ;;  %v8286_v12 = vld [vmem:[#allocation50_spill] sm:$0xff] }
 0x24e   :  { %2356 = vmatprep.subr.bf16.mxu0 %v5594_v13  ;;  %2397 = vmatprep.subr.bf16.mxu1 %v5597_v14  ;;  %v8287_v13 = vld [vmem:[#allocation51_spill] sm:$0xff]  ;;  %v8288_v14 = vld [vmem:[#allocation52_spill] sm:$0xff] }
 0x251   :  { %2357 = vmatpush2.bf16.msra.mxu0 %v8278_v60  ;;  %2398 = vmatpush2.bf16.msra.mxu1 %v8279_v58  ;;  %v8289_v60 = vld [vmem:[#allocation53_spill] sm:$0xff]  ;;  %v8290_v58 = vld [vmem:[#allocation54_spill] sm:$0xff] }
 0x252   :  { %2358 = vmatprep.subr.bf16.mxu0 %v8280_v59  ;;  %2399 = vmatprep.subr.bf16.mxu1 %v8281_v0  ;;  %v8291_v59 = vld [vmem:[#allocation55_spill] sm:$0xff]  ;;  %v8292_v0 = vld [vmem:[#allocation56_spill] sm:$0xff] }
 0x255   :  { %2359 = vmatpush2.bf16.msra.mxu0 %v8282_v1  ;;  %2400 = vmatpush2.bf16.msra.mxu1 %v8283_v2  ;;  %v8293_v1 = vld [vmem:[#allocation57_spill] sm:$0xff]  ;;  %v8294_v2 = vld [vmem:[#allocation58_spill] sm:$0xff] }
 0x256   :  { %2360 = vmatprep.subr.bf16.mxu0 %v8284_v3  ;;  %2401 = vmatprep.subr.bf16.mxu1 %v8285_v11  ;;  %v8295_v3 = vld [vmem:[#allocation59_spill] sm:$0xff]  ;;  %v8296_v11 = vld [vmem:[#allocation60_spill] sm:$0xff] }
 0x259   :  { %2361 = vmatpush2.bf16.msra.mxu0 %v8286_v12  ;;  %2402 = vmatpush2.bf16.msra.mxu1 %v8287_v13  ;;  %v8297_v12 = vld [vmem:[#allocation61_spill] sm:$0xff]  ;;  %v8298_v13 = vld [vmem:[#allocation62_spill] sm:$0xff] }
 0x25a   :  { %2362 = vmatprep.subr.bf16.mxu0 %v8288_v14  ;;  %2403 = vmatprep.subr.bf16.mxu1 %v8289_v60  ;;  %v8299_v14 = vld [vmem:[#allocation63_spill] sm:$0xff]  ;;  %v8300_v60 = vld [vmem:[#allocation64_spill] sm:$0xff] }
 0x25d   :  { %2363 = vmatpush2.bf16.msra.mxu0 %v8290_v58  ;;  %2404 = vmatpush2.bf16.msra.mxu1 %v8291_v59  ;;  %v8301_v58 = vld [vmem:[#allocation65_spill] sm:$0xff]  ;;  %v8302_v59 = vld [vmem:[#allocation66_spill] sm:$0xff] }
 0x25e   :  { %2364 = vmatprep.subr.bf16.mxu0 %v8292_v0  ;;  %2405 = vmatprep.subr.bf16.mxu1 %v8293_v1  ;;  %v8303_v0 = vld [vmem:[#allocation67_spill] sm:$0xff]  ;;  %v8304_v1 = vld [vmem:[#allocation68_spill] sm:$0xff] }
 0x261   :  { %2365 = vmatpush2.bf16.msra.mxu0 %v8294_v2  ;;  %2406 = vmatpush2.bf16.msra.mxu1 %v8295_v3  ;;  %v8305_v2 = vld [vmem:[#allocation69_spill] sm:$0xff]  ;;  %v8306_v3 = vld [vmem:[#allocation70_spill] sm:$0xff] }
 0x262   :  { %2366 = vmatprep.subr.bf16.mxu0 %v8296_v11  ;;  %2407 = vmatprep.subr.bf16.mxu1 %v8297_v12  ;;  %v8307_v11 = vld [vmem:[#allocation71_spill] sm:$0xff]  ;;  %v8308_v12 = vld [vmem:[#allocation72_spill] sm:$0xff] }
 0x265   :  { %2367 = vmatpush2.bf16.msra.mxu0 %v8298_v13  ;;  %2408 = vmatpush2.bf16.msra.mxu1 %v8299_v14  ;;  %v8309_v13 = vld [vmem:[#allocation73_spill] sm:$0xff] }
 0x266   :  { %2368 = vmatprep.subr.bf16.mxu0 %v8300_v60  ;;  %2409 = vmatprep.subr.bf16.mxu1 %v8301_v58 }
 0x269   :  { %2369 = vmatpush2.bf16.msra.mxu0 %v8302_v59  ;;  %2410 = vmatpush2.bf16.msra.mxu1 %v8303_v0 }
 0x26a   :  { %2370 = vmatprep.subr.bf16.mxu0 %v8304_v1  ;;  %2411 = vmatprep.subr.bf16.mxu1 %v8305_v2  ;;  %v8311_v1 = vld [vmem:[#allocation152_spill] sm:$0xff]  ;;  %v8312_v2 = vld [vmem:[#allocation153_spill] sm:$0xff] }
 0x26b   :  { %v2236_v48 = vrot.slane %v8311_v1, %v8310_v49 }
 0x26d   :  { %2371 = vmatpush2.bf16.msra.mxu0 %v8306_v3  ;;  %2412 = vmatpush2.bf16.msra.mxu1 %v8307_v11  ;;  %v2244_v3 = vrot.slane %v8312_v2, %v8310_v49  ;;  %v8313_v11 = vld [vmem:[#allocation155_spill] sm:$0xff] }
 0x26e   :  { %2422 = vmatprep.subr.bf16.mxu0 %v8308_v12  ;;  %2463 = vmatprep.subr.bf16.mxu1 %v8309_v13  ;;  %v2240_v12 = vrot.slane %v8313_v11, %v8310_v49 }
 0x2b0   :  { %v2103_v14 = vpop.f32.mrf.mxu0  ;;  %v2144_v60 = vpop.f32.mrf.mxu1 }
 0x2b1   :  { %v2265_v47 = vadd.f32 %v2236_v48, %v2103_v14  ;;  %v2267_v42 = vadd.f32 %v2244_v3, %v2144_v60 }
 0x2b2   :  { %v2105_v57 = vpop.f32.mrf.mxu0  ;;  %v2146_v58 = vpop.f32.mrf.mxu1 }
 0x2b3   :  { %v2266_v13 = vadd.f32 %v2240_v12, %v2105_v57  ;;  %v4533_v39 = vmul.f32 -1.442695, %v2265_v47  ;;  %v2252_v57 = vrot.slane %v6351_v30, %v8310_v49 }
 0x2b4   :  { %v2107_v55 = vpop.f32.mrf.mxu0  ;;  %v2148_v59 = vpop.f32.mrf.mxu1 }
 0x2b5   :  { %v2268_v55 = vadd.f32 %v2248_v40, %v2146_v58  ;;  %v4535_v59 = vmul.f32 -1.442695, %v2267_v42  ;;  %4636 = vpow2.f32 %v4533_v39  ;;  %v2260_v40 = vrot.slane %v6353_v9, %v8310_v49 }
 0x2b6   :  { %v2108_v50 = vpop.f32.mrf.mxu0  ;;  %v2149_v0 = vpop.f32.mrf.mxu1  ;;  %v2256_v58 = vrot.slane %v6355_v7, %v8310_v49 }
 0x2b7   :  { %v4534_v50 = vmul.f32 -1.442695, %v2266_v13  ;;  %v4536_v0 = vmul.f32 -1.442695, %v2268_v55  ;;  %4638 = vpow2.f32 %v4535_v59 }
 0x2b9   :  { %4640 = vpow2.f32 %v4534_v50 }
 0x2ba   :  { %4642 = vpow2.f32 %v4536_v0 }
 0x2c2   :  { %v4637_v1 = vpop.eup %4636 }
 0x2c3   :  { %v2279_v14 = vadd.f32 1.0, %v4637_v1  ;;  %v2264_v1 = vrot.slane %v6357_v22, %v8310_v49 }
 0x2c4   :  { %v4639_v2 = vpop.eup %4638 }
 0x2c5   :  { %v2291_v11 = vadd.f32 1.0, %v4639_v2  ;;  %4644 = vrcp.f32 %v2279_v14 }
 0x2c6   :  { %v4641_v48 = vpop.eup %4640 }
 0x2c7   :  { %v4643_v56 = vpop.eup %4642  ;;  %v2280_v3 = vadd.f32 1.0, %v4641_v48  ;;  %4646 = vrcp.f32 %v2291_v11 }
 0x2c8   :  { %v2292_v42 = vadd.f32 1.0, %v4643_v56 }
 0x2c9   :  { %4648 = vrcp.f32 %v2280_v3 }
 0x2f0   :  { %v2185_v39 = vpop.f32.mrf.mxu0  ;;  %v2226_v47 = vpop.f32.mrf.mxu1 }
 0x2f1   :  { %v2269_v12 = vadd.f32 %v2252_v57, %v2185_v39  ;;  %v2271_v13 = vadd.f32 %v2260_v40, %v2226_v47  ;;  %v4645_v57 = vpop.eup %4644 }
 0x2f2   :  { %v2187_v2 = vpop.f32.mrf.mxu0  ;;  %v2228_v60 = vpop.f32.mrf.mxu1 }
 0x2f3   :  { %4650 = vtanh.f32 %v2269_v12  ;;  %v4537_v55 = vmul.f32 -1.442695, %v2271_v13  ;;  %v2270_v59 = vadd.f32 %v2256_v58, %v2187_v2  ;;  %v2272_v50 = vadd.f32 %v2264_v1, %v2228_v60  ;;  %v4647_v40 = vpop.eup %4646 }
 0x2f4   :  { %4652 = vrcp.f32 %v2292_v42  ;;  %v2189_v56 = vpop.f32.mrf.mxu0  ;;  %v2230_v0 = vpop.f32.mrf.mxu1  ;;  %v2311_v47 = vmul.f32 %v4647_v40, %v6373_v17 }
 0x2f5   :  { %4654 = vpow2.f32 %v4537_v55  ;;  %v4538_v48 = vmul.f32 -1.442695, %v2272_v50  ;;  %v4649_v39 = vpop.eup %4648 }
 0x2f6   :  { %4656 = vtanh.f32 %v2270_v59  ;;  %v2190_v14 = vpop.f32.mrf.mxu0  ;;  %v2231_v11 = vpop.f32.mrf.mxu1 }
 0x2f7   :  { %4658 = vpow2.f32 %v4538_v48 }
 0x300   :  { %v4651_v49 = vpop.eup %4650 }
 0x301   :  { %v4653_v3 = vpop.eup %4652  ;;  %v2313_v12 = vmul.f32 %v4651_v49, %v4645_v57 }
 0x302   :  { %v4655_v13 = vpop.eup %4654  ;;  %v2312_v60 = vmul.f32 %v4653_v3, %v6376_v16  ;;  %v2337_v3 = vld [vmem:[%s7735_s6] sm:$0x11]  ;;  %v8330_v16 = vld [vmem:[#allocation98_spill] sm:$0xff] }
 0x303   :  { %v4657_v58 = vpop.eup %4656  ;;  %v6555_v1 = vadd.f32 %v2313_v12, %v2311_v47  ;;  %v2305_v42 = vadd.f32 1.0, %v4655_v13  ;;  %v8317_v12 = vld [vmem:[#allocation85_spill] sm:$0xff]  ;;  %v8318_v13 = vld [vmem:[#allocation86_spill] sm:$0xff] }
 0x304   :  { %v4659_v2 = vpop.eup %4658  ;;  %v2314_v55 = vmul.f32 %v4657_v58, %v4649_v39  ;;  %v8319_v58 = vld [vmem:[#allocation87_spill] sm:$0xff] }
 0x305   :  { %4660 = vtanh.f32 %v6555_v1  ;;  %v2306_v59 = vadd.f32 1.0, %v4659_v2  ;;  %v8321_v2 = vld [vmem:[#allocation89_spill] sm:$0xff] }
 0x306   :  { %4662 = vrcp.f32 %v2305_v42  ;;  %v6559_v50 = vadd.f32 %v2314_v55, %v2312_v60  ;;  %v8320_v42 = vld [vmem:[#allocation88_spill] sm:$0xff]  ;;  %v8322_v60 = vld [vmem:[#allocation90_spill] sm:$0xff]  ;;  %v8323_v55 = vld [vmem:[#allocation91_spill] sm:$0xff] }
 0x307   :  { %4664 = vrcp.f32 %v2306_v59  ;;  %v8324_v59 = vld [vmem:[#allocation92_spill] sm:$0xff] }
 0x308   :  { %4666 = vtanh.f32 %v6559_v50 }
 0x312   :  { %v4661_v17 = vpop.eup %4660 }
 0x313   :  { %v4663_v56 = vpop.eup %4662 }
 0x314   :  { %v4665_v0 = vpop.eup %4664  ;;  %v2319_v14 = vmul.f32 %v4663_v56, %v4661_v17  ;;  %v8325_v17 = vld [vmem:[#allocation93_spill] sm:$0xff]  ;;  %v8326_v56 = vld [vmem:[#allocation94_spill] sm:$0xff] }
 0x315   :  { %v4667_v48 = vpop.eup %4666 }
 0x316   :  { %v2320_v11 = vmul.f32 %v4667_v48, %v4665_v0  ;;  %v6568_v39 = vpack.c.bf16 %v2319_v14, %v2319_v14  ;;  %v8327_v0 = vld [vmem:[#allocation95_spill] sm:$0xff]  ;;  %v8328_v48 = vld [vmem:[#allocation96_spill] sm:$0xff] }
 0x318   :  { %v2322_v57 = vpack.c.bf16 %v2320_v11, %v2320_v11  ;;  %v4590_v40 = vpack.c.bf16 %v2320_v11, %v2319_v14  ;;  %v8329_v14 = vld [vmem:[#allocation97_spill] sm:$0xff]  ;;  %v8331_v11 = vld [vmem:[#allocation99_spill] sm:$0xff] }
 0x31a   :  { %2372 = vmatprep.mubr.bf16.mxu0 %v2322_v57  ;;  %2413 = vmatprep.mubr.bf16.mxu1 %v2322_v57  ;;  %v2329_v49 = vshll.u32 %v4590_v40, 16  ;;  %v8333_v40 = vld [vmem:[#allocation101_spill] sm:$0xff] }
 0x31b   :  { %2373 = vmatmul.mubr.bf16.vlgmr.msra.gmra.mxu0 %v6568_v39  ;;  %2414 = vmatmul.mubr.bf16.vlgmr.msra.gmra.mxu1 %v6568_v39 }
 0x31c   :  { %2423 = vmatpush1.bf16.msra.mxu0 %v8217_v62  ;;  %2464 = vmatpush1.bf16.msra.mxu1 %v8218_v19  ;;  %v2338_v47 = vsel %vm2336_vm11, %v2329_v49, %v2337_v3  ;;  %v8334_v49 = vld [vmem:[#allocation102_spill] sm:$0xff]  ;;  %v8335_v3 = vld [vmem:[#allocation103_spill] sm:$0xff]  ;;  %vm3144_vm11 = vcmask 1042434  }
 0x31d   :  { %2454 = vmatprep.mubr.bf16.mxu0 %v2322_v57  ;;  %2495 = vmatprep.mubr.bf16.mxu1 %v2322_v57  ;;  %2339 = vst [vmem:[%s7735_s6] sm:$0x11] %v2338_v47  ;;  %v8332_v57 = vld [vmem:[#allocation100_spill] sm:$0xff]  ;;  %vm7085_vm15 = vmand %vm3144_vm11, %vm3145_vm12  ;;  %vm3690_vm12 = vcmask 1047559  }
 0x31e   :  { %2424 = vmatprep.subr.bf16.mxu0 %v8219_v54  ;;  %2465 = vmatprep.subr.bf16.mxu1 %v8220_v61  ;;  %v8336_v47 = vld [vmem:[#allocation104_spill] sm:$0xff]  ;;  %vm3150_vm1 = vmor %vm3149_vm0, %vm7085_vm15 }
 0x31f   :  { %vm3692_vm15 = vmand %vm3690_vm12, %vm3691_vm13 }
 0x320   :  { %2425 = vmatpush1.bf16.msra.mxu0 %v8221_v44  ;;  %2466 = vmatpush1.bf16.msra.mxu1 %v8222_v45 }
 0x321   :  { %2426 = vmatprep.subr.bf16.mxu0 %v8223_v18  ;;  %2467 = vmatprep.subr.bf16.mxu1 %v8224_v4 }
 0x324   :  { %2427 = vmatpush1.bf16.msra.mxu0 %v8225_v24  ;;  %2468 = vmatpush1.bf16.msra.mxu1 %v8226_v51 }
 0x325   :  { %2428 = vmatprep.subr.bf16.mxu0 %v8227_v5  ;;  %2469 = vmatprep.subr.bf16.mxu1 %v8317_v12 }
 0x328   :  { %2429 = vmatpush1.bf16.msra.mxu0 %v8318_v13  ;;  %2470 = vmatpush1.bf16.msra.mxu1 %v8319_v58 }
 0x329   :  { %2430 = vmatprep.subr.bf16.mxu0 %v8320_v42  ;;  %2471 = vmatprep.subr.bf16.mxu1 %v8321_v2 }
 0x32c   :  { %2431 = vmatpush1.bf16.msra.mxu0 %v8322_v60  ;;  %2472 = vmatpush1.bf16.msra.mxu1 %v8323_v55 }
 0x32d   :  { %2432 = vmatprep.subr.bf16.mxu0 %v8324_v59  ;;  %2473 = vmatprep.subr.bf16.mxu1 %v8325_v17 }
 0x330   :  { %2433 = vmatpush1.bf16.msra.mxu0 %v8326_v56  ;;  %2474 = vmatpush1.bf16.msra.mxu1 %v8327_v0  ;;  %v8337_v56 = vld [vmem:[#allocation105_spill] sm:$0xff]  ;;  %v8338_v0 = vld [vmem:[#allocation106_spill] sm:$0xff] }
 0x331   :  { %2434 = vmatprep.subr.bf16.mxu0 %v8328_v48  ;;  %2475 = vmatprep.subr.bf16.mxu1 %v8329_v14  ;;  %v8339_v48 = vld [vmem:[#allocation107_spill] sm:$0xff]  ;;  %v8340_v14 = vld [vmem:[#allocation108_spill] sm:$0xff] }
 0x334   :  { %2435 = vmatpush1.bf16.msra.mxu0 %v8330_v16  ;;  %2476 = vmatpush1.bf16.msra.mxu1 %v8331_v11  ;;  %v8341_v16 = vld [vmem:[#allocation109_spill] sm:$0xff]  ;;  %v8342_v11 = vld [vmem:[#allocation110_spill] sm:$0xff] }
 0x335   :  { %2436 = vmatprep.subr.bf16.mxu0 %v8332_v57  ;;  %2477 = vmatprep.subr.bf16.mxu1 %v8333_v40  ;;  %v8343_v57 = vld [vmem:[#allocation111_spill] sm:$0xff]  ;;  %v8344_v40 = vld [vmem:[#allocation112_spill] sm:$0xff] }
 0x338   :  { %2437 = vmatpush1.bf16.msra.mxu0 %v8334_v49  ;;  %2478 = vmatpush1.bf16.msra.mxu1 %v8335_v3  ;;  %v8345_v49 = vld [vmem:[#allocation113_spill] sm:$0xff]  ;;  %v8346_v3 = vld [vmem:[#allocation114_spill] sm:$0xff] }
 0x339   :  { %2438 = vmatprep.subr.bf16.mxu0 %v8336_v47  ;;  %2479 = vmatprep.subr.bf16.mxu1 %v8337_v56 }
 0x33c   :  { %2439 = vmatpush2.bf16.msra.mxu0 %v8338_v0  ;;  %2480 = vmatpush2.bf16.msra.mxu1 %v8339_v48 }
 0x33d   :  { %2440 = vmatprep.subr.bf16.mxu0 %v8340_v14  ;;  %2481 = vmatprep.subr.bf16.mxu1 %v8341_v16 }
 0x340   :  { %2441 = vmatpush2.bf16.msra.mxu0 %v8342_v11  ;;  %2482 = vmatpush2.bf16.msra.mxu1 %v8343_v57  ;;  %v8347_v57 = vld [vmem:[#allocation122_spill] sm:$0xff] }
 0x341   :  { %2442 = vmatprep.subr.bf16.mxu0 %v8344_v40  ;;  %2483 = vmatprep.subr.bf16.mxu1 %v8345_v49  ;;  %v8348_v40 = vld [vmem:[#allocation123_spill] sm:$0xff]  ;;  %v8349_v49 = vld [vmem:[#allocation124_spill] sm:$0xff] }
 0x344   :  { %2443 = vmatpush2.bf16.msra.mxu0 %v8346_v3  ;;  %2484 = vmatpush2.bf16.msra.mxu1 %v8258_v36  ;;  %v8350_v3 = vld [vmem:[#allocation125_spill] sm:$0xff]  ;;  %v8351_v36 = vld [vmem:[#allocation126_spill] sm:$0xff] }
 0x345   :  { %2444 = vmatprep.subr.bf16.mxu0 %v8259_v46  ;;  %2485 = vmatprep.subr.bf16.mxu1 %v8260_v23 }
 0x348   :  { %2445 = vmatpush2.bf16.msra.mxu0 %v8261_v29  ;;  %2486 = vmatpush2.bf16.msra.mxu1 %v8262_v53  ;;  %v8352_v29 = vld [vmem:[#allocation129_spill] sm:$0xff]  ;;  %v8353_v53 = vld [vmem:[#allocation130_spill] sm:$0xff] }
 0x349   :  { %2446 = vmatprep.subr.bf16.mxu0 %v8263_v37  ;;  %2487 = vmatprep.subr.bf16.mxu1 %v8264_v43  ;;  %v8354_v37 = vld [vmem:[#allocation131_spill] sm:$0xff]  ;;  %v8355_v43 = vld [vmem:[#allocation132_spill] sm:$0xff] }
 0x34c   :  { %2447 = vmatpush2.bf16.msra.mxu0 %v8347_v57  ;;  %2488 = vmatpush2.bf16.msra.mxu1 %v8348_v40 }
 0x34d   :  { %2448 = vmatprep.subr.bf16.mxu0 %v8349_v49  ;;  %2489 = vmatprep.subr.bf16.mxu1 %v8350_v3 }
 0x350   :  { %2449 = vmatpush2.bf16.msra.mxu0 %v8351_v36  ;;  %2490 = vmatpush2.bf16.msra.mxu1 %v6129_v6 }
 0x351   :  { %2450 = vmatprep.subr.bf16.mxu0 %v6131_v21  ;;  %2491 = vmatprep.subr.bf16.mxu1 %v8352_v29 }
 0x354   :  { %2451 = vmatpush2.bf16.msra.mxu0 %v8353_v53  ;;  %2492 = vmatpush2.bf16.msra.mxu1 %v8354_v37 }
 0x355   :  { %2452 = vmatprep.subr.bf16.mxu0 %v8355_v43  ;;  %2493 = vmatprep.subr.bf16.mxu1 %v8269_v10 }
 0x358   :  { %2453 = vmatpush2.bf16.msra.mxu0 %v8270_v38  ;;  %2494 = vmatpush2.bf16.msra.mxu1 %v8271_v8  ;;  %v8409_v8 = vld [vmem:[#allocation137_spill] sm:$0xff] }
 0x359   :  { %2611 = vmatprep.subr.bf16.mxu0 %v8272_v31  ;;  %2652 = vmatprep.subr.bf16.mxu1 %v8273_v35  ;;  %v2519_v37 = vrot.slane %v8314_v41, %v8409_v8 }
 0x35b   :  { %2455 = vmatmul.mubr.bf16.vlgmr.msra.gmra.mxu0 %v6568_v39  ;;  %2496 = vmatmul.mubr.bf16.vlgmr.msra.gmra.mxu1 %v6568_v39  ;;  %v8356_v39 = vld [vmem:[#allocation21_spill] sm:$0xff] }
 0x35c   :  { %2612 = vmatpush1.bf16.msra.mxu0 %v8274_v20  ;;  %2653 = vmatpush1.bf16.msra.mxu1 %v8275_v63  ;;  %v8357_v63 = vld [vmem:[#allocation22_spill] sm:$0xff] }
 0x35d   :  { %2613 = vmatprep.subr.bf16.mxu0 %v8276_v52  ;;  %2654 = vmatprep.subr.bf16.mxu1 %v8277_v15  ;;  %v8358_v52 = vld [vmem:[#allocation23_spill] sm:$0xff]  ;;  %v8359_v15 = vld [vmem:[#allocation24_spill] sm:$0xff] }
 0x360   :  { %2614 = vmatpush1.bf16.msra.mxu0 %v5442_v25  ;;  %2655 = vmatpush1.bf16.msra.mxu1 %v5446_v26  ;;  %v8360_v25 = vld [vmem:[#allocation25_spill] sm:$0xff]  ;;  %v8361_v26 = vld [vmem:[#allocation26_spill] sm:$0xff] }
 0x361   :  { %2615 = vmatprep.subr.bf16.mxu0 %v5448_v27  ;;  %2656 = vmatprep.subr.bf16.mxu1 %v5451_v28  ;;  %v8362_v27 = vld [vmem:[#allocation27_spill] sm:$0xff]  ;;  %v8363_v28 = vld [vmem:[#allocation28_spill] sm:$0xff] }
 0x364   :  { %2616 = vmatpush1.bf16.msra.mxu0 %v5468_v32  ;;  %2657 = vmatpush1.bf16.msra.mxu1 %v5472_v33  ;;  %v8364_v32 = vld [vmem:[#allocation29_spill] sm:$0xff]  ;;  %v8365_v33 = vld [vmem:[#allocation30_spill] sm:$0xff] }
 0x365   :  { %2617 = vmatprep.subr.bf16.mxu0 %v5474_v34  ;;  %2658 = vmatprep.subr.bf16.mxu1 %v8356_v39  ;;  %v8366_v34 = vld [vmem:[#allocation31_spill] sm:$0xff]  ;;  %v8367_v39 = vld [vmem:[#allocation32_spill] sm:$0xff] }
 0x368   :  { %2618 = vmatpush1.bf16.msra.mxu0 %v8357_v63  ;;  %2659 = vmatpush1.bf16.msra.mxu1 %v8358_v52  ;;  %v8368_v63 = vld [vmem:[#allocation33_spill] sm:$0xff]  ;;  %v8369_v52 = vld [vmem:[#allocation34_spill] sm:$0xff] }
 0x369   :  { %2619 = vmatprep.subr.bf16.mxu0 %v8359_v15  ;;  %2660 = vmatprep.subr.bf16.mxu1 %v8360_v25  ;;  %v8370_v15 = vld [vmem:[#allocation35_spill] sm:$0xff]  ;;  %v8371_v25 = vld [vmem:[#allocation36_spill] sm:$0xff] }
 0x36c   :  { %2620 = vmatpush1.bf16.msra.mxu0 %v8361_v26  ;;  %2661 = vmatpush1.bf16.msra.mxu1 %v8362_v27  ;;  %v8372_v26 = vld [vmem:[#allocation37_spill] sm:$0xff]  ;;  %v8373_v27 = vld [vmem:[#allocation38_spill] sm:$0xff] }
 0x36d   :  { %2621 = vmatprep.subr.bf16.mxu0 %v8363_v28  ;;  %2662 = vmatprep.subr.bf16.mxu1 %v8364_v32  ;;  %v8374_v28 = vld [vmem:[#allocation39_spill] sm:$0xff]  ;;  %v8375_v32 = vld [vmem:[#allocation40_spill] sm:$0xff] }
 0x370   :  { %2622 = vmatpush1.bf16.msra.mxu0 %v8365_v33  ;;  %2663 = vmatpush1.bf16.msra.mxu1 %v8366_v34  ;;  %v8376_v33 = vld [vmem:[#allocation41_spill] sm:$0xff]  ;;  %v8377_v34 = vld [vmem:[#allocation42_spill] sm:$0xff] }
 0x371   :  { %2623 = vmatprep.subr.bf16.mxu0 %v8367_v39  ;;  %2664 = vmatprep.subr.bf16.mxu1 %v8368_v63  ;;  %v8378_v39 = vld [vmem:[#allocation43_spill] sm:$0xff]  ;;  %v8379_v63 = vld [vmem:[#allocation44_spill] sm:$0xff] }
 0x374   :  { %2624 = vmatpush1.bf16.msra.mxu0 %v8369_v52  ;;  %2665 = vmatpush1.bf16.msra.mxu1 %v8370_v15  ;;  %v8380_v52 = vld [vmem:[#allocation45_spill] sm:$0xff]  ;;  %v8381_v15 = vld [vmem:[#allocation46_spill] sm:$0xff] }
 0x375   :  { %2625 = vmatprep.subr.bf16.mxu0 %v8371_v25  ;;  %2666 = vmatprep.subr.bf16.mxu1 %v8372_v26  ;;  %v8382_v25 = vld [vmem:[#allocation47_spill] sm:$0xff]  ;;  %v8383_v26 = vld [vmem:[#allocation48_spill] sm:$0xff] }
 0x378   :  { %2626 = vmatpush1.bf16.msra.mxu0 %v8373_v27  ;;  %2667 = vmatpush1.bf16.msra.mxu1 %v8374_v28  ;;  %v8384_v27 = vld [vmem:[#allocation49_spill] sm:$0xff]  ;;  %v8385_v28 = vld [vmem:[#allocation50_spill] sm:$0xff] }
 0x379   :  { %2627 = vmatprep.subr.bf16.mxu0 %v8375_v32  ;;  %2668 = vmatprep.subr.bf16.mxu1 %v8376_v33  ;;  %v8386_v32 = vld [vmem:[#allocation51_spill] sm:$0xff]  ;;  %v8387_v33 = vld [vmem:[#allocation52_spill] sm:$0xff] }
 0x37c   :  { %2628 = vmatpush2.bf16.msra.mxu0 %v8377_v34  ;;  %2669 = vmatpush2.bf16.msra.mxu1 %v8378_v39  ;;  %v8388_v34 = vld [vmem:[#allocation53_spill] sm:$0xff]  ;;  %v8389_v39 = vld [vmem:[#allocation54_spill] sm:$0xff] }
 0x37d   :  { %2629 = vmatprep.subr.bf16.mxu0 %v8379_v63  ;;  %2670 = vmatprep.subr.bf16.mxu1 %v8380_v52  ;;  %v8390_v63 = vld [vmem:[#allocation55_spill] sm:$0xff]  ;;  %v8391_v52 = vld [vmem:[#allocation56_spill] sm:$0xff] }
 0x380   :  { %2630 = vmatpush2.bf16.msra.mxu0 %v8381_v15  ;;  %2671 = vmatpush2.bf16.msra.mxu1 %v8382_v25  ;;  %v8392_v15 = vld [vmem:[#allocation57_spill] sm:$0xff]  ;;  %v8393_v25 = vld [vmem:[#allocation58_spill] sm:$0xff] }
 0x381   :  { %2631 = vmatprep.subr.bf16.mxu0 %v8383_v26  ;;  %2672 = vmatprep.subr.bf16.mxu1 %v8384_v27  ;;  %v8394_v26 = vld [vmem:[#allocation59_spill] sm:$0xff]  ;;  %v8395_v27 = vld [vmem:[#allocation60_spill] sm:$0xff] }
 0x384   :  { %2632 = vmatpush2.bf16.msra.mxu0 %v8385_v28  ;;  %2673 = vmatpush2.bf16.msra.mxu1 %v8386_v32  ;;  %v8396_v28 = vld [vmem:[#allocation61_spill] sm:$0xff]  ;;  %v8397_v32 = vld [vmem:[#allocation62_spill] sm:$0xff] }
 0x385   :  { %2633 = vmatprep.subr.bf16.mxu0 %v8387_v33  ;;  %2674 = vmatprep.subr.bf16.mxu1 %v8388_v34  ;;  %v8398_v33 = vld [vmem:[#allocation63_spill] sm:$0xff]  ;;  %v8399_v34 = vld [vmem:[#allocation64_spill] sm:$0xff] }
 0x388   :  { %2634 = vmatpush2.bf16.msra.mxu0 %v8389_v39  ;;  %2675 = vmatpush2.bf16.msra.mxu1 %v8390_v63  ;;  %v8400_v39 = vld [vmem:[#allocation65_spill] sm:$0xff]  ;;  %v8401_v63 = vld [vmem:[#allocation66_spill] sm:$0xff] }
 0x389   :  { %2635 = vmatprep.subr.bf16.mxu0 %v8391_v52  ;;  %2676 = vmatprep.subr.bf16.mxu1 %v8392_v15  ;;  %v8402_v52 = vld [vmem:[#allocation67_spill] sm:$0xff]  ;;  %v8403_v15 = vld [vmem:[#allocation68_spill] sm:$0xff] }
 0x38c   :  { %2636 = vmatpush2.bf16.msra.mxu0 %v8393_v25  ;;  %2677 = vmatpush2.bf16.msra.mxu1 %v8394_v26  ;;  %v8404_v25 = vld [vmem:[#allocation69_spill] sm:$0xff]  ;;  %v8405_v26 = vld [vmem:[#allocation70_spill] sm:$0xff] }
 0x38d   :  { %2637 = vmatprep.subr.bf16.mxu0 %v8395_v27  ;;  %2678 = vmatprep.subr.bf16.mxu1 %v8396_v28  ;;  %v8406_v27 = vld [vmem:[#allocation71_spill] sm:$0xff]  ;;  %v8407_v28 = vld [vmem:[#allocation72_spill] sm:$0xff] }
 0x390   :  { %2638 = vmatpush2.bf16.msra.mxu0 %v8397_v32  ;;  %2679 = vmatpush2.bf16.msra.mxu1 %v8398_v33  ;;  %v8408_v32 = vld [vmem:[#allocation73_spill] sm:$0xff] }
 0x391   :  { %2639 = vmatprep.subr.bf16.mxu0 %v8399_v34  ;;  %2680 = vmatprep.subr.bf16.mxu1 %v8400_v39 }
 0x394   :  { %2640 = vmatpush2.bf16.msra.mxu0 %v8401_v63  ;;  %2681 = vmatpush2.bf16.msra.mxu1 %v8402_v52 }
 0x395   :  { %2641 = vmatprep.subr.bf16.mxu0 %v8403_v15  ;;  %2682 = vmatprep.subr.bf16.mxu1 %v8404_v25  ;;  %v8410_v15 = vld [vmem:[#allocation152_spill] sm:$0xff]  ;;  %v8411_v25 = vld [vmem:[#allocation153_spill] sm:$0xff] }
 0x396   :  { %v2507_v38 = vrot.slane %v8410_v15, %v8409_v8 }
 0x398   :  { %2642 = vmatpush2.bf16.msra.mxu0 %v8405_v26  ;;  %2683 = vmatpush2.bf16.msra.mxu1 %v8406_v27  ;;  %v2515_v26 = vrot.slane %v8411_v25, %v8409_v8  ;;  %v8412_v27 = vld [vmem:[#allocation155_spill] sm:$0xff] }
 0x399   :  { %2693 = vmatprep.subr.bf16.mxu0 %v8407_v28  ;;  %2734 = vmatprep.subr.bf16.mxu1 %v8408_v32  ;;  %v2511_v28 = vrot.slane %v8412_v27, %v8409_v8 }
 0x3db   :  { %v2374_v33 = vpop.f32.mrf.mxu0  ;;  %v2415_v34 = vpop.f32.mrf.mxu1 }
 0x3dc   :  { %v2536_v10 = vadd.f32 %v2507_v38, %v2374_v33  ;;  %v2538_v43 = vadd.f32 %v2515_v26, %v2415_v34  ;;  %v2531_v34 = vrot.slane %v6353_v9, %v8409_v8 }
 0x3dd   :  { %v2376_v20 = vpop.f32.mrf.mxu0  ;;  %v2417_v39 = vpop.f32.mrf.mxu1 }
 0x3de   :  { %v2537_v32 = vadd.f32 %v2511_v28, %v2376_v20  ;;  %v4540_v53 = vmul.f32 -1.442695, %v2536_v10  ;;  %v2523_v28 = vrot.slane %v6351_v30, %v8409_v8 }
 0x3df   :  { %v2378_v35 = vpop.f32.mrf.mxu0  ;;  %v2419_v63 = vpop.f32.mrf.mxu1 }
 0x3e0   :  { %v2539_v35 = vadd.f32 %v2519_v37, %v2417_v39  ;;  %v4542_v63 = vmul.f32 -1.442695, %v2538_v43  ;;  %4668 = vpow2.f32 %v4540_v53  ;;  %v2527_v37 = vrot.slane %v6355_v7, %v8409_v8 }
 0x3e1   :  { %v2379_v31 = vpop.f32.mrf.mxu0  ;;  %v2420_v52 = vpop.f32.mrf.mxu1 }
 0x3e2   :  { %v4541_v31 = vmul.f32 -1.442695, %v2537_v32  ;;  %v4543_v52 = vmul.f32 -1.442695, %v2539_v35  ;;  %4670 = vpow2.f32 %v4542_v63 }
 0x3e4   :  { %4672 = vpow2.f32 %v4541_v31 }
 0x3e5   :  { %4674 = vpow2.f32 %v4543_v52 }
 0x3ed   :  { %v4669_v15 = vpop.eup %4668 }
 0x3ee   :  { %v2550_v38 = vadd.f32 1.0, %v4669_v15 }
 0x3ef   :  { %v4671_v25 = vpop.eup %4670 }
 0x3f0   :  { %v2562_v27 = vadd.f32 1.0, %v4671_v25  ;;  %4676 = vrcp.f32 %v2550_v38  ;;  %v2535_v25 = vrot.slane %v6357_v22, %v8409_v8 }
 0x3f1   :  { %v4673_v33 = vpop.eup %4672 }
 0x3f2   :  { %v4675_v29 = vpop.eup %4674  ;;  %v2551_v26 = vadd.f32 1.0, %v4673_v33  ;;  %4678 = vrcp.f32 %v2562_v27 }
 0x3f3   :  { %v2563_v32 = vadd.f32 1.0, %v4675_v29 }
 0x3f4   :  { %4680 = vrcp.f32 %v2551_v26 }
 0x41b   :  { %v2456_v20 = vpop.f32.mrf.mxu0  ;;  %v2497_v53 = vpop.f32.mrf.mxu1 }
 0x41c   :  { %v2540_v43 = vadd.f32 %v2523_v28, %v2456_v20  ;;  %v2542_v10 = vadd.f32 %v2531_v34, %v2497_v53  ;;  %v4677_v28 = vpop.eup %4676 }
 0x41d   :  { %v2458_v15 = vpop.f32.mrf.mxu0  ;;  %v2499_v39 = vpop.f32.mrf.mxu1 }
 0x41e   :  { %4682 = vtanh.f32 %v2540_v43  ;;  %v4544_v35 = vmul.f32 -1.442695, %v2542_v10  ;;  %v2541_v63 = vadd.f32 %v2527_v37, %v2458_v15  ;;  %v2543_v31 = vadd.f32 %v2535_v25, %v2499_v39  ;;  %v4679_v34 = vpop.eup %4678 }
 0x41f   :  { %4684 = vrcp.f32 %v2563_v32  ;;  %v2460_v29 = vpop.f32.mrf.mxu0  ;;  %v2501_v52 = vpop.f32.mrf.mxu1  ;;  %v2582_v53 = vmul.f32 %v4679_v34, %v6555_v1 }
 0x420   :  { %4686 = vpow2.f32 %v4544_v35  ;;  %v4545_v33 = vmul.f32 -1.442695, %v2543_v31  ;;  %v4681_v20 = vpop.eup %4680 }
 0x421   :  { %4688 = vtanh.f32 %v2541_v63  ;;  %v2461_v38 = vpop.f32.mrf.mxu0  ;;  %v2502_v27 = vpop.f32.mrf.mxu1 }
 0x422   :  { %4690 = vpow2.f32 %v4545_v33 }
 0x42b   :  { %v4683_v8 = vpop.eup %4682 }
 0x42c   :  { %v4685_v26 = vpop.eup %4684  ;;  %v2584_v43 = vmul.f32 %v4683_v8, %v4677_v28  ;;  %v2608_v8 = vld [vmem:[%s7735_s6] sm:$0x22] }
 0x42d   :  { %v4687_v10 = vpop.eup %4686  ;;  %v2583_v39 = vmul.f32 %v4685_v26, %v6559_v50  ;;  %v8428_v50 = vld [vmem:[#allocation114_spill] sm:$0xff] }
 0x42e   :  { %v4689_v37 = vpop.eup %4688  ;;  %v6727_v25 = vadd.f32 %v2584_v43, %v2582_v53  ;;  %v2576_v32 = vadd.f32 1.0, %v4687_v10  ;;  %v8415_v43 = vld [vmem:[#allocation94_spill] sm:$0xff]  ;;  %v8416_v10 = vld [vmem:[#allocation95_spill] sm:$0xff] }
 0x42f   :  { %v4691_v15 = vpop.eup %4690  ;;  %v2585_v35 = vmul.f32 %v4689_v37, %v4681_v20  ;;  %v8417_v37 = vld [vmem:[#allocation96_spill] sm:$0xff] }
 0x430   :  { %4692 = vtanh.f32 %v6727_v25  ;;  %v2577_v63 = vadd.f32 1.0, %v4691_v15  ;;  %v8419_v15 = vld [vmem:[#allocation98_spill] sm:$0xff] }
 0x431   :  { %4694 = vrcp.f32 %v2576_v32  ;;  %v6731_v31 = vadd.f32 %v2585_v35, %v2583_v39  ;;  %v8418_v32 = vld [vmem:[#allocation97_spill] sm:$0xff]  ;;  %v8420_v39 = vld [vmem:[#allocation99_spill] sm:$0xff]  ;;  %v8421_v35 = vld [vmem:[#allocation100_spill] sm:$0xff] }
 0x432   :  { %4696 = vrcp.f32 %v2577_v63  ;;  %v8422_v63 = vld [vmem:[#allocation101_spill] sm:$0xff] }
 0x433   :  { %4698 = vtanh.f32 %v6731_v31 }
 0x43d   :  { %v4693_v1 = vpop.eup %4692 }
 0x43e   :  { %v4695_v29 = vpop.eup %4694 }
 0x43f   :  { %v4697_v52 = vpop.eup %4696  ;;  %v2590_v38 = vmul.f32 %v4695_v29, %v4693_v1  ;;  %v8423_v1 = vld [vmem:[#allocation102_spill] sm:$0xff]  ;;  %v8424_v29 = vld [vmem:[#allocation103_spill] sm:$0xff] }
 0x440   :  { %v4699_v33 = vpop.eup %4698 }
 0x441   :  { %v2591_v27 = vmul.f32 %v4699_v33, %v4697_v52  ;;  %v6740_v20 = vpack.c.bf16 %v2590_v38, %v2590_v38  ;;  %v8425_v52 = vld [vmem:[#allocation111_spill] sm:$0xff]  ;;  %v8426_v33 = vld [vmem:[#allocation112_spill] sm:$0xff] }
 0x443   :  { %v2593_v28 = vpack.c.bf16 %v2591_v27, %v2591_v27  ;;  %v4591_v34 = vpack.c.bf16 %v2591_v27, %v2590_v38  ;;  %v8427_v38 = vld [vmem:[#allocation113_spill] sm:$0xff]  ;;  %v8429_v27 = vld [vmem:[#allocation115_spill] sm:$0xff] }
 0x445   :  { %2643 = vmatprep.mubr.bf16.mxu0 %v2593_v28  ;;  %2684 = vmatprep.mubr.bf16.mxu1 %v2593_v28  ;;  %v2599_v26 = vrot.slane %v4591_v34, 7  ;;  %v8431_v34 = vld [vmem:[#allocation119_spill] sm:$0xff] }
 0x446   :  { %2644 = vmatmul.mubr.bf16.vlgmr.msra.gmra.mxu0 %v6740_v20  ;;  %2685 = vmatmul.mubr.bf16.vlgmr.msra.gmra.mxu1 %v6740_v20 }
 0x447   :  { %2694 = vmatpush1.bf16.msra.mxu0 %v8217_v62  ;;  %2735 = vmatpush1.bf16.msra.mxu1 %v8218_v19  ;;  %v2609_v53 = vsel %vm2607_vm2, %v2599_v26, %v2608_v8  ;;  %v8432_v8 = vld [vmem:[#allocation120_spill] sm:$0xff]  ;;  %v8433_v26 = vld [vmem:[#allocation121_spill] sm:$0xff]  ;;  %vm3418_vm2 = vsmask.f32 7946 }
 0x448   :  { %2725 = vmatprep.mubr.bf16.mxu0 %v2593_v28  ;;  %2766 = vmatprep.mubr.bf16.mxu1 %v2593_v28  ;;  %2610 = vst [vmem:[%s7735_s6] sm:$0x22] %v2609_v53  ;;  %v8430_v28 = vld [vmem:[#allocation118_spill] sm:$0xff]  ;;  %v8434_v53 = vld [vmem:[#allocation129_spill] sm:$0xff]  ;;  %vm7257_vm7 = vmand %vm3144_vm11, %vm3418_vm2  ;;  %vm3688_vm11 = vsmask.f32 3328 }
 0x449   :  { %2695 = vmatprep.subr.bf16.mxu0 %v8219_v54  ;;  %2736 = vmatprep.subr.bf16.mxu1 %v8220_v61  ;;  %vm3422_vm9 = vmor %vm7262_vm8, %vm7257_vm7  ;;  %vm3963_vm2 = vsmask.f32 7966 }
 0x44a   :  { %vm7612_vm7 = vmand %vm3690_vm12, %vm3963_vm2 }
 0x44b   :  { %2696 = vmatpush1.bf16.msra.mxu0 %v8221_v44  ;;  %2737 = vmatpush1.bf16.msra.mxu1 %v8222_v45 }
 0x44c   :  { %2697 = vmatprep.subr.bf16.mxu0 %v8223_v18  ;;  %2738 = vmatprep.subr.bf16.mxu1 %v8224_v4 }
 0x44f   :  { %2698 = vmatpush1.bf16.msra.mxu0 %v8225_v24  ;;  %2739 = vmatpush1.bf16.msra.mxu1 %v8226_v51 }
 0x450   :  { %2699 = vmatprep.subr.bf16.mxu0 %v8227_v5  ;;  %2740 = vmatprep.subr.bf16.mxu1 %v8317_v12 }
 0x453   :  { %2700 = vmatpush1.bf16.msra.mxu0 %v8318_v13  ;;  %2741 = vmatpush1.bf16.msra.mxu1 %v8319_v58 }
 0x454   :  { %2701 = vmatprep.subr.bf16.mxu0 %v8320_v42  ;;  %2742 = vmatprep.subr.bf16.mxu1 %v8321_v2 }
 0x457   :  { %2702 = vmatpush1.bf16.msra.mxu0 %v8322_v60  ;;  %2743 = vmatpush1.bf16.msra.mxu1 %v8323_v55 }
 0x458   :  { %2703 = vmatprep.subr.bf16.mxu0 %v8324_v59  ;;  %2744 = vmatprep.subr.bf16.mxu1 %v8325_v17 }
 0x45b   :  { %2704 = vmatpush1.bf16.msra.mxu0 %v8415_v43  ;;  %2745 = vmatpush1.bf16.msra.mxu1 %v8416_v10 }
 0x45c   :  { %2705 = vmatprep.subr.bf16.mxu0 %v8417_v37  ;;  %2746 = vmatprep.subr.bf16.mxu1 %v8418_v32 }
 0x45f   :  { %2706 = vmatpush1.bf16.msra.mxu0 %v8419_v15  ;;  %2747 = vmatpush1.bf16.msra.mxu1 %v8420_v39 }
 0x460   :  { %2707 = vmatprep.subr.bf16.mxu0 %v8421_v35  ;;  %2748 = vmatprep.subr.bf16.mxu1 %v8422_v63 }
 0x463   :  { %2708 = vmatpush1.bf16.msra.mxu0 %v8423_v1  ;;  %2749 = vmatpush1.bf16.msra.mxu1 %v8424_v29 }
 0x464   :  { %2709 = vmatprep.subr.bf16.mxu0 %v8336_v47  ;;  %2750 = vmatprep.subr.bf16.mxu1 %v8337_v56 }
 0x467   :  { %2710 = vmatpush2.bf16.msra.mxu0 %v8338_v0  ;;  %2751 = vmatpush2.bf16.msra.mxu1 %v8339_v48 }
 0x468   :  { %2711 = vmatprep.subr.bf16.mxu0 %v8340_v14  ;;  %2752 = vmatprep.subr.bf16.mxu1 %v8341_v16 }
 0x46b   :  { %2712 = vmatpush2.bf16.msra.mxu0 %v8342_v11  ;;  %2753 = vmatpush2.bf16.msra.mxu1 %v8425_v52 }
 0x46c   :  { %2713 = vmatprep.subr.bf16.mxu0 %v8426_v33  ;;  %2754 = vmatprep.subr.bf16.mxu1 %v8427_v38 }
 0x46f   :  { %2714 = vmatpush2.bf16.msra.mxu0 %v8428_v50  ;;  %2755 = vmatpush2.bf16.msra.mxu1 %v8429_v27 }
 0x470   :  { %2715 = vmatprep.subr.bf16.mxu0 %v8259_v46  ;;  %2756 = vmatprep.subr.bf16.mxu1 %v8260_v23  ;;  %v8507_v46 = vld [vmem:[#allocation139_spill] sm:$0xff] }
 0x471   :  { %v2790_v33 = vrot.slane %v8314_v41, %v8507_v46 }
 0x473   :  { %2716 = vmatpush2.bf16.msra.mxu0 %v8430_v28  ;;  %2757 = vmatpush2.bf16.msra.mxu1 %v8431_v34  ;;  %v8435_v34 = vld [vmem:[#allocation130_spill] sm:$0xff] }
 0x474   :  { %2717 = vmatprep.subr.bf16.mxu0 %v8432_v8  ;;  %2758 = vmatprep.subr.bf16.mxu1 %v8433_v26  ;;  %v8436_v8 = vld [vmem:[#allocation131_spill] sm:$0xff]  ;;  %v8437_v26 = vld [vmem:[#allocation132_spill] sm:$0xff] }
 0x477   :  { %2718 = vmatpush2.bf16.msra.mxu0 %v8347_v57  ;;  %2759 = vmatpush2.bf16.msra.mxu1 %v8348_v40  ;;  %v8438_v57 = vld [vmem:[#allocation133_spill] sm:$0xff]  ;;  %v8439_v40 = vld [vmem:[#allocation134_spill] sm:$0xff] }
 0x478   :  { %2719 = vmatprep.subr.bf16.mxu0 %v8349_v49  ;;  %2760 = vmatprep.subr.bf16.mxu1 %v8350_v3  ;;  %v8440_v49 = vld [vmem:[#allocation135_spill] sm:$0xff]  ;;  %v8441_v3 = vld [vmem:[#allocation8_spill] sm:$0xff] }
 0x47b   :  { %2720 = vmatpush2.bf16.msra.mxu0 %v8351_v36  ;;  %2761 = vmatpush2.bf16.msra.mxu1 %v6129_v6  ;;  %v8442_v36 = vld [vmem:[#allocation9_spill] sm:$0xff] }
 0x47c   :  { %2721 = vmatprep.subr.bf16.mxu0 %v6131_v21  ;;  %2762 = vmatprep.subr.bf16.mxu1 %v8434_v53  ;;  %v8443_v53 = vld [vmem:[#allocation10_spill] sm:$0xff]  ;;  %v8452_v21 = vld [vmem:[#allocation19_spill] sm:$0xff] }
 0x47f   :  { %2722 = vmatpush2.bf16.msra.mxu0 %v8435_v34  ;;  %2763 = vmatpush2.bf16.msra.mxu1 %v8436_v8  ;;  %v8444_v34 = vld [vmem:[#allocation11_spill] sm:$0xff]  ;;  %v8445_v8 = vld [vmem:[#allocation12_spill] sm:$0xff] }
 0x480   :  { %2723 = vmatprep.subr.bf16.mxu0 %v8437_v26  ;;  %2764 = vmatprep.subr.bf16.mxu1 %v8438_v57  ;;  %v8446_v26 = vld [vmem:[#allocation13_spill] sm:$0xff]  ;;  %v8447_v57 = vld [vmem:[#allocation14_spill] sm:$0xff] }
 0x483   :  { %2724 = vmatpush2.bf16.msra.mxu0 %v8439_v40  ;;  %2765 = vmatpush2.bf16.msra.mxu1 %v8440_v49  ;;  %v8448_v40 = vld [vmem:[#allocation15_spill] sm:$0xff]  ;;  %v8449_v49 = vld [vmem:[#allocation16_spill] sm:$0xff] }
 0x484   :  { %2883 = vmatprep.subr.bf16.mxu0 %v8441_v3  ;;  %2924 = vmatprep.subr.bf16.mxu1 %v8442_v36  ;;  %v8450_v3 = vld [vmem:[#allocation17_spill] sm:$0xff]  ;;  %v8451_v36 = vld [vmem:[#allocation18_spill] sm:$0xff] }
 0x486   :  { %2726 = vmatmul.mubr.bf16.vlgmr.msra.gmra.mxu0 %v6740_v20  ;;  %2767 = vmatmul.mubr.bf16.vlgmr.msra.gmra.mxu1 %v6740_v20  ;;  %v8453_v20 = vld [vmem:[#allocation20_spill] sm:$0xff] }
 0x487   :  { %2884 = vmatpush1.bf16.msra.mxu0 %v8443_v53  ;;  %2925 = vmatpush1.bf16.msra.mxu1 %v8444_v34  ;;  %v8454_v53 = vld [vmem:[#allocation21_spill] sm:$0xff]  ;;  %v8455_v34 = vld [vmem:[#allocation22_spill] sm:$0xff] }
 0x488   :  { %2885 = vmatprep.subr.bf16.mxu0 %v8445_v8  ;;  %2926 = vmatprep.subr.bf16.mxu1 %v8446_v26  ;;  %v8456_v8 = vld [vmem:[#allocation23_spill] sm:$0xff]  ;;  %v8457_v26 = vld [vmem:[#allocation24_spill] sm:$0xff] }
 0x48b   :  { %2886 = vmatpush1.bf16.msra.mxu0 %v8447_v57  ;;  %2927 = vmatpush1.bf16.msra.mxu1 %v8448_v40  ;;  %v8458_v57 = vld [vmem:[#allocation25_spill] sm:$0xff]  ;;  %v8459_v40 = vld [vmem:[#allocation26_spill] sm:$0xff] }
 0x48c   :  { %2887 = vmatprep.subr.bf16.mxu0 %v8449_v49  ;;  %2928 = vmatprep.subr.bf16.mxu1 %v8450_v3  ;;  %v8460_v49 = vld [vmem:[#allocation27_spill] sm:$0xff]  ;;  %v8461_v3 = vld [vmem:[#allocation28_spill] sm:$0xff] }
 0x48f   :  { %2888 = vmatpush1.bf16.msra.mxu0 %v8451_v36  ;;  %2929 = vmatpush1.bf16.msra.mxu1 %v8452_v21  ;;  %v8462_v36 = vld [vmem:[#allocation29_spill] sm:$0xff]  ;;  %v8463_v21 = vld [vmem:[#allocation30_spill] sm:$0xff] }
 0x490   :  { %2889 = vmatprep.subr.bf16.mxu0 %v8453_v20  ;;  %2930 = vmatprep.subr.bf16.mxu1 %v8454_v53  ;;  %v8464_v20 = vld [vmem:[#allocation31_spill] sm:$0xff]  ;;  %v8465_v53 = vld [vmem:[#allocation32_spill] sm:$0xff] }
 0x493   :  { %2890 = vmatpush1.bf16.msra.mxu0 %v8455_v34  ;;  %2931 = vmatpush1.bf16.msra.mxu1 %v8456_v8  ;;  %v8466_v34 = vld [vmem:[#allocation33_spill] sm:$0xff]  ;;  %v8467_v8 = vld [vmem:[#allocation34_spill] sm:$0xff] }
 0x494   :  { %2891 = vmatprep.subr.bf16.mxu0 %v8457_v26  ;;  %2932 = vmatprep.subr.bf16.mxu1 %v8458_v57  ;;  %v8468_v26 = vld [vmem:[#allocation35_spill] sm:$0xff]  ;;  %v8469_v57 = vld [vmem:[#allocation36_spill] sm:$0xff] }
 0x497   :  { %2892 = vmatpush1.bf16.msra.mxu0 %v8459_v40  ;;  %2933 = vmatpush1.bf16.msra.mxu1 %v8460_v49  ;;  %v8470_v40 = vld [vmem:[#allocation37_spill] sm:$0xff]  ;;  %v8471_v49 = vld [vmem:[#allocation38_spill] sm:$0xff] }
 0x498   :  { %2893 = vmatprep.subr.bf16.mxu0 %v8461_v3  ;;  %2934 = vmatprep.subr.bf16.mxu1 %v8462_v36  ;;  %v8472_v3 = vld [vmem:[#allocation39_spill] sm:$0xff]  ;;  %v8473_v36 = vld [vmem:[#allocation40_spill] sm:$0xff] }
 0x49b   :  { %2894 = vmatpush1.bf16.msra.mxu0 %v8463_v21  ;;  %2935 = vmatpush1.bf16.msra.mxu1 %v8464_v20  ;;  %v8474_v21 = vld [vmem:[#allocation41_spill] sm:$0xff]  ;;  %v8475_v20 = vld [vmem:[#allocation42_spill] sm:$0xff] }
 0x49c   :  { %2895 = vmatprep.subr.bf16.mxu0 %v8465_v53  ;;  %2936 = vmatprep.subr.bf16.mxu1 %v8466_v34  ;;  %v8476_v53 = vld [vmem:[#allocation43_spill] sm:$0xff]  ;;  %v8477_v34 = vld [vmem:[#allocation44_spill] sm:$0xff] }
 0x49f   :  { %2896 = vmatpush1.bf16.msra.mxu0 %v8467_v8  ;;  %2937 = vmatpush1.bf16.msra.mxu1 %v8468_v26  ;;  %v8478_v8 = vld [vmem:[#allocation45_spill] sm:$0xff]  ;;  %v8479_v26 = vld [vmem:[#allocation46_spill] sm:$0xff] }
 0x4a0   :  { %2897 = vmatprep.subr.bf16.mxu0 %v8469_v57  ;;  %2938 = vmatprep.subr.bf16.mxu1 %v8470_v40  ;;  %v8480_v57 = vld [vmem:[#allocation47_spill] sm:$0xff]  ;;  %v8481_v40 = vld [vmem:[#allocation48_spill] sm:$0xff] }
 0x4a3   :  { %2898 = vmatpush1.bf16.msra.mxu0 %v8471_v49  ;;  %2939 = vmatpush1.bf16.msra.mxu1 %v8472_v3  ;;  %v8482_v49 = vld [vmem:[#allocation49_spill] sm:$0xff]  ;;  %v8483_v3 = vld [vmem:[#allocation50_spill] sm:$0xff] }
 0x4a4   :  { %2899 = vmatprep.subr.bf16.mxu0 %v8473_v36  ;;  %2940 = vmatprep.subr.bf16.mxu1 %v8474_v21  ;;  %v8484_v36 = vld [vmem:[#allocation51_spill] sm:$0xff]  ;;  %v8485_v21 = vld [vmem:[#allocation52_spill] sm:$0xff] }
 0x4a7   :  { %2900 = vmatpush2.bf16.msra.mxu0 %v8475_v20  ;;  %2941 = vmatpush2.bf16.msra.mxu1 %v8476_v53  ;;  %v8486_v20 = vld [vmem:[#allocation53_spill] sm:$0xff]  ;;  %v8487_v53 = vld [vmem:[#allocation54_spill] sm:$0xff] }
 0x4a8   :  { %2901 = vmatprep.subr.bf16.mxu0 %v8477_v34  ;;  %2942 = vmatprep.subr.bf16.mxu1 %v8478_v8  ;;  %v8488_v34 = vld [vmem:[#allocation55_spill] sm:$0xff]  ;;  %v8489_v8 = vld [vmem:[#allocation56_spill] sm:$0xff] }
 0x4ab   :  { %2902 = vmatpush2.bf16.msra.mxu0 %v8479_v26  ;;  %2943 = vmatpush2.bf16.msra.mxu1 %v8480_v57  ;;  %v8490_v26 = vld [vmem:[#allocation57_spill] sm:$0xff]  ;;  %v8491_v57 = vld [vmem:[#allocation58_spill] sm:$0xff] }
 0x4ac   :  { %2903 = vmatprep.subr.bf16.mxu0 %v8481_v40  ;;  %2944 = vmatprep.subr.bf16.mxu1 %v8482_v49  ;;  %v8492_v40 = vld [vmem:[#allocation59_spill] sm:$0xff]  ;;  %v8493_v49 = vld [vmem:[#allocation60_spill] sm:$0xff] }
 0x4af   :  { %2904 = vmatpush2.bf16.msra.mxu0 %v8483_v3  ;;  %2945 = vmatpush2.bf16.msra.mxu1 %v8484_v36  ;;  %v8494_v3 = vld [vmem:[#allocation61_spill] sm:$0xff]  ;;  %v8495_v36 = vld [vmem:[#allocation62_spill] sm:$0xff] }
 0x4b0   :  { %2905 = vmatprep.subr.bf16.mxu0 %v8485_v21  ;;  %2946 = vmatprep.subr.bf16.mxu1 %v8486_v20  ;;  %v8496_v21 = vld [vmem:[#allocation63_spill] sm:$0xff]  ;;  %v8497_v20 = vld [vmem:[#allocation64_spill] sm:$0xff] }
 0x4b3   :  { %2906 = vmatpush2.bf16.msra.mxu0 %v8487_v53  ;;  %2947 = vmatpush2.bf16.msra.mxu1 %v8488_v34  ;;  %v8498_v53 = vld [vmem:[#allocation65_spill] sm:$0xff]  ;;  %v8499_v34 = vld [vmem:[#allocation66_spill] sm:$0xff] }
 0x4b4   :  { %2907 = vmatprep.subr.bf16.mxu0 %v8489_v8  ;;  %2948 = vmatprep.subr.bf16.mxu1 %v8490_v26  ;;  %v8500_v8 = vld [vmem:[#allocation67_spill] sm:$0xff]  ;;  %v8501_v26 = vld [vmem:[#allocation68_spill] sm:$0xff] }
 0x4b7   :  { %2908 = vmatpush2.bf16.msra.mxu0 %v8491_v57  ;;  %2949 = vmatpush2.bf16.msra.mxu1 %v8492_v40  ;;  %v8502_v57 = vld [vmem:[#allocation69_spill] sm:$0xff]  ;;  %v8503_v40 = vld [vmem:[#allocation70_spill] sm:$0xff] }
 0x4b8   :  { %2909 = vmatprep.subr.bf16.mxu0 %v8493_v49  ;;  %2950 = vmatprep.subr.bf16.mxu1 %v8494_v3  ;;  %v8504_v49 = vld [vmem:[#allocation71_spill] sm:$0xff]  ;;  %v8505_v3 = vld [vmem:[#allocation72_spill] sm:$0xff] }
 0x4bb   :  { %2910 = vmatpush2.bf16.msra.mxu0 %v8495_v36  ;;  %2951 = vmatpush2.bf16.msra.mxu1 %v8496_v21  ;;  %v8506_v36 = vld [vmem:[#allocation73_spill] sm:$0xff] }
 0x4bc   :  { %2911 = vmatprep.subr.bf16.mxu0 %v8497_v20  ;;  %2952 = vmatprep.subr.bf16.mxu1 %v8498_v53 }
 0x4bf   :  { %2912 = vmatpush2.bf16.msra.mxu0 %v8499_v34  ;;  %2953 = vmatpush2.bf16.msra.mxu1 %v8500_v8 }
 0x4c0   :  { %2913 = vmatprep.subr.bf16.mxu0 %v8501_v26  ;;  %2954 = vmatprep.subr.bf16.mxu1 %v8502_v57  ;;  %v8508_v26 = vld [vmem:[#allocation152_spill] sm:$0xff]  ;;  %v8509_v57 = vld [vmem:[#allocation153_spill] sm:$0xff] }
 0x4c1   :  { %v2778_v27 = vrot.slane %v8508_v26, %v8507_v46 }
 0x4c3   :  { %2914 = vmatpush2.bf16.msra.mxu0 %v8503_v40  ;;  %2955 = vmatpush2.bf16.msra.mxu1 %v8504_v49  ;;  %v2786_v40 = vrot.slane %v8509_v57, %v8507_v46  ;;  %v8510_v49 = vld [vmem:[#allocation155_spill] sm:$0xff] }
 0x4c4   :  { %2965 = vmatprep.subr.bf16.mxu0 %v8505_v3  ;;  %3006 = vmatprep.subr.bf16.mxu1 %v8506_v36  ;;  %v2782_v3 = vrot.slane %v8510_v49, %v8507_v46 }
 0x506   :  { %v2645_v21 = vpop.f32.mrf.mxu0  ;;  %v2686_v20 = vpop.f32.mrf.mxu1 }
 0x507   :  { %v2807_v50 = vadd.f32 %v2778_v27, %v2645_v21  ;;  %v2809_v38 = vadd.f32 %v2786_v40, %v2686_v20 }
 0x508   :  { %v2647_v6 = vpop.f32.mrf.mxu0  ;;  %v2688_v53 = vpop.f32.mrf.mxu1 }
 0x509   :  { %v2808_v36 = vadd.f32 %v2782_v3, %v2647_v6  ;;  %v4547_v52 = vmul.f32 -1.442695, %v2807_v50  ;;  %v2794_v6 = vrot.slane %v6351_v30, %v8507_v46  ;;  %v2802_v3 = vrot.slane %v6353_v9, %v8507_v46 }
 0x50a   :  { %v2649_v28 = vpop.f32.mrf.mxu0  ;;  %v2690_v34 = vpop.f32.mrf.mxu1 }
 0x50b   :  { %v2810_v28 = vadd.f32 %v2790_v33, %v2688_v53  ;;  %v4549_v34 = vmul.f32 -1.442695, %v2809_v38  ;;  %4700 = vpow2.f32 %v4547_v52  ;;  %v2798_v38 = vrot.slane %v6355_v7, %v8507_v46 }
 0x50c   :  { %v2650_v23 = vpop.f32.mrf.mxu0  ;;  %v2691_v8 = vpop.f32.mrf.mxu1 }
 0x50d   :  { %v4548_v23 = vmul.f32 -1.442695, %v2808_v36  ;;  %v4550_v8 = vmul.f32 -1.442695, %v2810_v28  ;;  %4702 = vpow2.f32 %v4549_v34 }
 0x50f   :  { %4704 = vpow2.f32 %v4548_v23 }
 0x510   :  { %4706 = vpow2.f32 %v4550_v8 }
 0x518   :  { %v4701_v26 = vpop.eup %4700 }
 0x519   :  { %v2821_v27 = vadd.f32 1.0, %v4701_v26 }
 0x51a   :  { %v4703_v57 = vpop.eup %4702 }
 0x51b   :  { %v2833_v49 = vadd.f32 1.0, %v4703_v57  ;;  %4708 = vrcp.f32 %v2821_v27  ;;  %v2806_v57 = vrot.slane %v6357_v22, %v8507_v46 }
 0x51c   :  { %v4705_v21 = vpop.eup %4704 }
 0x51d   :  { %v4707_v11 = vpop.eup %4706  ;;  %v2822_v40 = vadd.f32 1.0, %v4705_v21  ;;  %4710 = vrcp.f32 %v2833_v49 }
 0x51e   :  { %v2834_v36 = vadd.f32 1.0, %v4707_v11 }
 0x51f   :  { %4712 = vrcp.f32 %v2822_v40 }
 0x546   :  { %v2727_v52 = vpop.f32.mrf.mxu0  ;;  %v2768_v33 = vpop.f32.mrf.mxu1 }
 0x547   :  { %v2811_v50 = vadd.f32 %v2794_v6, %v2727_v52  ;;  %v2813_v53 = vadd.f32 %v2802_v3, %v2768_v33  ;;  %v4709_v6 = vpop.eup %4708 }
 0x548   :  { %v2729_v26 = vpop.f32.mrf.mxu0  ;;  %v2770_v20 = vpop.f32.mrf.mxu1 }
 0x549   :  { %4714 = vtanh.f32 %v2811_v50  ;;  %v4551_v28 = vmul.f32 -1.442695, %v2813_v53  ;;  %v2812_v34 = vadd.f32 %v2798_v38, %v2729_v26  ;;  %v2814_v23 = vadd.f32 %v2806_v57, %v2770_v20  ;;  %v4711_v3 = vpop.eup %4710 }
 0x54a   :  { %4716 = vrcp.f32 %v2834_v36  ;;  %v2731_v11 = vpop.f32.mrf.mxu0  ;;  %v2772_v8 = vpop.f32.mrf.mxu1  ;;  %v2853_v33 = vmul.f32 %v4711_v3, %v6727_v25 }
 0x54b   :  { %4718 = vpow2.f32 %v4551_v28  ;;  %v4552_v21 = vmul.f32 -1.442695, %v2814_v23  ;;  %v4713_v52 = vpop.eup %4712 }
 0x54c   :  { %4720 = vtanh.f32 %v2812_v34  ;;  %v2732_v27 = vpop.f32.mrf.mxu0  ;;  %v2773_v49 = vpop.f32.mrf.mxu1 }
 0x54d   :  { %4722 = vpow2.f32 %v4552_v21 }
 0x556   :  { %v4715_v46 = vpop.eup %4714 }
 0x557   :  { %v4717_v40 = vpop.eup %4716  ;;  %v2855_v50 = vmul.f32 %v4715_v46, %v4709_v6 }
 0x558   :  { %v4719_v53 = vpop.eup %4718  ;;  %v2854_v20 = vmul.f32 %v4717_v40, %v6731_v31  ;;  %v8527_v31 = vld [vmem:[#allocation122_spill] sm:$0xff] }
 0x559   :  { %v4721_v38 = vpop.eup %4720  ;;  %v6899_v57 = vadd.f32 %v2855_v50, %v2853_v33  ;;  %v2847_v36 = vadd.f32 1.0, %v4719_v53  ;;  %v2880_v50 = vld [vmem:[%s7735_s6] sm:$0x22] }
 0x55a   :  { %v4723_v26 = vpop.eup %4722  ;;  %v2856_v28 = vmul.f32 %v4721_v38, %v4713_v52  ;;  %v8515_v38 = vld [vmem:[#allocation110_spill] sm:$0xff]  ;;  %v8530_v52 = vld [vmem:[#allocation125_spill] sm:$0xff] }
 0x55b   :  { %4724 = vtanh.f32 %v6899_v57  ;;  %v2848_v34 = vadd.f32 1.0, %v4723_v26  ;;  %v8517_v26 = vld [vmem:[#allocation112_spill] sm:$0xff] }
 0x55c   :  { %4726 = vrcp.f32 %v2847_v36  ;;  %v6903_v23 = vadd.f32 %v2856_v28, %v2854_v20  ;;  %v8516_v36 = vld [vmem:[#allocation111_spill] sm:$0xff]  ;;  %v8518_v20 = vld [vmem:[#allocation113_spill] sm:$0xff]  ;;  %v8519_v28 = vld [vmem:[#allocation114_spill] sm:$0xff] }
 0x55d   :  { %4728 = vrcp.f32 %v2848_v34  ;;  %v8520_v34 = vld [vmem:[#allocation115_spill] sm:$0xff] }
 0x55e   :  { %4730 = vtanh.f32 %v6903_v23 }
 0x568   :  { %v4725_v25 = vpop.eup %4724 }
 0x569   :  { %v4727_v11 = vpop.eup %4726 }
 0x56a   :  { %v4729_v8 = vpop.eup %4728  ;;  %v2861_v27 = vmul.f32 %v4727_v11, %v4725_v25  ;;  %v8521_v25 = vld [vmem:[#allocation116_spill] sm:$0xff]  ;;  %v8522_v11 = vld [vmem:[#allocation117_spill] sm:$0xff] }
 0x56b   :  { %v4731_v21 = vpop.eup %4730 }
 0x56c   :  { %v2862_v49 = vmul.f32 %v4731_v21, %v4729_v8  ;;  %v6916_v46 = vpack.c.bf16 %v2861_v27, %v2861_v27  ;;  %v8523_v8 = vld [vmem:[#allocation118_spill] sm:$0xff]  ;;  %v8524_v21 = vld [vmem:[#allocation119_spill] sm:$0xff] }
 0x56e   :  { %v2864_v6 = vpack.c.bf16 %v2862_v49, %v2862_v49  ;;  %v4592_v3 = vpack.c.bf16 %v2862_v49, %v2861_v27  ;;  %v8525_v27 = vld [vmem:[#allocation120_spill] sm:$0xff]  ;;  %v8526_v49 = vld [vmem:[#allocation121_spill] sm:$0xff] }
 0x570   :  { %2915 = vmatprep.mubr.bf16.mxu0 %v2864_v6  ;;  %2956 = vmatprep.mubr.bf16.mxu1 %v2864_v6  ;;  %v2871_v40 = vshll.u32 %v4592_v3, 16  ;;  %v8529_v3 = vld [vmem:[#allocation124_spill] sm:$0xff] }
 0x571   :  { %2916 = vmatmul.mubr.bf16.vlgmr.msra.gmra.mxu0 %v6916_v46  ;;  %2957 = vmatmul.mubr.bf16.vlgmr.msra.gmra.mxu1 %v6916_v46 }
 0x572   :  { %v2873_v33 = vrot.slane %v2871_v40, 7  ;;  %2966 = vmatpush1.bf16.msra.mxu0 %v8217_v62  ;;  %3007 = vmatpush1.bf16.msra.mxu1 %v8218_v19  ;;  %v8531_v40 = vld [vmem:[#allocation126_spill] sm:$0xff] }
 0x573   :  { %2997 = vmatprep.mubr.bf16.mxu0 %v2864_v6  ;;  %3038 = vmatprep.mubr.bf16.mxu1 %v2864_v6  ;;  %v8528_v6 = vld [vmem:[#allocation123_spill] sm:$0xff] }
 0x574   :  { %2967 = vmatprep.subr.bf16.mxu0 %v8219_v54  ;;  %3008 = vmatprep.subr.bf16.mxu1 %v8220_v61  ;;  %v2881_v53 = vsel %vm2879_vm10, %v2873_v33, %v2880_v50  ;;  %v8532_v33 = vld [vmem:[#allocation127_spill] sm:$0xff]  ;;  %v8533_v50 = vld [vmem:[#allocation128_spill] sm:$0xff]  ;;  %vm3687_vm10 = vcmask 1043459  }
 0x575   :  { %2882 = vst [vmem:[%s7735_s6] sm:$0x22] %v2881_v53  ;;  %v8534_v53 = vld [vmem:[#allocation129_spill] sm:$0xff]  ;;  %vm7435_vm14 = vmand %vm3687_vm10, %vm3688_vm11 }
 0x576   :  { %2968 = vmatpush1.bf16.msra.mxu0 %v8221_v44  ;;  %3009 = vmatpush1.bf16.msra.mxu1 %v8222_v45  ;;  %vm3693_vm0 = vmor %vm3692_vm15, %vm7435_vm14 }
 0x577   :  { %2969 = vmatprep.subr.bf16.mxu0 %v8223_v18  ;;  %3010 = vmatprep.subr.bf16.mxu1 %v8224_v4 }
 0x57a   :  { %2970 = vmatpush1.bf16.msra.mxu0 %v8225_v24  ;;  %3011 = vmatpush1.bf16.msra.mxu1 %v8226_v51 }
 0x57b   :  { %2971 = vmatprep.subr.bf16.mxu0 %v8227_v5  ;;  %3012 = vmatprep.subr.bf16.mxu1 %v8317_v12 }
 0x57e   :  { %2972 = vmatpush1.bf16.msra.mxu0 %v8318_v13  ;;  %3013 = vmatpush1.bf16.msra.mxu1 %v8319_v58 }
 0x57f   :  { %2973 = vmatprep.subr.bf16.mxu0 %v8320_v42  ;;  %3014 = vmatprep.subr.bf16.mxu1 %v8321_v2 }
 0x582   :  { %2974 = vmatpush1.bf16.msra.mxu0 %v8322_v60  ;;  %3015 = vmatpush1.bf16.msra.mxu1 %v8323_v55 }
 0x583   :  { %2975 = vmatprep.subr.bf16.mxu0 %v8324_v59  ;;  %3016 = vmatprep.subr.bf16.mxu1 %v8325_v17 }
 0x586   :  { %2976 = vmatpush1.bf16.msra.mxu0 %v8415_v43  ;;  %3017 = vmatpush1.bf16.msra.mxu1 %v8416_v10 }
 0x587   :  { %2977 = vmatprep.subr.bf16.mxu0 %v8417_v37  ;;  %3018 = vmatprep.subr.bf16.mxu1 %v8418_v32 }
 0x58a   :  { %2978 = vmatpush1.bf16.msra.mxu0 %v8419_v15  ;;  %3019 = vmatpush1.bf16.msra.mxu1 %v8420_v39 }
 0x58b   :  { %2979 = vmatprep.subr.bf16.mxu0 %v8421_v35  ;;  %3020 = vmatprep.subr.bf16.mxu1 %v8422_v63 }
 0x58e   :  { %2980 = vmatpush1.bf16.msra.mxu0 %v8423_v1  ;;  %3021 = vmatpush1.bf16.msra.mxu1 %v8424_v29 }
 0x58f   :  { %2981 = vmatprep.subr.bf16.mxu0 %v8336_v47  ;;  %3022 = vmatprep.subr.bf16.mxu1 %v8337_v56 }
 0x592   :  { %2982 = vmatpush2.bf16.msra.mxu0 %v8338_v0  ;;  %3023 = vmatpush2.bf16.msra.mxu1 %v8339_v48 }
 0x593   :  { %2983 = vmatprep.subr.bf16.mxu0 %v8340_v14  ;;  %3024 = vmatprep.subr.bf16.mxu1 %v8341_v16 }
 0x596   :  { %2984 = vmatpush2.bf16.msra.mxu0 %v8515_v38  ;;  %3025 = vmatpush2.bf16.msra.mxu1 %v8516_v36 }
 0x597   :  { %2985 = vmatprep.subr.bf16.mxu0 %v8517_v26  ;;  %3026 = vmatprep.subr.bf16.mxu1 %v8518_v20 }
 0x59a   :  { %2986 = vmatpush2.bf16.msra.mxu0 %v8519_v28  ;;  %3027 = vmatpush2.bf16.msra.mxu1 %v8520_v34 }
 0x59b   :  { %2987 = vmatprep.subr.bf16.mxu0 %v8521_v25  ;;  %3028 = vmatprep.subr.bf16.mxu1 %v8522_v11  ;;  %v8607_v25 = vld [vmem:[#allocation144_spill] sm:$0xff] }
 0x59c   :  { %v3062_v26 = vrot.slane %v8314_v41, %v8607_v25 }
 0x59e   :  { %2988 = vmatpush2.bf16.msra.mxu0 %v8523_v8  ;;  %3029 = vmatpush2.bf16.msra.mxu1 %v8524_v21  ;;  %v8535_v21 = vld [vmem:[#allocation130_spill] sm:$0xff] }
 0x59f   :  { %2989 = vmatprep.subr.bf16.mxu0 %v8525_v27  ;;  %3030 = vmatprep.subr.bf16.mxu1 %v8526_v49  ;;  %v8536_v27 = vld [vmem:[#allocation131_spill] sm:$0xff]  ;;  %v8537_v49 = vld [vmem:[#allocation132_spill] sm:$0xff] }
 0x5a2   :  { %2990 = vmatpush2.bf16.msra.mxu0 %v8527_v31  ;;  %3031 = vmatpush2.bf16.msra.mxu1 %v8528_v6  ;;  %v8538_v31 = vld [vmem:[#allocation133_spill] sm:$0xff]  ;;  %v8539_v6 = vld [vmem:[#allocation134_spill] sm:$0xff] }
 0x5a3   :  { %2991 = vmatprep.subr.bf16.mxu0 %v8529_v3  ;;  %3032 = vmatprep.subr.bf16.mxu1 %v8530_v52  ;;  %v8540_v3 = vld [vmem:[#allocation135_spill] sm:$0xff]  ;;  %v8541_v52 = vld [vmem:[#allocation8_spill] sm:$0xff] }
 0x5a6   :  { %2992 = vmatpush2.bf16.msra.mxu0 %v8531_v40  ;;  %3033 = vmatpush2.bf16.msra.mxu1 %v8532_v33  ;;  %v8542_v40 = vld [vmem:[#allocation9_spill] sm:$0xff] }
 0x5a7   :  { %2993 = vmatprep.subr.bf16.mxu0 %v8533_v50  ;;  %3034 = vmatprep.subr.bf16.mxu1 %v8534_v53  ;;  %v8543_v53 = vld [vmem:[#allocation10_spill] sm:$0xff]  ;;  %v8552_v50 = vld [vmem:[#allocation19_spill] sm:$0xff] }
 0x5aa   :  { %2994 = vmatpush2.bf16.msra.mxu0 %v8535_v21  ;;  %3035 = vmatpush2.bf16.msra.mxu1 %v8536_v27  ;;  %v8544_v21 = vld [vmem:[#allocation11_spill] sm:$0xff]  ;;  %v8545_v27 = vld [vmem:[#allocation12_spill] sm:$0xff] }
 0x5ab   :  { %2995 = vmatprep.subr.bf16.mxu0 %v8537_v49  ;;  %3036 = vmatprep.subr.bf16.mxu1 %v8538_v31  ;;  %v8546_v49 = vld [vmem:[#allocation13_spill] sm:$0xff]  ;;  %v8547_v31 = vld [vmem:[#allocation14_spill] sm:$0xff] }
 0x5ae   :  { %2996 = vmatpush2.bf16.msra.mxu0 %v8539_v6  ;;  %3037 = vmatpush2.bf16.msra.mxu1 %v8540_v3  ;;  %v8548_v6 = vld [vmem:[#allocation15_spill] sm:$0xff]  ;;  %v8549_v3 = vld [vmem:[#allocation16_spill] sm:$0xff] }
 0x5af   :  { %3154 = vmatprep.subr.bf16.mxu0 %v8541_v52  ;;  %3195 = vmatprep.subr.bf16.mxu1 %v8542_v40  ;;  %v8550_v52 = vld [vmem:[#allocation17_spill] sm:$0xff]  ;;  %v8551_v40 = vld [vmem:[#allocation18_spill] sm:$0xff] }
 0x5b1   :  { %2998 = vmatmul.mubr.bf16.vlgmr.msra.gmra.mxu0 %v6916_v46  ;;  %3039 = vmatmul.mubr.bf16.vlgmr.msra.gmra.mxu1 %v6916_v46  ;;  %v8553_v46 = vld [vmem:[#allocation20_spill] sm:$0xff] }
 0x5b2   :  { %3155 = vmatpush1.bf16.msra.mxu0 %v8543_v53  ;;  %3196 = vmatpush1.bf16.msra.mxu1 %v8544_v21  ;;  %v8554_v53 = vld [vmem:[#allocation21_spill] sm:$0xff]  ;;  %v8555_v21 = vld [vmem:[#allocation22_spill] sm:$0xff] }
 0x5b3   :  { %3156 = vmatprep.subr.bf16.mxu0 %v8545_v27  ;;  %3197 = vmatprep.subr.bf16.mxu1 %v8546_v49  ;;  %v8556_v27 = vld [vmem:[#allocation23_spill] sm:$0xff]  ;;  %v8557_v49 = vld [vmem:[#allocation24_spill] sm:$0xff] }
 0x5b6   :  { %3157 = vmatpush1.bf16.msra.mxu0 %v8547_v31  ;;  %3198 = vmatpush1.bf16.msra.mxu1 %v8548_v6  ;;  %v8558_v31 = vld [vmem:[#allocation25_spill] sm:$0xff]  ;;  %v8559_v6 = vld [vmem:[#allocation26_spill] sm:$0xff] }
 0x5b7   :  { %3158 = vmatprep.subr.bf16.mxu0 %v8549_v3  ;;  %3199 = vmatprep.subr.bf16.mxu1 %v8550_v52  ;;  %v8560_v3 = vld [vmem:[#allocation27_spill] sm:$0xff]  ;;  %v8561_v52 = vld [vmem:[#allocation28_spill] sm:$0xff] }
 0x5ba   :  { %3159 = vmatpush1.bf16.msra.mxu0 %v8551_v40  ;;  %3200 = vmatpush1.bf16.msra.mxu1 %v8552_v50  ;;  %v8562_v40 = vld [vmem:[#allocation29_spill] sm:$0xff]  ;;  %v8563_v50 = vld [vmem:[#allocation30_spill] sm:$0xff] }
 0x5bb   :  { %3160 = vmatprep.subr.bf16.mxu0 %v8553_v46  ;;  %3201 = vmatprep.subr.bf16.mxu1 %v8554_v53  ;;  %v8564_v46 = vld [vmem:[#allocation31_spill] sm:$0xff]  ;;  %v8565_v53 = vld [vmem:[#allocation32_spill] sm:$0xff] }
 0x5be   :  { %3161 = vmatpush1.bf16.msra.mxu0 %v8555_v21  ;;  %3202 = vmatpush1.bf16.msra.mxu1 %v8556_v27  ;;  %v8566_v21 = vld [vmem:[#allocation33_spill] sm:$0xff]  ;;  %v8567_v27 = vld [vmem:[#allocation34_spill] sm:$0xff] }
 0x5bf   :  { %3162 = vmatprep.subr.bf16.mxu0 %v8557_v49  ;;  %3203 = vmatprep.subr.bf16.mxu1 %v8558_v31  ;;  %v8568_v49 = vld [vmem:[#allocation35_spill] sm:$0xff]  ;;  %v8569_v31 = vld [vmem:[#allocation36_spill] sm:$0xff] }
 0x5c2   :  { %3163 = vmatpush1.bf16.msra.mxu0 %v8559_v6  ;;  %3204 = vmatpush1.bf16.msra.mxu1 %v8560_v3  ;;  %v8570_v6 = vld [vmem:[#allocation37_spill] sm:$0xff]  ;;  %v8571_v3 = vld [vmem:[#allocation38_spill] sm:$0xff] }
 0x5c3   :  { %3164 = vmatprep.subr.bf16.mxu0 %v8561_v52  ;;  %3205 = vmatprep.subr.bf16.mxu1 %v8562_v40  ;;  %v8572_v52 = vld [vmem:[#allocation39_spill] sm:$0xff]  ;;  %v8573_v40 = vld [vmem:[#allocation40_spill] sm:$0xff] }
 0x5c6   :  { %3165 = vmatpush1.bf16.msra.mxu0 %v8563_v50  ;;  %3206 = vmatpush1.bf16.msra.mxu1 %v8564_v46  ;;  %v8574_v50 = vld [vmem:[#allocation41_spill] sm:$0xff]  ;;  %v8575_v46 = vld [vmem:[#allocation42_spill] sm:$0xff] }
 0x5c7   :  { %3166 = vmatprep.subr.bf16.mxu0 %v8565_v53  ;;  %3207 = vmatprep.subr.bf16.mxu1 %v8566_v21  ;;  %v8576_v53 = vld [vmem:[#allocation43_spill] sm:$0xff]  ;;  %v8577_v21 = vld [vmem:[#allocation44_spill] sm:$0xff] }
 0x5ca   :  { %3167 = vmatpush1.bf16.msra.mxu0 %v8567_v27  ;;  %3208 = vmatpush1.bf16.msra.mxu1 %v8568_v49  ;;  %v8578_v27 = vld [vmem:[#allocation45_spill] sm:$0xff]  ;;  %v8579_v49 = vld [vmem:[#allocation46_spill] sm:$0xff] }
 0x5cb   :  { %3168 = vmatprep.subr.bf16.mxu0 %v8569_v31  ;;  %3209 = vmatprep.subr.bf16.mxu1 %v8570_v6  ;;  %v8580_v31 = vld [vmem:[#allocation47_spill] sm:$0xff]  ;;  %v8581_v6 = vld [vmem:[#allocation48_spill] sm:$0xff] }
 0x5ce   :  { %3169 = vmatpush1.bf16.msra.mxu0 %v8571_v3  ;;  %3210 = vmatpush1.bf16.msra.mxu1 %v8572_v52  ;;  %v8582_v3 = vld [vmem:[#allocation49_spill] sm:$0xff]  ;;  %v8583_v52 = vld [vmem:[#allocation50_spill] sm:$0xff] }
 0x5cf   :  { %3170 = vmatprep.subr.bf16.mxu0 %v8573_v40  ;;  %3211 = vmatprep.subr.bf16.mxu1 %v8574_v50  ;;  %v8584_v40 = vld [vmem:[#allocation51_spill] sm:$0xff]  ;;  %v8585_v50 = vld [vmem:[#allocation52_spill] sm:$0xff] }
 0x5d2   :  { %3171 = vmatpush2.bf16.msra.mxu0 %v8575_v46  ;;  %3212 = vmatpush2.bf16.msra.mxu1 %v8576_v53  ;;  %v8586_v46 = vld [vmem:[#allocation53_spill] sm:$0xff]  ;;  %v8587_v53 = vld [vmem:[#allocation54_spill] sm:$0xff] }
 0x5d3   :  { %3172 = vmatprep.subr.bf16.mxu0 %v8577_v21  ;;  %3213 = vmatprep.subr.bf16.mxu1 %v8578_v27  ;;  %v8588_v21 = vld [vmem:[#allocation55_spill] sm:$0xff]  ;;  %v8589_v27 = vld [vmem:[#allocation56_spill] sm:$0xff] }
 0x5d6   :  { %3173 = vmatpush2.bf16.msra.mxu0 %v8579_v49  ;;  %3214 = vmatpush2.bf16.msra.mxu1 %v8580_v31  ;;  %v8590_v49 = vld [vmem:[#allocation57_spill] sm:$0xff]  ;;  %v8591_v31 = vld [vmem:[#allocation58_spill] sm:$0xff] }
 0x5d7   :  { %3174 = vmatprep.subr.bf16.mxu0 %v8581_v6  ;;  %3215 = vmatprep.subr.bf16.mxu1 %v8582_v3  ;;  %v8592_v6 = vld [vmem:[#allocation59_spill] sm:$0xff]  ;;  %v8593_v3 = vld [vmem:[#allocation60_spill] sm:$0xff] }
 0x5da   :  { %3175 = vmatpush2.bf16.msra.mxu0 %v8583_v52  ;;  %3216 = vmatpush2.bf16.msra.mxu1 %v8584_v40  ;;  %v8594_v52 = vld [vmem:[#allocation61_spill] sm:$0xff]  ;;  %v8595_v40 = vld [vmem:[#allocation62_spill] sm:$0xff] }
 0x5db   :  { %3176 = vmatprep.subr.bf16.mxu0 %v8585_v50  ;;  %3217 = vmatprep.subr.bf16.mxu1 %v8586_v46  ;;  %v8596_v50 = vld [vmem:[#allocation63_spill] sm:$0xff]  ;;  %v8597_v46 = vld [vmem:[#allocation64_spill] sm:$0xff] }
 0x5de   :  { %3177 = vmatpush2.bf16.msra.mxu0 %v8587_v53  ;;  %3218 = vmatpush2.bf16.msra.mxu1 %v8588_v21  ;;  %v8598_v53 = vld [vmem:[#allocation65_spill] sm:$0xff]  ;;  %v8599_v21 = vld [vmem:[#allocation66_spill] sm:$0xff] }
 0x5df   :  { %3178 = vmatprep.subr.bf16.mxu0 %v8589_v27  ;;  %3219 = vmatprep.subr.bf16.mxu1 %v8590_v49  ;;  %v8600_v27 = vld [vmem:[#allocation67_spill] sm:$0xff]  ;;  %v8601_v49 = vld [vmem:[#allocation68_spill] sm:$0xff] }
 0x5e2   :  { %3179 = vmatpush2.bf16.msra.mxu0 %v8591_v31  ;;  %3220 = vmatpush2.bf16.msra.mxu1 %v8592_v6  ;;  %v8602_v31 = vld [vmem:[#allocation69_spill] sm:$0xff]  ;;  %v8603_v6 = vld [vmem:[#allocation70_spill] sm:$0xff] }
 0x5e3   :  { %3180 = vmatprep.subr.bf16.mxu0 %v8593_v3  ;;  %3221 = vmatprep.subr.bf16.mxu1 %v8594_v52  ;;  %v8604_v3 = vld [vmem:[#allocation71_spill] sm:$0xff]  ;;  %v8605_v52 = vld [vmem:[#allocation72_spill] sm:$0xff] }
 0x5e6   :  { %3181 = vmatpush2.bf16.msra.mxu0 %v8595_v40  ;;  %3222 = vmatpush2.bf16.msra.mxu1 %v8596_v50  ;;  %v8606_v40 = vld [vmem:[#allocation73_spill] sm:$0xff] }
 0x5e7   :  { %3182 = vmatprep.subr.bf16.mxu0 %v8597_v46  ;;  %3223 = vmatprep.subr.bf16.mxu1 %v8598_v53 }
 0x5ea   :  { %3183 = vmatpush2.bf16.msra.mxu0 %v8599_v21  ;;  %3224 = vmatpush2.bf16.msra.mxu1 %v8600_v27 }
 0x5eb   :  { %3184 = vmatprep.subr.bf16.mxu0 %v8601_v49  ;;  %3225 = vmatprep.subr.bf16.mxu1 %v8602_v31  ;;  %v8608_v49 = vld [vmem:[#allocation152_spill] sm:$0xff]  ;;  %v8609_v31 = vld [vmem:[#allocation153_spill] sm:$0xff] }
 0x5ec   :  { %v3050_v34 = vrot.slane %v8608_v49, %v8607_v25 }
 0x5ee   :  { %3185 = vmatpush2.bf16.msra.mxu0 %v8603_v6  ;;  %3226 = vmatpush2.bf16.msra.mxu1 %v8604_v3  ;;  %v3058_v6 = vrot.slane %v8609_v31, %v8607_v25  ;;  %v8610_v3 = vld [vmem:[#allocation155_spill] sm:$0xff] }
 0x5ef   :  { %3236 = vmatprep.subr.bf16.mxu0 %v8605_v52  ;;  %3277 = vmatprep.subr.bf16.mxu1 %v8606_v40  ;;  %v3054_v52 = vrot.slane %v8610_v3, %v8607_v25 }
 0x631   :  { %v2917_v50 = vpop.f32.mrf.mxu0  ;;  %v2958_v46 = vpop.f32.mrf.mxu1 }
 0x632   :  { %v3079_v28 = vadd.f32 %v3050_v34, %v2917_v50  ;;  %v3081_v20 = vadd.f32 %v3058_v6, %v2958_v46 }
 0x633   :  { %v2919_v33 = vpop.f32.mrf.mxu0  ;;  %v2960_v53 = vpop.f32.mrf.mxu1 }
 0x634   :  { %v3080_v40 = vadd.f32 %v3054_v52, %v2919_v33  ;;  %v4554_v36 = vmul.f32 -1.442695, %v3079_v28  ;;  %v3066_v52 = vrot.slane %v6351_v30, %v8607_v25 }
 0x635   :  { %v2921_v8 = vpop.f32.mrf.mxu0  ;;  %v2962_v21 = vpop.f32.mrf.mxu1 }
 0x636   :  { %v3082_v8 = vadd.f32 %v3062_v26, %v2960_v53  ;;  %v4556_v21 = vmul.f32 -1.442695, %v3081_v20  ;;  %4732 = vpow2.f32 %v4554_v36  ;;  %v3074_v26 = vrot.slane %v6353_v9, %v8607_v25 }
 0x637   :  { %v2922_v11 = vpop.f32.mrf.mxu0  ;;  %v2963_v27 = vpop.f32.mrf.mxu1 }
 0x638   :  { %v4555_v11 = vmul.f32 -1.442695, %v3080_v40  ;;  %v4557_v27 = vmul.f32 -1.442695, %v3082_v8  ;;  %4734 = vpow2.f32 %v4556_v21  ;;  %v3070_v40 = vrot.slane %v6355_v7, %v8607_v25 }
 0x63a   :  { %4736 = vpow2.f32 %v4555_v11 }
 0x63b   :  { %4738 = vpow2.f32 %v4557_v27 }
 0x643   :  { %v4733_v49 = vpop.eup %4732 }
 0x644   :  { %v3093_v50 = vadd.f32 1.0, %v4733_v49  ;;  %v3078_v49 = vrot.slane %v6357_v22, %v8607_v25 }
 0x645   :  { %v4735_v31 = vpop.eup %4734 }
 0x646   :  { %v3105_v3 = vadd.f32 1.0, %v4735_v31  ;;  %4740 = vrcp.f32 %v3093_v50 }
 0x647   :  { %v4737_v34 = vpop.eup %4736 }
 0x648   :  { %v4739_v38 = vpop.eup %4738  ;;  %v3094_v6 = vadd.f32 1.0, %v4737_v34  ;;  %4742 = vrcp.f32 %v3105_v3 }
 0x649   :  { %v3106_v20 = vadd.f32 1.0, %v4739_v38 }
 0x64a   :  { %4744 = vrcp.f32 %v3094_v6 }
 0x671   :  { %v2999_v36 = vpop.f32.mrf.mxu0  ;;  %v3040_v28 = vpop.f32.mrf.mxu1 }
 0x672   :  { %v3083_v33 = vadd.f32 %v3066_v52, %v2999_v36  ;;  %v3085_v53 = vadd.f32 %v3074_v26, %v3040_v28  ;;  %v4741_v52 = vpop.eup %4740 }
 0x673   :  { %v3001_v31 = vpop.f32.mrf.mxu0  ;;  %v3042_v46 = vpop.f32.mrf.mxu1 }
 0x674   :  { %4746 = vtanh.f32 %v3083_v33  ;;  %v4558_v8 = vmul.f32 -1.442695, %v3085_v53  ;;  %v3084_v21 = vadd.f32 %v3070_v40, %v3001_v31  ;;  %v3086_v11 = vadd.f32 %v3078_v49, %v3042_v46  ;;  %v4743_v26 = vpop.eup %4742 }
 0x675   :  { %4748 = vrcp.f32 %v3106_v20  ;;  %v3003_v38 = vpop.f32.mrf.mxu0  ;;  %v3044_v27 = vpop.f32.mrf.mxu1  ;;  %v3125_v28 = vmul.f32 %v4743_v26, %v6899_v57 }
 0x676   :  { %4750 = vpow2.f32 %v4558_v8  ;;  %v4559_v34 = vmul.f32 -1.442695, %v3086_v11  ;;  %v4745_v36 = vpop.eup %4744 }
 0x677   :  { %4752 = vtanh.f32 %v3084_v21  ;;  %v3004_v50 = vpop.f32.mrf.mxu0  ;;  %v3045_v3 = vpop.f32.mrf.mxu1 }
 0x678   :  { %4754 = vpow2.f32 %v4559_v34 }
 0x681   :  { %v4747_v25 = vpop.eup %4746 }
 0x682   :  { %v4749_v6 = vpop.eup %4748  ;;  %v3127_v33 = vmul.f32 %v4747_v25, %v4741_v52  ;;  %v3151_v25 = vld [vmem:[%s7735_s6] sm:$0x44] }
 0x683   :  { %v4751_v53 = vpop.eup %4750  ;;  %v3126_v46 = vmul.f32 %v4749_v6, %v6903_v23  ;;  %v8626_v23 = vld [vmem:[#allocation123_spill] sm:$0xff] }
 0x684   :  { %v4753_v40 = vpop.eup %4752  ;;  %v7077_v49 = vadd.f32 %v3127_v33, %v3125_v28  ;;  %v3119_v20 = vadd.f32 1.0, %v4751_v53  ;;  %v8613_v33 = vld [vmem:[#allocation110_spill] sm:$0xff]  ;;  %v8614_v53 = vld [vmem:[#allocation111_spill] sm:$0xff] }
 0x685   :  { %v4755_v31 = vpop.eup %4754  ;;  %v3128_v8 = vmul.f32 %v4753_v40, %v4745_v36  ;;  %v8615_v40 = vld [vmem:[#allocation112_spill] sm:$0xff] }
 0x686   :  { %4756 = vtanh.f32 %v7077_v49  ;;  %v3120_v21 = vadd.f32 1.0, %v4755_v31  ;;  %v8617_v31 = vld [vmem:[#allocation114_spill] sm:$0xff] }
 0x687   :  { %4758 = vrcp.f32 %v3119_v20  ;;  %v7081_v11 = vadd.f32 %v3128_v8, %v3126_v46  ;;  %v8616_v20 = vld [vmem:[#allocation113_spill] sm:$0xff]  ;;  %v8618_v46 = vld [vmem:[#allocation115_spill] sm:$0xff]  ;;  %v8619_v8 = vld [vmem:[#allocation116_spill] sm:$0xff] }
 0x688   :  { %4760 = vrcp.f32 %v3120_v21  ;;  %v8620_v21 = vld [vmem:[#allocation117_spill] sm:$0xff] }
 0x689   :  { %4762 = vtanh.f32 %v7081_v11 }
 0x693   :  { %v4757_v57 = vpop.eup %4756 }
 0x694   :  { %v4759_v38 = vpop.eup %4758 }
 0x695   :  { %v4761_v27 = vpop.eup %4760  ;;  %v3133_v50 = vmul.f32 %v4759_v38, %v4757_v57  ;;  %v8621_v57 = vld [vmem:[#allocation118_spill] sm:$0xff]  ;;  %v8622_v38 = vld [vmem:[#allocation119_spill] sm:$0xff] }
 0x696   :  { %v4763_v34 = vpop.eup %4762 }
 0x697   :  { %v3134_v3 = vmul.f32 %v4763_v34, %v4761_v27  ;;  %v7090_v36 = vpack.c.bf16 %v3133_v50, %v3133_v50  ;;  %v8623_v27 = vld [vmem:[#allocation120_spill] sm:$0xff]  ;;  %v8624_v34 = vld [vmem:[#allocation121_spill] sm:$0xff] }
 0x699   :  { %v3136_v52 = vpack.c.bf16 %v3134_v3, %v3134_v3  ;;  %v4593_v26 = vpack.c.bf16 %v3134_v3, %v3133_v50  ;;  %v8625_v50 = vld [vmem:[#allocation122_spill] sm:$0xff]  ;;  %v8627_v3 = vld [vmem:[#allocation124_spill] sm:$0xff] }
 0x69b   :  { %3186 = vmatprep.mubr.bf16.mxu0 %v3136_v52  ;;  %3227 = vmatprep.mubr.bf16.mxu1 %v3136_v52  ;;  %v3142_v6 = vrot.slane %v4593_v26, 6  ;;  %v8629_v26 = vld [vmem:[#allocation126_spill] sm:$0xff] }
 0x69c   :  { %3187 = vmatmul.mubr.bf16.vlgmr.msra.gmra.mxu0 %v7090_v36  ;;  %3228 = vmatmul.mubr.bf16.vlgmr.msra.gmra.mxu1 %v7090_v36 }
 0x69d   :  { %3237 = vmatpush1.bf16.msra.mxu0 %v8217_v62  ;;  %3278 = vmatpush1.bf16.msra.mxu1 %v8218_v19  ;;  %v3152_v28 = vsel %vm3150_vm1, %v3142_v6, %v3151_v25  ;;  %v8630_v25 = vld [vmem:[#allocation127_spill] sm:$0xff]  ;;  %v8631_v6 = vld [vmem:[#allocation128_spill] sm:$0xff]  ;;  %vm3961_vm1 = vsmask.f32 7950 }
 0x69e   :  { %3268 = vmatprep.mubr.bf16.mxu0 %v3136_v52  ;;  %3309 = vmatprep.mubr.bf16.mxu1 %v3136_v52  ;;  %3153 = vst [vmem:[%s7735_s6] sm:$0x44] %v3152_v28  ;;  %v8628_v52 = vld [vmem:[#allocation125_spill] sm:$0xff]  ;;  %vm7607_vm3 = vmand %vm3687_vm10, %vm3961_vm1 }
 0x69f   :  { %3238 = vmatprep.subr.bf16.mxu0 %v8219_v54  ;;  %3279 = vmatprep.subr.bf16.mxu1 %v8220_v61  ;;  %v8632_v28 = vld [vmem:[#allocation129_spill] sm:$0xff]  ;;  %vm3965_vm8 = vmor %vm7612_vm7, %vm7607_vm3 }
 0x6a1   :  { %3239 = vmatpush1.bf16.msra.mxu0 %v8221_v44  ;;  %3280 = vmatpush1.bf16.msra.mxu1 %v8222_v45 }
 0x6a2   :  { %3240 = vmatprep.subr.bf16.mxu0 %v8223_v18  ;;  %3281 = vmatprep.subr.bf16.mxu1 %v8224_v4 }
 0x6a5   :  { %3241 = vmatpush1.bf16.msra.mxu0 %v8225_v24  ;;  %3282 = vmatpush1.bf16.msra.mxu1 %v8226_v51 }
 0x6a6   :  { %3242 = vmatprep.subr.bf16.mxu0 %v8227_v5  ;;  %3283 = vmatprep.subr.bf16.mxu1 %v8317_v12 }
 0x6a9   :  { %3243 = vmatpush1.bf16.msra.mxu0 %v8318_v13  ;;  %3284 = vmatpush1.bf16.msra.mxu1 %v8319_v58 }
 0x6aa   :  { %3244 = vmatprep.subr.bf16.mxu0 %v8320_v42  ;;  %3285 = vmatprep.subr.bf16.mxu1 %v8321_v2 }
 0x6ad   :  { %3245 = vmatpush1.bf16.msra.mxu0 %v8322_v60  ;;  %3286 = vmatpush1.bf16.msra.mxu1 %v8323_v55 }
 0x6ae   :  { %3246 = vmatprep.subr.bf16.mxu0 %v8324_v59  ;;  %3287 = vmatprep.subr.bf16.mxu1 %v8325_v17 }
 0x6b1   :  { %3247 = vmatpush1.bf16.msra.mxu0 %v8415_v43  ;;  %3288 = vmatpush1.bf16.msra.mxu1 %v8416_v10 }
 0x6b2   :  { %3248 = vmatprep.subr.bf16.mxu0 %v8417_v37  ;;  %3289 = vmatprep.subr.bf16.mxu1 %v8418_v32 }
 0x6b5   :  { %3249 = vmatpush1.bf16.msra.mxu0 %v8419_v15  ;;  %3290 = vmatpush1.bf16.msra.mxu1 %v8420_v39 }
 0x6b6   :  { %3250 = vmatprep.subr.bf16.mxu0 %v8421_v35  ;;  %3291 = vmatprep.subr.bf16.mxu1 %v8422_v63 }
 0x6b9   :  { %3251 = vmatpush1.bf16.msra.mxu0 %v8423_v1  ;;  %3292 = vmatpush1.bf16.msra.mxu1 %v8424_v29 }
 0x6ba   :  { %3252 = vmatprep.subr.bf16.mxu0 %v8336_v47  ;;  %3293 = vmatprep.subr.bf16.mxu1 %v8337_v56 }
 0x6bd   :  { %3253 = vmatpush2.bf16.msra.mxu0 %v8338_v0  ;;  %3294 = vmatpush2.bf16.msra.mxu1 %v8339_v48 }
 0x6be   :  { %3254 = vmatprep.subr.bf16.mxu0 %v8340_v14  ;;  %3295 = vmatprep.subr.bf16.mxu1 %v8341_v16 }
 0x6c1   :  { %3255 = vmatpush2.bf16.msra.mxu0 %v8613_v33  ;;  %3296 = vmatpush2.bf16.msra.mxu1 %v8614_v53 }
 0x6c2   :  { %3256 = vmatprep.subr.bf16.mxu0 %v8615_v40  ;;  %3297 = vmatprep.subr.bf16.mxu1 %v8616_v20 }
 0x6c5   :  { %3257 = vmatpush2.bf16.msra.mxu0 %v8617_v31  ;;  %3298 = vmatpush2.bf16.msra.mxu1 %v8618_v46 }
 0x6c6   :  { %3258 = vmatprep.subr.bf16.mxu0 %v8619_v8  ;;  %3299 = vmatprep.subr.bf16.mxu1 %v8620_v21  ;;  %v8705_v8 = vld [vmem:[#allocation146_spill] sm:$0xff] }
 0x6c7   :  { %v3333_v40 = vrot.slane %v8314_v41, %v8705_v8 }
 0x6c9   :  { %3259 = vmatpush2.bf16.msra.mxu0 %v8621_v57  ;;  %3300 = vmatpush2.bf16.msra.mxu1 %v8622_v38  ;;  %v8633_v38 = vld [vmem:[#allocation130_spill] sm:$0xff] }
 0x6ca   :  { %3260 = vmatprep.subr.bf16.mxu0 %v8623_v27  ;;  %3301 = vmatprep.subr.bf16.mxu1 %v8624_v34  ;;  %v8634_v27 = vld [vmem:[#allocation131_spill] sm:$0xff]  ;;  %v8635_v34 = vld [vmem:[#allocation132_spill] sm:$0xff] }
 0x6cd   :  { %3261 = vmatpush2.bf16.msra.mxu0 %v8625_v50  ;;  %3302 = vmatpush2.bf16.msra.mxu1 %v8626_v23  ;;  %v8636_v50 = vld [vmem:[#allocation133_spill] sm:$0xff]  ;;  %v8637_v23 = vld [vmem:[#allocation134_spill] sm:$0xff] }
 0x6ce   :  { %3262 = vmatprep.subr.bf16.mxu0 %v8627_v3  ;;  %3303 = vmatprep.subr.bf16.mxu1 %v8628_v52  ;;  %v8638_v3 = vld [vmem:[#allocation135_spill] sm:$0xff]  ;;  %v8639_v52 = vld [vmem:[#allocation8_spill] sm:$0xff] }
 0x6d1   :  { %3263 = vmatpush2.bf16.msra.mxu0 %v8629_v26  ;;  %3304 = vmatpush2.bf16.msra.mxu1 %v8630_v25  ;;  %v8640_v26 = vld [vmem:[#allocation9_spill] sm:$0xff] }
 0x6d2   :  { %3264 = vmatprep.subr.bf16.mxu0 %v8631_v6  ;;  %3305 = vmatprep.subr.bf16.mxu1 %v8632_v28  ;;  %v8641_v28 = vld [vmem:[#allocation10_spill] sm:$0xff]  ;;  %v8650_v6 = vld [vmem:[#allocation19_spill] sm:$0xff] }
 0x6d5   :  { %3265 = vmatpush2.bf16.msra.mxu0 %v8633_v38  ;;  %3306 = vmatpush2.bf16.msra.mxu1 %v8634_v27  ;;  %v8642_v38 = vld [vmem:[#allocation11_spill] sm:$0xff]  ;;  %v8643_v27 = vld [vmem:[#allocation12_spill] sm:$0xff] }
 0x6d6   :  { %3266 = vmatprep.subr.bf16.mxu0 %v8635_v34  ;;  %3307 = vmatprep.subr.bf16.mxu1 %v8636_v50  ;;  %v8644_v34 = vld [vmem:[#allocation13_spill] sm:$0xff]  ;;  %v8645_v50 = vld [vmem:[#allocation14_spill] sm:$0xff] }
 0x6d9   :  { %3267 = vmatpush2.bf16.msra.mxu0 %v8637_v23  ;;  %3308 = vmatpush2.bf16.msra.mxu1 %v8638_v3  ;;  %v8646_v23 = vld [vmem:[#allocation15_spill] sm:$0xff]  ;;  %v8647_v3 = vld [vmem:[#allocation16_spill] sm:$0xff] }
 0x6da   :  { %3426 = vmatprep.subr.bf16.mxu0 %v8639_v52  ;;  %3467 = vmatprep.subr.bf16.mxu1 %v8640_v26  ;;  %v8648_v52 = vld [vmem:[#allocation17_spill] sm:$0xff]  ;;  %v8649_v26 = vld [vmem:[#allocation18_spill] sm:$0xff] }
 0x6dc   :  { %3269 = vmatmul.mubr.bf16.vlgmr.msra.gmra.mxu0 %v7090_v36  ;;  %3310 = vmatmul.mubr.bf16.vlgmr.msra.gmra.mxu1 %v7090_v36  ;;  %v8651_v36 = vld [vmem:[#allocation20_spill] sm:$0xff] }
 0x6dd   :  { %3427 = vmatpush1.bf16.msra.mxu0 %v8641_v28  ;;  %3468 = vmatpush1.bf16.msra.mxu1 %v8642_v38  ;;  %v8652_v28 = vld [vmem:[#allocation21_spill] sm:$0xff]  ;;  %v8653_v38 = vld [vmem:[#allocation22_spill] sm:$0xff] }
 0x6de   :  { %3428 = vmatprep.subr.bf16.mxu0 %v8643_v27  ;;  %3469 = vmatprep.subr.bf16.mxu1 %v8644_v34  ;;  %v8654_v27 = vld [vmem:[#allocation23_spill] sm:$0xff]  ;;  %v8655_v34 = vld [vmem:[#allocation24_spill] sm:$0xff] }
 0x6e1   :  { %3429 = vmatpush1.bf16.msra.mxu0 %v8645_v50  ;;  %3470 = vmatpush1.bf16.msra.mxu1 %v8646_v23  ;;  %v8656_v50 = vld [vmem:[#allocation25_spill] sm:$0xff]  ;;  %v8657_v23 = vld [vmem:[#allocation26_spill] sm:$0xff] }
 0x6e2   :  { %3430 = vmatprep.subr.bf16.mxu0 %v8647_v3  ;;  %3471 = vmatprep.subr.bf16.mxu1 %v8648_v52  ;;  %v8658_v3 = vld [vmem:[#allocation27_spill] sm:$0xff]  ;;  %v8659_v52 = vld [vmem:[#allocation28_spill] sm:$0xff] }
 0x6e5   :  { %3431 = vmatpush1.bf16.msra.mxu0 %v8649_v26  ;;  %3472 = vmatpush1.bf16.msra.mxu1 %v8650_v6  ;;  %v8660_v26 = vld [vmem:[#allocation29_spill] sm:$0xff]  ;;  %v8661_v6 = vld [vmem:[#allocation30_spill] sm:$0xff] }
 0x6e6   :  { %3432 = vmatprep.subr.bf16.mxu0 %v8651_v36  ;;  %3473 = vmatprep.subr.bf16.mxu1 %v8652_v28  ;;  %v8662_v36 = vld [vmem:[#allocation31_spill] sm:$0xff]  ;;  %v8663_v28 = vld [vmem:[#allocation32_spill] sm:$0xff] }
 0x6e9   :  { %3433 = vmatpush1.bf16.msra.mxu0 %v8653_v38  ;;  %3474 = vmatpush1.bf16.msra.mxu1 %v8654_v27  ;;  %v8664_v38 = vld [vmem:[#allocation33_spill] sm:$0xff]  ;;  %v8665_v27 = vld [vmem:[#allocation34_spill] sm:$0xff] }
 0x6ea   :  { %3434 = vmatprep.subr.bf16.mxu0 %v8655_v34  ;;  %3475 = vmatprep.subr.bf16.mxu1 %v8656_v50  ;;  %v8666_v34 = vld [vmem:[#allocation35_spill] sm:$0xff]  ;;  %v8667_v50 = vld [vmem:[#allocation36_spill] sm:$0xff] }
 0x6ed   :  { %3435 = vmatpush1.bf16.msra.mxu0 %v8657_v23  ;;  %3476 = vmatpush1.bf16.msra.mxu1 %v8658_v3  ;;  %v8668_v23 = vld [vmem:[#allocation37_spill] sm:$0xff]  ;;  %v8669_v3 = vld [vmem:[#allocation38_spill] sm:$0xff] }
 0x6ee   :  { %3436 = vmatprep.subr.bf16.mxu0 %v8659_v52  ;;  %3477 = vmatprep.subr.bf16.mxu1 %v8660_v26  ;;  %v8670_v52 = vld [vmem:[#allocation39_spill] sm:$0xff]  ;;  %v8671_v26 = vld [vmem:[#allocation40_spill] sm:$0xff] }
 0x6f1   :  { %3437 = vmatpush1.bf16.msra.mxu0 %v8661_v6  ;;  %3478 = vmatpush1.bf16.msra.mxu1 %v8662_v36  ;;  %v8672_v6 = vld [vmem:[#allocation41_spill] sm:$0xff]  ;;  %v8673_v36 = vld [vmem:[#allocation42_spill] sm:$0xff] }
 0x6f2   :  { %3438 = vmatprep.subr.bf16.mxu0 %v8663_v28  ;;  %3479 = vmatprep.subr.bf16.mxu1 %v8664_v38  ;;  %v8674_v28 = vld [vmem:[#allocation43_spill] sm:$0xff]  ;;  %v8675_v38 = vld [vmem:[#allocation44_spill] sm:$0xff] }
 0x6f5   :  { %3439 = vmatpush1.bf16.msra.mxu0 %v8665_v27  ;;  %3480 = vmatpush1.bf16.msra.mxu1 %v8666_v34  ;;  %v8676_v27 = vld [vmem:[#allocation45_spill] sm:$0xff]  ;;  %v8677_v34 = vld [vmem:[#allocation46_spill] sm:$0xff] }
 0x6f6   :  { %3440 = vmatprep.subr.bf16.mxu0 %v8667_v50  ;;  %3481 = vmatprep.subr.bf16.mxu1 %v8668_v23  ;;  %v8678_v50 = vld [vmem:[#allocation47_spill] sm:$0xff]  ;;  %v8679_v23 = vld [vmem:[#allocation48_spill] sm:$0xff] }
 0x6f9   :  { %3441 = vmatpush1.bf16.msra.mxu0 %v8669_v3  ;;  %3482 = vmatpush1.bf16.msra.mxu1 %v8670_v52  ;;  %v8680_v3 = vld [vmem:[#allocation49_spill] sm:$0xff]  ;;  %v8681_v52 = vld [vmem:[#allocation50_spill] sm:$0xff] }
 0x6fa   :  { %3442 = vmatprep.subr.bf16.mxu0 %v8671_v26  ;;  %3483 = vmatprep.subr.bf16.mxu1 %v8672_v6  ;;  %v8682_v26 = vld [vmem:[#allocation51_spill] sm:$0xff]  ;;  %v8683_v6 = vld [vmem:[#allocation52_spill] sm:$0xff] }
 0x6fd   :  { %3443 = vmatpush2.bf16.msra.mxu0 %v8673_v36  ;;  %3484 = vmatpush2.bf16.msra.mxu1 %v8674_v28  ;;  %v8684_v36 = vld [vmem:[#allocation53_spill] sm:$0xff]  ;;  %v8685_v28 = vld [vmem:[#allocation54_spill] sm:$0xff] }
 0x6fe   :  { %3444 = vmatprep.subr.bf16.mxu0 %v8675_v38  ;;  %3485 = vmatprep.subr.bf16.mxu1 %v8676_v27  ;;  %v8686_v38 = vld [vmem:[#allocation55_spill] sm:$0xff]  ;;  %v8687_v27 = vld [vmem:[#allocation56_spill] sm:$0xff] }
 0x701   :  { %3445 = vmatpush2.bf16.msra.mxu0 %v8677_v34  ;;  %3486 = vmatpush2.bf16.msra.mxu1 %v8678_v50  ;;  %v8688_v34 = vld [vmem:[#allocation57_spill] sm:$0xff]  ;;  %v8689_v50 = vld [vmem:[#allocation58_spill] sm:$0xff] }
 0x702   :  { %3446 = vmatprep.subr.bf16.mxu0 %v8679_v23  ;;  %3487 = vmatprep.subr.bf16.mxu1 %v8680_v3  ;;  %v8690_v23 = vld [vmem:[#allocation59_spill] sm:$0xff]  ;;  %v8691_v3 = vld [vmem:[#allocation60_spill] sm:$0xff] }
 0x705   :  { %3447 = vmatpush2.bf16.msra.mxu0 %v8681_v52  ;;  %3488 = vmatpush2.bf16.msra.mxu1 %v8682_v26  ;;  %v8692_v52 = vld [vmem:[#allocation61_spill] sm:$0xff]  ;;  %v8693_v26 = vld [vmem:[#allocation62_spill] sm:$0xff] }
 0x706   :  { %3448 = vmatprep.subr.bf16.mxu0 %v8683_v6  ;;  %3489 = vmatprep.subr.bf16.mxu1 %v8684_v36  ;;  %v8694_v6 = vld [vmem:[#allocation63_spill] sm:$0xff]  ;;  %v8695_v36 = vld [vmem:[#allocation64_spill] sm:$0xff] }
 0x709   :  { %3449 = vmatpush2.bf16.msra.mxu0 %v8685_v28  ;;  %3490 = vmatpush2.bf16.msra.mxu1 %v8686_v38  ;;  %v8696_v28 = vld [vmem:[#allocation65_spill] sm:$0xff]  ;;  %v8697_v38 = vld [vmem:[#allocation66_spill] sm:$0xff] }
 0x70a   :  { %3450 = vmatprep.subr.bf16.mxu0 %v8687_v27  ;;  %3491 = vmatprep.subr.bf16.mxu1 %v8688_v34  ;;  %v8698_v27 = vld [vmem:[#allocation67_spill] sm:$0xff]  ;;  %v8699_v34 = vld [vmem:[#allocation68_spill] sm:$0xff] }
 0x70d   :  { %3451 = vmatpush2.bf16.msra.mxu0 %v8689_v50  ;;  %3492 = vmatpush2.bf16.msra.mxu1 %v8690_v23  ;;  %v8700_v50 = vld [vmem:[#allocation69_spill] sm:$0xff]  ;;  %v8701_v23 = vld [vmem:[#allocation70_spill] sm:$0xff] }
 0x70e   :  { %3452 = vmatprep.subr.bf16.mxu0 %v8691_v3  ;;  %3493 = vmatprep.subr.bf16.mxu1 %v8692_v52  ;;  %v8702_v3 = vld [vmem:[#allocation71_spill] sm:$0xff]  ;;  %v8703_v52 = vld [vmem:[#allocation72_spill] sm:$0xff] }
 0x711   :  { %3453 = vmatpush2.bf16.msra.mxu0 %v8693_v26  ;;  %3494 = vmatpush2.bf16.msra.mxu1 %v8694_v6  ;;  %v8704_v26 = vld [vmem:[#allocation73_spill] sm:$0xff] }
 0x712   :  { %3454 = vmatprep.subr.bf16.mxu0 %v8695_v36  ;;  %3495 = vmatprep.subr.bf16.mxu1 %v8696_v28 }
 0x715   :  { %3455 = vmatpush2.bf16.msra.mxu0 %v8697_v38  ;;  %3496 = vmatpush2.bf16.msra.mxu1 %v8698_v27 }
 0x716   :  { %3456 = vmatprep.subr.bf16.mxu0 %v8699_v34  ;;  %3497 = vmatprep.subr.bf16.mxu1 %v8700_v50  ;;  %v8706_v34 = vld [vmem:[#allocation152_spill] sm:$0xff]  ;;  %v8707_v50 = vld [vmem:[#allocation153_spill] sm:$0xff] }
 0x717   :  { %v3321_v46 = vrot.slane %v8706_v34, %v8705_v8 }
 0x719   :  { %3457 = vmatpush2.bf16.msra.mxu0 %v8701_v23  ;;  %3498 = vmatpush2.bf16.msra.mxu1 %v8702_v3  ;;  %v3329_v23 = vrot.slane %v8707_v50, %v8705_v8  ;;  %v8708_v3 = vld [vmem:[#allocation155_spill] sm:$0xff] }
 0x71a   :  { %3508 = vmatprep.subr.bf16.mxu0 %v8703_v52  ;;  %3549 = vmatprep.subr.bf16.mxu1 %v8704_v26  ;;  %v3325_v52 = vrot.slane %v8708_v3, %v8705_v8 }
 0x75c   :  { %v3188_v6 = vpop.f32.mrf.mxu0  ;;  %v3229_v36 = vpop.f32.mrf.mxu1 }
 0x75d   :  { %v3350_v31 = vadd.f32 %v3321_v46, %v3188_v6  ;;  %v3352_v20 = vadd.f32 %v3329_v23, %v3229_v36 }
 0x75e   :  { %v3190_v25 = vpop.f32.mrf.mxu0  ;;  %v3231_v28 = vpop.f32.mrf.mxu1 }
 0x75f   :  { %v3351_v26 = vadd.f32 %v3325_v52, %v3190_v25  ;;  %v4561_v53 = vmul.f32 -1.442695, %v3350_v31  ;;  %v3337_v52 = vrot.slane %v6351_v30, %v8705_v8 }
 0x760   :  { %v3192_v57 = vpop.f32.mrf.mxu0  ;;  %v3233_v38 = vpop.f32.mrf.mxu1 }
 0x761   :  { %v3353_v57 = vadd.f32 %v3333_v40, %v3231_v28  ;;  %v4563_v38 = vmul.f32 -1.442695, %v3352_v20  ;;  %4764 = vpow2.f32 %v4561_v53  ;;  %v3345_v40 = vrot.slane %v6353_v9, %v8705_v8 }
 0x762   :  { %v3193_v21 = vpop.f32.mrf.mxu0  ;;  %v3234_v27 = vpop.f32.mrf.mxu1 }
 0x763   :  { %v4562_v21 = vmul.f32 -1.442695, %v3351_v26  ;;  %v4564_v27 = vmul.f32 -1.442695, %v3353_v57  ;;  %4766 = vpow2.f32 %v4563_v38  ;;  %v3341_v26 = vrot.slane %v6355_v7, %v8705_v8 }
 0x765   :  { %4768 = vpow2.f32 %v4562_v21 }
 0x766   :  { %4770 = vpow2.f32 %v4564_v27 }
 0x76e   :  { %v4765_v34 = vpop.eup %4764 }
 0x76f   :  { %v3364_v6 = vadd.f32 1.0, %v4765_v34  ;;  %v3349_v34 = vrot.slane %v6357_v22, %v8705_v8 }
 0x770   :  { %v4767_v50 = vpop.eup %4766 }
 0x771   :  { %v3376_v3 = vadd.f32 1.0, %v4767_v50  ;;  %4772 = vrcp.f32 %v3364_v6 }
 0x772   :  { %v4769_v46 = vpop.eup %4768 }
 0x773   :  { %v4771_v33 = vpop.eup %4770  ;;  %v3365_v23 = vadd.f32 1.0, %v4769_v46  ;;  %4774 = vrcp.f32 %v3376_v3 }
 0x774   :  { %v3377_v20 = vadd.f32 1.0, %v4771_v33 }
 0x775   :  { %4776 = vrcp.f32 %v3365_v23 }
 0x79c   :  { %v3270_v53 = vpop.f32.mrf.mxu0  ;;  %v3311_v31 = vpop.f32.mrf.mxu1 }
 0x79d   :  { %v3354_v25 = vadd.f32 %v3337_v52, %v3270_v53  ;;  %v3356_v28 = vadd.f32 %v3345_v40, %v3311_v31  ;;  %v4773_v52 = vpop.eup %4772 }
 0x79e   :  { %v3272_v50 = vpop.f32.mrf.mxu0  ;;  %v3313_v36 = vpop.f32.mrf.mxu1 }
 0x79f   :  { %4778 = vtanh.f32 %v3354_v25  ;;  %v4565_v57 = vmul.f32 -1.442695, %v3356_v28  ;;  %v3355_v38 = vadd.f32 %v3341_v26, %v3272_v50  ;;  %v3357_v21 = vadd.f32 %v3349_v34, %v3313_v36  ;;  %v4775_v40 = vpop.eup %4774 }
 0x7a0   :  { %4780 = vrcp.f32 %v3377_v20  ;;  %v3274_v33 = vpop.f32.mrf.mxu0  ;;  %v3315_v27 = vpop.f32.mrf.mxu1  ;;  %v3396_v31 = vmul.f32 %v4775_v40, %v7077_v49 }
 0x7a1   :  { %4782 = vpow2.f32 %v4565_v57  ;;  %v4566_v46 = vmul.f32 -1.442695, %v3357_v21  ;;  %v4777_v53 = vpop.eup %4776 }
 0x7a2   :  { %4784 = vtanh.f32 %v3355_v38  ;;  %v3275_v6 = vpop.f32.mrf.mxu0  ;;  %v3316_v3 = vpop.f32.mrf.mxu1 }
 0x7a3   :  { %4786 = vpow2.f32 %v4566_v46 }
 0x7ac   :  { %v4779_v8 = vpop.eup %4778 }
 0x7ad   :  { %v4781_v23 = vpop.eup %4780  ;;  %v3398_v25 = vmul.f32 %v4779_v8, %v4773_v52 }
 0x7ae   :  { %v4783_v28 = vpop.eup %4782  ;;  %v3397_v36 = vmul.f32 %v4781_v23, %v7081_v11  ;;  %v8725_v11 = vld [vmem:[#allocation122_spill] sm:$0xff] }
 0x7af   :  { %v4785_v26 = vpop.eup %4784  ;;  %v7249_v34 = vadd.f32 %v3398_v25, %v3396_v31  ;;  %v3390_v20 = vadd.f32 1.0, %v4783_v28  ;;  %v3423_v25 = vld [vmem:[%s7735_s6] sm:$0x44] }
 0x7b0   :  { %v4787_v50 = vpop.eup %4786  ;;  %v3399_v57 = vmul.f32 %v4785_v26, %v4777_v53  ;;  %v8713_v26 = vld [vmem:[#allocation110_spill] sm:$0xff]  ;;  %v8728_v53 = vld [vmem:[#allocation125_spill] sm:$0xff] }
 0x7b1   :  { %4788 = vtanh.f32 %v7249_v34  ;;  %v3391_v38 = vadd.f32 1.0, %v4787_v50  ;;  %v8715_v50 = vld [vmem:[#allocation112_spill] sm:$0xff] }
 0x7b2   :  { %4790 = vrcp.f32 %v3390_v20  ;;  %v7253_v21 = vadd.f32 %v3399_v57, %v3397_v36  ;;  %v8714_v20 = vld [vmem:[#allocation111_spill] sm:$0xff]  ;;  %v8716_v36 = vld [vmem:[#allocation113_spill] sm:$0xff]  ;;  %v8717_v57 = vld [vmem:[#allocation114_spill] sm:$0xff] }
 0x7b3   :  { %4792 = vrcp.f32 %v3391_v38  ;;  %v8718_v38 = vld [vmem:[#allocation115_spill] sm:$0xff] }
 0x7b4   :  { %4794 = vtanh.f32 %v7253_v21 }
 0x7be   :  { %v4789_v49 = vpop.eup %4788 }
 0x7bf   :  { %v4791_v33 = vpop.eup %4790 }
 0x7c0   :  { %v4793_v27 = vpop.eup %4792  ;;  %v3404_v6 = vmul.f32 %v4791_v33, %v4789_v49  ;;  %v8719_v49 = vld [vmem:[#allocation116_spill] sm:$0xff]  ;;  %v8720_v33 = vld [vmem:[#allocation117_spill] sm:$0xff] }
 0x7c1   :  { %v4795_v46 = vpop.eup %4794 }
 0x7c2   :  { %v3405_v3 = vmul.f32 %v4795_v46, %v4793_v27  ;;  %v7266_v8 = vpack.c.bf16 %v3404_v6, %v3404_v6  ;;  %v8721_v27 = vld [vmem:[#allocation118_spill] sm:$0xff]  ;;  %v8722_v46 = vld [vmem:[#allocation119_spill] sm:$0xff] }
 0x7c4   :  { %v3407_v52 = vpack.c.bf16 %v3405_v3, %v3405_v3  ;;  %v4594_v40 = vpack.c.bf16 %v3405_v3, %v3404_v6  ;;  %v8723_v6 = vld [vmem:[#allocation120_spill] sm:$0xff]  ;;  %v8724_v3 = vld [vmem:[#allocation121_spill] sm:$0xff] }
 0x7c6   :  { %3458 = vmatprep.mubr.bf16.mxu0 %v3407_v52  ;;  %3499 = vmatprep.mubr.bf16.mxu1 %v3407_v52  ;;  %v3414_v23 = vshll.u32 %v4594_v40, 16  ;;  %v8727_v40 = vld [vmem:[#allocation124_spill] sm:$0xff] }
 0x7c7   :  { %3459 = vmatmul.mubr.bf16.vlgmr.msra.gmra.mxu0 %v7266_v8  ;;  %3500 = vmatmul.mubr.bf16.vlgmr.msra.gmra.mxu1 %v7266_v8 }
 0x7c8   :  { %v3416_v31 = vrot.slane %v3414_v23, 6  ;;  %3509 = vmatpush1.bf16.msra.mxu0 %v8217_v62  ;;  %3550 = vmatpush1.bf16.msra.mxu1 %v8218_v19  ;;  %v8729_v23 = vld [vmem:[#allocation126_spill] sm:$0xff] }
 0x7c9   :  { %3540 = vmatprep.mubr.bf16.mxu0 %v3407_v52  ;;  %3581 = vmatprep.mubr.bf16.mxu1 %v3407_v52  ;;  %v8726_v52 = vld [vmem:[#allocation123_spill] sm:$0xff] }
 0x7ca   :  { %3510 = vmatprep.subr.bf16.mxu0 %v8219_v54  ;;  %3551 = vmatprep.subr.bf16.mxu1 %v8220_v61  ;;  %v3424_v28 = vsel %vm3422_vm9, %v3416_v31, %v3423_v25  ;;  %v8730_v31 = vld [vmem:[#allocation127_spill] sm:$0xff]  ;;  %v8731_v25 = vld [vmem:[#allocation128_spill] sm:$0xff] }
 0x7cb   :  { %3425 = vst [vmem:[%s7735_s6] sm:$0x44] %v3424_v28  ;;  %v8732_v28 = vld [vmem:[#allocation129_spill] sm:$0xff] }
 0x7cc   :  { %3511 = vmatpush1.bf16.msra.mxu0 %v8221_v44  ;;  %3552 = vmatpush1.bf16.msra.mxu1 %v8222_v45 }
 0x7cd   :  { %3512 = vmatprep.subr.bf16.mxu0 %v8223_v18  ;;  %3553 = vmatprep.subr.bf16.mxu1 %v8224_v4 }
 0x7d0   :  { %3513 = vmatpush1.bf16.msra.mxu0 %v8225_v24  ;;  %3554 = vmatpush1.bf16.msra.mxu1 %v8226_v51 }
 0x7d1   :  { %3514 = vmatprep.subr.bf16.mxu0 %v8227_v5  ;;  %3555 = vmatprep.subr.bf16.mxu1 %v8317_v12 }
 0x7d4   :  { %3515 = vmatpush1.bf16.msra.mxu0 %v8318_v13  ;;  %3556 = vmatpush1.bf16.msra.mxu1 %v8319_v58 }
 0x7d5   :  { %3516 = vmatprep.subr.bf16.mxu0 %v8320_v42  ;;  %3557 = vmatprep.subr.bf16.mxu1 %v8321_v2 }
 0x7d8   :  { %3517 = vmatpush1.bf16.msra.mxu0 %v8322_v60  ;;  %3558 = vmatpush1.bf16.msra.mxu1 %v8323_v55 }
 0x7d9   :  { %3518 = vmatprep.subr.bf16.mxu0 %v8324_v59  ;;  %3559 = vmatprep.subr.bf16.mxu1 %v8325_v17 }
 0x7dc   :  { %3519 = vmatpush1.bf16.msra.mxu0 %v8415_v43  ;;  %3560 = vmatpush1.bf16.msra.mxu1 %v8416_v10 }
 0x7dd   :  { %3520 = vmatprep.subr.bf16.mxu0 %v8417_v37  ;;  %3561 = vmatprep.subr.bf16.mxu1 %v8418_v32 }
 0x7e0   :  { %3521 = vmatpush1.bf16.msra.mxu0 %v8419_v15  ;;  %3562 = vmatpush1.bf16.msra.mxu1 %v8420_v39 }
 0x7e1   :  { %3522 = vmatprep.subr.bf16.mxu0 %v8421_v35  ;;  %3563 = vmatprep.subr.bf16.mxu1 %v8422_v63 }
 0x7e4   :  { %3523 = vmatpush1.bf16.msra.mxu0 %v8423_v1  ;;  %3564 = vmatpush1.bf16.msra.mxu1 %v8424_v29 }
 0x7e5   :  { %3524 = vmatprep.subr.bf16.mxu0 %v8336_v47  ;;  %3565 = vmatprep.subr.bf16.mxu1 %v8337_v56 }
 0x7e8   :  { %3525 = vmatpush2.bf16.msra.mxu0 %v8338_v0  ;;  %3566 = vmatpush2.bf16.msra.mxu1 %v8339_v48 }
 0x7e9   :  { %3526 = vmatprep.subr.bf16.mxu0 %v8340_v14  ;;  %3567 = vmatprep.subr.bf16.mxu1 %v8341_v16 }
 0x7ec   :  { %3527 = vmatpush2.bf16.msra.mxu0 %v8713_v26  ;;  %3568 = vmatpush2.bf16.msra.mxu1 %v8714_v20 }
 0x7ed   :  { %3528 = vmatprep.subr.bf16.mxu0 %v8715_v50  ;;  %3569 = vmatprep.subr.bf16.mxu1 %v8716_v36 }
 0x7f0   :  { %3529 = vmatpush2.bf16.msra.mxu0 %v8717_v57  ;;  %3570 = vmatpush2.bf16.msra.mxu1 %v8718_v38 }
 0x7f1   :  { %3530 = vmatprep.subr.bf16.mxu0 %v8719_v49  ;;  %3571 = vmatprep.subr.bf16.mxu1 %v8720_v33  ;;  %v8805_v49 = vld [vmem:[#allocation145_spill] sm:$0xff] }
 0x7f2   :  { %v3605_v50 = vrot.slane %v8314_v41, %v8805_v49 }
 0x7f4   :  { %3531 = vmatpush2.bf16.msra.mxu0 %v8721_v27  ;;  %3572 = vmatpush2.bf16.msra.mxu1 %v8722_v46  ;;  %v8733_v46 = vld [vmem:[#allocation130_spill] sm:$0xff] }
 0x7f5   :  { %3532 = vmatprep.subr.bf16.mxu0 %v8723_v6  ;;  %3573 = vmatprep.subr.bf16.mxu1 %v8724_v3  ;;  %v8734_v6 = vld [vmem:[#allocation131_spill] sm:$0xff]  ;;  %v8735_v3 = vld [vmem:[#allocation132_spill] sm:$0xff] }
 0x7f8   :  { %3533 = vmatpush2.bf16.msra.mxu0 %v8725_v11  ;;  %3574 = vmatpush2.bf16.msra.mxu1 %v8726_v52  ;;  %v8736_v11 = vld [vmem:[#allocation133_spill] sm:$0xff]  ;;  %v8737_v52 = vld [vmem:[#allocation134_spill] sm:$0xff] }
 0x7f9   :  { %3534 = vmatprep.subr.bf16.mxu0 %v8727_v40  ;;  %3575 = vmatprep.subr.bf16.mxu1 %v8728_v53  ;;  %v8738_v40 = vld [vmem:[#allocation135_spill] sm:$0xff]  ;;  %v8739_v53 = vld [vmem:[#allocation8_spill] sm:$0xff] }
 0x7fc   :  { %3535 = vmatpush2.bf16.msra.mxu0 %v8729_v23  ;;  %3576 = vmatpush2.bf16.msra.mxu1 %v8730_v31  ;;  %v8740_v23 = vld [vmem:[#allocation9_spill] sm:$0xff] }
 0x7fd   :  { %3536 = vmatprep.subr.bf16.mxu0 %v8731_v25  ;;  %3577 = vmatprep.subr.bf16.mxu1 %v8732_v28  ;;  %v8741_v28 = vld [vmem:[#allocation10_spill] sm:$0xff]  ;;  %v8750_v25 = vld [vmem:[#allocation19_spill] sm:$0xff] }
 0x800   :  { %3537 = vmatpush2.bf16.msra.mxu0 %v8733_v46  ;;  %3578 = vmatpush2.bf16.msra.mxu1 %v8734_v6  ;;  %v8742_v46 = vld [vmem:[#allocation11_spill] sm:$0xff]  ;;  %v8743_v6 = vld [vmem:[#allocation12_spill] sm:$0xff] }
 0x801   :  { %3538 = vmatprep.subr.bf16.mxu0 %v8735_v3  ;;  %3579 = vmatprep.subr.bf16.mxu1 %v8736_v11  ;;  %v8744_v3 = vld [vmem:[#allocation13_spill] sm:$0xff]  ;;  %v8745_v11 = vld [vmem:[#allocation14_spill] sm:$0xff] }
 0x804   :  { %3539 = vmatpush2.bf16.msra.mxu0 %v8737_v52  ;;  %3580 = vmatpush2.bf16.msra.mxu1 %v8738_v40  ;;  %v8746_v52 = vld [vmem:[#allocation15_spill] sm:$0xff]  ;;  %v8747_v40 = vld [vmem:[#allocation16_spill] sm:$0xff] }
 0x805   :  { %3697 = vmatprep.subr.bf16.mxu0 %v8739_v53  ;;  %3738 = vmatprep.subr.bf16.mxu1 %v8740_v23  ;;  %v8748_v53 = vld [vmem:[#allocation17_spill] sm:$0xff]  ;;  %v8749_v23 = vld [vmem:[#allocation18_spill] sm:$0xff] }
 0x807   :  { %3541 = vmatmul.mubr.bf16.vlgmr.msra.gmra.mxu0 %v7266_v8  ;;  %3582 = vmatmul.mubr.bf16.vlgmr.msra.gmra.mxu1 %v7266_v8  ;;  %v8751_v8 = vld [vmem:[#allocation20_spill] sm:$0xff] }
 0x808   :  { %3698 = vmatpush1.bf16.msra.mxu0 %v8741_v28  ;;  %3739 = vmatpush1.bf16.msra.mxu1 %v8742_v46  ;;  %v8752_v28 = vld [vmem:[#allocation21_spill] sm:$0xff]  ;;  %v8753_v46 = vld [vmem:[#allocation22_spill] sm:$0xff] }
 0x809   :  { %3699 = vmatprep.subr.bf16.mxu0 %v8743_v6  ;;  %3740 = vmatprep.subr.bf16.mxu1 %v8744_v3  ;;  %v8754_v6 = vld [vmem:[#allocation23_spill] sm:$0xff]  ;;  %v8755_v3 = vld [vmem:[#allocation24_spill] sm:$0xff] }
 0x80c   :  { %3700 = vmatpush1.bf16.msra.mxu0 %v8745_v11  ;;  %3741 = vmatpush1.bf16.msra.mxu1 %v8746_v52  ;;  %v8756_v11 = vld [vmem:[#allocation25_spill] sm:$0xff]  ;;  %v8757_v52 = vld [vmem:[#allocation26_spill] sm:$0xff] }
 0x80d   :  { %3701 = vmatprep.subr.bf16.mxu0 %v8747_v40  ;;  %3742 = vmatprep.subr.bf16.mxu1 %v8748_v53  ;;  %v8758_v40 = vld [vmem:[#allocation27_spill] sm:$0xff]  ;;  %v8759_v53 = vld [vmem:[#allocation28_spill] sm:$0xff] }
 0x810   :  { %3702 = vmatpush1.bf16.msra.mxu0 %v8749_v23  ;;  %3743 = vmatpush1.bf16.msra.mxu1 %v8750_v25  ;;  %v8760_v23 = vld [vmem:[#allocation29_spill] sm:$0xff]  ;;  %v8761_v25 = vld [vmem:[#allocation30_spill] sm:$0xff] }
 0x811   :  { %3703 = vmatprep.subr.bf16.mxu0 %v8751_v8  ;;  %3744 = vmatprep.subr.bf16.mxu1 %v8752_v28  ;;  %v8762_v8 = vld [vmem:[#allocation31_spill] sm:$0xff]  ;;  %v8763_v28 = vld [vmem:[#allocation32_spill] sm:$0xff] }
 0x814   :  { %3704 = vmatpush1.bf16.msra.mxu0 %v8753_v46  ;;  %3745 = vmatpush1.bf16.msra.mxu1 %v8754_v6  ;;  %v8764_v46 = vld [vmem:[#allocation33_spill] sm:$0xff]  ;;  %v8765_v6 = vld [vmem:[#allocation34_spill] sm:$0xff] }
 0x815   :  { %3705 = vmatprep.subr.bf16.mxu0 %v8755_v3  ;;  %3746 = vmatprep.subr.bf16.mxu1 %v8756_v11  ;;  %v8766_v3 = vld [vmem:[#allocation35_spill] sm:$0xff]  ;;  %v8767_v11 = vld [vmem:[#allocation36_spill] sm:$0xff] }
 0x818   :  { %3706 = vmatpush1.bf16.msra.mxu0 %v8757_v52  ;;  %3747 = vmatpush1.bf16.msra.mxu1 %v8758_v40  ;;  %v8768_v52 = vld [vmem:[#allocation37_spill] sm:$0xff]  ;;  %v8769_v40 = vld [vmem:[#allocation38_spill] sm:$0xff] }
 0x819   :  { %3707 = vmatprep.subr.bf16.mxu0 %v8759_v53  ;;  %3748 = vmatprep.subr.bf16.mxu1 %v8760_v23  ;;  %v8770_v53 = vld [vmem:[#allocation39_spill] sm:$0xff]  ;;  %v8771_v23 = vld [vmem:[#allocation40_spill] sm:$0xff] }
 0x81c   :  { %3708 = vmatpush1.bf16.msra.mxu0 %v8761_v25  ;;  %3749 = vmatpush1.bf16.msra.mxu1 %v8762_v8  ;;  %v8772_v25 = vld [vmem:[#allocation41_spill] sm:$0xff]  ;;  %v8773_v8 = vld [vmem:[#allocation42_spill] sm:$0xff] }
 0x81d   :  { %3709 = vmatprep.subr.bf16.mxu0 %v8763_v28  ;;  %3750 = vmatprep.subr.bf16.mxu1 %v8764_v46  ;;  %v8774_v28 = vld [vmem:[#allocation43_spill] sm:$0xff]  ;;  %v8775_v46 = vld [vmem:[#allocation44_spill] sm:$0xff] }
 0x820   :  { %3710 = vmatpush1.bf16.msra.mxu0 %v8765_v6  ;;  %3751 = vmatpush1.bf16.msra.mxu1 %v8766_v3  ;;  %v8776_v6 = vld [vmem:[#allocation45_spill] sm:$0xff]  ;;  %v8777_v3 = vld [vmem:[#allocation46_spill] sm:$0xff] }
 0x821   :  { %3711 = vmatprep.subr.bf16.mxu0 %v8767_v11  ;;  %3752 = vmatprep.subr.bf16.mxu1 %v8768_v52  ;;  %v8778_v11 = vld [vmem:[#allocation47_spill] sm:$0xff]  ;;  %v8779_v52 = vld [vmem:[#allocation48_spill] sm:$0xff] }
 0x824   :  { %3712 = vmatpush1.bf16.msra.mxu0 %v8769_v40  ;;  %3753 = vmatpush1.bf16.msra.mxu1 %v8770_v53  ;;  %v8780_v40 = vld [vmem:[#allocation49_spill] sm:$0xff]  ;;  %v8781_v53 = vld [vmem:[#allocation50_spill] sm:$0xff] }
 0x825   :  { %3713 = vmatprep.subr.bf16.mxu0 %v8771_v23  ;;  %3754 = vmatprep.subr.bf16.mxu1 %v8772_v25  ;;  %v8782_v23 = vld [vmem:[#allocation51_spill] sm:$0xff]  ;;  %v8783_v25 = vld [vmem:[#allocation52_spill] sm:$0xff] }
 0x828   :  { %3714 = vmatpush2.bf16.msra.mxu0 %v8773_v8  ;;  %3755 = vmatpush2.bf16.msra.mxu1 %v8774_v28  ;;  %v8784_v8 = vld [vmem:[#allocation53_spill] sm:$0xff]  ;;  %v8785_v28 = vld [vmem:[#allocation54_spill] sm:$0xff] }
 0x829   :  { %3715 = vmatprep.subr.bf16.mxu0 %v8775_v46  ;;  %3756 = vmatprep.subr.bf16.mxu1 %v8776_v6  ;;  %v8786_v46 = vld [vmem:[#allocation55_spill] sm:$0xff]  ;;  %v8787_v6 = vld [vmem:[#allocation56_spill] sm:$0xff] }
 0x82c   :  { %3716 = vmatpush2.bf16.msra.mxu0 %v8777_v3  ;;  %3757 = vmatpush2.bf16.msra.mxu1 %v8778_v11  ;;  %v8788_v3 = vld [vmem:[#allocation57_spill] sm:$0xff]  ;;  %v8789_v11 = vld [vmem:[#allocation58_spill] sm:$0xff] }
 0x82d   :  { %3717 = vmatprep.subr.bf16.mxu0 %v8779_v52  ;;  %3758 = vmatprep.subr.bf16.mxu1 %v8780_v40  ;;  %v8790_v52 = vld [vmem:[#allocation59_spill] sm:$0xff]  ;;  %v8791_v40 = vld [vmem:[#allocation60_spill] sm:$0xff] }
 0x830   :  { %3718 = vmatpush2.bf16.msra.mxu0 %v8781_v53  ;;  %3759 = vmatpush2.bf16.msra.mxu1 %v8782_v23  ;;  %v8792_v53 = vld [vmem:[#allocation61_spill] sm:$0xff]  ;;  %v8793_v23 = vld [vmem:[#allocation62_spill] sm:$0xff] }
 0x831   :  { %3719 = vmatprep.subr.bf16.mxu0 %v8783_v25  ;;  %3760 = vmatprep.subr.bf16.mxu1 %v8784_v8  ;;  %v8794_v25 = vld [vmem:[#allocation63_spill] sm:$0xff]  ;;  %v8795_v8 = vld [vmem:[#allocation64_spill] sm:$0xff] }
 0x834   :  { %3720 = vmatpush2.bf16.msra.mxu0 %v8785_v28  ;;  %3761 = vmatpush2.bf16.msra.mxu1 %v8786_v46  ;;  %v8796_v28 = vld [vmem:[#allocation65_spill] sm:$0xff]  ;;  %v8797_v46 = vld [vmem:[#allocation66_spill] sm:$0xff] }
 0x835   :  { %3721 = vmatprep.subr.bf16.mxu0 %v8787_v6  ;;  %3762 = vmatprep.subr.bf16.mxu1 %v8788_v3  ;;  %v8798_v6 = vld [vmem:[#allocation67_spill] sm:$0xff]  ;;  %v8799_v3 = vld [vmem:[#allocation68_spill] sm:$0xff] }
 0x838   :  { %3722 = vmatpush2.bf16.msra.mxu0 %v8789_v11  ;;  %3763 = vmatpush2.bf16.msra.mxu1 %v8790_v52  ;;  %v8800_v11 = vld [vmem:[#allocation69_spill] sm:$0xff]  ;;  %v8801_v52 = vld [vmem:[#allocation70_spill] sm:$0xff] }
 0x839   :  { %3723 = vmatprep.subr.bf16.mxu0 %v8791_v40  ;;  %3764 = vmatprep.subr.bf16.mxu1 %v8792_v53  ;;  %v8802_v40 = vld [vmem:[#allocation71_spill] sm:$0xff]  ;;  %v8803_v53 = vld [vmem:[#allocation72_spill] sm:$0xff] }
 0x83c   :  { %3724 = vmatpush2.bf16.msra.mxu0 %v8793_v23  ;;  %3765 = vmatpush2.bf16.msra.mxu1 %v8794_v25  ;;  %v8804_v23 = vld [vmem:[#allocation73_spill] sm:$0xff] }
 0x83d   :  { %3725 = vmatprep.subr.bf16.mxu0 %v8795_v8  ;;  %3766 = vmatprep.subr.bf16.mxu1 %v8796_v28 }
 0x840   :  { %3726 = vmatpush2.bf16.msra.mxu0 %v8797_v46  ;;  %3767 = vmatpush2.bf16.msra.mxu1 %v8798_v6 }
 0x841   :  { %3727 = vmatprep.subr.bf16.mxu0 %v8799_v3  ;;  %3768 = vmatprep.subr.bf16.mxu1 %v8800_v11  ;;  %v8806_v3 = vld [vmem:[#allocation152_spill] sm:$0xff]  ;;  %v8807_v11 = vld [vmem:[#allocation153_spill] sm:$0xff] }
 0x842   :  { %v3593_v38 = vrot.slane %v8806_v3, %v8805_v49 }
 0x844   :  { %3728 = vmatpush2.bf16.msra.mxu0 %v8801_v52  ;;  %3769 = vmatpush2.bf16.msra.mxu1 %v8802_v40  ;;  %v3601_v52 = vrot.slane %v8807_v11, %v8805_v49  ;;  %v8808_v40 = vld [vmem:[#allocation155_spill] sm:$0xff] }
 0x845   :  { %3779 = vmatprep.subr.bf16.mxu0 %v8803_v53  ;;  %3820 = vmatprep.subr.bf16.mxu1 %v8804_v23  ;;  %v3597_v53 = vrot.slane %v8808_v40, %v8805_v49 }
 0x887   :  { %v3460_v25 = vpop.f32.mrf.mxu0  ;;  %v3501_v8 = vpop.f32.mrf.mxu1 }
 0x888   :  { %v3622_v57 = vadd.f32 %v3593_v38, %v3460_v25  ;;  %v3624_v36 = vadd.f32 %v3601_v52, %v3501_v8 }
 0x889   :  { %v3462_v31 = vpop.f32.mrf.mxu0  ;;  %v3503_v28 = vpop.f32.mrf.mxu1 }
 0x88a   :  { %v3623_v23 = vadd.f32 %v3597_v53, %v3462_v31  ;;  %v4568_v20 = vmul.f32 -1.442695, %v3622_v57  ;;  %v3609_v53 = vrot.slane %v6351_v30, %v8805_v49 }
 0x88b   :  { %v3464_v27 = vpop.f32.mrf.mxu0  ;;  %v3505_v46 = vpop.f32.mrf.mxu1 }
 0x88c   :  { %v3625_v27 = vadd.f32 %v3605_v50, %v3503_v28  ;;  %v4570_v46 = vmul.f32 -1.442695, %v3624_v36  ;;  %4796 = vpow2.f32 %v4568_v20  ;;  %v3617_v50 = vrot.slane %v6353_v9, %v8805_v49 }
 0x88d   :  { %v3465_v33 = vpop.f32.mrf.mxu0  ;;  %v3506_v6 = vpop.f32.mrf.mxu1 }
 0x88e   :  { %v4569_v33 = vmul.f32 -1.442695, %v3623_v23  ;;  %v4571_v6 = vmul.f32 -1.442695, %v3625_v27  ;;  %4798 = vpow2.f32 %v4570_v46  ;;  %v3613_v23 = vrot.slane %v6355_v7, %v8805_v49 }
 0x890   :  { %4800 = vpow2.f32 %v4569_v33 }
 0x891   :  { %4802 = vpow2.f32 %v4571_v6 }
 0x899   :  { %v4797_v3 = vpop.eup %4796 }
 0x89a   :  { %v3636_v25 = vadd.f32 1.0, %v4797_v3  ;;  %v3621_v3 = vrot.slane %v6357_v22, %v8805_v49 }
 0x89b   :  { %v4799_v11 = vpop.eup %4798 }
 0x89c   :  { %v3648_v40 = vadd.f32 1.0, %v4799_v11  ;;  %4804 = vrcp.f32 %v3636_v25 }
 0x89d   :  { %v4801_v38 = vpop.eup %4800 }
 0x89e   :  { %v4803_v26 = vpop.eup %4802  ;;  %v3637_v52 = vadd.f32 1.0, %v4801_v38  ;;  %4806 = vrcp.f32 %v3648_v40 }
 0x89f   :  { %v3649_v36 = vadd.f32 1.0, %v4803_v26 }
 0x8a0   :  { %4808 = vrcp.f32 %v3637_v52 }
 0x8c7   :  { %v3542_v20 = vpop.f32.mrf.mxu0  ;;  %v3583_v57 = vpop.f32.mrf.mxu1 }
 0x8c8   :  { %v3626_v31 = vadd.f32 %v3609_v53, %v3542_v20  ;;  %v3628_v28 = vadd.f32 %v3617_v50, %v3583_v57  ;;  %v4805_v53 = vpop.eup %4804 }
 0x8c9   :  { %v3544_v11 = vpop.f32.mrf.mxu0  ;;  %v3585_v8 = vpop.f32.mrf.mxu1 }
 0x8ca   :  { %4810 = vtanh.f32 %v3626_v31  ;;  %v4572_v27 = vmul.f32 -1.442695, %v3628_v28  ;;  %v3627_v46 = vadd.f32 %v3613_v23, %v3544_v11  ;;  %v3629_v33 = vadd.f32 %v3621_v3, %v3585_v8  ;;  %v4807_v50 = vpop.eup %4806 }
 0x8cb   :  { %4812 = vrcp.f32 %v3649_v36  ;;  %v3546_v26 = vpop.f32.mrf.mxu0  ;;  %v3587_v6 = vpop.f32.mrf.mxu1  ;;  %v3668_v57 = vmul.f32 %v4807_v50, %v7249_v34 }
 0x8cc   :  { %4814 = vpow2.f32 %v4572_v27  ;;  %v4573_v38 = vmul.f32 -1.442695, %v3629_v33  ;;  %v4809_v20 = vpop.eup %4808 }
 0x8cd   :  { %4816 = vtanh.f32 %v3627_v46  ;;  %v3547_v25 = vpop.f32.mrf.mxu0  ;;  %v3588_v40 = vpop.f32.mrf.mxu1 }
 0x8ce   :  { %4818 = vpow2.f32 %v4573_v38 }
 0x8d7   :  { %v4811_v49 = vpop.eup %4810 }
 0x8d8   :  { %v4813_v52 = vpop.eup %4812  ;;  %v3670_v31 = vmul.f32 %v4811_v49, %v4805_v53  ;;  %v3694_v49 = vld [vmem:[%s7735_s6] sm:$0x88] }
 0x8d9   :  { %v4815_v28 = vpop.eup %4814  ;;  %v3669_v8 = vmul.f32 %v4813_v52, %v7253_v21  ;;  %v8824_v21 = vld [vmem:[#allocation123_spill] sm:$0xff] }
 0x8da   :  { %v4817_v23 = vpop.eup %4816  ;;  %v7427_v3 = vadd.f32 %v3670_v31, %v3668_v57  ;;  %v3662_v36 = vadd.f32 1.0, %v4815_v28  ;;  %v8811_v31 = vld [vmem:[#allocation110_spill] sm:$0xff]  ;;  %v8812_v28 = vld [vmem:[#allocation111_spill] sm:$0xff] }
 0x8db   :  { %v4819_v11 = vpop.eup %4818  ;;  %v3671_v27 = vmul.f32 %v4817_v23, %v4809_v20  ;;  %v8813_v23 = vld [vmem:[#allocation112_spill] sm:$0xff] }
 0x8dc   :  { %4820 = vtanh.f32 %v7427_v3  ;;  %v3663_v46 = vadd.f32 1.0, %v4819_v11  ;;  %v8815_v11 = vld [vmem:[#allocation114_spill] sm:$0xff] }
 0x8dd   :  { %4822 = vrcp.f32 %v3662_v36  ;;  %v7431_v33 = vadd.f32 %v3671_v27, %v3669_v8  ;;  %v8814_v36 = vld [vmem:[#allocation113_spill] sm:$0xff]  ;;  %v8816_v8 = vld [vmem:[#allocation115_spill] sm:$0xff]  ;;  %v8817_v27 = vld [vmem:[#allocation116_spill] sm:$0xff] }
 0x8de   :  { %4824 = vrcp.f32 %v3663_v46  ;;  %v8818_v46 = vld [vmem:[#allocation117_spill] sm:$0xff] }
 0x8df   :  { %4826 = vtanh.f32 %v7431_v33 }
 0x8e9   :  { %v4821_v34 = vpop.eup %4820 }
 0x8ea   :  { %v4823_v26 = vpop.eup %4822 }
 0x8eb   :  { %v4825_v6 = vpop.eup %4824  ;;  %v3676_v25 = vmul.f32 %v4823_v26, %v4821_v34  ;;  %v8819_v34 = vld [vmem:[#allocation118_spill] sm:$0xff]  ;;  %v8820_v26 = vld [vmem:[#allocation119_spill] sm:$0xff] }
 0x8ec   :  { %v4827_v38 = vpop.eup %4826 }
 0x8ed   :  { %v3677_v40 = vmul.f32 %v4827_v38, %v4825_v6  ;;  %v7440_v20 = vpack.c.bf16 %v3676_v25, %v3676_v25  ;;  %v8821_v6 = vld [vmem:[#allocation120_spill] sm:$0xff]  ;;  %v8822_v38 = vld [vmem:[#allocation121_spill] sm:$0xff] }
 0x8ef   :  { %v3679_v53 = vpack.c.bf16 %v3677_v40, %v3677_v40  ;;  %v4595_v50 = vpack.c.bf16 %v3677_v40, %v3676_v25  ;;  %v8823_v25 = vld [vmem:[#allocation122_spill] sm:$0xff]  ;;  %v8825_v40 = vld [vmem:[#allocation124_spill] sm:$0xff] }
 0x8f1   :  { %3729 = vmatprep.mubr.bf16.mxu0 %v3679_v53  ;;  %3770 = vmatprep.mubr.bf16.mxu1 %v3679_v53  ;;  %v3685_v52 = vrot.slane %v4595_v50, 5  ;;  %v8827_v50 = vld [vmem:[#allocation126_spill] sm:$0xff] }
 0x8f2   :  { %3730 = vmatmul.mubr.bf16.vlgmr.msra.gmra.mxu0 %v7440_v20  ;;  %3771 = vmatmul.mubr.bf16.vlgmr.msra.gmra.mxu1 %v7440_v20 }
 0x8f3   :  { %3780 = vmatpush1.bf16.msra.mxu0 %v8217_v62  ;;  %3821 = vmatpush1.bf16.msra.mxu1 %v8218_v19  ;;  %v3695_v57 = vsel %vm3693_vm0, %v3685_v52, %v3694_v49  ;;  %v8828_v49 = vld [vmem:[#allocation127_spill] sm:$0xff]  ;;  %v8829_v52 = vld [vmem:[#allocation128_spill] sm:$0xff] }
 0x8f4   :  { %3811 = vmatprep.mubr.bf16.mxu0 %v3679_v53  ;;  %3852 = vmatprep.mubr.bf16.mxu1 %v3679_v53  ;;  %3696 = vst [vmem:[%s7735_s6] sm:$0x88] %v3695_v57  ;;  %v8826_v53 = vld [vmem:[#allocation125_spill] sm:$0xff] }
 0x8f5   :  { %3781 = vmatprep.subr.bf16.mxu0 %v8219_v54  ;;  %3822 = vmatprep.subr.bf16.mxu1 %v8220_v61  ;;  %v8830_v57 = vld [vmem:[#allocation129_spill] sm:$0xff] }
 0x8f7   :  { %3782 = vmatpush1.bf16.msra.mxu0 %v8221_v44  ;;  %3823 = vmatpush1.bf16.msra.mxu1 %v8222_v45 }
 0x8f8   :  { %3783 = vmatprep.subr.bf16.mxu0 %v8223_v18  ;;  %3824 = vmatprep.subr.bf16.mxu1 %v8224_v4 }
 0x8fb   :  { %3784 = vmatpush1.bf16.msra.mxu0 %v8225_v24  ;;  %3825 = vmatpush1.bf16.msra.mxu1 %v8226_v51 }
 0x8fc   :  { %3785 = vmatprep.subr.bf16.mxu0 %v8227_v5  ;;  %3826 = vmatprep.subr.bf16.mxu1 %v8317_v12 }
 0x8ff   :  { %3786 = vmatpush1.bf16.msra.mxu0 %v8318_v13  ;;  %3827 = vmatpush1.bf16.msra.mxu1 %v8319_v58 }
 0x900   :  { %3787 = vmatprep.subr.bf16.mxu0 %v8320_v42  ;;  %3828 = vmatprep.subr.bf16.mxu1 %v8321_v2 }
 0x903   :  { %3788 = vmatpush1.bf16.msra.mxu0 %v8322_v60  ;;  %3829 = vmatpush1.bf16.msra.mxu1 %v8323_v55 }
 0x904   :  { %3789 = vmatprep.subr.bf16.mxu0 %v8324_v59  ;;  %3830 = vmatprep.subr.bf16.mxu1 %v8325_v17 }
 0x907   :  { %3790 = vmatpush1.bf16.msra.mxu0 %v8415_v43  ;;  %3831 = vmatpush1.bf16.msra.mxu1 %v8416_v10 }
 0x908   :  { %3791 = vmatprep.subr.bf16.mxu0 %v8417_v37  ;;  %3832 = vmatprep.subr.bf16.mxu1 %v8418_v32 }
 0x90b   :  { %3792 = vmatpush1.bf16.msra.mxu0 %v8419_v15  ;;  %3833 = vmatpush1.bf16.msra.mxu1 %v8420_v39 }
 0x90c   :  { %3793 = vmatprep.subr.bf16.mxu0 %v8421_v35  ;;  %3834 = vmatprep.subr.bf16.mxu1 %v8422_v63 }
 0x90f   :  { %3794 = vmatpush1.bf16.msra.mxu0 %v8423_v1  ;;  %3835 = vmatpush1.bf16.msra.mxu1 %v8424_v29 }
 0x910   :  { %3795 = vmatprep.subr.bf16.mxu0 %v8336_v47  ;;  %3836 = vmatprep.subr.bf16.mxu1 %v8337_v56 }
 0x913   :  { %3796 = vmatpush2.bf16.msra.mxu0 %v8338_v0  ;;  %3837 = vmatpush2.bf16.msra.mxu1 %v8339_v48 }
 0x914   :  { %3797 = vmatprep.subr.bf16.mxu0 %v8340_v14  ;;  %3838 = vmatprep.subr.bf16.mxu1 %v8341_v16 }
 0x917   :  { %3798 = vmatpush2.bf16.msra.mxu0 %v8811_v31  ;;  %3839 = vmatpush2.bf16.msra.mxu1 %v8812_v28 }
 0x918   :  { %3799 = vmatprep.subr.bf16.mxu0 %v8813_v23  ;;  %3840 = vmatprep.subr.bf16.mxu1 %v8814_v36 }
 0x91b   :  { %3800 = vmatpush2.bf16.msra.mxu0 %v8815_v11  ;;  %3841 = vmatpush2.bf16.msra.mxu1 %v8816_v8 }
 0x91c   :  { %3801 = vmatprep.subr.bf16.mxu0 %v8817_v27  ;;  %3842 = vmatprep.subr.bf16.mxu1 %v8818_v46  ;;  %v8903_v27 = vld [vmem:[#allocation147_spill] sm:$0xff] }
 0x91d   :  { %v3876_v23 = vrot.slane %v8314_v41, %v8903_v27  ;;  %v3888_v41 = vrot.slane %v6353_v9, %v8903_v27 }
 0x91f   :  { %3802 = vmatpush2.bf16.msra.mxu0 %v8819_v34  ;;  %3843 = vmatpush2.bf16.msra.mxu1 %v8820_v26  ;;  %v8831_v26 = vld [vmem:[#allocation130_spill] sm:$0xff] }
 0x920   :  { %3803 = vmatprep.subr.bf16.mxu0 %v8821_v6  ;;  %3844 = vmatprep.subr.bf16.mxu1 %v8822_v38  ;;  %v8832_v6 = vld [vmem:[#allocation131_spill] sm:$0xff]  ;;  %v8833_v38 = vld [vmem:[#allocation132_spill] sm:$0xff] }
 0x923   :  { %3804 = vmatpush2.bf16.msra.mxu0 %v8823_v25  ;;  %3845 = vmatpush2.bf16.msra.mxu1 %v8824_v21  ;;  %v8834_v25 = vld [vmem:[#allocation133_spill] sm:$0xff]  ;;  %v8835_v21 = vld [vmem:[#allocation134_spill] sm:$0xff] }
 0x924   :  { %3805 = vmatprep.subr.bf16.mxu0 %v8825_v40  ;;  %3846 = vmatprep.subr.bf16.mxu1 %v8826_v53  ;;  %v8836_v40 = vld [vmem:[#allocation135_spill] sm:$0xff]  ;;  %v8837_v53 = vld [vmem:[#allocation8_spill] sm:$0xff] }
 0x927   :  { %3806 = vmatpush2.bf16.msra.mxu0 %v8827_v50  ;;  %3847 = vmatpush2.bf16.msra.mxu1 %v8828_v49  ;;  %v8838_v50 = vld [vmem:[#allocation9_spill] sm:$0xff] }
 0x928   :  { %3807 = vmatprep.subr.bf16.mxu0 %v8829_v52  ;;  %3848 = vmatprep.subr.bf16.mxu1 %v8830_v57  ;;  %v8839_v57 = vld [vmem:[#allocation10_spill] sm:$0xff]  ;;  %v8848_v52 = vld [vmem:[#allocation19_spill] sm:$0xff] }
 0x92b   :  { %3808 = vmatpush2.bf16.msra.mxu0 %v8831_v26  ;;  %3849 = vmatpush2.bf16.msra.mxu1 %v8832_v6  ;;  %v8840_v26 = vld [vmem:[#allocation11_spill] sm:$0xff]  ;;  %v8841_v6 = vld [vmem:[#allocation12_spill] sm:$0xff] }
 0x92c   :  { %3809 = vmatprep.subr.bf16.mxu0 %v8833_v38  ;;  %3850 = vmatprep.subr.bf16.mxu1 %v8834_v25  ;;  %v8842_v38 = vld [vmem:[#allocation13_spill] sm:$0xff]  ;;  %v8843_v25 = vld [vmem:[#allocation14_spill] sm:$0xff] }
 0x92f   :  { %3810 = vmatpush2.bf16.msra.mxu0 %v8835_v21  ;;  %3851 = vmatpush2.bf16.msra.mxu1 %v8836_v40  ;;  %v8844_v21 = vld [vmem:[#allocation15_spill] sm:$0xff]  ;;  %v8845_v40 = vld [vmem:[#allocation16_spill] sm:$0xff] }
 0x930   :  { %3969 = vmatprep.subr.bf16.mxu0 %v8837_v53  ;;  %4010 = vmatprep.subr.bf16.mxu1 %v8838_v50  ;;  %v8846_v53 = vld [vmem:[#allocation17_spill] sm:$0xff]  ;;  %v8847_v50 = vld [vmem:[#allocation18_spill] sm:$0xff] }
 0x932   :  { %3812 = vmatmul.mubr.bf16.vlgmr.msra.gmra.mxu0 %v7440_v20  ;;  %3853 = vmatmul.mubr.bf16.vlgmr.msra.gmra.mxu1 %v7440_v20  ;;  %v8849_v20 = vld [vmem:[#allocation20_spill] sm:$0xff] }
 0x933   :  { %3970 = vmatpush1.bf16.msra.mxu0 %v8839_v57  ;;  %4011 = vmatpush1.bf16.msra.mxu1 %v8840_v26  ;;  %v8850_v57 = vld [vmem:[#allocation21_spill] sm:$0xff]  ;;  %v8851_v26 = vld [vmem:[#allocation22_spill] sm:$0xff] }
 0x934   :  { %3971 = vmatprep.subr.bf16.mxu0 %v8841_v6  ;;  %4012 = vmatprep.subr.bf16.mxu1 %v8842_v38  ;;  %v8852_v6 = vld [vmem:[#allocation23_spill] sm:$0xff]  ;;  %v8853_v38 = vld [vmem:[#allocation24_spill] sm:$0xff] }
 0x937   :  { %3972 = vmatpush1.bf16.msra.mxu0 %v8843_v25  ;;  %4013 = vmatpush1.bf16.msra.mxu1 %v8844_v21  ;;  %v8854_v25 = vld [vmem:[#allocation25_spill] sm:$0xff]  ;;  %v8855_v21 = vld [vmem:[#allocation26_spill] sm:$0xff] }
 0x938   :  { %3973 = vmatprep.subr.bf16.mxu0 %v8845_v40  ;;  %4014 = vmatprep.subr.bf16.mxu1 %v8846_v53  ;;  %v8856_v40 = vld [vmem:[#allocation27_spill] sm:$0xff]  ;;  %v8857_v53 = vld [vmem:[#allocation28_spill] sm:$0xff] }
 0x93b   :  { %3974 = vmatpush1.bf16.msra.mxu0 %v8847_v50  ;;  %4015 = vmatpush1.bf16.msra.mxu1 %v8848_v52  ;;  %v8858_v50 = vld [vmem:[#allocation29_spill] sm:$0xff]  ;;  %v8859_v52 = vld [vmem:[#allocation30_spill] sm:$0xff] }
 0x93c   :  { %3975 = vmatprep.subr.bf16.mxu0 %v8849_v20  ;;  %4016 = vmatprep.subr.bf16.mxu1 %v8850_v57  ;;  %v8860_v20 = vld [vmem:[#allocation31_spill] sm:$0xff]  ;;  %v8861_v57 = vld [vmem:[#allocation32_spill] sm:$0xff] }
 0x93f   :  { %3976 = vmatpush1.bf16.msra.mxu0 %v8851_v26  ;;  %4017 = vmatpush1.bf16.msra.mxu1 %v8852_v6  ;;  %v8862_v26 = vld [vmem:[#allocation33_spill] sm:$0xff]  ;;  %v8863_v6 = vld [vmem:[#allocation34_spill] sm:$0xff] }
 0x940   :  { %3977 = vmatprep.subr.bf16.mxu0 %v8853_v38  ;;  %4018 = vmatprep.subr.bf16.mxu1 %v8854_v25  ;;  %v8864_v38 = vld [vmem:[#allocation35_spill] sm:$0xff]  ;;  %v8865_v25 = vld [vmem:[#allocation36_spill] sm:$0xff] }
 0x943   :  { %3978 = vmatpush1.bf16.msra.mxu0 %v8855_v21  ;;  %4019 = vmatpush1.bf16.msra.mxu1 %v8856_v40  ;;  %v8866_v21 = vld [vmem:[#allocation37_spill] sm:$0xff]  ;;  %v8867_v40 = vld [vmem:[#allocation38_spill] sm:$0xff] }
 0x944   :  { %3979 = vmatprep.subr.bf16.mxu0 %v8857_v53  ;;  %4020 = vmatprep.subr.bf16.mxu1 %v8858_v50  ;;  %v8868_v53 = vld [vmem:[#allocation39_spill] sm:$0xff]  ;;  %v8869_v50 = vld [vmem:[#allocation40_spill] sm:$0xff] }
 0x947   :  { %3980 = vmatpush1.bf16.msra.mxu0 %v8859_v52  ;;  %4021 = vmatpush1.bf16.msra.mxu1 %v8860_v20  ;;  %v8870_v52 = vld [vmem:[#allocation41_spill] sm:$0xff]  ;;  %v8871_v20 = vld [vmem:[#allocation42_spill] sm:$0xff] }
 0x948   :  { %3981 = vmatprep.subr.bf16.mxu0 %v8861_v57  ;;  %4022 = vmatprep.subr.bf16.mxu1 %v8862_v26  ;;  %v8872_v57 = vld [vmem:[#allocation43_spill] sm:$0xff]  ;;  %v8873_v26 = vld [vmem:[#allocation44_spill] sm:$0xff] }
 0x94b   :  { %3982 = vmatpush1.bf16.msra.mxu0 %v8863_v6  ;;  %4023 = vmatpush1.bf16.msra.mxu1 %v8864_v38  ;;  %v8874_v6 = vld [vmem:[#allocation45_spill] sm:$0xff]  ;;  %v8875_v38 = vld [vmem:[#allocation46_spill] sm:$0xff] }
 0x94c   :  { %3983 = vmatprep.subr.bf16.mxu0 %v8865_v25  ;;  %4024 = vmatprep.subr.bf16.mxu1 %v8866_v21  ;;  %v8876_v25 = vld [vmem:[#allocation47_spill] sm:$0xff]  ;;  %v8877_v21 = vld [vmem:[#allocation48_spill] sm:$0xff] }
 0x94f   :  { %3984 = vmatpush1.bf16.msra.mxu0 %v8867_v40  ;;  %4025 = vmatpush1.bf16.msra.mxu1 %v8868_v53  ;;  %v8878_v40 = vld [vmem:[#allocation49_spill] sm:$0xff]  ;;  %v8879_v53 = vld [vmem:[#allocation50_spill] sm:$0xff] }
 0x950   :  { %3985 = vmatprep.subr.bf16.mxu0 %v8869_v50  ;;  %4026 = vmatprep.subr.bf16.mxu1 %v8870_v52  ;;  %v8880_v50 = vld [vmem:[#allocation51_spill] sm:$0xff]  ;;  %v8881_v52 = vld [vmem:[#allocation52_spill] sm:$0xff] }
 0x953   :  { %3986 = vmatpush2.bf16.msra.mxu0 %v8871_v20  ;;  %4027 = vmatpush2.bf16.msra.mxu1 %v8872_v57  ;;  %v8882_v20 = vld [vmem:[#allocation53_spill] sm:$0xff]  ;;  %v8883_v57 = vld [vmem:[#allocation54_spill] sm:$0xff] }
 0x954   :  { %3987 = vmatprep.subr.bf16.mxu0 %v8873_v26  ;;  %4028 = vmatprep.subr.bf16.mxu1 %v8874_v6  ;;  %v8884_v26 = vld [vmem:[#allocation55_spill] sm:$0xff]  ;;  %v8885_v6 = vld [vmem:[#allocation56_spill] sm:$0xff] }
 0x957   :  { %3988 = vmatpush2.bf16.msra.mxu0 %v8875_v38  ;;  %4029 = vmatpush2.bf16.msra.mxu1 %v8876_v25  ;;  %v8886_v38 = vld [vmem:[#allocation57_spill] sm:$0xff]  ;;  %v8887_v25 = vld [vmem:[#allocation58_spill] sm:$0xff] }
 0x958   :  { %3989 = vmatprep.subr.bf16.mxu0 %v8877_v21  ;;  %4030 = vmatprep.subr.bf16.mxu1 %v8878_v40  ;;  %v8888_v21 = vld [vmem:[#allocation59_spill] sm:$0xff]  ;;  %v8889_v40 = vld [vmem:[#allocation60_spill] sm:$0xff] }
 0x95b   :  { %3990 = vmatpush2.bf16.msra.mxu0 %v8879_v53  ;;  %4031 = vmatpush2.bf16.msra.mxu1 %v8880_v50  ;;  %v8890_v53 = vld [vmem:[#allocation61_spill] sm:$0xff]  ;;  %v8891_v50 = vld [vmem:[#allocation62_spill] sm:$0xff] }
 0x95c   :  { %3991 = vmatprep.subr.bf16.mxu0 %v8881_v52  ;;  %4032 = vmatprep.subr.bf16.mxu1 %v8882_v20  ;;  %v8892_v52 = vld [vmem:[#allocation63_spill] sm:$0xff]  ;;  %v8893_v20 = vld [vmem:[#allocation64_spill] sm:$0xff] }
 0x95f   :  { %3992 = vmatpush2.bf16.msra.mxu0 %v8883_v57  ;;  %4033 = vmatpush2.bf16.msra.mxu1 %v8884_v26  ;;  %v8894_v57 = vld [vmem:[#allocation65_spill] sm:$0xff]  ;;  %v8895_v26 = vld [vmem:[#allocation66_spill] sm:$0xff] }
 0x960   :  { %3993 = vmatprep.subr.bf16.mxu0 %v8885_v6  ;;  %4034 = vmatprep.subr.bf16.mxu1 %v8886_v38  ;;  %v8896_v6 = vld [vmem:[#allocation67_spill] sm:$0xff]  ;;  %v8897_v38 = vld [vmem:[#allocation68_spill] sm:$0xff] }
 0x963   :  { %3994 = vmatpush2.bf16.msra.mxu0 %v8887_v25  ;;  %4035 = vmatpush2.bf16.msra.mxu1 %v8888_v21  ;;  %v8898_v25 = vld [vmem:[#allocation69_spill] sm:$0xff]  ;;  %v8899_v21 = vld [vmem:[#allocation70_spill] sm:$0xff] }
 0x964   :  { %3995 = vmatprep.subr.bf16.mxu0 %v8889_v40  ;;  %4036 = vmatprep.subr.bf16.mxu1 %v8890_v53  ;;  %v8900_v40 = vld [vmem:[#allocation71_spill] sm:$0xff]  ;;  %v8901_v53 = vld [vmem:[#allocation72_spill] sm:$0xff] }
 0x967   :  { %3996 = vmatpush2.bf16.msra.mxu0 %v8891_v50  ;;  %4037 = vmatpush2.bf16.msra.mxu1 %v8892_v52  ;;  %v8902_v50 = vld [vmem:[#allocation73_spill] sm:$0xff] }
 0x968   :  { %3997 = vmatprep.subr.bf16.mxu0 %v8893_v20  ;;  %4038 = vmatprep.subr.bf16.mxu1 %v8894_v57 }
 0x96b   :  { %3998 = vmatpush2.bf16.msra.mxu0 %v8895_v26  ;;  %4039 = vmatpush2.bf16.msra.mxu1 %v8896_v6 }
 0x96c   :  { %3999 = vmatprep.subr.bf16.mxu0 %v8897_v38  ;;  %4040 = vmatprep.subr.bf16.mxu1 %v8898_v25  ;;  %v8904_v38 = vld [vmem:[#allocation152_spill] sm:$0xff]  ;;  %v8905_v25 = vld [vmem:[#allocation153_spill] sm:$0xff] }
 0x96d   :  { %v3864_v8 = vrot.slane %v8904_v38, %v8903_v27 }
 0x96f   :  { %4000 = vmatpush2.bf16.msra.mxu0 %v8899_v21  ;;  %4041 = vmatpush2.bf16.msra.mxu1 %v8900_v40  ;;  %v3872_v21 = vrot.slane %v8905_v25, %v8903_v27  ;;  %v8906_v40 = vld [vmem:[#allocation155_spill] sm:$0xff] }
 0x970   :  { %4051 = vmatprep.subr.bf16.mxu0 %v8901_v53  ;;  %4092 = vmatprep.subr.bf16.mxu1 %v8902_v50  ;;  %v3868_v53 = vrot.slane %v8906_v40, %v8903_v27 }
 0x9b2   :  { %v3731_v52 = vpop.f32.mrf.mxu0  ;;  %v3772_v20 = vpop.f32.mrf.mxu1 }
 0x9b3   :  { %v3893_v11 = vadd.f32 %v3864_v8, %v3731_v52  ;;  %v3895_v36 = vadd.f32 %v3872_v21, %v3772_v20 }
 0x9b4   :  { %v3733_v49 = vpop.f32.mrf.mxu0  ;;  %v3774_v57 = vpop.f32.mrf.mxu1 }
 0x9b5   :  { %v3894_v50 = vadd.f32 %v3868_v53, %v3733_v49  ;;  %v4575_v28 = vmul.f32 -1.442695, %v3893_v11  ;;  %v3880_v49 = vrot.slane %v6351_v30, %v8903_v27  ;;  %v3884_v11 = vrot.slane %v6355_v7, %v8903_v27 }
 0x9b6   :  { %v3735_v34 = vpop.f32.mrf.mxu0  ;;  %v3776_v26 = vpop.f32.mrf.mxu1  ;;  %v3892_v53 = vrot.slane %v6357_v22, %v8903_v27 }
 0x9b7   :  { %v3896_v34 = vadd.f32 %v3876_v23, %v3774_v57  ;;  %v4577_v26 = vmul.f32 -1.442695, %v3895_v36  ;;  %4828 = vpow2.f32 %v4575_v28 }
 0x9b8   :  { %v3736_v46 = vpop.f32.mrf.mxu0  ;;  %v3777_v6 = vpop.f32.mrf.mxu1 }
 0x9b9   :  { %v4576_v46 = vmul.f32 -1.442695, %v3894_v50  ;;  %v4578_v6 = vmul.f32 -1.442695, %v3896_v34  ;;  %4830 = vpow2.f32 %v4577_v26 }
 0x9bb   :  { %4832 = vpow2.f32 %v4576_v46 }
 0x9bc   :  { %4834 = vpow2.f32 %v4578_v6 }
 0x9c4   :  { %v4829_v38 = vpop.eup %4828 }
 0x9c5   :  { %v3907_v52 = vadd.f32 1.0, %v4829_v38 }
 0x9c6   :  { %v4831_v25 = vpop.eup %4830 }
 0x9c7   :  { %v3919_v40 = vadd.f32 1.0, %v4831_v25  ;;  %4836 = vrcp.f32 %v3907_v52 }
 0x9c8   :  { %v4833_v8 = vpop.eup %4832 }
 0x9c9   :  { %v4835_v31 = vpop.eup %4834  ;;  %v3908_v20 = vadd.f32 1.0, %v4833_v8  ;;  %4838 = vrcp.f32 %v3919_v40 }
 0x9ca   :  { %v3920_v23 = vadd.f32 1.0, %v4835_v31 }
 0x9cb   :  { %4840 = vrcp.f32 %v3908_v20 }
 0x9d4   :  { %v4837_v25 = vpop.eup %4836 }
 0x9d6   :  { %v4839_v8 = vpop.eup %4838 }
 0x9d7   :  { %v3939_v40 = vmul.f32 %v4839_v8, %v7427_v3  ;;  %v3966_v8 = vld [vmem:[%s7735_s6] sm:$0x88] }
 0x9d8   :  { %v4841_v52 = vpop.eup %4840 }
 0x9f2   :  { %v3813_v28 = vpop.f32.mrf.mxu0  ;;  %v3854_v36 = vpop.f32.mrf.mxu1 }
 0x9f3   :  { %v3897_v57 = vadd.f32 %v3880_v49, %v3813_v28  ;;  %v3899_v21 = vadd.f32 %v3888_v41, %v3854_v36 }
 0x9f4   :  { %v3815_v50 = vpop.f32.mrf.mxu0  ;;  %v3856_v34 = vpop.f32.mrf.mxu1 }
 0x9f5   :  { %4842 = vtanh.f32 %v3897_v57  ;;  %v4579_v30 = vmul.f32 -1.442695, %v3899_v21  ;;  %v3898_v26 = vadd.f32 %v3884_v11, %v3815_v50  ;;  %v3900_v9 = vadd.f32 %v3892_v53, %v3856_v34 }
 0x9f6   :  { %4844 = vrcp.f32 %v3920_v23  ;;  %v3817_v31 = vpop.f32.mrf.mxu0  ;;  %v3858_v46 = vpop.f32.mrf.mxu1 }
 0x9f7   :  { %4846 = vpow2.f32 %v4579_v30  ;;  %v4580_v6 = vmul.f32 -1.442695, %v3900_v9 }
 0x9f8   :  { %4848 = vtanh.f32 %v3898_v26  ;;  %v3818_v7 = vpop.f32.mrf.mxu0  ;;  %v3859_v38 = vpop.f32.mrf.mxu1 }
 0x9f9   :  { %4850 = vpow2.f32 %v4580_v6 }
 0xa02   :  { %v4843_v22 = vpop.eup %4842 }
 0xa03   :  { %v4845_v27 = vpop.eup %4844  ;;  %v3941_v20 = vmul.f32 %v4843_v22, %v4837_v25 }
 0xa04   :  { %v4847_v49 = vpop.eup %4846  ;;  %v3940_v11 = vmul.f32 %v4845_v27, %v7431_v33  ;;  %v8939_v27 = vld [vmem:[#allocation141_spill] sm:$0xff] }
 0xa05   :  { %v4849_v41 = vpop.eup %4848  ;;  %v7599_v28 = vadd.f32 %v3941_v20, %v3939_v40  ;;  %v3933_v23 = vadd.f32 1.0, %v4847_v49  ;;  %v8940_v49 = vld [vmem:[#allocation142_spill] sm:$0xff] }
 0xa06   :  { %v4851_v36 = vpop.eup %4850  ;;  %v3942_v57 = vmul.f32 %v4849_v41, %v4841_v52 }
 0xa07   :  { %4852 = vtanh.f32 %v7599_v28  ;;  %v3934_v21 = vadd.f32 1.0, %v4851_v36 }
 0xa08   :  { %4854 = vrcp.f32 %v3933_v23  ;;  %v7603_v53 = vadd.f32 %v3942_v57, %v3940_v11  ;;  %v8941_v11 = vld [vmem:[#allocation143_spill] sm:$0xff] }
 0xa09   :  { %4856 = vrcp.f32 %v3934_v21 }
 0xa0a   :  { %4858 = vtanh.f32 %v7603_v53 }
 0xa14   :  { %v4853_v3 = vpop.eup %4852 }
 0xa15   :  { %v4855_v50 = vpop.eup %4854 }
 0xa16   :  { %v4857_v34 = vpop.eup %4856  ;;  %v3947_v26 = vmul.f32 %v4855_v50, %v4853_v3 }
 0xa17   :  { %v4859_v30 = vpop.eup %4858 }
 0xa18   :  { %v3948_v9 = vmul.f32 %v4859_v30, %v4857_v34  ;;  %v7616_v7 = vpack.c.bf16 %v3947_v26, %v3947_v26 }
 0xa1a   :  { %v3950_v31 = vpack.c.bf16 %v3948_v9, %v3948_v9  ;;  %v4596_v46 = vpack.c.bf16 %v3948_v9, %v3947_v26 }
 0xa1c   :  { %4001 = vmatprep.mubr.bf16.mxu0 %v3950_v31  ;;  %4042 = vmatprep.mubr.bf16.mxu1 %v3950_v31  ;;  %v3957_v38 = vshll.u32 %v4596_v46, 16 }
 0xa1d   :  { %4002 = vmatmul.mubr.bf16.vlgmr.msra.gmra.mxu0 %v7616_v7  ;;  %4043 = vmatmul.mubr.bf16.vlgmr.msra.gmra.mxu1 %v7616_v7 }
 0xa1e   :  { %v3959_v25 = vrot.slane %v3957_v38, 5  ;;  %4052 = vmatpush1.bf16.msra.mxu0 %v8217_v62  ;;  %4093 = vmatpush1.bf16.msra.mxu1 %v8218_v19  ;;  %v8911_v62 = vld [vmem:[#allocation110_spill] sm:$0xff]  ;;  %v8912_v19 = vld [vmem:[#allocation111_spill] sm:$0xff]  ;;  %v8942_v38 = vld [vmem:[#allocation148_spill] sm:$0xff] }
 0xa1f   :  { %4083 = vmatprep.mubr.bf16.mxu0 %v3950_v31  ;;  %4124 = vmatprep.mubr.bf16.mxu1 %v3950_v31 }
 0xa20   :  { %4053 = vmatprep.subr.bf16.mxu0 %v8219_v54  ;;  %4094 = vmatprep.subr.bf16.mxu1 %v8220_v61  ;;  %v3967_v52 = vsel %vm3965_vm8, %v3959_v25, %v3966_v8  ;;  %v8913_v54 = vld [vmem:[#allocation112_spill] sm:$0xff]  ;;  %v8914_v61 = vld [vmem:[#allocation113_spill] sm:$0xff] }
 0xa21   :  { %3968 = vst [vmem:[%s7735_s6] sm:$0x88] %v3967_v52  ;;  %v8943_v8 = vld [vmem:[#allocation149_spill] sm:$0xff] }
 0xa22   :  { %4054 = vmatpush1.bf16.msra.mxu0 %v8221_v44  ;;  %4095 = vmatpush1.bf16.msra.mxu1 %v8222_v45  ;;  %v8915_v44 = vld [vmem:[#allocation114_spill] sm:$0xff]  ;;  %v8916_v45 = vld [vmem:[#allocation115_spill] sm:$0xff] }
 0xa23   :  { %4055 = vmatprep.subr.bf16.mxu0 %v8223_v18  ;;  %4096 = vmatprep.subr.bf16.mxu1 %v8224_v4  ;;  %v8917_v18 = vld [vmem:[#allocation116_spill] sm:$0xff]  ;;  %v8918_v4 = vld [vmem:[#allocation117_spill] sm:$0xff] }
 0xa26   :  { %4056 = vmatpush1.bf16.msra.mxu0 %v8225_v24  ;;  %4097 = vmatpush1.bf16.msra.mxu1 %v8226_v51  ;;  %v8919_v24 = vld [vmem:[#allocation118_spill] sm:$0xff]  ;;  %v8920_v51 = vld [vmem:[#allocation119_spill] sm:$0xff] }
 0xa27   :  { %4057 = vmatprep.subr.bf16.mxu0 %v8227_v5  ;;  %4098 = vmatprep.subr.bf16.mxu1 %v8317_v12  ;;  %v8921_v5 = vld [vmem:[#allocation120_spill] sm:$0xff]  ;;  %v8922_v12 = vld [vmem:[#allocation121_spill] sm:$0xff] }
 0xa2a   :  { %4058 = vmatpush1.bf16.msra.mxu0 %v8318_v13  ;;  %4099 = vmatpush1.bf16.msra.mxu1 %v8319_v58  ;;  %v8923_v13 = vld [vmem:[#allocation122_spill] sm:$0xff]  ;;  %v8924_v58 = vld [vmem:[#allocation123_spill] sm:$0xff] }
 0xa2b   :  { %4059 = vmatprep.subr.bf16.mxu0 %v8320_v42  ;;  %4100 = vmatprep.subr.bf16.mxu1 %v8321_v2  ;;  %v8925_v42 = vld [vmem:[#allocation124_spill] sm:$0xff]  ;;  %v8926_v2 = vld [vmem:[#allocation125_spill] sm:$0xff] }
 0xa2e   :  { %4060 = vmatpush1.bf16.msra.mxu0 %v8322_v60  ;;  %4101 = vmatpush1.bf16.msra.mxu1 %v8323_v55  ;;  %v8927_v60 = vld [vmem:[#allocation126_spill] sm:$0xff]  ;;  %v8928_v55 = vld [vmem:[#allocation127_spill] sm:$0xff] }
 0xa2f   :  { %4061 = vmatprep.subr.bf16.mxu0 %v8324_v59  ;;  %4102 = vmatprep.subr.bf16.mxu1 %v8325_v17  ;;  %v8929_v59 = vld [vmem:[#allocation128_spill] sm:$0xff]  ;;  %v8930_v17 = vld [vmem:[#allocation129_spill] sm:$0xff] }
 0xa32   :  { %4062 = vmatpush1.bf16.msra.mxu0 %v8415_v43  ;;  %4103 = vmatpush1.bf16.msra.mxu1 %v8416_v10 }
 0xa33   :  { %4063 = vmatprep.subr.bf16.mxu0 %v8417_v37  ;;  %4104 = vmatprep.subr.bf16.mxu1 %v8418_v32 }
 0xa36   :  { %4064 = vmatpush1.bf16.msra.mxu0 %v8419_v15  ;;  %4105 = vmatpush1.bf16.msra.mxu1 %v8420_v39 }
 0xa37   :  { %4065 = vmatprep.subr.bf16.mxu0 %v8421_v35  ;;  %4106 = vmatprep.subr.bf16.mxu1 %v8422_v63 }
 0xa3a   :  { %4066 = vmatpush1.bf16.msra.mxu0 %v8423_v1  ;;  %4107 = vmatpush1.bf16.msra.mxu1 %v8424_v29  ;;  %v8937_v1 = vld [vmem:[#allocation136_spill] sm:$0xff] }
 0xa3b   :  { %4067 = vmatprep.subr.bf16.mxu0 %v8336_v47  ;;  %4108 = vmatprep.subr.bf16.mxu1 %v8337_v56  ;;  %v8931_v56 = vld [vmem:[#allocation130_spill] sm:$0xff]  ;;  %v8936_v47 = vld [vmem:[#allocation135_spill] sm:$0xff]  ;;  %v8938_v29 = vld [vmem:[#allocation140_spill] sm:$0xff]  ;;  %v4144_v40 = vrot.slane %v8939_v27, %v8937_v1  ;;  %v4140_v41 = vrot.slane %v8940_v49, %v8937_v1  ;;  %v4148_v57 = vrot.slane %v8941_v11, %v8937_v1 }
 0xa3c   :  { %v4136_v22 = vrot.slane %v8938_v29, %v8937_v1  ;;  %v4152_v25 = vrot.slane %v8942_v38, %v8937_v1  ;;  %v4160_v52 = vrot.slane %v8943_v8, %v8937_v1 }
 0xa3e   :  { %4068 = vmatpush2.bf16.msra.mxu0 %v8338_v0  ;;  %4109 = vmatpush2.bf16.msra.mxu1 %v8339_v48  ;;  %v8932_v0 = vld [vmem:[#allocation131_spill] sm:$0xff]  ;;  %v8933_v48 = vld [vmem:[#allocation132_spill] sm:$0xff] }
 0xa3f   :  { %4069 = vmatprep.subr.bf16.mxu0 %v8340_v14  ;;  %4110 = vmatprep.subr.bf16.mxu1 %v8341_v16  ;;  %v8934_v14 = vld [vmem:[#allocation133_spill] sm:$0xff]  ;;  %v8935_v16 = vld [vmem:[#allocation134_spill] sm:$0xff] }
 0xa42   :  { %4070 = vmatpush2.bf16.msra.mxu0 %v8911_v62  ;;  %4111 = vmatpush2.bf16.msra.mxu1 %v8912_v19 }
 0xa43   :  { %4071 = vmatprep.subr.bf16.mxu0 %v8913_v54  ;;  %4112 = vmatprep.subr.bf16.mxu1 %v8914_v61  ;;  %v8944_v61 = vld [vmem:[#allocation150_spill] sm:$0xff] }
 0xa46   :  { %4072 = vmatpush2.bf16.msra.mxu0 %v8915_v44  ;;  %4113 = vmatpush2.bf16.msra.mxu1 %v8916_v45  ;;  %v4156_v44 = vrot.slane %v8944_v61, %v8937_v1 }
 0xa47   :  { %4073 = vmatprep.subr.bf16.mxu0 %v8917_v18  ;;  %4114 = vmatprep.subr.bf16.mxu1 %v8918_v4  ;;  %v8945_v4 = vld [vmem:[#allocation151_spill] sm:$0xff] }
 0xa4a   :  { %4074 = vmatpush2.bf16.msra.mxu0 %v8919_v24  ;;  %4115 = vmatpush2.bf16.msra.mxu1 %v8920_v51  ;;  %v4164_v24 = vrot.slane %v8945_v4, %v8937_v1 }
 0xa4b   :  { %4075 = vmatprep.subr.bf16.mxu0 %v8921_v5  ;;  %4116 = vmatprep.subr.bf16.mxu1 %v8922_v12 }
 0xa4e   :  { %4076 = vmatpush2.bf16.msra.mxu0 %v8923_v13  ;;  %4117 = vmatpush2.bf16.msra.mxu1 %v8924_v58 }
 0xa4f   :  { %4077 = vmatprep.subr.bf16.mxu0 %v8925_v42  ;;  %4118 = vmatprep.subr.bf16.mxu1 %v8926_v2 }
 0xa52   :  { %4078 = vmatpush2.bf16.msra.mxu0 %v8927_v60  ;;  %4119 = vmatpush2.bf16.msra.mxu1 %v8928_v55 }
 0xa53   :  { %4079 = vmatprep.subr.bf16.mxu0 %v8929_v59  ;;  %4120 = vmatprep.subr.bf16.mxu1 %v8930_v17 }
 0xa56   :  { %4080 = vmatpush2.bf16.msra.mxu0 %v8931_v56  ;;  %4121 = vmatpush2.bf16.msra.mxu1 %v8932_v0 }
 0xa57   :  { %4081 = vmatprep.subr.bf16.mxu0 %v8933_v48  ;;  %4122 = vmatprep.subr.bf16.mxu1 %v8934_v14 }
 0xa5a   :  { %4082 = vmatpush2.bf16.msra.mxu0 %v8935_v16  ;;  %4123 = vmatpush2.bf16.msra.mxu1 %v8936_v47 }
 0xa5d   :  { %4084 = vmatmul.mubr.bf16.vlgmr.msra.gmra.mxu0 %v7616_v7  ;;  %4125 = vmatmul.mubr.bf16.vlgmr.msra.gmra.mxu1 %v7616_v7 }
 0xadd   :  { %v4003_v43 = vpop.f32.mrf.mxu0  ;;  %v4044_v10 = vpop.f32.mrf.mxu1 }
 0xade   :  { %v4165_v20 = vadd.f32 %v4136_v22, %v4003_v43  ;;  %v4167_v23 = vadd.f32 %v4144_v40, %v4044_v10 }
 0xadf   :  { %v4005_v37 = vpop.f32.mrf.mxu0  ;;  %v4046_v32 = vpop.f32.mrf.mxu1 }
 0xae0   :  { %v4166_v36 = vadd.f32 %v4140_v41, %v4005_v37  ;;  %v4582_v21 = vmul.f32 -1.442695, %v4165_v20  ;;  %v4168_v3 = vadd.f32 %v4148_v57, %v4046_v32  ;;  %v4584_v50 = vmul.f32 -1.442695, %v4167_v23 }
 0xae1   :  { %v4007_v15 = vpop.f32.mrf.mxu0  ;;  %v4048_v39 = vpop.f32.mrf.mxu1 }
 0xae2   :  { %v4583_v34 = vmul.f32 -1.442695, %v4166_v36  ;;  %4860 = vpow2.f32 %v4582_v21  ;;  %v4585_v30 = vmul.f32 -1.442695, %v4168_v3 }
 0xae3   :  { %v4008_v35 = vpop.f32.mrf.mxu0  ;;  %v4049_v63 = vpop.f32.mrf.mxu1  ;;  %4862 = vpow2.f32 %v4584_v50 }
 0xae4   :  { %4864 = vpow2.f32 %v4583_v34 }
 0xae5   :  { %4866 = vpow2.f32 %v4585_v30 }
 0xaef   :  { %v4861_v26 = vpop.eup %4860 }
 0xaf0   :  { %v4863_v9 = vpop.eup %4862  ;;  %v4179_v31 = vadd.f32 1.0, %v4861_v26 }
 0xaf1   :  { %v4865_v33 = vpop.eup %4864  ;;  %v4191_v6 = vadd.f32 1.0, %v4863_v9 }
 0xaf2   :  { %v4867_v46 = vpop.eup %4866  ;;  %v4180_v7 = vadd.f32 1.0, %v4865_v33  ;;  %4868 = vrcp.f32 %v4179_v31 }
 0xaf3   :  { %v4192_v62 = vadd.f32 1.0, %v4867_v46  ;;  %4870 = vrcp.f32 %v4191_v6 }
 0xaf4   :  { %4872 = vrcp.f32 %v4180_v7 }
 0xaff   :  { %v4869_v17 = vpop.eup %4868 }
 0xb00   :  { %v4871_v56 = vpop.eup %4870 }
 0xb01   :  { %v4873_v0 = vpop.eup %4872  ;;  %v4211_v16 = vmul.f32 %v4871_v56, %v7599_v28 }
 0xb1d   :  { %v4085_v19 = vpop.f32.mrf.mxu0  ;;  %v4126_v54 = vpop.f32.mrf.mxu1 }
 0xb1e   :  { %v4169_v45 = vadd.f32 %v4152_v25, %v4085_v19  ;;  %v4171_v18 = vadd.f32 %v4160_v52, %v4126_v54 }
 0xb1f   :  { %v4087_v51 = vpop.f32.mrf.mxu0  ;;  %v4128_v5 = vpop.f32.mrf.mxu1 }
 0xb20   :  { %4874 = vtanh.f32 %v4169_v45  ;;  %v4586_v12 = vmul.f32 -1.442695, %v4171_v18  ;;  %v4170_v13 = vadd.f32 %v4156_v44, %v4087_v51  ;;  %v4172_v58 = vadd.f32 %v4164_v24, %v4128_v5 }
 0xb21   :  { %4876 = vrcp.f32 %v4192_v62  ;;  %v4089_v42 = vpop.f32.mrf.mxu0  ;;  %v4130_v2 = vpop.f32.mrf.mxu1 }
 0xb22   :  { %4878 = vpow2.f32 %v4586_v12  ;;  %v4587_v60 = vmul.f32 -1.442695, %v4172_v58 }
 0xb23   :  { %4880 = vtanh.f32 %v4170_v13  ;;  %v4090_v55 = vpop.f32.mrf.mxu0  ;;  %v4131_v59 = vpop.f32.mrf.mxu1 }
 0xb24   :  { %4882 = vpow2.f32 %v4587_v60 }
 0xb2d   :  { %v4875_v48 = vpop.eup %4874 }
 0xb2e   :  { %v4877_v14 = vpop.eup %4876  ;;  %v4213_v47 = vmul.f32 %v4875_v48, %v4869_v17 }
 0xb2f   :  { %v4879_v43 = vpop.eup %4878  ;;  %v4212_v39 = vmul.f32 %v4877_v14, %v7603_v53 }
 0xb30   :  { %v4881_v10 = vpop.eup %4880  ;;  %v4215_v37 = vadd.f32 %v4213_v47, %v4211_v16  ;;  %v4205_v32 = vadd.f32 1.0, %v4879_v43 }
 0xb31   :  { %v4883_v15 = vpop.eup %4882  ;;  %v4214_v35 = vmul.f32 %v4881_v10, %v4873_v0 }
 0xb32   :  { %4234 = vst [vmem:[#allocation4] sm:$0xff] %v4215_v37  ;;  %4884 = vrcp.f32 %v4205_v32  ;;  %v4206_v63 = vadd.f32 1.0, %v4883_v15 }
 0xb33   :  { %v4216_v1 = vadd.f32 %v4214_v35, %v4212_v39  ;;  %4886 = vtanh.f32 %v4215_v37 }
 0xb34   :  { %4888 = vrcp.f32 %v4206_v63 }
 0xb35   :  { %4235 = vst [vmem:[#allocation4 + $0x8] sm:$0xff] %v4216_v1  ;;  %4890 = vtanh.f32 %v4216_v1 }
 0xb36   :  { %4903 = shalt.err (!%p4900_p4)
}
 0xb37   :  { %4257 = dma.vmem_to_hbm [thread:$0]  %s4255_s20, 256, %s7737_s8, [#allocation5]   ;;  %v4229_v20 = vld [vmem:[%s7735_s6 + $0x8] sm:$0x11] }
 0xb38   :  { %s4938_s3 = smov [#allocation2]  }
 0xb39   :  { %s4244_s23 = sshll.u32 %s4938_s3, 4  ;;  %s4245_s23 = int_to_ptr.vmem [resolvable:$true] %s4244_s23 }
 0xb3a   :  { %s4912_s26 = scalar_lea.vmem %s4245_s23, 256  ;;  %p4917_p6 = scmp.lt.s32.totalorder %s4245_s23, %s4245_s23 }
 0xb3b   :  { %p4913_p5 = scmp.ne.s32.totalorder %s4245_s23, %s4912_s26  ;;  %p4918_p7 = scmp.lt.s32.totalorder %s4912_s26, %s4912_s26 }
 0xb3d   :  { %p4919_p8 = por %p4918_p7, %p4917_p6 }
 0xb3f   :  { %v4885_v28 = vpop.eup %4884  ;;  %p4920_p9 = pnand %p4919_p8, %p4913_p5 }
 0xb40   :  { %v4887_v53 = vpop.eup %4886 }
 0xb41   :  { %v4889_v29 = vpop.eup %4888  ;;  %v4219_v22 = vmul.f32 %v4887_v53, %v4885_v28 }
 0xb42   :  { %v4891_v27 = vpop.eup %4890 }
 0xb43   :  { %v4220_v40 = vmul.f32 %v4891_v27, %v4889_v29  ;;  %4232 = vst [vmem:[#allocation2] sm:$0xff] %v4219_v22 }
 0xb45   :  { %v4597_v49 = vpack.c.bf16 %v4220_v40, %v4219_v22  ;;  %4233 = vst [vmem:[#allocation2 + $0x8] sm:$0xff] %v4220_v40 }
 0xb46   :  { %4923 = shalt.err (!%p4920_p9)
}
 0xb47   :  { %4247 = dma.vmem_to_hbm [thread:$0]  %s4245_s23, 256, %s7736_s7, [#allocation3]   ;;  %v4230_v36 = vsel %vm2065_vm6, %v4597_v49, %v4229_v20 }
 0xb48   :  { %4231 = vst [vmem:[%s7735_s6 + $0x8] sm:$0x11] %v4230_v36 }
 0xb49   :  { %4932 = dma.done.wait [#allocation3], 256  }
 0xb4a   :  { %4933 = vsyncadd [#allocation3], 4294967040 }
 0xb4b   :  { %4934 = dma.done.wait [#allocation5], 256  }
 0xb4c   :  { %4935 = vsyncadd [#allocation5], 4294967040 }
 0xb4d   :  { %4266 = vsyncpa [#allocation3], 1 }
 0xb4e   :  { %4267 = vsyncpa [#allocation5], 1 }

</bundles_post_ra>
